<compile_context>
chip_gen: v7x
topology: tpu7x:2x2x1
jax: 0.10.0
libtpu: 0.0.40
codegen_flags: <defaults>
</compile_context>

<pallas_src>
import jax
import jax.numpy as jnp
from jax import lax
from jax.experimental import pallas as pl
from jax.experimental.pallas import tpu as pltpu


# Fixed Sobel bank of the module (requires_grad=False).  Filter t (t=0..7) is
# "+1 at the centre, -1 at neighbour t"; filter 8 is the identity.
_SOBEL = [
    [[-1, 0, 0], [0, 1, 0], [0, 0, 0]],
    [[0, -1, 0], [0, 1, 0], [0, 0, 0]],
    [[0, 0, -1], [0, 1, 0], [0, 0, 0]],
    [[0, 0, 0], [-1, 1, 0], [0, 0, 0]],
    [[0, 0, 0], [0, 1, -1], [0, 0, 0]],
    [[0, 0, 0], [0, 1, 0], [-1, 0, 0]],
    [[0, 0, 0], [0, 1, 0], [0, -1, 0]],
    [[0, 0, 0], [0, 1, 0], [0, 0, -1]],
    [[0, 0, 0], [0, 1, 0], [0, 0, 0]],
]


def _make_kernel(wp):
    # lane offset of every 3x3 tap on the flattened padded (hp*wp) plane
    offs = [(kh - 1) * wp + (kw - 1) for kh in range(3) for kw in range(3)]
    # offsets of the "-1" neighbour of Sobel filters 0..7 (same ordering)
    neigh = [d for d in offs if d != 0]

    def shift(a, d):
        # shifted[..., p] = a[..., (p + d) % n]  — static lane rotation on the XLU.
        if d == 0:
            return a
        return pltpu.roll(a, shift=(-d) % a.shape[-1], axis=a.ndim - 1)

    def kernel(x_ref, mask_ref, w1_ref, b1_ref, w2_ref, b2_ref, o_ref):
        x0 = x_ref[0]                          # (1, N) zero-padded input plane(s)
        mask = mask_ref[...]                   # (1, N): 1 inside image, 0 on pad ring/tail

        # ---- layer 1: sparse Sobel bank (centre - neighbour; identity last), |.|
        # The module's ReLU after |.| is a no-op and is omitted.
        a1 = jnp.concatenate(
            [jnp.abs(x0 - shift(x0, d)) for d in neigh] + [jnp.abs(x0)], axis=0)
        a1 = a1 * mask                         # (9, N); re-zero padding ring

        # ---- layer 2: 9 -> 20.  One K=81 MXU dot over the tap-stacked activations.
        s1 = jnp.concatenate([shift(a1, d) for d in offs], axis=0)           # (81, N)
        a2 = jnp.dot(w1_ref[...], s1, preferred_element_type=jnp.float32)    # (20, N)
        a2 = jnp.maximum(a2 + b1_ref[...], 0.0) * mask                       # ReLU of conv_3d_2

        # ---- layer 3: 20 -> 3.  One K=180 MXU dot.
        s2 = jnp.concatenate([shift(a2, d) for d in offs], axis=0)           # (180, N)
        a3 = jnp.dot(w2_ref[...], s2, preferred_element_type=jnp.float32)    # (3, N)
        o_ref[0] = (a3 + b2_ref[...]).astype(o_ref.dtype)

    return kernel


def conv3d_sobel(x, w1, b1, w2, b2):
    """Pallas TPU implementation of Conv_3d_Sobel.forward.

    x: (B, C, H, W); w1: (20, 9, 3, 3); b1: (20,); w2: (3, 20, 3, 3); b2: (3,).
    Returns (B, 3*C, H, W) float32 (same layout as the PyTorch .view()).
    """
    B, C, H, W = x.shape
    hp, wp = H + 2, W + 2
    n_slice = hp * wp                         # flattened padded plane per (b,c) slice
    n_slices = B * C
    c1, c2, c3 = 9, w1.shape[0], w2.shape[0]  # 9, 20, 3

    # ---- per-chip sizing ---------------------------------------------------
    try:
        info = pltpu.get_tpu_info()
        vmem_cap = int(getattr(info, "vmem_capacity_bytes", 64 * 1024 * 1024))
    except Exception:
        vmem_cap = 64 * 1024 * 1024
    big_vmem = vmem_cap >= (96 << 20)         # v5e/v6e: 128 MiB, v7x: 64 MiB
    act_budget = vmem_cap // 4 if big_vmem else vmem_cap // 6
    vmem_limit = (min(vmem_cap * 3 // 4, 96 << 20) if big_vmem
                  else min(vmem_cap // 2, 32 << 20))

    # live f32 rows per folded plane: x(1)+a1(9)+s1(81)+a2(20)+s2(180)+a3(3)
    # + pipelined in/out blocks; rounded up generously for concat temporaries.
    bytes_per_slice = 4 * n_slice * 400

    # fold several (b,c) planes onto the lane axis per grid step; prefer an
    # even step count so v7x's two TensorCores split the parallel axis evenly.
    divisors = [g for g in range(1, n_slices + 1) if n_slices % g == 0]
    fit = [g for g in divisors if g * bytes_per_slice <= act_budget] or [1]
    even_steps = [g for g in fit if (n_slices // g) % 2 == 0]
    group = max(even_steps) if even_steps else max(fit)
    steps = n_slices // group

    n_lane = group * n_slice
    n_lane_pad = ((n_lane + 127) // 128) * 128      # 128-aligned, lane-dense blocks

    # ---- operand prep (all f32) ---------------------------------------------
    xpad = jnp.pad(x.astype(jnp.float32), ((0, 0), (0, 0), (1, 1), (1, 1)))
    x_grp = xpad.reshape(steps, 1, n_lane)
    x_grp = jnp.pad(x_grp, ((0, 0), (0, 0), (0, n_lane_pad - n_lane)))

    # interior mask: 1 inside the original HxW image, 0 on the pad ring and tail
    pos = jnp.arange(n_slice)
    hh, ww = pos // wp, pos % wp
    mask1 = ((hh >= 1) & (hh <= H) & (ww >= 1) & (ww <= W)).astype(jnp.float32)
    mask = jnp.pad(jnp.tile(mask1, (group,)), (0, n_lane_pad - n_lane))
    mask = mask.reshape(1, n_lane_pad)

    # weights flattened tap-major so one dot per layer: column = tap*Cin + cin
    w1_mat = jnp.transpose(w1.astype(jnp.float32), (0, 2, 3, 1)).reshape(c2, 9 * c1)
    w2_mat = jnp.transpose(w2.astype(jnp.float32), (0, 2, 3, 1)).reshape(c3, 9 * c2)
    b1_col = b1.reshape(c2, 1).astype(jnp.float32)
    b2_col = b2.reshape(c3, 1).astype(jnp.float32)

    out_grp = pl.pallas_call(
        _make_kernel(wp),
        out_shape=jax.ShapeDtypeStruct((steps, c3, n_lane_pad), jnp.float32),
        grid_spec=pltpu.PrefetchScalarGridSpec(
            num_scalar_prefetch=0,
            grid=(steps,),
            in_specs=[
                pl.BlockSpec((1, 1, n_lane_pad), lambda i: (i, 0, 0)),  # x planes
                pl.BlockSpec((1, n_lane_pad), lambda i: (0, 0)),        # interior mask
                pl.BlockSpec((c2, 9 * c1), lambda i: (0, 0)),           # W1 (20, 81)
                pl.BlockSpec((c2, 1), lambda i: (0, 0)),                # b1
                pl.BlockSpec((c3, 9 * c2), lambda i: (0, 0)),           # W2 (3, 180)
                pl.BlockSpec((c3, 1), lambda i: (0, 0)),                # b2
            ],
            out_specs=pl.BlockSpec((1, c3, n_lane_pad), lambda i: (i, 0, 0)),
        ),
        compiler_params=pltpu.CompilerParams(
            dimension_semantics=("parallel",),
            vmem_limit_bytes=int(vmem_limit),
        ),
    )(x_grp, mask, w1_mat, b1_col, w2_mat, b2_col)

    # un-fold, drop the 128-pad tail and the padding ring, rearrange to (B,3C,H,W)
    out = out_grp[..., :n_lane].reshape(steps, c3, group, n_slice)
    out = out.transpose(0, 2, 1, 3).reshape(B, C, c3, hp, wp)[..., 1:H + 1, 1:W + 1]
    return out.transpose(0, 2, 1, 3, 4).reshape(B, c3 * C, H, W)


def _reference(x, w1, b1, w2, b2, sobel):
    """Pure-JAX reference using lax.conv (depth-1 Conv3d == per-plane Conv2d)."""
    B, C, H, W = x.shape
    x2 = x.reshape(B * C, 1, H, W)

    def conv(v, w):
        return lax.conv_general_dilated(
            v, w, window_strides=(1, 1), padding=((1, 1), (1, 1)),
            dimension_numbers=("NCHW", "OIHW", "NCHW"),
            precision=lax.Precision.HIGHEST)

    a1 = jnp.abs(conv(x2, sobel))
    a2 = conv(jax.nn.relu(a1), w1) + b1[None, :, None, None]
    a3 = conv(jax.nn.relu(a2), w2) + b2[None, :, None, None]
    return a3.reshape(B, C, 3, H, W).transpose(0, 2, 1, 3, 4).reshape(B, 3 * C, H, W)


if __name__ == "__main__":
    key = jax.random.PRNGKey(0)
    kx, k1, kb1, k2, kb2 = jax.random.split(key, 5)
    B, C, H, W = 2, 4, 16, 16
    x = jax.random.normal(kx, (B, C, H, W), dtype=jnp.float32)

    # deterministic stand-ins for the learned Conv3d weights (depth dim squeezed)
    w1 = 0.15 * jax.random.normal(k1, (20, 9, 3, 3), dtype=jnp.float32)
    b1 = 0.10 * jax.random.normal(kb1, (20,), dtype=jnp.float32)
    w2 = 0.15 * jax.random.normal(k2, (3, 20, 3, 3), dtype=jnp.float32)
    b2 = 0.10 * jax.random.normal(kb2, (3,), dtype=jnp.float32)

    out = conv3d_sobel(x, w1, b1, w2, b2)
    out = jax.block_until_ready(out)
    assert out.shape == (B, 3 * C, H, W), out.shape

    sobel = jnp.asarray(_SOBEL, jnp.float32).reshape(9, 1, 3, 3)
    ref = _reference(x, w1, b1, w2, b2, sobel)
    err = float(jnp.max(jnp.abs(out - ref)))
    assert jnp.allclose(out, ref, atol=2e-2, rtol=2e-2), f"mismatch, max|err|={err}"

    print("KERNEL_OK")
</pallas_src>

<mosaic_0001>
module attributes {stable_mosaic.version = 11 : i64} {
  func.func @kernel(%arg0: i32, %arg1: memref<1x1x1408xf32, #tpu.memory_space<vmem>>, %arg2: memref<1x1408xf32, #tpu.memory_space<vmem>>, %arg3: memref<20x81xf32, #tpu.memory_space<vmem>>, %arg4: memref<20x1xf32, #tpu.memory_space<vmem>>, %arg5: memref<3x180xf32, #tpu.memory_space<vmem>>, %arg6: memref<3x1xf32, #tpu.memory_space<vmem>>, %arg7: memref<1x3x1408xf32, #tpu.memory_space<vmem>>) attributes {dimension_semantics = [#tpu.dimension_semantics<parallel>], iteration_bounds = array<i64: 2>, scalar_prefetch = 0 : i64, scratch_operands = 0 : i64, tpu.core_type = #tpu.core_type<tc>, window_params = [{transform_indices = @transform_0, window_bounds = array<i64: 1, 1, 1408>}, {pipeline_mode = #tpu.pipeline_mode<synchronous>, transform_indices = @transform_1, window_bounds = array<i64: 1, 1408>}, {pipeline_mode = #tpu.pipeline_mode<synchronous>, transform_indices = @transform_2, window_bounds = array<i64: 20, 81>}, {pipeline_mode = #tpu.pipeline_mode<synchronous>, transform_indices = @transform_3, window_bounds = array<i64: 20, 1>}, {pipeline_mode = #tpu.pipeline_mode<synchronous>, transform_indices = @transform_4, window_bounds = array<i64: 3, 180>}, {pipeline_mode = #tpu.pipeline_mode<synchronous>, transform_indices = @transform_5, window_bounds = array<i64: 3, 1>}, {transform_indices = @transform_6, window_bounds = array<i64: 1, 3, 1408>}]} {
    %c0 = arith.constant 0 : index
    %c0_0 = arith.constant 0 : index
    %c0_1 = arith.constant 0 : index
    %0 = vector.load %arg1[%c0, %c0_0, %c0_1] : memref<1x1x1408xf32, #tpu.memory_space<vmem>>, vector<1x1x1408xf32>
    %1 = vector.shape_cast %0 : vector<1x1x1408xf32> to vector<1x1408xf32>
    %c0_2 = arith.constant 0 : index
    %c0_3 = arith.constant 0 : index
    %2 = vector.load %arg2[%c0_2, %c0_3] : memref<1x1408xf32, #tpu.memory_space<vmem>>, vector<1x1408xf32>
    %c19_i32 = arith.constant 19 : i32
    %3 = tpu.dynamic_rotate %1 by %c19_i32 dim 1 : vector<1x1408xf32>, i32 -> vector<1x1408xf32>
    %4 = arith.subf %1, %3 : vector<1x1408xf32>
    %5 = math.absf %4 : vector<1x1408xf32>
    %c18_i32 = arith.constant 18 : i32
    %6 = tpu.dynamic_rotate %1 by %c18_i32 dim 1 : vector<1x1408xf32>, i32 -> vector<1x1408xf32>
    %7 = arith.subf %1, %6 : vector<1x1408xf32>
    %8 = math.absf %7 : vector<1x1408xf32>
    %c17_i32 = arith.constant 17 : i32
    %9 = tpu.dynamic_rotate %1 by %c17_i32 dim 1 : vector<1x1408xf32>, i32 -> vector<1x1408xf32>
    %10 = arith.subf %1, %9 : vector<1x1408xf32>
    %11 = math.absf %10 : vector<1x1408xf32>
    %c1_i32 = arith.constant 1 : i32
    %12 = tpu.dynamic_rotate %1 by %c1_i32 dim 1 : vector<1x1408xf32>, i32 -> vector<1x1408xf32>
    %13 = arith.subf %1, %12 : vector<1x1408xf32>
    %14 = math.absf %13 : vector<1x1408xf32>
    %c1407_i32 = arith.constant 1407 : i32
    %15 = tpu.dynamic_rotate %1 by %c1407_i32 dim 1 : vector<1x1408xf32>, i32 -> vector<1x1408xf32>
    %16 = arith.subf %1, %15 : vector<1x1408xf32>
    %17 = math.absf %16 : vector<1x1408xf32>
    %c1391_i32 = arith.constant 1391 : i32
    %18 = tpu.dynamic_rotate %1 by %c1391_i32 dim 1 : vector<1x1408xf32>, i32 -> vector<1x1408xf32>
    %19 = arith.subf %1, %18 : vector<1x1408xf32>
    %20 = math.absf %19 : vector<1x1408xf32>
    %c1390_i32 = arith.constant 1390 : i32
    %21 = tpu.dynamic_rotate %1 by %c1390_i32 dim 1 : vector<1x1408xf32>, i32 -> vector<1x1408xf32>
    %22 = arith.subf %1, %21 : vector<1x1408xf32>
    %23 = math.absf %22 : vector<1x1408xf32>
    %c1389_i32 = arith.constant 1389 : i32
    %24 = tpu.dynamic_rotate %1 by %c1389_i32 dim 1 : vector<1x1408xf32>, i32 -> vector<1x1408xf32>
    %25 = arith.subf %1, %24 : vector<1x1408xf32>
    %26 = math.absf %25 : vector<1x1408xf32>
    %27 = math.absf %1 : vector<1x1408xf32>
    %28 = tpu.concatenate %5, %8, %11, %14, %17, %20, %23, %26, %27 in 0 : vector<1x1408xf32>, vector<1x1408xf32>, vector<1x1408xf32>, vector<1x1408xf32>, vector<1x1408xf32>, vector<1x1408xf32>, vector<1x1408xf32>, vector<1x1408xf32>, vector<1x1408xf32> -> vector<9x1408xf32>
    %29 = vector.broadcast %2 : vector<1x1408xf32> to vector<9x1408xf32>
    %30 = arith.mulf %28, %29 : vector<9x1408xf32>
    %c19_i32_4 = arith.constant 19 : i32
    %31 = tpu.dynamic_rotate %30 by %c19_i32_4 dim 1 : vector<9x1408xf32>, i32 -> vector<9x1408xf32>
    %c18_i32_5 = arith.constant 18 : i32
    %32 = tpu.dynamic_rotate %30 by %c18_i32_5 dim 1 : vector<9x1408xf32>, i32 -> vector<9x1408xf32>
    %c17_i32_6 = arith.constant 17 : i32
    %33 = tpu.dynamic_rotate %30 by %c17_i32_6 dim 1 : vector<9x1408xf32>, i32 -> vector<9x1408xf32>
    %c1_i32_7 = arith.constant 1 : i32
    %34 = tpu.dynamic_rotate %30 by %c1_i32_7 dim 1 : vector<9x1408xf32>, i32 -> vector<9x1408xf32>
    %c1407_i32_8 = arith.constant 1407 : i32
    %35 = tpu.dynamic_rotate %30 by %c1407_i32_8 dim 1 : vector<9x1408xf32>, i32 -> vector<9x1408xf32>
    %c1391_i32_9 = arith.constant 1391 : i32
    %36 = tpu.dynamic_rotate %30 by %c1391_i32_9 dim 1 : vector<9x1408xf32>, i32 -> vector<9x1408xf32>
    %c1390_i32_10 = arith.constant 1390 : i32
    %37 = tpu.dynamic_rotate %30 by %c1390_i32_10 dim 1 : vector<9x1408xf32>, i32 -> vector<9x1408xf32>
    %c1389_i32_11 = arith.constant 1389 : i32
    %38 = tpu.dynamic_rotate %30 by %c1389_i32_11 dim 1 : vector<9x1408xf32>, i32 -> vector<9x1408xf32>
    %39 = tpu.concatenate %31, %32, %33, %34, %30, %35, %36, %37, %38 in 0 : vector<9x1408xf32>, vector<9x1408xf32>, vector<9x1408xf32>, vector<9x1408xf32>, vector<9x1408xf32>, vector<9x1408xf32>, vector<9x1408xf32>, vector<9x1408xf32>, vector<9x1408xf32> -> vector<81x1408xf32>
    %c0_12 = arith.constant 0 : index
    %c0_13 = arith.constant 0 : index
    %40 = vector.load %arg3[%c0_12, %c0_13] : memref<20x81xf32, #tpu.memory_space<vmem>>, vector<20x81xf32>
    %cst = arith.constant dense<0.000000e+00> : vector<20x1408xf32>
    %41 = tpu.matmul %40, %39, %cst {dimension_numbers = #tpu.dot_dimension_numbers<[1], [0], [0], [1], [0, 0, 1, 1], [], []>} : vector<20x81xf32>, vector<81x1408xf32>, vector<20x1408xf32> -> vector<20x1408xf32>
    %c0_14 = arith.constant 0 : index
    %c0_15 = arith.constant 0 : index
    %42 = vector.load %arg4[%c0_14, %c0_15] : memref<20x1xf32, #tpu.memory_space<vmem>>, vector<20x1xf32>
    %43 = vector.broadcast %42 : vector<20x1xf32> to vector<20x1408xf32>
    %44 = arith.addf %41, %43 : vector<20x1408xf32>
    %cst_16 = arith.constant 0.000000e+00 : f32
    %45 = vector.broadcast %cst_16 : f32 to vector<20x1408xf32>
    %46 = arith.maximumf %44, %45 : vector<20x1408xf32>
    %47 = vector.broadcast %2 : vector<1x1408xf32> to vector<20x1408xf32>
    %48 = arith.mulf %46, %47 : vector<20x1408xf32>
    %c19_i32_17 = arith.constant 19 : i32
    %49 = tpu.dynamic_rotate %48 by %c19_i32_17 dim 1 : vector<20x1408xf32>, i32 -> vector<20x1408xf32>
    %c18_i32_18 = arith.constant 18 : i32
    %50 = tpu.dynamic_rotate %48 by %c18_i32_18 dim 1 : vector<20x1408xf32>, i32 -> vector<20x1408xf32>
    %c17_i32_19 = arith.constant 17 : i32
    %51 = tpu.dynamic_rotate %48 by %c17_i32_19 dim 1 : vector<20x1408xf32>, i32 -> vector<20x1408xf32>
    %c1_i32_20 = arith.constant 1 : i32
    %52 = tpu.dynamic_rotate %48 by %c1_i32_20 dim 1 : vector<20x1408xf32>, i32 -> vector<20x1408xf32>
    %c1407_i32_21 = arith.constant 1407 : i32
    %53 = tpu.dynamic_rotate %48 by %c1407_i32_21 dim 1 : vector<20x1408xf32>, i32 -> vector<20x1408xf32>
    %c1391_i32_22 = arith.constant 1391 : i32
    %54 = tpu.dynamic_rotate %48 by %c1391_i32_22 dim 1 : vector<20x1408xf32>, i32 -> vector<20x1408xf32>
    %c1390_i32_23 = arith.constant 1390 : i32
    %55 = tpu.dynamic_rotate %48 by %c1390_i32_23 dim 1 : vector<20x1408xf32>, i32 -> vector<20x1408xf32>
    %c1389_i32_24 = arith.constant 1389 : i32
    %56 = tpu.dynamic_rotate %48 by %c1389_i32_24 dim 1 : vector<20x1408xf32>, i32 -> vector<20x1408xf32>
    %57 = tpu.concatenate %49, %50, %51, %52, %48, %53, %54, %55, %56 in 0 : vector<20x1408xf32>, vector<20x1408xf32>, vector<20x1408xf32>, vector<20x1408xf32>, vector<20x1408xf32>, vector<20x1408xf32>, vector<20x1408xf32>, vector<20x1408xf32>, vector<20x1408xf32> -> vector<180x1408xf32>
    %c0_25 = arith.constant 0 : index
    %c0_26 = arith.constant 0 : index
    %58 = vector.load %arg5[%c0_25, %c0_26] : memref<3x180xf32, #tpu.memory_space<vmem>>, vector<3x180xf32>
    %cst_27 = arith.constant dense<0.000000e+00> : vector<3x1408xf32>
    %59 = tpu.matmul %58, %57, %cst_27 {dimension_numbers = #tpu.dot_dimension_numbers<[1], [0], [0], [1], [0, 0, 1, 1], [], []>} : vector<3x180xf32>, vector<180x1408xf32>, vector<3x1408xf32> -> vector<3x1408xf32>
    %c0_28 = arith.constant 0 : index
    %c0_29 = arith.constant 0 : index
    %60 = vector.load %arg6[%c0_28, %c0_29] : memref<3x1xf32, #tpu.memory_space<vmem>>, vector<3x1xf32>
    %61 = vector.broadcast %60 : vector<3x1xf32> to vector<3x1408xf32>
    %62 = arith.addf %59, %61 : vector<3x1408xf32>
    %c0_30 = arith.constant 0 : index
    %c0_31 = arith.constant 0 : index
    %c0_32 = arith.constant 0 : index
    %63 = vector.load %arg7[%c0_30, %c0_31, %c0_32] : memref<1x3x1408xf32, #tpu.memory_space<vmem>>, vector<1x3x1408xf32>
    %64 = vector.shape_cast %63 : vector<1x3x1408xf32> to vector<3x1408xf32>
    %65 = vector.shape_cast %62 : vector<3x1408xf32> to vector<1x3x1408xf32>
    tpu.vector_store %arg7[%c0_30, %c0_31, %c0_32], %65 {strides = array<i32>} : memref<1x3x1408xf32, #tpu.memory_space<vmem>>, vector<1x3x1408xf32>,
    return
  }
  func.func @transform_0(%arg0: i32) -> (i32, i32, i32) {
    %c0_i32 = arith.constant 0 : i32
    %c0_i32_0 = arith.constant 0 : i32
    %c0_i32_1 = arith.constant 0 : i32
    return %arg0, %c0_i32, %c0_i32_0 : i32, i32, i32
  }
  func.func @transform_1(%arg0: i32) -> (i32, i32) {
    %c0_i32 = arith.constant 0 : i32
    %c0_i32_0 = arith.constant 0 : i32
    %c0_i32_1 = arith.constant 0 : i32
    return %c0_i32, %c0_i32_0 : i32, i32
  }
  func.func @transform_2(%arg0: i32) -> (i32, i32) {
    %c0_i32 = arith.constant 0 : i32
    %c0_i32_0 = arith.constant 0 : i32
    %c0_i32_1 = arith.constant 0 : i32
    return %c0_i32, %c0_i32_0 : i32, i32
  }
  func.func @transform_3(%arg0: i32) -> (i32, i32) {
    %c0_i32 = arith.constant 0 : i32
    %c0_i32_0 = arith.constant 0 : i32
    %c0_i32_1 = arith.constant 0 : i32
    return %c0_i32, %c0_i32_0 : i32, i32
  }
  func.func @transform_4(%arg0: i32) -> (i32, i32) {
    %c0_i32 = arith.constant 0 : i32
    %c0_i32_0 = arith.constant 0 : i32
    %c0_i32_1 = arith.constant 0 : i32
    return %c0_i32, %c0_i32_0 : i32, i32
  }
  func.func @transform_5(%arg0: i32) -> (i32, i32) {
    %c0_i32 = arith.constant 0 : i32
    %c0_i32_0 = arith.constant 0 : i32
    %c0_i32_1 = arith.constant 0 : i32
    return %c0_i32, %c0_i32_0 : i32, i32
  }
  func.func @transform_6(%arg0: i32) -> (i32, i32, i32) {
    %c0_i32 = arith.constant 0 : i32
    %c0_i32_0 = arith.constant 0 : i32
    %c0_i32_1 = arith.constant 0 : i32
    return %arg0, %c0_i32, %c0_i32_0 : i32, i32, i32
  }
}

</mosaic_0001>

<bundles_post_ra>
// kernel: tpu_custom_call.1
= control target key start
LH: loop header
LB: loop body
LE: loop exit
PB: predicated region body
PF: predicated region fallthrough
CT: control target
= control target key end

     0   :  { %11 = vsyncpa [#allocation3], 0  ;;  %s13722_s0 = inlined_call_operand.hbm [shape: f32[2,1,1408], index: 0, kind: input, shape index: {}]   ;;  %s13723_s1 = inlined_call_operand.vmem [shape: f32[1,1408], index: 1, kind: input, shape index: {}]   ;;  %s13724_s2 = inlined_call_operand.vmem [shape: f32[20,81], index: 2, kind: input, shape index: {}]   ;;  %s13725_s3 = inlined_call_operand.vmem [shape: f32[20,1], index: 3, kind: input, shape index: {}]   ;;  %s13726_s4 = inlined_call_operand.vmem [shape: f32[3,180], index: 4, kind: input, shape index: {}]   ;;  %s13727_s5 = inlined_call_operand.vmem [shape: f32[3,1], index: 5, kind: input, shape index: {}]   ;;  %s13728_s6 = inlined_call_operand.vmem [shape: f32[2,3,1408], index: 6, kind: output, shape index: {}]  }
   0x1   :  { %13 = vsyncpa [#allocation3 + $0x1], 0  ;;  %s7318_s21 = smov 0   ;;  %s7320_s22 = smov 0  }
   0x2   :  { %s7322_s23 = smov 0   ;;  %s7324_s24 = smov 0  }
   0x3 LB: > { %s7337_s25 = sadd.s32 4294967295, %s7267_s24   ;;  %s7340_s26 = sadd.s32 1, %s7267_s24   ;;  %s7267_s24 = sphi %s7324_s24, %s15098_s24   ;;  %s7263_s23 = sphi %s7322_s23, %s15097_s23   ;;  %s7259_s22 = sphi %s7320_s22, %s15096_s22   ;;  %s7255_s21 = sphi %s7318_s21, %s15095_s21  }
   0x4   : > { %s23_s27 = ssub.s32 %s7267_s24, %s7340_s26  ;;  %s26_s28 = sadd.s32 1, %s7263_s23 }
   0x5   : > { %p24_p0 = scmp.eq.s32.totalorder %s23_s27, 0  ;;  %p33_p1 = scmp.ne.s32.totalorder %s7263_s23, %s7259_s22 }
   0x6   : > { %p34_p2 = scmp.eq.s32.totalorder %s7267_s24, 0  ;;  %p39_p3 = scmp.ne.s32.totalorder %s7259_s22, %s7255_s21 }
   0x7   : > { %s7350_s29 = scalar_select %p24_p0, %s7263_s23, %s26_s28  }
   0x8   : > { %p35_p4 = por %p34_p2, %p33_p1  ;;  %p40_p5 = scmp.eq.s32.totalorder %s7337_s25, 0 }
   0x9   : > { %p6124_p6 = scmp.lt.s32.totalorder %s7267_s24, 2  ;;  %s209_s7 = sand.u32 1, %s7263_s23  }
   0xa   : > { %p7354_p7 = por %p40_p5, %p39_p3  ;;  %s6114_s8 = smul.u32 11, %s209_s7 }
   0xb   : > { %s6115_s9 = smul.u32 176, %s7267_s24  ;;  %p7360_p8 = pnand %p6124_p6, %p35_p4 }
   0xc   : > { %s213_s14 = scalar_lea.vmem [#allocation2], %s6114_s8  ;;  %s210_s16 = scalar_lea.sflag [#allocation3], %s209_s7 }
   0xd   : > { %s7368_s13 = scalar_lea.hbm %s13722_s0, %s6115_s9  ;;  %s221_s15 = sshll.u32 %s213_s14, 4  ;;  %s7370_s15 = int_to_ptr.vmem [resolvable:$true] %s221_s15 }
   0xe   : > { %s7203_s17 = scalar_lea.hbm %s7368_s13, 176  ;;  %p7205_p11 = pneg %p7360_p8 }
   0xf   : > { %p7204_p10 = scmp.ne.s32.totalorder %s7368_s13, %s7203_s17  ;;  %s7208_s20 = scalar_lea.hbm %s13722_s0, 352 }
  0x10   : > { %p7209_p0 = scmp.lt.u32.totalorder %s7368_s13, %s13722_s0  ;;  %p7210_p1 = scmp.lt.u32.totalorder %s7208_s20, %s7203_s17 }
  0x11   : > { %p7206_p12 = pnand %p7205_p11, %p7204_p10  ;;  %p7212_p3 = scmp.lt.u32.totalorder %s7203_s17, %s7368_s13 }
  0x12   : > { %p7211_p2 = por %p7210_p1, %p7209_p0 }
  0x13   : > { %p7207_p13 = pneg %p7206_p12 }
  0x14   : > { %p7213_p4 = por %p7212_p3, %p7211_p2 }
  0x16   : > { %p7214_p5 = pnand %p7213_p4, %p7207_p13 }
  0x18   : > { %7217 = shalt.err (!%p7214_p5)
}
  0x19   : > { %s7218_s28 = scalar_lea.vmem %s7370_s15, 176  ;;  %s7269_s7 = smov [#allocation2]  }
  0x1a   : > { %p7219_p6 = scmp.ne.s32.totalorder %s7370_s15, %s7218_s28  ;;  %s7223_s8 = sshll.u32 %s7269_s7, 4  ;;  %s7224_s8 = int_to_ptr.vmem [resolvable:$false] %s7223_s8 }
  0x1b   : > { %s7225_s9 = scalar_lea.vmem %s7224_s8, 352  ;;  %p7226_p9 = scmp.lt.s32.totalorder %s7370_s15, %s7224_s8 }
  0x1c   : > { %p7221_p10 = pnand %p7219_p6, %p7205_p11  ;;  %p7227_p0 = scmp.lt.s32.totalorder %s7225_s9, %s7218_s28 }
  0x1e   : > { %p7222_p12 = pneg %p7221_p10  ;;  %p7228_p1 = por %p7227_p0, %p7226_p9 }
  0x20   : > { %p7229_p2 = pnand %p7228_p1, %p7222_p12 }
  0x22   : > { %7232 = shalt.err (!%p7229_p2)
}
  0x23   : > { %6123 = dma.hbm_to_vmem [thread:$0]  (!%p7360_p8), %s7368_s13, 176, %s7370_s15, %s210_s16  }
  0x24   : > { %p226_p13 = scmp.lt.s32.totalorder %s7267_s24, 3  ;;  %p14093_p3 = scmp.ge.s32.totalorder %s7267_s24, 1 }
  0x26   : > { %p227_p11 = pnand %p14093_p3, %p226_p13 }
  0x28   : > { %230 = sbr.rel (%p227_p11) target bundleno = 1567 (0x61f), region = 44 }
  0x2f   : > { %s232_s11 = sand.u32 1, %s7259_s22  }
  0x30   : > { %s6116_s12 = smul.u32 11, %s232_s11  ;;  %s233_s14 = scalar_lea.sflag [#allocation3], %s232_s11 }
  0x32   : > { %s7401_s17 = scalar_lea.vmem [#allocation2], %s6116_s12 }
  0x33   : > { %7250 = dma.done.wait (%p7354_p7), %s233_s14, 176  }
  0x34   : > { %7252 = vsyncadd (%p7354_p7), %s233_s14, 4294967120  ;;  %v276_v0 = vlaneseq  ;;  %v7420_v5 = vld [vmem:[%s7401_s17] sm:$0xff]  ;;  %s7270_s24 = smov 19   ;;  %v7482_v19 = vld [vmem:[%s7401_s17 + $0x8] sm:$0x7]  ;;  %s7271_s30 = smov 18  }
  0x35   : > { %s7272_s10 = smov 17   ;;  %s7273_s13 = smov 1   ;;  %v7278_v56 = vmov 1966171168   ;;  %vm1832_vm3 = vcmask 1040384   ;;  %vm1844_vm6 = vcmask 1041408  }
  0x36   : > { %v7408_v1 = vshrl.u32 %v276_v0, 7  ;;  %s7274_s15 = smov 127   ;;  %s7275_s16 = smov 111   ;;  %v7725_v55 = vand.u32 127, %v276_v0  ;;  %v383_v57 = vunpack.c.l.s4 %v7278_v56  ;;  %vm1856_vm8 = vcmask 1042432  }
  0x37   : > { %s7276_s18 = smov 110   ;;  %s7277_s19 = smov 109   ;;  %vm1868_vm10 = vcmask 1043456   ;;  %vm1880_vm12 = vcmask 1044480   ;;  %vm1892_vm13 = vcmask 1045504   ;;  %vm1904_vm14 = vcmask 1046528  }
  0x38   : > { %v7411_v2 = vsub.s32 2, %v7408_v1  ;;  %v7414_v3 = vsub.s32 0, %v7408_v1  ;;  %v7417_v4 = vsub.s32 3, %v7408_v1  ;;  %v7423_v6 = vsub.s32 1, %v7408_v1  ;;  %p265_p7 = scmp.lt.s32.totalorder %s7337_s25, 1 }
  0x39   : > { %v7446_v11 = vsub.s32 5, %v7408_v1  ;;  %v7449_v12 = vsub.s32 4, %v7408_v1  ;;  %v7464_v15 = vsub.s32 7, %v7408_v1  ;;  %v7467_v16 = vsub.s32 6, %v7408_v1 }
  0x3a   : > { %v7427_v7 = vrot.slane %v7420_v5, %v7411_v2  ;;  %v7431_v8 = vrot.slane %v7420_v5, %v7414_v3  ;;  %v7439_v9 = vrot.slane %v7420_v5, %v7417_v4  ;;  %v7443_v10 = vrot.slane %v7420_v5, %v7423_v6  ;;  %s15100_s25 = smov (!%p265_p7, %s7337_s25), 1 }
  0x3b   : > { %v7457_v13 = vrot.slane %v7420_v5, %v7446_v11  ;;  %v7461_v14 = vrot.slane %v7420_v5, %v7449_v12  ;;  %v7475_v17 = vrot.slane %v7420_v5, %v7464_v15  ;;  %v7479_v18 = vrot.slane %v7420_v5, %v7467_v16 }
  0x3c   : > { %335 = vrot.lane.b32.xlu1 %v7427_v7, %s7270_s24  ;;  %331 = vrot.lane.b32.xlu0 %v7431_v8, %s7270_s24  ;;  %v7490_v20 = vrot.slane %v7482_v19, %v7423_v6  ;;  %v7494_v21 = vrot.slane %v7482_v19, %v7414_v3  ;;  %v7502_v22 = vrot.slane %v7482_v19, %v7411_v2  ;;  %vm13869_vm0 = vcmp.lt.s32.totalorder %v7725_v55, 19 }
  0x3d   : > { %v384_v60 = vunpack.c.0.s8 %v383_v57  ;;  %vm478_vm1 = vcmp.lt.s32.totalorder %v7725_v55, 18  ;;  %vm601_vm2 = vcmp.lt.s32.totalorder %v7725_v55, 17  ;;  %vm724_vm4 = vcmp.lt.s32.totalorder %v7725_v55, 1 }
  0x3e   : > { %vm847_vm5 = vcmp.lt.s32.totalorder %v7725_v55, 127  ;;  %vm970_vm7 = vcmp.lt.s32.totalorder %v7725_v55, 111  ;;  %vm1093_vm9 = vcmp.lt.s32.totalorder %v7725_v55, 110  ;;  %vm1216_vm11 = vcmp.lt.s32.totalorder %v7725_v55, 109 }
  0x3f   : > { %vm3160_vm15 = vcmask 662528  }
  0x40   : > { %337 = vrot.lane.b32.xlu1 %v7439_v9, %s7270_s24  ;;  %333 = vrot.lane.b32.xlu0 %v7443_v10, %s7270_s24 }
  0x44   : > { %341 = vrot.lane.b32.xlu1 %v7457_v13, %s7270_s24  ;;  %339 = vrot.lane.b32.xlu0 %v7461_v14, %s7270_s24 }
  0x48   : > { %345 = vrot.lane.b32.xlu1 %v7475_v17, %s7270_s24  ;;  %343 = vrot.lane.b32.xlu0 %v7479_v18, %s7270_s24 }
  0x4c   : > { %349 = vrot.lane.b32.xlu1 %v7490_v20, %s7270_s24  ;;  %347 = vrot.lane.b32.xlu0 %v7494_v21, %s7270_s24 }
  0x50   : > { %456 = vrot.lane.b32.xlu1 %v7431_v8, %s7271_s30  ;;  %351 = vrot.lane.b32.xlu0 %v7502_v22, %s7270_s24 }
  0x54   : > { %460 = vrot.lane.b32.xlu1 %v7427_v7, %s7271_s30  ;;  %458 = vrot.lane.b32.xlu0 %v7443_v10, %s7271_s30 }
  0x58   : > { %464 = vrot.lane.b32.xlu1 %v7461_v14, %s7271_s30  ;;  %462 = vrot.lane.b32.xlu0 %v7439_v9, %s7271_s30 }
  0x5c   : > { %468 = vrot.lane.b32.xlu1 %v7479_v18, %s7271_s30  ;;  %466 = vrot.lane.b32.xlu0 %v7457_v13, %s7271_s30 }
  0x60   : > { %472 = vrot.lane.b32.xlu1 %v7494_v21, %s7271_s30  ;;  %470 = vrot.lane.b32.xlu0 %v7475_v17, %s7271_s30 }
  0x64   : > { %476 = vrot.lane.b32.xlu1 %v7502_v22, %s7271_s30  ;;  %474 = vrot.lane.b32.xlu0 %v7490_v20, %s7271_s30 }
  0x68   : > { %581 = vrot.lane.b32.xlu1 %v7443_v10, %s7272_s10  ;;  %579 = vrot.lane.b32.xlu0 %v7431_v8, %s7272_s10 }
  0x6c   : > { %585 = vrot.lane.b32.xlu1 %v7439_v9, %s7272_s10  ;;  %583 = vrot.lane.b32.xlu0 %v7427_v7, %s7272_s10 }
  0x70   : > { %589 = vrot.lane.b32.xlu1 %v7457_v13, %s7272_s10  ;;  %587 = vrot.lane.b32.xlu0 %v7461_v14, %s7272_s10 }
  0x74   : > { %593 = vrot.lane.b32.xlu1 %v7475_v17, %s7272_s10  ;;  %591 = vrot.lane.b32.xlu0 %v7479_v18, %s7272_s10 }
  0x78   : > { %597 = vrot.lane.b32.xlu1 %v7490_v20, %s7272_s10  ;;  %595 = vrot.lane.b32.xlu0 %v7494_v21, %s7272_s10 }
  0x7c   : > { %702 = vrot.lane.b32.xlu1 %v7431_v8, %s7273_s13  ;;  %599 = vrot.lane.b32.xlu0 %v7502_v22, %s7272_s10 }
  0x80   : > { %706 = vrot.lane.b32.xlu1 %v7427_v7, %s7273_s13  ;;  %704 = vrot.lane.b32.xlu0 %v7443_v10, %s7273_s13 }
  0x84   : > { %710 = vrot.lane.b32.xlu1 %v7461_v14, %s7273_s13  ;;  %708 = vrot.lane.b32.xlu0 %v7439_v9, %s7273_s13 }
  0x88   : > { %714 = vrot.lane.b32.xlu1 %v7479_v18, %s7273_s13  ;;  %712 = vrot.lane.b32.xlu0 %v7457_v13, %s7273_s13 }
  0x8c   : > { %718 = vrot.lane.b32.xlu1 %v7494_v21, %s7273_s13  ;;  %716 = vrot.lane.b32.xlu0 %v7475_v17, %s7273_s13 }
  0x90   : > { %722 = vrot.lane.b32.xlu1 %v7502_v22, %s7273_s13  ;;  %720 = vrot.lane.b32.xlu0 %v7490_v20, %s7273_s13 }
  0x94   : > { %827 = vrot.lane.b32.xlu1 %v7443_v10, %s7274_s15  ;;  %825 = vrot.lane.b32.xlu0 %v7431_v8, %s7274_s15 }
  0x98   : > { %831 = vrot.lane.b32.xlu1 %v7439_v9, %s7274_s15  ;;  %829 = vrot.lane.b32.xlu0 %v7427_v7, %s7274_s15 }
  0x9c   : > { %835 = vrot.lane.b32.xlu1 %v7457_v13, %s7274_s15  ;;  %833 = vrot.lane.b32.xlu0 %v7461_v14, %s7274_s15 }
  0xa0   : > { %839 = vrot.lane.b32.xlu1 %v7475_v17, %s7274_s15  ;;  %837 = vrot.lane.b32.xlu0 %v7479_v18, %s7274_s15 }
  0xa4   : > { %843 = vrot.lane.b32.xlu1 %v7490_v20, %s7274_s15  ;;  %841 = vrot.lane.b32.xlu0 %v7494_v21, %s7274_s15 }
  0xa8   : > { %948 = vrot.lane.b32.xlu1 %v7431_v8, %s7275_s16  ;;  %845 = vrot.lane.b32.xlu0 %v7502_v22, %s7274_s15 }
  0xac   : > { %952 = vrot.lane.b32.xlu1 %v7427_v7, %s7275_s16  ;;  %950 = vrot.lane.b32.xlu0 %v7443_v10, %s7275_s16 }
  0xae   : > { %v7600_v23 = vpop.permute.xlu1 %335  ;;  %v7602_v24 = vpop.permute.xlu0 %331 }
  0xb0   : > { %956 = vrot.lane.b32.xlu1 %v7461_v14, %s7275_s16  ;;  %954 = vrot.lane.b32.xlu0 %v7439_v9, %s7275_s16 }
  0xb2   : > { %v7608_v25 = vpop.permute.xlu1 %337  ;;  %v7610_v26 = vpop.permute.xlu0 %333 }
  0xb3   : > { %v363_v62 = vsel %vm13869_vm0, %v7600_v23, %v7608_v25  ;;  %v364_v63 = vsel %vm13869_vm0, %v7610_v26, %v7600_v23 }
  0xb4   : > { %960 = vrot.lane.b32.xlu1 %v7479_v18, %s7275_s16  ;;  %958 = vrot.lane.b32.xlu0 %v7457_v13, %s7275_s16 }
  0xb6   : > { %v7616_v27 = vpop.permute.xlu1 %341  ;;  %v7618_v28 = vpop.permute.xlu0 %339 }
  0xb8   : > { %964 = vrot.lane.b32.xlu1 %v7494_v21, %s7275_s16  ;;  %962 = vrot.lane.b32.xlu0 %v7475_v17, %s7275_s16 }
  0xba   : > { %v7624_v29 = vpop.permute.xlu1 %345  ;;  %v7626_v30 = vpop.permute.xlu0 %343 }
  0xbc   : > { %968 = vrot.lane.b32.xlu1 %v7502_v22, %s7275_s16  ;;  %966 = vrot.lane.b32.xlu0 %v7490_v20, %s7275_s16 }
  0xbe   : > { %v7632_v31 = vpop.permute.xlu1 %349  ;;  %v7634_v32 = vpop.permute.xlu0 %347 }
  0xbf   : > { %v358_v23 = vsel %vm13869_vm0, %v7624_v29, %v7634_v32 }
  0xc0   : > { %1073 = vrot.lane.b32.xlu1 %v7443_v10, %s7276_s18  ;;  %1071 = vrot.lane.b32.xlu0 %v7431_v8, %s7276_s18 }
  0xc2   : > { %v7640_v33 = vpop.permute.xlu1 %456  ;;  %v7642_v34 = vpop.permute.xlu0 %351 }
  0xc3   : > { %v366_v61 = vsel %vm13869_vm0, %v7642_v34, %v7602_v24 }
  0xc4   : > { %1077 = vrot.lane.b32.xlu1 %v7439_v9, %s7276_s18  ;;  %1075 = vrot.lane.b32.xlu0 %v7427_v7, %s7276_s18 }
  0xc6   : > { %v7648_v35 = vpop.permute.xlu1 %460  ;;  %v7650_v36 = vpop.permute.xlu0 %458 }
  0xc8   : > { %1081 = vrot.lane.b32.xlu1 %v7457_v13, %s7276_s18  ;;  %1079 = vrot.lane.b32.xlu0 %v7461_v14, %s7276_s18 }
  0xca   : > { %v7656_v37 = vpop.permute.xlu1 %464  ;;  %v7658_v38 = vpop.permute.xlu0 %462 }
  0xcc   : > { %1085 = vrot.lane.b32.xlu1 %v7475_v17, %s7276_s18  ;;  %1083 = vrot.lane.b32.xlu0 %v7479_v18, %s7276_s18 }
  0xce   : > { %v7664_v39 = vpop.permute.xlu1 %468  ;;  %v7666_v40 = vpop.permute.xlu0 %466 }
  0xd0   : > { %1089 = vrot.lane.b32.xlu1 %v7490_v20, %s7276_s18  ;;  %1087 = vrot.lane.b32.xlu0 %v7494_v21, %s7276_s18 }
  0xd2   : > { %v7672_v41 = vpop.permute.xlu1 %472  ;;  %v7674_v42 = vpop.permute.xlu0 %470 }
  0xd4   : > { %1194 = vrot.lane.b32.xlu1 %v7431_v8, %s7277_s19  ;;  %1091 = vrot.lane.b32.xlu0 %v7502_v22, %s7276_s18  ;;  %v365_v8 = vsel %vm13869_vm0, %v7602_v24, %v7610_v26 }
  0xd6   : > { %v7680_v43 = vpop.permute.xlu1 %476  ;;  %v7682_v44 = vpop.permute.xlu0 %474 }
  0xd8   : > { %1198 = vrot.lane.b32.xlu1 %v7427_v7, %s7277_s19  ;;  %1196 = vrot.lane.b32.xlu0 %v7443_v10, %s7277_s19  ;;  %v360_v10 = vsel %vm13869_vm0, %v7616_v27, %v7626_v30 }
  0xda   : > { %v7688_v45 = vpop.permute.xlu1 %581  ;;  %v7690_v46 = vpop.permute.xlu0 %579 }
  0xdc   : > { %1202 = vrot.lane.b32.xlu1 %v7461_v14, %s7277_s19  ;;  %1200 = vrot.lane.b32.xlu0 %v7439_v9, %s7277_s19  ;;  %v359_v9 = vsel %vm13869_vm0, %v7626_v30, %v7624_v29  ;;  %v362_v14 = vsel %vm13869_vm0, %v7608_v25, %v7618_v28  ;;  %v488_v29 = vsel %vm478_vm1, %v7640_v33, %v7650_v36 }
  0xdd   : > { %v486_v30 = vsel %vm478_vm1, %v7648_v35, %v7658_v38 }
  0xde   : > { %v7696_v47 = vpop.permute.xlu1 %585  ;;  %v7698_v48 = vpop.permute.xlu0 %583 }
  0xe0   : > { %1206 = vrot.lane.b32.xlu1 %v7479_v18, %s7277_s19  ;;  %1204 = vrot.lane.b32.xlu0 %v7457_v13, %s7277_s19  ;;  %v361_v13 = vsel %vm13869_vm0, %v7618_v28, %v7616_v27  ;;  %v7769_v18 = vsub.s32 %v384_v60, %v7408_v1  ;;  %v489_v1 = vsel %vm478_vm1, %v7680_v43, %v7640_v33 }
  0xe1   : > { %v380_v26 = vcombine.low %v362_v14, %v361_v13  ;;  %v356_v27 = vsel %vm13869_vm0, %v7632_v31, %v7642_v34  ;;  %v501_v34 = vcombine.low %v489_v1, %v488_v29  ;;  %v487_v33 = vsel %vm478_vm1, %v7650_v36, %v7648_v35 }
  0xe2   : > { %v7704_v49 = vpop.permute.xlu1 %589  ;;  %v7706_v50 = vpop.permute.xlu0 %587  ;;  %v483_v60 = vsel %vm478_vm1, %v7666_v40, %v7664_v39 }
  0xe3   : > { %v402_v35 = vrot.slane %v380_v26, %v7769_v18 }
  0xe4   : > { %1210 = vrot.lane.b32.xlu1 %v7494_v21, %s7277_s19  ;;  %1208 = vrot.lane.b32.xlu0 %v7475_v17, %s7277_s19  ;;  %v378_v17 = vcombine.low %v366_v61, %v365_v8  ;;  %v381_v21 = vcombine.low %v360_v10, %v359_v9  ;;  %v484_v61 = vsel %vm478_vm1, %v7656_v37, %v7666_v40 }
  0xe5   : > { %v441_v8 = vrot.slane %v356_v27, %v7769_v18  ;;  %v502_v9 = vcombine.low %v487_v33, %v486_v30  ;;  %v511_v40 = vrot.slane %v501_v34, %v7769_v18 }
  0xe6   : > { %v7712_v51 = vpop.permute.xlu1 %593  ;;  %v7714_v52 = vpop.permute.xlu0 %591  ;;  %v388_v28 = vrot.slane %v378_v17, %v7769_v18  ;;  %v409_v57 = vrot.slane %v381_v21, %v7769_v18  ;;  %v480_v17 = vsel %vm478_vm1, %v7672_v41, %v7682_v44 }
  0xe7   : > { %v518_v1 = vrot.slane %v502_v9, %v7769_v18 }
  0xe8   : > { %1214 = vrot.lane.b32.xlu1 %v7502_v22, %s7277_s19  ;;  %1212 = vrot.lane.b32.xlu0 %v7490_v20, %s7277_s19  ;;  %v379_v20 = vcombine.low %v364_v63, %v363_v62  ;;  %v357_v22 = vsel %vm13869_vm0, %v7634_v32, %v7632_v31  ;;  %v482_v32 = vsel %vm478_vm1, %v7664_v39, %v7674_v42 }
  0xe9   : > { %v427_v31 = vcombine.low %v358_v23, %v357_v22  ;;  %v504_v10 = vcombine.low %v483_v60, %v482_v32  ;;  %v485_v39 = vsel %vm478_vm1, %v7658_v38, %v7656_v37  ;;  %v481_v37 = vsel %vm478_vm1, %v7674_v42, %v7672_v41 }
  0xea   : > { %v7720_v53 = vpop.permute.xlu1 %597  ;;  %v7722_v54 = vpop.permute.xlu0 %595  ;;  %v395_v56 = vrot.slane %v379_v20, %v7769_v18  ;;  %v503_v14 = vcombine.low %v485_v39, %v484_v61  ;;  %v411_v20 = vcombine.low %v402_v35, %v409_v57  ;;  %v550_v27 = vcombine.low %v481_v37, %v480_v17 }
  0xeb   : > { %v434_v13 = vrot.slane %v427_v31, %v7769_v18  ;;  %v532_v38 = vrot.slane %v504_v10, %v7769_v18  ;;  %v533_v29 = vcombine.low %v511_v40, %v518_v1  ;;  %v479_v41 = vsel %vm478_vm1, %v7682_v44, %v7680_v43 }
  0xec   : > { %v410_v36 = vcombine.low %v388_v28, %v395_v56  ;;  %v525_v28 = vrot.slane %v503_v14, %v7769_v18  ;;  %v425_v30 = vrot.slane %v411_v20, %v7769_v18  ;;  %v557_v57 = vrot.slane %v550_v27, %v7769_v18 }
  0xed   : > { %v442_v23 = vcombine.low %v434_v13, %v441_v8  ;;  %v541_v33 = vrot.slane %v533_v29, %v7769_v18  ;;  %v564_v60 = vrot.slane %v479_v41, %v7769_v18  ;;  %v609_v20 = vsel %vm601_vm2, %v7698_v48, %v7696_v47 }
  0xee   : > { %v7727_v58 = vpop.permute.xlu1 %702  ;;  %v7729_v59 = vpop.permute.xlu0 %599  ;;  %v418_v26 = vrot.slane %v410_v36, %v7769_v18  ;;  %v534_v34 = vcombine.low %v525_v28, %v532_v38 }
  0xef   : > { %v449_v31 = vrot.slane %v442_v23, %v7769_v18  ;;  %v565_v36 = vcombine.low %v557_v57, %v564_v60  ;;  %v610_v23 = vsel %vm601_vm2, %v7688_v45, %v7698_v48 }
  0xf0   : > { %v426_v42 = vcombine.low %v418_v26, %v425_v30  ;;  %v548_v10 = vrot.slane %v534_v34, %v7769_v18  ;;  %v625_v48 = vcombine.low %v610_v23, %v609_v20  ;;  %v606_v20 = vsel %vm601_vm2, %v7704_v49, %v7714_v52 }
  0xf1   : > { %v453_v9 = vsub.f32 %v7482_v19, %v449_v31  ;;  %v572_v40 = vrot.slane %v565_v36, %v7769_v18  ;;  %v603_v36 = vsel %vm601_vm2, %v7722_v54, %v7720_v53  ;;  %v608_v23 = vsel %vm601_vm2, %v7696_v47, %v7706_v50 }
  0xf2   : > { %v7744_v0 = vpop.permute.xlu1 %706  ;;  %v7746_v7 = vpop.permute.xlu0 %704  ;;  %v452_v35 = vsub.f32 %v7420_v5, %v426_v42  ;;  %v549_v39 = vcombine.low %v541_v33, %v548_v10 }
  0xf3   : > { %v7871_v13 = vand.u32 2147483647, %v453_v9  ;;  %v576_v29 = vsub.f32 %v7482_v19, %v572_v40 }
  0xf4   : > { %v7874_v14 = vand.u32 2147483647, %v452_v35  ;;  %v575_v17 = vsub.f32 %v7420_v5, %v549_v39  ;;  %v611_v35 = vsel %vm601_vm2, %v7690_v46, %v7688_v45  ;;  %v604_v39 = vsel %vm601_vm2, %v7712_v51, %v7722_v54 }
  0xf5   : > { %v578_v40 = vand.u32 2147483647, %v576_v29  ;;  %v605_v45 = vsel %vm601_vm2, %v7714_v52, %v7712_v51  ;;  %v602_v51 = vsel %vm601_vm2, %v7720_v53, %v7729_v59 }
  0xf6   : > { %v7784_v24 = vpop.permute.xlu1 %710  ;;  %v7786_v25 = vpop.permute.xlu0 %708  ;;  %v1324_v27 = vrot.slane %v7874_v14, %v7414_v3  ;;  %v1328_v30 = vrot.slane %v7874_v14, %v7423_v6  ;;  %v1332_v31 = vrot.slane %v7874_v14, %v7411_v2  ;;  %v1336_v34 = vrot.slane %v7874_v14, %v7417_v4 }
  0xf7   : > { %v577_v41 = vand.u32 2147483647, %v575_v17  ;;  %v1340_v42 = vrot.slane %v7874_v14, %v7449_v12  ;;  %v1344_v57 = vrot.slane %v7874_v14, %v7446_v11  ;;  %v1348_v33 = vrot.slane %v7874_v14, %v7467_v16 }
  0xf8   : > { %v1352_v60 = vrot.slane %v7874_v14, %v7464_v15  ;;  %v612_v14 = vsel %vm601_vm2, %v7729_v59, %v7690_v46  ;;  %v7935_v17 = vrot.slane %v625_v48, %v7769_v18  ;;  %v607_v46 = vsel %vm601_vm2, %v7706_v50, %v7704_v49 }
  0xf9   : > { %v1381_v54 = vrot.slane %v577_v41, %v7414_v3  ;;  %v1385_v29 = vrot.slane %v577_v41, %v7423_v6  ;;  %v1389_v52 = vrot.slane %v577_v41, %v7411_v2  ;;  %v673_v48 = vcombine.low %v604_v39, %v603_v36 }
  0xfa   : > { %v7819_v62 = vpop.permute.xlu1 %714  ;;  %v7821_v63 = vpop.permute.xlu0 %712  ;;  %v624_v28 = vcombine.low %v612_v14, %v611_v35  ;;  %v1393_v49 = vrot.slane %v577_v41, %v7417_v4  ;;  %v1401_v47 = vrot.slane %v577_v41, %v7446_v11  ;;  %v627_v50 = vcombine.low %v606_v20, %v605_v45 }
  0xfb   : > { %v1409_v53 = vrot.slane %v577_v41, %v7464_v15  ;;  %v1413_v59 = vrot.slane %v578_v40, %v7414_v3  ;;  %v687_v36 = vrot.slane %v602_v51, %v7769_v18  ;;  %v7972_v35 = vsel %vm1832_vm3, %v1324_v27, %v1381_v54 }
  0xfc   : > { %v1417_v39 = vrot.slane %v578_v40, %v7423_v6  ;;  %v1421_v14 = vrot.slane %v578_v40, %v7411_v2  ;;  %v7980_v45 = vsel %vm1832_vm3, %v1332_v31, %v1389_v52  ;;  %v634_v20 = vrot.slane %v624_v28, %v7769_v18 }
  0xfd   : > { %v7989_v27 = vsel %vm1832_vm3, %v1336_v34, %v1393_v49  ;;  %v655_v31 = vrot.slane %v627_v50, %v7769_v18  ;;  %v8002_v28 = vsel %vm1832_vm3, %v1352_v60, %v1409_v53  ;;  %v734_v60 = vsel %vm724_vm4, %v7727_v58, %v7746_v7 }
  0xfe   : > { %v7835_v21 = vpop.permute.xlu1 %718  ;;  %v7837_v22 = vpop.permute.xlu0 %716  ;;  %v733_v50 = vsel %vm724_vm4, %v7746_v7, %v7744_v0  ;;  %v272_v7 = vld [vmem:[%s13723_s1] sm:$0xff] }
  0xff   : > { %v728_v52 = vsel %vm724_vm4, %v7819_v62, %v7837_v22 }
 0x102   : > { %v7848_v32 = vpop.permute.xlu1 %722  ;;  %v7850_v56 = vpop.permute.xlu0 %720 }
 0x103   : > { %v735_v34 = vsel %vm724_vm4, %v7848_v32, %v7727_v58 }
 0x104   : > { %v747_v53 = vcombine.low %v735_v34, %v734_v60 }
 0x106   : > { %v7860_v61 = vpop.permute.xlu1 %827  ;;  %v7862_v8 = vpop.permute.xlu0 %825 }
 0x107   : > { %14094 = vst [vmem:[#allocation5_spill] sm:$0xff] %v7860_v61  ;;  %14095 = vst [vmem:[#allocation6_spill] sm:$0xff] %v7862_v8  ;;  %v1397_v8 = vrot.slane %v577_v41, %v7449_v12  ;;  %v1405_v61 = vrot.slane %v577_v41, %v7467_v16  ;;  %v680_v41 = vrot.slane %v673_v48, %v7769_v18 }
 0x109   : > { %v7992_v40 = vsel %vm1832_vm3, %v1340_v42, %v1397_v8  ;;  %v7999_v54 = vsel %vm1832_vm3, %v1348_v33, %v1405_v61  ;;  %v14100_v8 = vrot.slane %v7871_v13, %v7414_v3 }
 0x10a   : > { %v7867_v43 = vpop.permute.xlu1 %831  ;;  %v7869_v44 = vpop.permute.xlu0 %829 }
 0x10b   : > { %14096 = vst [vmem:[#allocation7_spill] sm:$0xff] %v7869_v44  ;;  %v7977_v44 = vsel %vm1832_vm3, %v1328_v30, %v1385_v29  ;;  %v7995_v30 = vsel %vm1832_vm3, %v1344_v57, %v1401_v47  ;;  %v8012_v42 = vsel %vm1832_vm3, %v14100_v8, %v1413_v59  ;;  %v14101_v57 = vrot.slane %v7871_v13, %v7423_v6  ;;  %v8055_v59 = vld [vmem:[%s13723_s1 + $0x8] sm:$0x7] }
 0x10c   : > { %v732_v29 = vsel %vm724_vm4, %v7744_v0, %v7786_v25  ;;  %14104 = vst [vmem:[#allocation12_spill] sm:$0xff] %v8055_v59  ;;  %v727_v0 = vsel %vm724_vm4, %v7837_v22, %v7835_v21  ;;  %v8087_v22 = vrot.slane %v8055_v59, %v7414_v3  ;;  %v8091_v34 = vrot.slane %v8055_v59, %v7423_v6 }
 0x10d   : > { %v8018_v61 = vsel %vm1832_vm3, %v14101_v57, %v1417_v39  ;;  %v730_v39 = vsel %vm724_vm4, %v7784_v24, %v7821_v63  ;;  %v757_v57 = vrot.slane %v747_v53, %v7769_v18  ;;  %v8150_v59 = vrot.slane %v272_v7, %v7464_v15 }
 0x10e   : > { %v7886_v1 = vpop.permute.xlu1 %835  ;;  %v7888_v37 = vpop.permute.xlu0 %833  ;;  %14105 = vst [vmem:[#allocation13_spill] sm:$0xff] %v8087_v22  ;;  %14106 = vst [vmem:[#allocation14_spill] sm:$0xff] %v8091_v34 }
 0x10f   : > { %14097 = vst [vmem:[#allocation8_spill] sm:$0xff] %v7886_v1  ;;  %14114 = vst [vmem:[#allocation22_spill] sm:$0xff] %v8150_v59 }
 0x112   : > { %v7914_v9 = vpop.permute.xlu1 %839  ;;  %v7916_v10 = vpop.permute.xlu0 %837 }
 0x116   : > { %v7960_v26 = vpop.permute.xlu1 %843  ;;  %v7962_v38 = vpop.permute.xlu0 %841 }
 0x117   : > { %14098 = vst [vmem:[#allocation9_spill] sm:$0xff] %v7960_v26  ;;  %v626_v26 = vcombine.low %v608_v23, %v607_v46  ;;  %v688_v46 = vcombine.low %v680_v41, %v687_v36  ;;  %v656_v23 = vcombine.low %v634_v20, %v7935_v17  ;;  %v14103_v17 = vrot.slane %v7871_v13, %v7411_v2 }
 0x118   : > { %v729_v13 = vsel %vm724_vm4, %v7821_v63, %v7819_v62  ;;  %v731_v63 = vsel %vm724_vm4, %v7786_v25, %v7784_v24  ;;  %v8098_v24 = vrot.slane %v272_v7, %v7414_v3 }
 0x119   : > { %v648_v33 = vrot.slane %v626_v26, %v7769_v18  ;;  %v726_v26 = vsel %vm724_vm4, %v7835_v21, %v7850_v56  ;;  %v8046_v49 = vsel %vm1832_vm3, %v14103_v17, %v1421_v14  ;;  %v695_v36 = vrot.slane %v688_v46, %v7769_v18 }
 0x11a   : > { %v7984_v1 = vpop.permute.xlu1 %948  ;;  %v7986_v51 = vpop.permute.xlu0 %845  ;;  %v748_v14 = vcombine.low %v733_v50, %v732_v29  ;;  %v750_v41 = vcombine.low %v729_v13, %v728_v52  ;;  %v796_v20 = vcombine.low %v727_v0, %v726_v26  ;;  %v664_v62 = vrot.slane %v656_v23, %v7769_v18  ;;  %14108 = vst [vmem:[#allocation16_spill] sm:$0xff] %v8098_v24 }
 0x11b   : > { %14099 = vst [vmem:[#allocation10_spill] sm:$0xff] %v7984_v1  ;;  %v657_v47 = vcombine.low %v648_v33, %v655_v31  ;;  %v8074_v31 = vand.u32 2147483647, %v7420_v5  ;;  %v749_v8 = vcombine.low %v731_v63, %v730_v39  ;;  %v8095_v33 = vrot.slane %v272_v7, %v7423_v6 }
 0x11c   : > { %v699_v60 = vsub.f32 %v7482_v19, %v695_v36  ;;  %v725_v23 = vsel %vm724_vm4, %v7850_v56, %v7848_v32  ;;  %v8108_v29 = vrot.slane %v272_v7, %v7417_v4  ;;  %v764_v52 = vrot.slane %v748_v14, %v7769_v18 }
 0x11d   : > { %14107 = vst [vmem:[#allocation15_spill] sm:$0xff] %v8095_v33  ;;  %v671_v25 = vrot.slane %v657_v47, %v7769_v18  ;;  %v778_v26 = vrot.slane %v750_v41, %v7769_v18  ;;  %v803_v17 = vrot.slane %v796_v20, %v7769_v18  ;;  %v1784_v47 = vrot.slane %v8074_v31, %v7423_v6 }
 0x11e   : > { %v8038_v48 = vpop.permute.xlu1 %952  ;;  %v8040_v58 = vpop.permute.xlu0 %950  ;;  %14109 = vst [vmem:[#allocation17_spill] sm:$0xff] %v8108_v29  ;;  %v1780_v32 = vrot.slane %v8074_v31, %v7414_v3  ;;  %v1792_v56 = vrot.slane %v8074_v31, %v7417_v4  ;;  %v1788_v13 = vrot.slane %v8074_v31, %v7411_v2  ;;  %v771_v39 = vrot.slane %v749_v8, %v7769_v18 }
 0x11f   : > { %14102 = vst [vmem:[#allocation11_spill] sm:$0xff] %v8040_v58  ;;  %v672_v50 = vcombine.low %v664_v62, %v671_v25  ;;  %v779_v0 = vcombine.low %v757_v57, %v764_v52  ;;  %v810_v14 = vrot.slane %v725_v23, %v7769_v18  ;;  %v8128_v41 = vrot.slane %v272_v7, %v7411_v2 }
 0x120   : > { %v8130_v20 = vand.u32 2147483647, %v699_v60  ;;  %v1800_v62 = vrot.slane %v8074_v31, %v7446_v11  ;;  %v8135_v63 = vrot.slane %v272_v7, %v7446_v11  ;;  %v1796_v25 = vrot.slane %v8074_v31, %v7449_v12 }
 0x121   : > { %14111 = vst [vmem:[#allocation19_spill] sm:$0xff] %v8128_v41  ;;  %v780_v22 = vcombine.low %v771_v39, %v778_v26  ;;  %v811_v34 = vcombine.low %v803_v17, %v810_v14  ;;  %v8140_v8 = vrot.slane %v272_v7, %v7449_v12  ;;  %v1808_v57 = vrot.slane %v8074_v31, %v7464_v15 }
 0x122   : > { %v8081_v46 = vpop.permute.xlu1 %956  ;;  %v8083_v21 = vpop.permute.xlu0 %954  ;;  %14112 = vst [vmem:[#allocation20_spill] sm:$0xff] %v8135_v63  ;;  %v698_v60 = vsub.f32 %v7420_v5, %v672_v50  ;;  %v1804_v1 = vrot.slane %v8074_v31, %v7467_v16  ;;  %v8155_v26 = vrot.slane %v272_v7, %v7467_v16  ;;  %v787_v17 = vrot.slane %v779_v0, %v7769_v18 }
 0x123   : > { %14113 = vst [vmem:[#allocation21_spill] sm:$0xff] %v8140_v8  ;;  %v8159_v39 = vmul.f32 %v8095_v33, %v1784_v47  ;;  %v8162_v50 = vmul.f32 %v8098_v24, %v1780_v32  ;;  %v8165_v14 = vmul.f32 %v8108_v29, %v1792_v56  ;;  %v1470_v58 = vrot.slane %v8130_v20, %v7414_v3 }
 0x124   : > { %14115 = vst [vmem:[#allocation23_spill] sm:$0xff] %v8155_v26  ;;  %v8173_v7 = vmul.f32 %v8135_v63, %v1800_v62  ;;  %v8176_v31 = vand.u32 2147483647, %v7482_v19  ;;  %v794_v47 = vrot.slane %v780_v22, %v7769_v18  ;;  %v818_v32 = vrot.slane %v811_v34, %v7769_v18 }
 0x125   : > { %14116 = vst [vmem:[#allocation24_spill] sm:$0xff] %v8159_v39  ;;  %14117 = vst [vmem:[#allocation25_spill] sm:$0xff] %v8162_v50  ;;  %v850_v56 = vsel %vm847_vm5, %v7914_v9, %v7962_v38  ;;  %v8185_v0 = vmul.f32 %v8140_v8, %v1796_v25  ;;  %v1474_v62 = vrot.slane %v8130_v20, %v7423_v6 }
 0x126   : > { %v8115_v53 = vpop.permute.xlu1 %960  ;;  %v8117_v36 = vpop.permute.xlu0 %958  ;;  %14118 = vst [vmem:[#allocation26_spill] sm:$0xff] %v8165_v14  ;;  %14120 = vst [vmem:[#allocation28_spill] sm:$0xff] %v8173_v7  ;;  %v8194_v22 = vmul.f32 %v8150_v59, %v1808_v57  ;;  %v8197_v34 = vmul.f32 %v8155_v26, %v1804_v1  ;;  %v854_v25 = vsel %vm847_vm5, %v7867_v43, %v7888_v37 }
 0x127   : > { %14110 = vst [vmem:[#allocation18_spill] sm:$0xff] %v8117_v36  ;;  %v8170_v36 = vmul.f32 %v8128_v41, %v1788_v13  ;;  %14121 = vst [vmem:[#allocation29_spill] sm:$0xff] %v8176_v31  ;;  %v700_v13 = vand.u32 2147483647, %v698_v60  ;;  %v851_v60 = vsel %vm847_vm5, %v7916_v10, %v7914_v9  ;;  %v1478_v1 = vrot.slane %v8130_v20, %v7411_v2  ;;  %v14126_v9 = vld [vmem:[#allocation7_spill] sm:$0xff] }
 0x128   : > { %14122 = vst [vmem:[#allocation30_spill] sm:$0xff] %v8185_v0  ;;  %14123 = vst [vmem:[#allocation31_spill] sm:$0xff] %v8194_v22  ;;  %v14125_v0 = vld [vmem:[#allocation8_spill] sm:$0xff]  ;;  %v822_v22 = vsub.f32 %v7482_v19, %v818_v32  ;;  %v855_v26 = vsel %vm847_vm5, %v14126_v9, %v7867_v43 }
 0x129   : > { %14119 = vst [vmem:[#allocation27_spill] sm:$0xff] %v8170_v36  ;;  %14124 = vst [vmem:[#allocation32_spill] sm:$0xff] %v8197_v34  ;;  %v795_v36 = vcombine.low %v787_v17, %v794_v47  ;;  %v852_v57 = vsel %vm847_vm5, %v14125_v0, %v7916_v10  ;;  %v8215_v17 = vsel %vm1844_vm6, %v8012_v42, %v1470_v58  ;;  %v14127_v10 = vld [vmem:[#allocation5_spill] sm:$0xff] }
 0x12a   : > { %v8145_v23 = vpop.permute.xlu1 %964  ;;  %v8147_v52 = vpop.permute.xlu0 %962  ;;  %v873_v47 = vcombine.low %v851_v60, %v850_v56  ;;  %v856_v20 = vsel %vm847_vm5, %v14127_v10, %v14126_v9  ;;  %v853_v42 = vsel %vm847_vm5, %v7888_v37, %v14125_v0  ;;  %v1438_v58 = vrot.slane %v700_v13, %v7414_v3  ;;  %v14128_v37 = vld [vmem:[#allocation6_spill] sm:$0xff] }
 0x12b   : > { %v1442_v32 = vrot.slane %v700_v13, %v7423_v6  ;;  %v871_v56 = vcombine.low %v855_v26, %v854_v25  ;;  %v872_v60 = vcombine.low %v853_v42, %v852_v57  ;;  %v1446_v59 = vrot.slane %v700_v13, %v7411_v2 }
 0x12c   : > { %v1450_v9 = vrot.slane %v700_v13, %v7417_v4  ;;  %v821_v31 = vsub.f32 %v7420_v5, %v795_v36  ;;  %v857_v0 = vsel %vm847_vm5, %v14128_v37, %v14127_v10  ;;  %v1454_v8 = vrot.slane %v700_v13, %v7449_v12 }
 0x12d   : > { %v8249_v26 = vsel %vm1844_vm6, %v8018_v61, %v1474_v62  ;;  %v870_v25 = vcombine.low %v857_v0, %v856_v20  ;;  %v901_v57 = vrot.slane %v873_v47, %v7769_v18  ;;  %v1458_v42 = vrot.slane %v700_v13, %v7446_v11 }
 0x12e   : > { %v8189_v7 = vpop.permute.xlu1 %968  ;;  %v8191_v63 = vpop.permute.xlu0 %966  ;;  %v1462_v14 = vrot.slane %v700_v13, %v7467_v16  ;;  %v1466_v36 = vrot.slane %v700_v13, %v7464_v15  ;;  %v8255_v41 = vand.u32 2147483647, %v822_v22  ;;  %v1845_v10 = vsel %vm1844_vm6, %v7972_v35, %v1438_v58 }
 0x12f   : > { %v8261_v29 = vsel %vm1844_vm6, %v8046_v49, %v1478_v1  ;;  %v887_v61 = vrot.slane %v871_v56, %v7769_v18  ;;  %v894_v62 = vrot.slane %v872_v60, %v7769_v18  ;;  %v1846_v13 = vsel %vm1844_vm6, %v7977_v44, %v1442_v32  ;;  %v14129_v60 = vld [vmem:[#allocation9_spill] sm:$0xff] }
 0x130   : > { %v1847_v22 = vsel %vm1844_vm6, %v7980_v45, %v1446_v59  ;;  %v1848_v35 = vsel %vm1844_vm6, %v7989_v27, %v1450_v9  ;;  %v8275_v58 = vand.u32 2147483647, %v821_v31  ;;  %v1849_v49 = vsel %vm1844_vm6, %v7992_v40, %v1454_v8 }
 0x131   : > { %v880_v1 = vrot.slane %v870_v25, %v7769_v18  ;;  %v903_v56 = vcombine.low %v894_v62, %v901_v57  ;;  %v848_v44 = vsel %vm847_vm5, %v14129_v60, %v7986_v51  ;;  %v1850_v45 = vsel %vm1844_vm6, %v7995_v30, %v1458_v42  ;;  %v14130_v62 = vld [vmem:[#allocation18_spill] sm:$0xff] }
 0x132   : > { %v8235_v34 = vpop.permute.xlu1 %1073  ;;  %v8237_v43 = vpop.permute.xlu0 %1071  ;;  %v8288_v27 = vsel %vm1844_vm6, %v7999_v54, %v1462_v14  ;;  %v8292_v59 = vsel %vm1844_vm6, %v8002_v28, %v1466_v36  ;;  %v849_v54 = vsel %vm847_vm5, %v7962_v38, %v14129_v60  ;;  %v1495_v32 = vrot.slane %v8275_v58, %v7414_v3 }
 0x133   : > { %v902_v30 = vcombine.low %v880_v1, %v887_v61  ;;  %v919_v9 = vcombine.low %v849_v54, %v848_v44  ;;  %v973_v0 = vsel %vm970_vm7, %v8147_v52, %v8145_v23  ;;  %v974_v25 = vsel %vm970_vm7, %v8115_v53, %v8147_v52 }
 0x134   : > { %v1499_v57 = vrot.slane %v8275_v58, %v7423_v6  ;;  %v1503_v38 = vrot.slane %v8275_v58, %v7411_v2  ;;  %v1507_v42 = vrot.slane %v8275_v58, %v7417_v4  ;;  %v917_v36 = vrot.slane %v903_v56, %v7769_v18 }
 0x135   : > { %v977_v61 = vsel %vm970_vm7, %v8083_v21, %v8081_v46  ;;  %v978_v52 = vsel %vm970_vm7, %v8038_v48, %v8083_v21  ;;  %v975_v1 = vsel %vm970_vm7, %v14130_v62, %v8115_v53  ;;  %v976_v56 = vsel %vm970_vm7, %v8081_v46, %v14130_v62  ;;  %v14131_v46 = vld [vmem:[#allocation11_spill] sm:$0xff] }
 0x136   : > { %v8265_v47 = vpop.permute.xlu1 %1077  ;;  %v8267_v20 = vpop.permute.xlu0 %1075  ;;  %v1511_v60 = vrot.slane %v8275_v58, %v7449_v12  ;;  %v910_v44 = vrot.slane %v902_v30, %v7769_v18  ;;  %v858_v21 = vsel %vm847_vm5, %v7986_v51, %v14128_v37  ;;  %v996_v54 = vcombine.low %v974_v25, %v973_v0  ;;  %v14132_v30 = vld [vmem:[#allocation10_spill] sm:$0xff] }
 0x137   : > { %v1515_v53 = vrot.slane %v8275_v58, %v7446_v11  ;;  %v926_v40 = vrot.slane %v919_v9, %v7769_v18  ;;  %v979_v62 = vsel %vm970_vm7, %v14131_v46, %v8038_v48  ;;  %v980_v50 = vsel %vm970_vm7, %v14132_v30, %v14131_v46 }
 0x138   : > { %v1519_v51 = vrot.slane %v8275_v58, %v7467_v16  ;;  %v918_v37 = vcombine.low %v910_v44, %v917_v36  ;;  %v994_v0 = vcombine.low %v978_v52, %v977_v61  ;;  %v995_v25 = vcombine.low %v976_v56, %v975_v1 }
 0x139   : > { %v1523_v39 = vrot.slane %v8275_v58, %v7464_v15  ;;  %v8361_v9 = vsel %vm1856_vm8, %v1845_v10, %v1495_v32  ;;  %v8364_v24 = vsel %vm1856_vm8, %v1846_v13, %v1499_v57  ;;  %v933_v48 = vrot.slane %v858_v21, %v7769_v18 }
 0x13a   : > { %v1082_v14 = vpop.permute.xlu1 %1081  ;;  %v1080_v28 = vpop.permute.xlu0 %1079  ;;  %v993_v33 = vcombine.low %v980_v50, %v979_v62  ;;  %v1024_v46 = vrot.slane %v996_v54, %v7769_v18  ;;  %v971_v36 = vsel %vm970_vm7, %v8191_v63, %v8189_v7  ;;  %v972_v58 = vsel %vm970_vm7, %v8145_v23, %v8191_v63 }
 0x13b   : > { %v8381_v13 = vsel %vm1856_vm8, %v1847_v22, %v1503_v38  ;;  %v8384_v50 = vsel %vm1856_vm8, %v1848_v35, %v1507_v42  ;;  %v934_v57 = vcombine.low %v926_v40, %v933_v48  ;;  %v8390_v52 = vsel %vm1856_vm8, %v1849_v49, %v1511_v60 }
 0x13c   : > { %v944_v63 = vsub.f32 %v7420_v5, %v918_v37  ;;  %v1010_v23 = vrot.slane %v994_v0, %v7769_v18  ;;  %v1017_v1 = vrot.slane %v995_v25, %v7769_v18  ;;  %v1042_v56 = vcombine.low %v972_v58, %v971_v36 }
 0x13d   : > { %v1100_v22 = vsel %vm1093_vm9, %v8265_v47, %v1080_v28  ;;  %v8403_v49 = vsel %vm1856_vm8, %v1850_v45, %v1515_v53  ;;  %v1003_v5 = vrot.slane %v993_v33, %v7769_v18  ;;  %v941_v21 = vrot.slane %v934_v57, %v7769_v18 }
 0x13e   : > { %v1086_v31 = vpop.permute.xlu1 %1085  ;;  %v1084_v8 = vpop.permute.xlu0 %1083  ;;  %v1026_v38 = vcombine.low %v1017_v1, %v1024_v46  ;;  %v1102_v33 = vsel %vm1093_vm9, %v8235_v34, %v8267_v20  ;;  %v1099_v45 = vsel %vm1093_vm9, %v1080_v28, %v1082_v14  ;;  %v981_v54 = vsel %vm970_vm7, %v8189_v7, %v14132_v30 }
 0x13f   : > { %v1097_v35 = vsel %vm1093_vm9, %v1084_v8, %v1086_v31  ;;  %v1098_v40 = vsel %vm1093_vm9, %v1082_v14, %v1084_v8  ;;  %v1101_v8 = vsel %vm1093_vm9, %v8267_v20, %v8265_v47  ;;  %v8428_v37 = vsel %vm1856_vm8, %v8288_v27, %v1519_v51 }
 0x140   : > { %v1117_v53 = vcombine.low %v1101_v8, %v1100_v22  ;;  %v1118_v62 = vcombine.low %v1099_v45, %v1098_v40  ;;  %v8430_v47 = vand.u32 2147483647, %v944_v63  ;;  %v1049_v0 = vrot.slane %v1042_v56, %v7769_v18 }
 0x141   : > { %v1103_v20 = vsel %vm1093_vm9, %v8237_v43, %v8235_v34  ;;  %v8439_v14 = vsel %vm1856_vm8, %v8292_v59, %v1523_v39  ;;  %v1040_v7 = vrot.slane %v1026_v38, %v7769_v18  ;;  %v14133_v25 = vrot.slane %v8255_v41, %v7414_v3 }
 0x142   : > { %v8376_v10 = vpop.permute.xlu1 %1089  ;;  %v8378_v32 = vpop.permute.xlu0 %1087  ;;  %v1116_v28 = vcombine.low %v1103_v20, %v1102_v33  ;;  %v14134_v34 = vrot.slane %v8255_v41, %v7423_v6  ;;  %v14135_v59 = vrot.slane %v8255_v41, %v7411_v2  ;;  %v1056_v36 = vrot.slane %v981_v54, %v7769_v18 }
 0x143   : > { %v1096_v61 = vsel %vm1093_vm9, %v1086_v31, %v8378_v32  ;;  %v1025_v31 = vcombine.low %v1003_v5, %v1010_v23  ;;  %v8448_v48 = vsel %vm1856_vm8, %v8215_v17, %v14133_v25  ;;  %v945_v58 = vsub.f32 %v7482_v19, %v941_v21 }
 0x144   : > { %v1119_v42 = vcombine.low %v1097_v35, %v1096_v61  ;;  %v8455_v39 = vsel %vm1856_vm8, %v8249_v26, %v14134_v34  ;;  %v8462_v46 = vsel %vm1856_vm8, %v8261_v29, %v14135_v59  ;;  %v1133_v57 = vrot.slane %v1117_v53, %v7769_v18 }
 0x145   : > { %v1033_v17 = vrot.slane %v1025_v31, %v7769_v18  ;;  %v1140_v61 = vrot.slane %v1118_v62, %v7769_v18  ;;  %v1552_v26 = vrot.slane %v8430_v47, %v7414_v3  ;;  %v1556_v41 = vrot.slane %v8430_v47, %v7423_v6 }
 0x146   : > { %v8406_v60 = vpop.permute.xlu1 %1194  ;;  %v8408_v44 = vpop.permute.xlu0 %1091  ;;  %v1147_v30 = vrot.slane %v1119_v42, %v7769_v18  ;;  %v1560_v29 = vrot.slane %v8430_v47, %v7411_v2  ;;  %v1057_v63 = vcombine.low %v1049_v0, %v1056_v36  ;;  %v1564_v23 = vrot.slane %v8430_v47, %v7417_v4 }
 0x147   : > { %v1041_v19 = vcombine.low %v1033_v17, %v1040_v7  ;;  %v1126_v1 = vrot.slane %v1116_v28, %v7769_v18  ;;  %v1568_v40 = vrot.slane %v8430_v47, %v7449_v12  ;;  %v1572_v5 = vrot.slane %v8430_v47, %v7446_v11 }
 0x148   : > { %v1149_v56 = vcombine.low %v1140_v61, %v1147_v30  ;;  %v1576_v38 = vrot.slane %v8430_v47, %v7467_v16  ;;  %v1580_v42 = vrot.slane %v8430_v47, %v7464_v15  ;;  %v947_v21 = vand.u32 2147483647, %v945_v58  ;;  %v8504_v47 = vld [vmem:[%s7401_s17] sm:$0xff]  ;;  %v8540_v61 = vld [vmem:[%s7401_s17 + $0x8] sm:$0x7] }
 0x149   : > { %v1148_v8 = vcombine.low %v1126_v1, %v1133_v57  ;;  %v8492_v31 = vsel %vm1868_vm10, %v8361_v9, %v1552_v26  ;;  %v8496_v54 = vsel %vm1868_vm10, %v8364_v24, %v1556_v41  ;;  %v8500_v53 = vsel %vm1868_vm10, %v8381_v13, %v1560_v29 }
 0x14a   : > { %v1199_v27 = vpop.permute.xlu1 %1198  ;;  %v1197_v51 = vpop.permute.xlu0 %1196  ;;  %v1064_v62 = vrot.slane %v1057_v63, %v7769_v18  ;;  %v1067_v0 = vsub.f32 %v8504_v47, %v1041_v19  ;;  %v1163_v20 = vrot.slane %v1149_v56, %v7769_v18  ;;  %v8515_v13 = vsel %vm1868_vm10, %v8384_v50, %v1564_v23 }
 0x14b   : > { %v1225_v9 = vsel %vm1216_vm11, %v1197_v51, %v1199_v27  ;;  %v1226_v24 = vsel %vm1216_vm11, %v8406_v60, %v1197_v51  ;;  %v8519_v30 = vsel %vm1868_vm10, %v8390_v52, %v1568_v40  ;;  %v1584_v34 = vrot.slane %v947_v21, %v7414_v3 }
 0x14c   : > { %v1156_v51 = vrot.slane %v1148_v8, %v7769_v18  ;;  %v1588_v36 = vrot.slane %v947_v21, %v7423_v6  ;;  %v1592_v52 = vrot.slane %v947_v21, %v7411_v2  ;;  %v1095_v58 = vsel %vm1093_vm9, %v8378_v32, %v8376_v10 }
 0x14d   : > { %v1239_v17 = vcombine.low %v1226_v24, %v1225_v9  ;;  %v8537_v57 = vand.u32 2147483647, %v1067_v0  ;;  %v1068_v26 = vsub.f32 %v8540_v61, %v1064_v62  ;;  %v1874_v32 = vsel %vm1868_vm10, %v8403_v49, %v1572_v5 }
 0x14e   : > { %v1203_v22 = vpop.permute.xlu1 %1202  ;;  %v1201_v35 = vpop.permute.xlu0 %1200  ;;  %v1164_v41 = vcombine.low %v1156_v51, %v1163_v20  ;;  %v8556_v40 = vsel %vm1868_vm10, %v8448_v48, %v1584_v34  ;;  %v8560_v21 = vsel %vm1868_vm10, %v8455_v39, %v1588_v36  ;;  %v1104_v8 = vsel %vm1093_vm9, %v8408_v44, %v8237_v43 }
 0x14f   : > { %v1223_v33 = vsel %vm1216_vm11, %v1201_v35, %v1203_v22  ;;  %v1224_v45 = vsel %vm1216_vm11, %v1199_v27, %v1201_v35  ;;  %v1094_v27 = vsel %vm1093_vm9, %v8376_v10, %v8408_v44  ;;  %v1876_v35 = vsel %vm1868_vm10, %v8439_v14, %v1580_v42 }
 0x150   : > { %v1240_v25 = vcombine.low %v1224_v45, %v1223_v33  ;;  %v1165_v29 = vcombine.low %v1095_v58, %v1094_v27  ;;  %v1249_v49 = vrot.slane %v1239_v17, %v7769_v18  ;;  %v8571_v14 = vand.u32 2147483647, %v1068_v26 }
 0x151   : > { %v1190_v48 = vsub.f32 %v8504_v47, %v1164_v41  ;;  %v1609_v42 = vrot.slane %v8537_v57, %v7414_v3  ;;  %v1613_v9 = vrot.slane %v8537_v57, %v7423_v6  ;;  %v1617_v24 = vrot.slane %v8537_v57, %v7411_v2 }
 0x152   : > { %v1207_v7 = vpop.permute.xlu1 %1206  ;;  %v1205_v28 = vpop.permute.xlu0 %1204  ;;  %v1256_v19 = vrot.slane %v1240_v25, %v7769_v18  ;;  %v1621_v27 = vrot.slane %v8537_v57, %v7417_v4  ;;  %v1633_v58 = vrot.slane %v8537_v57, %v7467_v16  ;;  %v1637_v17 = vrot.slane %v8537_v57, %v7464_v15 }
 0x153   : > { %v1221_v59 = vsel %vm1216_vm11, %v1205_v28, %v1207_v7  ;;  %v1222_v50 = vsel %vm1216_vm11, %v1203_v22, %v1205_v28  ;;  %v1875_v22 = vsel %vm1868_vm10, %v8428_v37, %v1576_v38  ;;  %v8569_v37 = vsel %vm1868_vm10, %v8462_v46, %v1592_v52 }
 0x154   : > { %v1241_v1 = vcombine.low %v1222_v50, %v1221_v59  ;;  %v1172_v38 = vrot.slane %v1165_v29, %v7769_v18  ;;  %v1271_v33 = vcombine.low %v1249_v49, %v1256_v19  ;;  %v1179_v46 = vrot.slane %v1104_v8, %v7769_v18 }
 0x155   : > { %v8595_v25 = vand.u32 2147483647, %v1190_v48  ;;  %v1625_v52 = vrot.slane %v8537_v57, %v7449_v12  ;;  %v1641_v26 = vrot.slane %v8571_v14, %v7414_v3  ;;  %v1645_v41 = vrot.slane %v8571_v14, %v7423_v6 }
 0x156   : > { %v1211_v63 = vpop.permute.xlu1 %1210  ;;  %v1209_v23 = vpop.permute.xlu0 %1208  ;;  %v1263_v43 = vrot.slane %v1241_v1, %v7769_v18  ;;  %v1180_v34 = vcombine.low %v1172_v38, %v1179_v46  ;;  %v1279_v51 = vrot.slane %v1271_v33, %v7769_v18  ;;  %v1649_v29 = vrot.slane %v8571_v14, %v7411_v2 }
 0x157   : > { %v1219_v56 = vsel %vm1216_vm11, %v1209_v23, %v1211_v63  ;;  %v1220_v10 = vsel %vm1216_vm11, %v1207_v7, %v1209_v23  ;;  %v1670_v19 = vrot.slane %v8595_v25, %v7423_v6  ;;  %v1884_v8 = vsel %vm1880_vm12, %v8515_v13, %v1621_v27 }
 0x158   : > { %v1242_v5 = vcombine.low %v1220_v10, %v1219_v56  ;;  %v1187_v1 = vrot.slane %v1180_v34, %v7769_v18  ;;  %v1882_v56 = vsel %vm1880_vm12, %v8496_v54, %v1613_v9  ;;  %v1883_v49 = vsel %vm1880_vm12, %v8500_v53, %v1617_v24 }
 0x159   : > { %v1666_v48 = vrot.slane %v8595_v25, %v7414_v3  ;;  %v1674_v38 = vrot.slane %v8595_v25, %v7411_v2  ;;  %v1678_v54 = vrot.slane %v8595_v25, %v7417_v4  ;;  %v1885_v13 = vsel %vm1880_vm12, %v8519_v30, %v1625_v52  ;;  %v14141_v52 = vld [vmem:[#allocation25_spill] sm:$0xff] }
 0x15a   : > { %v1215_v39 = vpop.permute.xlu1 %1214  ;;  %v1270_v44 = vrot.slane %v1242_v5, %v7769_v18  ;;  %v1213_v45 = vpop.permute.xlu0 %1212  ;;  %v1887_v53 = vsel %vm1880_vm12, %v1875_v22, %v1633_v58  ;;  %v1191_v33 = vsub.f32 %v8540_v61, %v1187_v1  ;;  %v1690_v34 = vrot.slane %v8595_v25, %v7467_v16 }
 0x15b   : > { %v1227_v62 = vsel %vm1216_vm11, %v1215_v39, %v8406_v60  ;;  %v1217_v0 = vsel %vm1216_vm11, %v1213_v45, %v1215_v39  ;;  %v1218_v20 = vsel %vm1216_vm11, %v1211_v63, %v1213_v45  ;;  %v1629_v60 = vrot.slane %v8537_v57, %v7446_v11 }
 0x15c   : > { %v1272_v7 = vcombine.low %v1263_v43, %v1270_v44  ;;  %v1288_v28 = vcombine.low %v1218_v20, %v1217_v0  ;;  %v1302_v50 = vrot.slane %v1227_v62, %v7769_v18  ;;  %v1881_v57 = vsel %vm1880_vm12, %v8492_v31, %v1609_v42 }
 0x15d   : > { %v1886_v5 = vsel %vm1880_vm12, %v1874_v32, %v1629_v60  ;;  %v1888_v39 = vsel %vm1880_vm12, %v1876_v35, %v1637_v17  ;;  %v1682_v32 = vrot.slane %v8595_v25, %v7449_v12  ;;  %v1686_v42 = vrot.slane %v8595_v25, %v7446_v11  ;;  %v14142_v17 = vld [vmem:[#allocation17_spill] sm:$0xff] }
 0x15e   : > { %v1286_v59 = vrot.slane %v1272_v7, %v7769_v18  ;;  %v1295_v36 = vrot.slane %v1288_v28, %v7769_v18  ;;  %v1894_v43 = vsel %vm1892_vm13, %v1882_v56, %v1670_v19  ;;  %v1893_v45 = vsel %vm1892_vm13, %v1881_v57, %v1666_v48  ;;  %v14136_v28 = vld [vmem:[#allocation15_spill] sm:$0xff]  ;;  %v14144_v48 = vld [vmem:[#allocation26_spill] sm:$0xff] }
 0x15f   : > { %v1896_v46 = vsel %vm1892_vm13, %v1884_v8, %v1678_v54  ;;  %v1895_v62 = vsel %vm1892_vm13, %v1883_v49, %v1674_v38  ;;  %v1193_v7 = vand.u32 2147483647, %v1191_v33  ;;  %v1897_v8 = vsel %vm1892_vm13, %v1885_v13, %v1682_v32  ;;  %v14145_v54 = vld [vmem:[#allocation27_spill] sm:$0xff]  ;;  %v14148_v13 = vld [vmem:[#allocation21_spill] sm:$0xff] }
 0x160   : > { %v1287_v63 = vcombine.low %v1279_v51, %v1286_v59  ;;  %v1303_v23 = vcombine.low %v1295_v36, %v1302_v50  ;;  %v1898_v59 = vsel %vm1892_vm13, %v1886_v5, %v1686_v42  ;;  %v14140_v50 = vld [vmem:[#allocation24_spill] sm:$0xff]  ;;  %v1899_v5 = vsel %vm1892_vm13, %v1887_v53, %v1690_v34 }
 0x161   : > { %v1698_v57 = vrot.slane %v1193_v7, %v7414_v3  ;;  %v1706_v49 = vrot.slane %v1193_v7, %v7411_v2 }
 0x162   : > { %v1313_v10 = vsub.f32 %v8504_v47, %v1287_v63  ;;  %v1310_v31 = vrot.slane %v1303_v23, %v7769_v18  ;;  %v14143_v23 = vld [vmem:[#allocation19_spill] sm:$0xff] }
 0x164   : > { %v1315_v47 = vand.u32 2147483647, %v1313_v10  ;;  %v1314_v22 = vsub.f32 %v8540_v61, %v1310_v31  ;;  %v1702_v10 = vrot.slane %v1193_v7, %v7423_v6 }
 0x166   : > { %v1723_v18 = vrot.slane %v1315_v47, %v7414_v3  ;;  %v1727_v44 = vrot.slane %v1315_v47, %v7423_v6  ;;  %v1731_v30 = vrot.slane %v1315_v47, %v7411_v2  ;;  %v1735_v35 = vrot.slane %v1315_v47, %v7417_v4  ;;  %v14138_v4 = vld [vmem:[#allocation16_spill] sm:$0xff] }
 0x167   : > { %v1743_v0 = vrot.slane %v1315_v47, %v7446_v11  ;;  %v1694_v11 = vrot.slane %v8595_v25, %v7464_v15  ;;  %v1739_v51 = vrot.slane %v1315_v47, %v7449_v12  ;;  %v1747_v25 = vrot.slane %v1315_v47, %v7467_v16 }
 0x168   : > { %v1906_v20 = vsel %vm1904_vm14, %v1894_v43, %v1727_v44  ;;  %v1905_v9 = vsel %vm1904_vm14, %v1893_v45, %v1723_v18  ;;  %v1908_v24 = vsel %vm1904_vm14, %v1896_v46, %v1735_v35  ;;  %v1907_v60 = vsel %vm1904_vm14, %v1895_v62, %v1731_v30  ;;  %v14152_v46 = vld [vmem:[#allocation30_spill] sm:$0xff] }
 0x169   : > { %v8656_v27 = vmul.f32 %v14136_v28, %v1906_v20  ;;  %v8659_v61 = vmul.f32 %v14138_v4, %v1905_v9  ;;  %v8677_v63 = vmul.f32 %v14142_v17, %v1908_v24  ;;  %v8680_v19 = vmul.f32 %v14143_v23, %v1907_v60  ;;  %v14155_v20 = vld [vmem:[#allocation23_spill] sm:$0xff]  ;;  %v14157_v9 = vld [vmem:[#allocation12_spill] sm:$0xff] }
 0x16a   : > { %v1751_v12 = vrot.slane %v1315_v47, %v7464_v15  ;;  %v1316_v1 = vand.u32 2147483647, %v1314_v22  ;;  %v1910_v56 = vsel %vm1904_vm14, %v1898_v59, %v1743_v0  ;;  %v1909_v16 = vsel %vm1904_vm14, %v1897_v8, %v1739_v51  ;;  %v14146_v47 = vld [vmem:[#allocation20_spill] sm:$0xff]  ;;  %v14153_v0 = vld [vmem:[#allocation22_spill] sm:$0xff]  ;;  %v14162_v59 = vld [vmem:[#allocation13_spill] sm:$0xff] }
 0x16b   : > { %14137 = vst [vmem:[#allocation8_spill] sm:$0xff] %v8656_v27  ;;  %14139 = vst [vmem:[#allocation7_spill] sm:$0xff] %v8659_v61  ;;  %v8670_v36 = vpack.i.bf16 %v14140_v50, %v8656_v27  ;;  %v8674_v58 = vpack.i.bf16 %v14141_v52, %v8659_v61  ;;  %v1900_v15 = vsel %vm1892_vm13, %v1888_v39, %v1694_v11  ;;  %v14151_v22 = vld [vmem:[#allocation28_spill] sm:$0xff]  ;;  %v14160_v11 = vld [vmem:[#allocation14_spill] sm:$0xff] }
 0x16c   : > { %v8698_v38 = vpack.i.bf16 %v14144_v48, %v8677_v63  ;;  %v8702_v31 = vpack.i.bf16 %v14145_v54, %v8680_v19  ;;  %v8705_v42 = vmul.f32 %v14146_v47, %v1910_v56  ;;  %v8708_v32 = vmul.f32 %v14148_v13, %v1909_v16 }
 0x16d   : > { %6176 = vrot.lane.b32.xlu1 %v8670_v36, %s7270_s24  ;;  %6171 = vrot.lane.b32.xlu0 %v8674_v58, %s7270_s24  ;;  %v1755_v33 = vrot.slane %v1316_v1, %v7414_v3  ;;  %v1759_v39 = vrot.slane %v1316_v1, %v7423_v6  ;;  %v1912_v53 = vsel %vm1904_vm14, %v1900_v15, %v1751_v12 }
 0x16e   : > { %14147 = vst [vmem:[#allocation5_spill] sm:$0xff] %v8705_v42  ;;  %14149 = vst [vmem:[#allocation6_spill] sm:$0xff] %v8708_v32  ;;  %v1911_v43 = vsel %vm1904_vm14, %v1899_v5, %v1747_v25  ;;  %v1889_v18 = vsel %vm1880_vm12, %v8556_v40, %v1641_v26  ;;  %v1890_v44 = vsel %vm1880_vm12, %v8560_v21, %v1645_v41  ;;  %v14150_v21 = vld [vmem:[#allocation29_spill] sm:$0xff] }
 0x16f   : > { %v1763_v30 = vrot.slane %v1316_v1, %v7411_v2  ;;  %v1891_v40 = vsel %vm1880_vm12, %v8569_v37, %v1649_v29  ;;  %v1901_v26 = vsel %vm1892_vm13, %v1889_v18, %v1698_v57  ;;  %v1902_v35 = vsel %vm1892_vm13, %v1890_v44, %v1702_v10  ;;  %v14166_v57 = vld [vmem:[#allocation31_spill] sm:$0xff] }
 0x170   : > { %v1812_v41 = vrot.slane %v14150_v21, %v7414_v3  ;;  %v8740_v45 = vpack.i.bf16 %v14151_v22, %v8705_v42  ;;  %v8744_v62 = vpack.i.bf16 %v14152_v46, %v8708_v32  ;;  %v8747_v14 = vmul.f32 %v14153_v0, %v1912_v53 }
 0x171   : > { %6186 = vrot.lane.b32.xlu1 %v8698_v38, %s7270_s24  ;;  %6181 = vrot.lane.b32.xlu0 %v8702_v31, %s7270_s24  ;;  %v8750_v37 = vmul.f32 %v14155_v20, %v1911_v43  ;;  %v1903_v29 = vsel %vm1892_vm13, %v1891_v40, %v1706_v49  ;;  %v8755_v24 = vrot.slane %v14157_v9, %v7411_v2  ;;  %v13766_v9 = vmov 0.0  }
 0x172   : > { %14154 = vst [vmem:[#allocation9_spill] sm:$0xff] %v8747_v14  ;;  %v1913_v3 = vsel %vm1904_vm14, %v1901_v26, %v1755_v33  ;;  %v1914_v7 = vsel %vm1904_vm14, %v1902_v35, %v1759_v39  ;;  %v1915_v60 = vsel %vm1904_vm14, %v1903_v29, %v1763_v30  ;;  %v14159_v34 = vrot.slane %v14150_v21, %v7423_v6  ;;  %v14167_v6 = vld [vmem:[#allocation32_spill] sm:$0xff] }
 0x173   : > { %14156 = vst [vmem:[#allocation18_spill] sm:$0xff] %v8750_v37  ;;  %14158 = vst [vmem:[#allocation11_spill] sm:$0xff] %v8755_v24  ;;  %v8771_v25 = vmul.f32 %v14162_v59, %v1812_v41  ;;  %v1820_v12 = vrot.slane %v14150_v21, %v7411_v2  ;;  %v8776_v1 = vmul.f32 %v14162_v59, %v1913_v3  ;;  %3350 = vmatprep.mubr.f32.mxu1 %v13766_v9 }
 0x174   : > { %v8768_v51 = vmul.f32 %v14160_v11, %v14159_v34  ;;  %v8779_v56 = vmul.f32 %v14160_v11, %v1914_v7  ;;  %v8783_v10 = vpack.i.bf16 %v14166_v57, %v8747_v14  ;;  %v8787_v8 = vpack.i.bf16 %v14167_v6, %v8750_v37  ;;  %3267 = vmatprep.mubr.f32.mxu0 %v13766_v9 }
 0x175   : > { %6196 = vrot.lane.b32.xlu1 %v8740_v45, %s7270_s24  ;;  %6191 = vrot.lane.b32.xlu0 %v8744_v62, %s7270_s24  ;;  %14163 = vst [vmem:[#allocation26_spill] sm:$0xff] %v8771_v25  ;;  %14164 = vst [vmem:[#allocation27_spill] sm:$0xff] %v8776_v1  ;;  %v8790_v49 = vmul.f32 %v8755_v24, %v1915_v60  ;;  %v6350_v2 = vpack.i.bf16 %v8708_v32, %v8677_v63  ;;  %v14181_v32 = vrot.slane %v14166_v57, 4 }
 0x176   : > { %14161 = vst [vmem:[#allocation10_spill] sm:$0xff] %v8768_v51  ;;  %14165 = vst [vmem:[#allocation29_spill] sm:$0xff] %v8779_v56  ;;  %v6400_v16 = vpack.i.bf16 %v8747_v14, %v8680_v19  ;;  %v6405_v15 = vpack.i.bf16 %v8747_v14, %v8750_v37  ;;  %v8804_v5 = vpack.i.bf16 %v8768_v51, %v8779_v56 }
 0x177   : > { %14168 = vst [vmem:[#allocation12_spill] sm:$0xff] %v8790_v49  ;;  %v8808_v33 = vpack.i.bf16 %v8771_v25, %v8776_v1  ;;  %v8811_v39 = vmul.f32 %v8755_v24, %v1820_v12  ;;  %v8815_v53 = vpack.i.bf16 %v8776_v1, %v8747_v14  ;;  %v6470_v43 = vpack.i.bf16 %v8790_v49, %v8659_v61 }
 0x178   : > { %v6465_v18 = vpack.i.bf16 %v8750_v37, %v8776_v1  ;;  %v8827_v44 = vpack.i.bf16 %v8659_v61, %v8656_v27  ;;  %v6335_v26 = vpack.i.bf16 %v8677_v63, %v8680_v19  ;;  %v6345_v35 = vpack.i.bf16 %v14140_v50, %v14144_v48 }
 0x179   : > { %6206 = vrot.lane.b32.xlu1 %v8783_v10, %s7270_s24  ;;  %6201 = vrot.lane.b32.xlu0 %v8787_v8, %s7270_s24  ;;  %14169 = vst [vmem:[#allocation31_spill] sm:$0xff] %v8811_v39  ;;  %v8831_v30 = vpack.i.bf16 %v8811_v39, %v8790_v49  ;;  %v6340_v21 = vpack.i.bf16 %v14145_v54, %v8656_v27 }
 0x17a   : > { %v6355_v41 = vpack.i.bf16 %v14144_v48, %v8680_v19  ;;  %v6360_v29 = vpack.i.bf16 %v14145_v54, %v14152_v46  ;;  %v6430_v3 = vpack.i.bf16 %v14167_v6, %v8771_v25  ;;  %v6425_v7 = vpack.i.bf16 %v14166_v57, %v8750_v37 }
 0x17b   : > { %v6500_v40 = vpack.i.bf16 %v8811_v39, %v14141_v52  ;;  %v6520_v4 = vpack.i.bf16 %v14140_v50, %v8790_v49 }
 0x17d   : > { %6216 = vrot.lane.b32.xlu1 %v8804_v5, %s7270_s24  ;;  %6211 = vrot.lane.b32.xlu0 %v8808_v33, %s7270_s24 }
 0x181   : > { %6226 = vrot.lane.b32.xlu1 %v8674_v58, %s7271_s30  ;;  %6221 = vrot.lane.b32.xlu0 %v8831_v30, %s7270_s24 }
 0x185   : > { %6236 = vrot.lane.b32.xlu1 %v8702_v31, %s7271_s30  ;;  %6231 = vrot.lane.b32.xlu0 %v8670_v36, %s7271_s30 }
 0x189   : > { %6246 = vrot.lane.b32.xlu1 %v8744_v62, %s7271_s30  ;;  %6241 = vrot.lane.b32.xlu0 %v8698_v38, %s7271_s30 }
 0x18d   : > { %6256 = vrot.lane.b32.xlu1 %v8787_v8, %s7271_s30  ;;  %6251 = vrot.lane.b32.xlu0 %v8740_v45, %s7271_s30 }
 0x191   : > { %6266 = vrot.lane.b32.xlu1 %v8808_v33, %s7271_s30  ;;  %6261 = vrot.lane.b32.xlu0 %v8783_v10, %s7271_s30 }
 0x195   : > { %6276 = vrot.lane.b32.xlu1 %v8831_v30, %s7271_s30  ;;  %6271 = vrot.lane.b32.xlu0 %v8804_v5, %s7271_s30 }
 0x199   : > { %6286 = vrot.lane.b32.xlu1 %v8670_v36, %s7272_s10  ;;  %6281 = vrot.lane.b32.xlu0 %v8674_v58, %s7272_s10 }
 0x19d   : > { %6296 = vrot.lane.b32.xlu1 %v8698_v38, %s7272_s10  ;;  %6291 = vrot.lane.b32.xlu0 %v8702_v31, %s7272_s10 }
 0x1a1   : > { %6306 = vrot.lane.b32.xlu1 %v8740_v45, %s7272_s10  ;;  %6301 = vrot.lane.b32.xlu0 %v8744_v62, %s7272_s10 }
 0x1a5   : > { %6316 = vrot.lane.b32.xlu1 %v8783_v10, %s7272_s10  ;;  %6311 = vrot.lane.b32.xlu0 %v8787_v8, %s7272_s10 }
 0x1a9   : > { %6326 = vrot.lane.b32.xlu1 %v8804_v5, %s7272_s10  ;;  %6321 = vrot.lane.b32.xlu0 %v8808_v33, %s7272_s10 }
 0x1ad   : > { %6336 = vrot.lane.b32.xlu1 %v6335_v26, %s7273_s13  ;;  %6331 = vrot.lane.b32.xlu0 %v8831_v30, %s7272_s10 }
 0x1b1   : > { %6346 = vrot.lane.b32.xlu1 %v6345_v35, %s7273_s13  ;;  %6341 = vrot.lane.b32.xlu0 %v6340_v21, %s7273_s13 }
 0x1b5   : > { %6356 = vrot.lane.b32.xlu1 %v6355_v41, %s7274_s15  ;;  %6351 = vrot.lane.b32.xlu0 %v6350_v2, %s7274_s15 }
 0x1b9   : > { %6366 = vrot.lane.b32.xlu1 %v8698_v38, %s7275_s16  ;;  %6361 = vrot.lane.b32.xlu0 %v6360_v29, %s7274_s15  ;;  %v6410_v38 = vpack.i.bf16 %v14167_v6, %v8705_v42 }
 0x1bd   : > { %6376 = vrot.lane.b32.xlu1 %v8702_v31, %s7275_s16  ;;  %6371 = vrot.lane.b32.xlu0 %v8744_v62, %s7275_s16  ;;  %v6415_v31 = vpack.i.bf16 %v14151_v22, %v14166_v57 }
 0x1c1   : > { %6386 = vrot.lane.b32.xlu1 %v6355_v41, %s7276_s18  ;;  %6381 = vrot.lane.b32.xlu0 %v6350_v2, %s7276_s18  ;;  %v2793_v41 = vrot.slane %v14144_v48, 4 }
 0x1c5   : > { %6396 = vrot.lane.b32.xlu1 %v6350_v2, %s7277_s19  ;;  %6391 = vrot.lane.b32.xlu0 %v6360_v29, %s7276_s18  ;;  %v2791_v29 = vrot.slane %v14145_v54, 4 }
 0x1c9   : > { %2471 = vrot.lane.b32.xlu1 %v14144_v48, %s7277_s19  ;;  %6401 = vrot.lane.b32.xlu0 %v6400_v16, %s7277_s19 }
 0x1cd   : > { %6406 = vrot.lane.b32.xlu1 %v6405_v15, %s7273_s13  ;;  %2475 = vrot.lane.b32.xlu0 %v14152_v46, %s7277_s19 }
 0x1d1   : > { %6411 = vrot.lane.b32.xlu1 %v6410_v38, %s7273_s13  ;;  %2467 = vrot.lane.b32.xlu0 %v14145_v54, %s7277_s19 }
 0x1d5   : > { %6421 = vrot.lane.b32.xlu1 %v8815_v53, %s7274_s15  ;;  %6416 = vrot.lane.b32.xlu0 %v6415_v31, %s7273_s13 }
 0x1d9   : > { %6431 = vrot.lane.b32.xlu1 %v6430_v3, %s7274_s15  ;;  %6426 = vrot.lane.b32.xlu0 %v6425_v7, %s7274_s15 }
 0x1dd   : > { %6441 = vrot.lane.b32.xlu1 %v8808_v33, %s7275_s16  ;;  %6436 = vrot.lane.b32.xlu0 %v8783_v10, %s7275_s16 }
 0x1df   : > { %v8935_v60 = vpop.permute.xlu1 %6176  ;;  %v8937_v34 = vpop.permute.xlu0 %6171 }
 0x1e0   : > { %v14170_v0 = vunpack.i.h.bf16 %v8937_v34  ;;  %v14171_v9 = vunpack.i.l.bf16 %v8935_v60  ;;  %v14172_v59 = vunpack.i.l.bf16 %v8937_v34 }
 0x1e1   : > { %6451 = vrot.lane.b32.xlu1 %v8815_v53, %s7276_s18  ;;  %6446 = vrot.lane.b32.xlu0 %v8787_v8, %s7275_s16 }
 0x1e2   : > { %v2057_v47 = vsel %vm13869_vm0, %v14172_v59, %v14171_v9 }
 0x1e3   : > { %v8943_v12 = vpop.permute.xlu1 %6186  ;;  %v8945_v2 = vpop.permute.xlu0 %6181 }
 0x1e4   : > { %v6188_v24 = vunpack.i.l.bf16 %v8943_v12 }
 0x1e5   : > { %6461 = vrot.lane.b32.xlu1 %v6430_v3, %s7276_s18  ;;  %6456 = vrot.lane.b32.xlu0 %v6425_v7, %s7276_s18 }
 0x1e7   : > { %v8949_v16 = vpop.permute.xlu1 %6196  ;;  %v8951_v10 = vpop.permute.xlu0 %6191 }
 0x1e9   : > { %6471 = vrot.lane.b32.xlu1 %v6470_v43, %s7273_s13  ;;  %6466 = vrot.lane.b32.xlu0 %v6465_v18, %s7277_s19  ;;  %v6475_v43 = vpack.i.bf16 %v8779_v56, %v14141_v52  ;;  %v6480_v18 = vpack.i.bf16 %v8768_v51, %v8811_v39 }
 0x1eb   : > { %v8961_v8 = vpop.permute.xlu1 %6206  ;;  %v8963_v15 = vpop.permute.xlu0 %6201 }
 0x1ed   : > { %2491 = vrot.lane.b32.xlu1 %v8771_v25, %s7277_s19  ;;  %2487 = vrot.lane.b32.xlu0 %v14166_v57, %s7277_s19  ;;  %v6198_v25 = vunpack.i.l.bf16 %v8949_v16 }
 0x1ef   : > { %v8969_v53 = vpop.permute.xlu1 %6216  ;;  %v8971_v26 = vpop.permute.xlu0 %6211 }
 0x1f1   : > { %6476 = vrot.lane.b32.xlu1 %v6475_v43, %s7273_s13  ;;  %2483 = vrot.lane.b32.xlu0 %v14167_v6, %s7277_s19  ;;  %v6490_v43 = vpack.i.bf16 %v8790_v49, %v14140_v50 }
 0x1f3   : > { %v8980_v35 = vpop.permute.xlu1 %6226  ;;  %v8982_v21 = vpop.permute.xlu0 %6221 }
 0x1f4   : > { %v13770_v54 = vunpack.i.l.bf16 %v8980_v35 }
 0x1f5   : > { %6486 = vrot.lane.b32.xlu1 %v8827_v44, %s7274_s15  ;;  %6481 = vrot.lane.b32.xlu0 %v6480_v18, %s7273_s13  ;;  %v6179_v18 = vunpack.i.h.bf16 %v8935_v60 }
 0x1f7   : > { %v8991_v3 = vpop.permute.xlu1 %6236  ;;  %v8993_v7 = vpop.permute.xlu0 %6231  ;;  %v2058_v20 = vsel %vm13869_vm0, %v14170_v0, %v6179_v18  ;;  %v6189_v0 = vunpack.i.h.bf16 %v8943_v12  ;;  %v14179_v12 = vrot.slane %v8680_v19, 4 }
 0x1f8   : > { %v6233_v38 = vunpack.i.l.bf16 %v8993_v7 }
 0x1f9   : > { %6496 = vrot.lane.b32.xlu1 %v8670_v36, %s7275_s16  ;;  %6491 = vrot.lane.b32.xlu0 %v6490_v43, %s7274_s15  ;;  %v6238_v36 = vunpack.i.l.bf16 %v8991_v3 }
 0x1fa   : > { %v9015_v48 = vsel %vm478_vm1, %v13770_v54, %v6233_v38 }
 0x1fb   : > { %v9021_v43 = vpop.permute.xlu1 %6246  ;;  %v9023_v11 = vpop.permute.xlu0 %6241  ;;  %v14173_v54 = vrot.slane %v9015_v48, 7 }
 0x1fc   : > { %v6243_v31 = vunpack.i.l.bf16 %v9023_v11  ;;  %v14174_v23 = vunpack.i.l.bf16 %v9021_v43 }
 0x1fd   : > { %6506 = vrot.lane.b32.xlu1 %v8674_v58, %s7275_s16  ;;  %6501 = vrot.lane.b32.xlu0 %v6500_v40, %s7274_s15  ;;  %v3063_v13 = vsel %vm1832_vm3, %v2058_v20, %v14173_v54  ;;  %v9067_v54 = vsel %vm478_vm1, %v6233_v38, %v6238_v36 }
 0x1fe   : > { %v9052_v58 = vsel %vm478_vm1, %v6243_v31, %v14174_v23  ;;  %v5746_v28 = vpack.c.bf16 %v3063_v13, %v2057_v47  ;;  %v9063_v20 = vsel %vm478_vm1, %v6238_v36, %v6243_v31  ;;  %v6184_v23 = vunpack.i.h.bf16 %v8945_v2 }
 0x1ff   : > { %v13777_v59 = vrot.slane %v9052_v58, 7  ;;  %v9057_v9 = vpop.permute.xlu1 %6256  ;;  %v9059_v17 = vpop.permute.xlu0 %6251  ;;  %v14175_v47 = vunpack.i.h.bf16 %v8951_v10  ;;  %v14180_v36 = vrot.slane %v9063_v20, 7 }
 0x200   : > { %5747 = vmatprep.subr.bf16.mxu0 %v5746_v28  ;;  %v6193_v28 = vunpack.i.l.bf16 %v8951_v10  ;;  %v2054_v31 = vsel %vm13869_vm0, %v6184_v23, %v6189_v0 }
 0x201   : > { %v2052_v13 = vsel %vm13869_vm0, %v6189_v0, %v14175_v47  ;;  %6516 = vrot.lane.b32.xlu1 %v8831_v30, %s7275_s16  ;;  %6511 = vrot.lane.b32.xlu0 %v8827_v44, %s7276_s18  ;;  %v6183_v47 = vunpack.i.l.bf16 %v8945_v2  ;;  %v9103_v2 = vsel %vm1868_vm10, %v14179_v12, %v2791_v29  ;;  %v3065_v46 = vsel %vm1832_vm3, %v2054_v31, %v14180_v36 }
 0x202   : > { %v9082_v38 = vsel %vm1832_vm3, %v2052_v13, %v13777_v59  ;;  %v14178_v13 = vrot.slane %v8677_v63, 4  ;;  %v2056_v0 = vsel %vm13869_vm0, %v6179_v18, %v6184_v23  ;;  %v6199_v12 = vunpack.i.h.bf16 %v8949_v16 }
 0x203   : > { %14176 = vst [vmem:[#allocation32_spill] sm:$0xff] %v9082_v38  ;;  %v9088_v1 = vpop.permute.xlu1 %6266  ;;  %v9090_v30 = vpop.permute.xlu0 %6261  ;;  %v14183_v31 = vrot.slane %v9067_v54, 7  ;;  %v14185_v36 = vrot.slane %v8750_v37, 4  ;;  %v2053_v16 = vsel %vm13869_vm0, %v6183_v47, %v6188_v24  ;;  %v9151_v29 = vsel %vm13869_vm0, %v6193_v28, %v6198_v25 }
 0x204   : > { %14177 = vst [vmem:[#allocation33_spill] sm:$0xff] %v9088_v1  ;;  %v9098_v59 = vsel %vm1868_vm10, %v14178_v13, %v2793_v41  ;;  %v14182_v41 = vrot.slane %v8747_v14, 4  ;;  %14189 = vst [vmem:[#allocation36_spill] sm:$0xff] %v9151_v29  ;;  %v6249_v37 = vunpack.i.h.bf16 %v9021_v43 }
 0x205   : > { %6526 = vrot.lane.b32.xlu1 %v6500_v40, %s7276_s18  ;;  %6521 = vrot.lane.b32.xlu0 %v6520_v4, %s7276_s18  ;;  %v3064_v40 = vsel %vm1832_vm3, %v2056_v0, %v14183_v31  ;;  %v14184_v4 = vrot.slane %v14167_v6, 4  ;;  %v14188_v0 = vunpack.i.l.bf16 %v8935_v60  ;;  %v6224_v60 = vunpack.i.h.bf16 %v8982_v21 }
 0x206   : > { %v9117_v13 = vsel %vm1868_vm10, %v14182_v41, %v14181_v32  ;;  %v9134_v32 = vsel %vm13869_vm0, %v6188_v24, %v6193_v28  ;;  %v6203_v24 = vunpack.i.l.bf16 %v8963_v15  ;;  %v6219_v28 = vunpack.i.h.bf16 %v8969_v53 }
 0x207   : > { %v9129_v18 = vsel %vm1868_vm10, %v14185_v36, %v14184_v4  ;;  %14187 = vst [vmem:[#allocation35_spill] sm:$0xff] %v9134_v32  ;;  %v2055_v6 = vsel %vm13869_vm0, %v14188_v0, %v6183_v47  ;;  %v9143_v41 = vpop.permute.xlu1 %6276  ;;  %v9145_v31 = vpop.permute.xlu0 %6271  ;;  %v5766_v36 = vpack.c.bf16 %v3065_v46, %v2053_v16  ;;  %v14190_v0 = vpack.i.bf16 %v8705_v42, %v8790_v49 }
 0x208   : > { %14186 = vst [vmem:[#allocation34_spill] sm:$0xff] %v9129_v18  ;;  %v6278_v57 = vunpack.i.l.bf16 %v9143_v41  ;;  %v5768_v23 = vpack.c.bf16 %v3064_v40, %v2055_v6  ;;  %v14191_v16 = vunpack.i.l.bf16 %v8980_v35  ;;  %v14192_v6 = vunpack.i.h.bf16 %v8951_v10 }
 0x209   : > { %6536 = vrot.lane.b32.xlu1 %v14190_v0, %s7277_s19  ;;  %6531 = vrot.lane.b32.xlu0 %v8827_v44, %s7277_s19  ;;  %v6239_v0 = vunpack.i.h.bf16 %v8991_v3  ;;  %v6234_v44 = vunpack.i.h.bf16 %v8993_v7  ;;  %v14193_v46 = vunpack.i.l.bf16 %v9059_v17  ;;  %v14194_v47 = vunpack.i.l.bf16 %v9021_v43 }
 0x20a   : > { %5767 = vmatprep.subr.bf16.mxu1 %v5766_v36  ;;  %v9168_v40 = vsel %vm478_vm1, %v6278_v57, %v14191_v16  ;;  %v2050_v4 = vsel %vm13869_vm0, %v14192_v6, %v6199_v12  ;;  %v14195_v16 = vunpack.i.l.bf16 %v9145_v31  ;;  %v6208_v7 = vunpack.i.l.bf16 %v8961_v8 }
 0x20b   : > { %v9182_v36 = vsel %vm478_vm1, %v14194_v47, %v14193_v46  ;;  %5769 = vmatpush1.bf16.msra.mxu1 %v5768_v23  ;;  %v9190_v6 = vpop.permute.xlu1 %6286  ;;  %v9192_v3 = vpop.permute.xlu0 %6281  ;;  %v14197_v42 = vunpack.i.h.bf16 %v8963_v15  ;;  %v6223_v23 = vunpack.i.l.bf16 %v8982_v21  ;;  %v6218_v46 = vunpack.i.l.bf16 %v8969_v53 }
 0x20c   : > { %v9188_v10 = vsel %vm478_vm1, %v14195_v16, %v6278_v57  ;;  %v9205_v57 = vsel %vm13869_vm0, %v6198_v25, %v6203_v24  ;;  %v2040_v16 = vsel %vm13869_vm0, %v6219_v28, %v6224_v60  ;;  %v6214_v21 = vunpack.i.h.bf16 %v8971_v26 }
 0x20d   : > { %14196 = vst [vmem:[#allocation37_spill] sm:$0xff] %v9188_v10  ;;  %v9199_v49 = vsel %vm13869_vm0, %v6199_v12, %v14197_v42  ;;  %v13789_v47 = vrot.slane %v9188_v10, 7  ;;  %2459 = vrot.lane.b32.xlu1 %v14141_v52, %s7277_s19  ;;  %2463 = vrot.lane.b32.xlu0 %v14140_v50, %s7277_s19  ;;  %v14198_v25 = vunpack.i.h.bf16 %v8937_v34  ;;  %v6213_v52 = vunpack.i.l.bf16 %v8971_v26 }
 0x20e   : > { %v2122_v27 = vsel %vm478_vm1, %v6234_v44, %v6239_v0  ;;  %v14200_v18 = vrot.slane %v9168_v40, 7  ;;  %v13794_v26 = vunpack.i.l.bf16 %v9057_v9  ;;  %v13793_v10 = vunpack.i.h.bf16 %v8980_v35 }
 0x20f   : > { %v2060_v53 = vsel %vm13869_vm0, %v6224_v60, %v14198_v25  ;;  %v9224_v61 = vsel %vm1832_vm3, %v2040_v16, %v13789_v47  ;;  %v9230_v50 = vpop.permute.xlu1 %6296  ;;  %v9232_v12 = vpop.permute.xlu0 %6291  ;;  %v9239_v25 = vsel %vm13869_vm0, %v6218_v46, %v6223_v23  ;;  %v6244_v16 = vunpack.i.h.bf16 %v9023_v11 }
 0x210   : > { %14199 = vst [vmem:[#allocation38_spill] sm:$0xff] %v9224_v61  ;;  %v3062_v60 = vsel %vm1832_vm3, %v2060_v53, %v14200_v18  ;;  %14201 = vst [vmem:[#allocation39_spill] sm:$0xff] %v9239_v25  ;;  %v14202_v47 = vunpack.i.l.bf16 %v8937_v34  ;;  %v2560_v18 = vrot.slane %v2122_v27, 7  ;;  %v9257_v34 = vsel %vm13869_vm0, %v6203_v24, %v6208_v7 }
 0x211   : > { %6541 = vrot.lane.b32.xlu1 %v8744_v62, %s7273_s13  ;;  %2499 = vrot.lane.b32.xlu0 %v8811_v39, %s7277_s19  ;;  %v14205_v62 = vunpack.i.h.bf16 %v8961_v8  ;;  %v9274_v27 = vsel %vm13869_vm0, %v6208_v7, %v6213_v52  ;;  %v9280_v24 = vsel %vm478_vm1, %v13793_v10, %v6234_v44  ;;  %v14208_v7 = vunpack.i.l.bf16 %v9059_v17 }
 0x212   : > { %v2059_v42 = vsel %vm13869_vm0, %v6223_v23, %v14202_v47  ;;  %v14203_v23 = vrot.slane %v9182_v36, 7  ;;  %14206 = vst [vmem:[#allocation41_spill] sm:$0xff] %v9274_v27  ;;  %v9300_v43 = vsel %vm13869_vm0, %v6213_v52, %v6218_v46  ;;  %v2118_v52 = vsel %vm478_vm1, %v6244_v16, %v6249_v37 }
 0x213   : > { %v5748_v14 = vpack.c.bf16 %v3062_v60, %v2059_v42  ;;  %v9270_v42 = vsel %vm13869_vm0, %v14205_v62, %v6214_v21  ;;  %v9286_v60 = vpop.permute.xlu1 %6306  ;;  %v2120_v62 = vsel %vm478_vm1, %v6239_v0, %v6244_v16  ;;  %v9296_v44 = vsel %vm478_vm1, %v14208_v7, %v13794_v26  ;;  %14209 = vst [vmem:[#allocation42_spill] sm:$0xff] %v9300_v43 }
 0x214   : > { %v9262_v47 = vsel %vm1832_vm3, %v2050_v4, %v14203_v23  ;;  %v14207_v4 = vunpack.i.h.bf16 %v9059_v17  ;;  %v6302_v23 = vpop.permute.xlu0 %6301  ;;  %v2562_v26 = vrot.slane %v2120_v62, 7  ;;  %v14211_v32 = vunpack.i.l.bf16 %v9286_v60 }
 0x215   : > { %14204 = vst [vmem:[#allocation40_spill] sm:$0xff] %v9262_v47  ;;  %5749 = vmatpush1.bf16.msra.mxu0 %v5748_v14  ;;  %v9304_v14 = vsel %vm13869_vm0, %v6214_v21, %v6219_v28  ;;  %v6304_v11 = vunpack.i.h.bf16 %v6302_v23  ;;  %v6303_v10 = vunpack.i.l.bf16 %v6302_v23  ;;  %6551 = vrot.lane.b32.xlu1 %v8740_v45, %s7275_s16  ;;  %v14210_v28 = vrot.slane %v9067_v54, 7 }
 0x216   : > { %v2116_v53 = vsel %vm478_vm1, %v6249_v37, %v14207_v4  ;;  %v13797_v4 = vunpack.i.h.bf16 %v9286_v60  ;;  %6546 = vrot.lane.b32.xlu0 %v8740_v45, %s7274_s15  ;;  %v6259_v23 = vunpack.i.h.bf16 %v9057_v9  ;;  %v6298_v38 = vunpack.i.l.bf16 %v9230_v50 }
 0x217   : > { %v2566_v46 = vrot.slane %v2116_v53, 7  ;;  %v9318_v21 = vsel %vm1832_vm3, %v14210_v28, %v2560_v18  ;;  %v2181_v7 = vsel %vm601_vm2, %v6303_v10, %v14211_v32  ;;  %v9329_v37 = vpop.permute.xlu1 %6316  ;;  %v6268_v18 = vunpack.i.l.bf16 %v9088_v1 }
 0x218   : > { %v2182_v0 = vsel %vm601_vm2, %v6304_v11, %v13797_v4  ;;  %v9331_v16 = vpop.permute.xlu0 %6311  ;;  %v2627_v62 = vrot.slane %v2181_v7, 6  ;;  %v6299_v28 = vunpack.i.h.bf16 %v9230_v50  ;;  %v6294_v4 = vunpack.i.h.bf16 %v9232_v12 }
 0x219   : > { %v2643_v53 = vrot.slane %v2182_v0, 6  ;;  %v6293_v25 = vunpack.i.l.bf16 %v9232_v12  ;;  %2479 = vrot.lane.b32.xlu1 %v14151_v22, %s7277_s19  ;;  %v14212_v32 = vunpack.i.l.bf16 %v9145_v31  ;;  %v14214_v50 = vrot.slane %v9182_v36, 7 }
 0x21a   : > { %6556 = vrot.lane.b32.xlu0 %v8740_v45, %s7276_s18  ;;  %v6264_v45 = vunpack.i.h.bf16 %v9090_v30  ;;  %v2184_v61 = vsel %vm601_vm2, %v6299_v28, %v6304_v11  ;;  %v2564_v36 = vrot.slane %v2118_v52, 7  ;;  %v14217_v22 = vunpack.i.h.bf16 %v9059_v17 }
 0x21b   : > { %v9347_v0 = vsel %vm478_vm1, %v6268_v18, %v14212_v32  ;;  %v2567_v54 = vsel %vm1832_vm3, %v14214_v50, %v2566_v46  ;;  %v9355_v12 = vsel %vm1844_vm6, %v2627_v62, %v2643_v53  ;;  %v9363_v32 = vsel %vm601_vm2, %v6298_v38, %v6303_v10  ;;  %v9365_v39 = vpop.permute.xlu1 %6326 }
 0x21c   : > { %14213 = vst [vmem:[#allocation43_spill] sm:$0xff] %v9347_v0  ;;  %14215 = vst [vmem:[#allocation44_spill] sm:$0xff] %v9355_v12  ;;  %v9367_v7 = vpop.permute.xlu0 %6321  ;;  %v6263_v46 = vunpack.i.l.bf16 %v9090_v30  ;;  %v13804_v53 = vunpack.i.h.bf16 %v9190_v6  ;;  %v13805_v50 = vunpack.i.l.bf16 %v9190_v6  ;;  %v9376_v11 = vsel %vm478_vm1, %v14217_v22, %v6259_v23 }
 0x21d   : > { %14216 = vst [vmem:[#allocation45_spill] sm:$0xff] %v9367_v7  ;;  %v2186_v29 = vsel %vm601_vm2, %v6294_v4, %v6299_v28  ;;  %v2185_v52 = vsel %vm601_vm2, %v6293_v25, %v6298_v38  ;;  %6566 = vrot.lane.b32.xlu1 %v8804_v5, %s7274_s15  ;;  %v2641_v30 = vrot.slane %v2184_v61, 6  ;;  %v2626_v28 = vrot.slane %v9363_v32, 6 }
 0x21e   : > { %6561 = vrot.lane.b32.xlu0 %v8808_v33, %s7273_s13  ;;  %v2188_v17 = vsel %vm601_vm2, %v13804_v53, %v6294_v4  ;;  %v2187_v22 = vsel %vm601_vm2, %v13805_v50, %v6293_v25  ;;  %v14218_v38 = vunpack.i.h.bf16 %v9088_v1  ;;  %v9404_v33 = vsel %vm478_vm1, %v6259_v23, %v6264_v45 }
 0x21f   : > { %v9406_v47 = vpop.permute.xlu1 %6336  ;;  %v14219_v53 = vrot.slane %v9063_v20, 7  ;;  %v14220_v25 = vrot.slane %v9296_v44, 7  ;;  %v14221_v23 = vunpack.i.l.bf16 %v9057_v9  ;;  %v2639_v50 = vrot.slane %v2186_v29, 6 }
 0x220   : > { %v9400_v10 = vsel %vm478_vm1, %v6264_v45, %v14218_v38  ;;  %v9408_v4 = vpop.permute.xlu0 %6331  ;;  %v9421_v38 = vsel %vm478_vm1, %v6263_v46, %v6268_v18  ;;  %v2625_v20 = vrot.slane %v2185_v52, 6  ;;  %v2637_v1 = vrot.slane %v2188_v17, 6 }
 0x221   : > { %v2563_v61 = vsel %vm1832_vm3, %v14219_v53, %v2562_v26  ;;  %v9417_v32 = vsel %vm1832_vm3, %v9199_v49, %v14220_v25  ;;  %v9427_v45 = vsel %vm478_vm1, %v14221_v23, %v6263_v46  ;;  %v2624_v26 = vrot.slane %v2187_v22, 6  ;;  %6576 = vrot.lane.b32.xlu1 %v8804_v5, %s7276_s18 }
 0x222   : > { %v13807_v53 = vunpack.i.h.bf16 %v9406_v47  ;;  %v6338_v12 = vunpack.i.l.bf16 %v9406_v47  ;;  %6571 = vrot.lane.b32.xlu0 %v8804_v5, %s7275_s16  ;;  %v9436_v49 = vsel %vm1844_vm6, %v2567_v54, %v2627_v62  ;;  %v14222_v9 = vrot.slane %v9052_v58, 7 }
 0x223   : > { %v9442_v18 = vsel %vm1844_vm6, %v2626_v28, %v2641_v30  ;;  %v14223_v46 = vrot.slane %v9347_v0, 7  ;;  %v9457_v62 = vpop.permute.xlu1 %6346  ;;  %v13809_v22 = vunpack.i.h.bf16 %v9367_v7  ;;  %v3076_v25 = vsel %vm1844_vm6, %v2563_v61, %v2625_v20 }
 0x224   : > { %v2565_v29 = vsel %vm1832_vm3, %v14222_v9, %v2564_v36  ;;  %v2251_v58 = vsel %vm724_vm4, %v6338_v12, %v13807_v53  ;;  %v9459_v36 = vpop.permute.xlu0 %6341  ;;  %v3075_v53 = vsel %vm1844_vm6, %v9318_v21, %v2624_v26  ;;  %v14226_v5 = vunpack.i.h.bf16 %v9457_v62 }
 0x225   : > { %v9448_v52 = vsel %vm1832_vm3, %v9304_v14, %v14223_v46  ;;  %v2702_v30 = vrot.slane %v2251_v58, 5  ;;  %v2640_v14 = vsel %vm1844_vm6, %v2625_v20, %v2639_v50  ;;  %2495 = vrot.lane.b32.xlu1 %v8768_v51, %s7277_s19  ;;  %v2638_v46 = vsel %vm1844_vm6, %v2624_v26, %v2637_v1 }
 0x226   : > { %14224 = vst [vmem:[#allocation46_spill] sm:$0xff] %v9448_v52  ;;  %2493 = vrot.lane.b32.xlu0 %v8779_v56, %s7277_s19  ;;  %v13810_v58 = vunpack.i.h.bf16 %v9329_v37  ;;  %v6344_v50 = vunpack.i.h.bf16 %v9459_v36  ;;  %v13812_v61 = vunpack.i.l.bf16 %v9459_v36  ;;  %v14225_v26 = vunpack.i.l.bf16 %v9457_v62 }
 0x227   : > { %v3087_v20 = vsel %vm1856_vm8, %v2640_v14, %v2702_v30  ;;  %v9480_v23 = vpop.permute.xlu1 %6356  ;;  %v9508_v56 = vsel %vm1844_vm6, %v2565_v29, %v2626_v28  ;;  %v14230_v28 = vrot.slane %v9421_v38, 7 }
 0x228   : > { %v9482_v1 = vpop.permute.xlu0 %6351  ;;  %v5770_v9 = vpack.c.bf16 %v3087_v20, %v3076_v25  ;;  %v9490_v21 = vsel %vm601_vm2, %v13810_v58, %v13809_v22  ;;  %v2252_v14 = vsel %vm724_vm4, %v6344_v50, %v14225_v26  ;;  %v2254_v17 = vsel %vm724_vm4, %v14226_v5, %v6344_v50  ;;  %14227 = vst [vmem:[#allocation47_spill] sm:$0xff] %v9508_v56 }
 0x229   : > { %v2253_v25 = vsel %vm724_vm4, %v13812_v61, %v6338_v12  ;;  %v2714_v20 = vrot.slane %v2254_v17, 5  ;;  %v2716_v54 = vrot.slane %v2252_v14, 5  ;;  %v13821_v22 = vunpack.i.l.bf16 %v9480_v23 }
 0x22a   : > { %v2701_v0 = vrot.slane %v2253_v25, 5  ;;  %5771 = vmatprep.subr.bf16.mxu1 %v5770_v9  ;;  %v13818_v58 = vunpack.i.h.bf16 %v9482_v1  ;;  %v6353_v26 = vunpack.i.l.bf16 %v9482_v1  ;;  %v14228_v50 = vunpack.i.l.bf16 %v9367_v7 }
 0x22b   : > { %v14229_v12 = vunpack.i.l.bf16 %v9329_v37  ;;  %v6359_v9 = vunpack.i.h.bf16 %v9480_v23  ;;  %v6367_v14 = vpop.permute.xlu1 %6366  ;;  %v9528_v29 = vsel %vm1832_vm3, %v9270_v42, %v14230_v28 }
 0x22c   : > { %v9521_v25 = vpop.permute.xlu0 %6361  ;;  %v3086_v61 = vsel %vm1856_vm8, %v2638_v46, %v2701_v0  ;;  %14231 = vst [vmem:[#allocation48_spill] sm:$0xff] %v9528_v29  ;;  %v2315_v5 = vsel %vm847_vm5, %v6353_v26, %v13818_v58  ;;  %v2715_v46 = vsel %vm1856_vm8, %v2701_v0, %v2714_v20  ;;  %v6369_v28 = vunpack.i.h.bf16 %v6367_v14 }
 0x22d   : > { %v9518_v17 = vsel %vm601_vm2, %v14229_v12, %v14228_v50  ;;  %v2317_v50 = vsel %vm847_vm5, %v13821_v22, %v6353_v26  ;;  %v2717_v12 = vsel %vm1856_vm8, %v2702_v30, %v2716_v54  ;;  %v2856_v52 = vrot.slane %v2315_v5, 3 }
 0x22e   : > { %v2855_v43 = vrot.slane %v2317_v50, 3  ;;  %v13820_v7 = vunpack.i.h.bf16 %v9521_v25  ;;  %v13819_v42 = vunpack.i.l.bf16 %v9521_v25  ;;  %v6368_v51 = vunpack.i.l.bf16 %v6367_v14 }
 0x22f   : > { %v5772_v56 = vpack.c.bf16 %v3086_v61, %v3075_v53  ;;  %v9552_v54 = vpop.permute.xlu1 %6376  ;;  %v3109_v53 = vsel %vm1880_vm12, %v9098_v59, %v2856_v52  ;;  %v14232_v14 = vrot.slane %v8677_v63, 4 }
 0x230   : > { %v2318_v26 = vsel %vm847_vm5, %v13820_v7, %v6359_v9  ;;  %v2316_v0 = vsel %vm847_vm5, %v6359_v9, %v13819_v42  ;;  %v9554_v30 = vpop.permute.xlu0 %6371  ;;  %v3108_v61 = vsel %vm1880_vm12, %v9103_v2, %v2855_v43  ;;  %v13825_v5 = vunpack.i.l.bf16 %v9552_v54 }
 0x231   : > { %5773 = vmatpush1.bf16.msra.mxu1 %v5772_v56  ;;  %v3098_v50 = vsel %vm1868_vm10, %v2717_v12, %v14232_v14  ;;  %v14233_v9 = vrot.slane %v8680_v19, 4  ;;  %v13822_v42 = vunpack.i.h.bf16 %v9554_v30  ;;  %v13823_v59 = vunpack.i.l.bf16 %v9554_v30 }
 0x232   : > { %v5774_v7 = vpack.c.bf16 %v3109_v53, %v3098_v50  ;;  %v2868_v2 = vrot.slane %v2318_v26, 3  ;;  %v2870_v56 = vrot.slane %v2316_v0, 3  ;;  %v2383_v20 = vsel %vm970_vm7, %v13825_v5, %v6368_v51 }
 0x233   : > { %v3097_v58 = vsel %vm1868_vm10, %v2715_v46, %v14233_v9  ;;  %v14234_v63 = vunpack.i.h.bf16 %v9552_v54  ;;  %v2932_v12 = vrot.slane %v2383_v20, 2  ;;  %v2382_v53 = vsel %vm970_vm7, %v6369_v28, %v13822_v42  ;;  %v9586_v26 = vpop.permute.xlu1 %6386 }
 0x234   : > { %v5776_v22 = vpack.c.bf16 %v3108_v61, %v3097_v58  ;;  %v2381_v58 = vsel %vm970_vm7, %v6368_v51, %v13823_v59  ;;  %5775 = vmatprep.subr.bf16.mxu1 %v5774_v7  ;;  %v9588_v0 = vpop.permute.xlu0 %6381  ;;  %v6313_v61 = vunpack.i.l.bf16 %v9331_v16  ;;  %v2947_v14 = vrot.slane %v2382_v53, 2 }
 0x235   : > { %v2384_v19 = vsel %vm970_vm7, %v14234_v63, %v6369_v28  ;;  %v2933_v20 = vrot.slane %v2381_v58, 2  ;;  %v13826_v50 = vunpack.i.l.bf16 %v9586_v26  ;;  %v2649_v9 = vrot.slane %v9490_v21, 6 }
 0x236   : > { %v2945_v46 = vrot.slane %v2384_v19, 2  ;;  %5777 = vmatpush1.bf16.msra.mxu1 %v5776_v22  ;;  %v2630_v28 = vrot.slane %v9518_v17, 6  ;;  %v13824_v63 = vunpack.i.h.bf16 %v9588_v0  ;;  %v6383_v51 = vunpack.i.l.bf16 %v9588_v0 }
 0x237   : > { %v6389_v7 = vunpack.i.h.bf16 %v9586_v26  ;;  %v2871_v19 = vsel %vm1880_vm12, %v2856_v52, %v2870_v56  ;;  %v2869_v42 = vsel %vm1880_vm12, %v2855_v43, %v2868_v2  ;;  %v9608_v17 = vpop.permute.xlu1 %6396  ;;  %v14235_v43 = vrot.slane %v9400_v10, 7 }
 0x238   : > { %v2946_v53 = vsel %vm1892_vm13, %v2932_v12, %v2945_v46  ;;  %v2447_v22 = vsel %vm1093_vm9, %v6383_v51, %v13824_v63  ;;  %v2449_v21 = vsel %vm1093_vm9, %v13826_v50, %v6383_v51  ;;  %v9610_v58 = vpop.permute.xlu0 %6391  ;;  %v3119_v52 = vsel %vm1892_vm13, %v2869_v42, %v2932_v12 }
 0x239   : > { %v14236_v2 = vrot.slane %v9421_v38, 7  ;;  %v3009_v46 = vrot.slane %v2449_v21, 1  ;;  %v3010_v59 = vrot.slane %v2447_v22, 1  ;;  %v2948_v63 = vsel %vm1892_vm13, %v2933_v20, %v2947_v14 }
 0x23a   : > { %v3120_v5 = vsel %vm1892_vm13, %v2871_v19, %v2933_v20  ;;  %v13828_v51 = vunpack.i.h.bf16 %v9610_v58  ;;  %v13829_v50 = vunpack.i.l.bf16 %v9610_v58  ;;  %v9623_v27 = vsel %vm1844_vm6, %v2630_v28, %v2649_v9 }
 0x23b   : > { %v2573_v56 = vsel %vm1832_vm3, %v14236_v2, %v14235_v43  ;;  %v6398_v38 = vunpack.i.l.bf16 %v9608_v17  ;;  %v3131_v12 = vsel %vm1904_vm14, %v2948_v63, %v3010_v59  ;;  %v3130_v14 = vsel %vm1904_vm14, %v2946_v53, %v3009_v46 }
 0x23c   : > { %v9626_v42 = vsel %vm1844_vm6, %v2573_v56, %v2630_v28  ;;  %v2450_v20 = vsel %vm1093_vm9, %v13828_v51, %v6389_v7  ;;  %v2448_v9 = vsel %vm1093_vm9, %v6389_v7, %v13829_v50  ;;  %v2472_v28 = vpop.permute.xlu1 %2471  ;;  %v9640_v19 = vpop.permute.xlu0 %6401  ;;  %v5778_v22 = vpack.c.bf16 %v3131_v12, %v3120_v5 }
 0x23d   : > { %14237 = vst [vmem:[#allocation49_spill] sm:$0xff] %v9626_v42  ;;  %v5780_v21 = vpack.c.bf16 %v3130_v14, %v3119_v52  ;;  %v14238_v43 = vunpack.i.h.bf16 %v9329_v37  ;;  %v14239_v63 = vunpack.i.h.bf16 %v9331_v16  ;;  %v3022_v2 = vrot.slane %v2450_v20, 1 }
 0x23e   : > { %v3024_v56 = vrot.slane %v2448_v9, 1  ;;  %v13834_v51 = vunpack.i.l.bf16 %v9640_v19  ;;  %v2552_v10 = vrot.slane %v9427_v45, 7  ;;  %v13836_v7 = vunpack.i.h.bf16 %v9143_v41  ;;  %5779 = vmatprep.subr.bf16.mxu1 %v5778_v22 }
 0x23f   : > { %v2178_v53 = vsel %vm601_vm2, %v14239_v63, %v14238_v43  ;;  %v14240_v50 = vmov %v14239_v63  ;;  %v14241_v5 = vunpack.i.h.bf16 %v9286_v60  ;;  %v14242_v12 = vunpack.i.l.bf16 %v9329_v37  ;;  %5781 = vmatpush1.bf16.msra.mxu1 %v5780_v21 }
 0x240   : > { %v14243_v20 = vunpack.i.h.bf16 %v9608_v17  ;;  %v3025_v9 = vsel %vm1904_vm14, %v3010_v59, %v3024_v56  ;;  %v2515_v16 = vsel %vm1216_vm11, %v13834_v51, %v6398_v38  ;;  %v2647_v37 = vrot.slane %v2178_v53, 6  ;;  %v9675_v21 = vpop.permute.xlu1 %6406  ;;  %v9677_v63 = vpop.permute.xlu0 %2475 }
 0x241   : > { %v2180_v52 = vsel %vm601_vm2, %v14241_v5, %v14240_v50  ;;  %v2177_v14 = vsel %vm601_vm2, %v6313_v61, %v14242_v12  ;;  %v3023_v50 = vsel %vm1904_vm14, %v3009_v46, %v3022_v2  ;;  %v14244_v43 = vunpack.i.l.bf16 %v9286_v60  ;;  %14245 = vst [vmem:[#allocation50_spill] sm:$0xff] %v9677_v63 }
 0x242   : > { %v2513_v45 = vsel %vm1216_vm11, %v6398_v38, %v14243_v20  ;;  %v5784_v12 = vpack.c.bf16 %v2515_v16, %v3023_v50  ;;  %v2629_v59 = vrot.slane %v2177_v14, 6  ;;  %v13830_v56 = vunpack.i.h.bf16 %v9675_v21 }
 0x243   : > { %v2179_v22 = vsel %vm601_vm2, %v14244_v43, %v6313_v61  ;;  %v5782_v5 = vpack.c.bf16 %v2513_v45, %v3025_v9  ;;  %v6408_v20 = vunpack.i.l.bf16 %v9675_v21  ;;  %v2514_v46 = vsel %vm1216_vm11, %v2472_v28, %v9677_v63 }
 0x244   : > { %v2568_v60 = vrot.slane %v9376_v11, 7  ;;  %v14246_v61 = vunpack.i.h.bf16 %v8961_v8  ;;  %v14247_v53 = vunpack.i.h.bf16 %v8963_v15  ;;  %v14248_v14 = vrot.slane %v9280_v24, 7 }
 0x245   : > { %5783 = vmatprep.subr.bf16.mxu1 %v5782_v5  ;;  %v14249_v45 = vrot.slane %v9015_v48, 7  ;;  %v14250_v16 = vunpack.i.h.bf16 %v8980_v35  ;;  %v9709_v8 = vsel %vm724_vm4, %v6408_v20, %v13830_v56  ;;  %v5808_v48 = vpack.c.bf16 %v9417_v32, %v9205_v57  ;;  %v9717_v5 = vpop.permute.xlu1 %6411  ;;  %v9728_v57 = vld [vmem:[%s13724_s2] sm:$0xff] }
 0x246   : > { %v2046_v2 = vsel %vm13869_vm0, %v14247_v53, %v14246_v61  ;;  %5785 = vmatpush1.bf16.msra.mxu1 %v5784_v12  ;;  %v13837_v24 = vunpack.i.h.bf16 %v9192_v3  ;;  %v2645_v35 = vrot.slane %v2180_v52, 6  ;;  %v2628_v50 = vrot.slane %v2179_v22, 6  ;;  %v9719_v61 = vpop.permute.xlu0 %2467 }
 0x247   : > { %v9697_v9 = vsel %vm1832_vm3, %v14249_v45, %v14248_v14  ;;  %v2126_v11 = vsel %vm478_vm1, %v13836_v7, %v14250_v16  ;;  %v3069_v15 = vsel %vm1832_vm3, %v2046_v2, %v2552_v10  ;;  %v2706_v43 = vrot.slane %v9709_v8, 5  ;;  %5658 = vmatprep.subr.msk.mxu1 %vm1832_vm3, %v2514_v46  ;;  %v14258_v7 = vld [vmem:[#allocation9_spill] sm:$0xff] }
 0x248   : > { %v13831_v53 = vunpack.i.l.bf16 %v9717_v5  ;;  %v2516_v12 = vsel %vm1216_vm11, %v9719_v61, %v2472_v28  ;;  %v14251_v32 = vrot.slane %v9404_v33, 7  ;;  %v2648_v22 = vsel %vm1844_vm6, %v2629_v59, %v2647_v37 }
 0x249   : > { %v6283_v46 = vunpack.i.l.bf16 %v9192_v3  ;;  %v5806_v2 = vpack.c.bf16 %v3069_v15, %v9257_v34  ;;  %v3091_v28 = vsel %vm1856_vm8, %v2648_v22, %v2706_v43  ;;  %v2556_v45 = vrot.slane %v2126_v11, 7 }
 0x24a   : > { %v2571_v52 = vsel %vm1832_vm3, %v2552_v10, %v14251_v32  ;;  %v2245_v33 = vsel %vm724_vm4, %v13831_v53, %v6408_v20  ;;  %5659 = vmatpush1.msk.msra.mxu1 %vm1832_vm3, %v2516_v12  ;;  %v14252_v37 = vrot.slane %v9296_v44, 7  ;;  %v14253_v34 = vunpack.i.h.bf16 %v9190_v6  ;;  %v9757_v20 = vpop.permute.xlu1 %6421  ;;  %v9759_v12 = vpop.permute.xlu0 %6416 }
 0x24b   : > { %v3080_v14 = vsel %vm1844_vm6, %v2571_v52, %v2629_v59  ;;  %v6414_v11 = vunpack.i.h.bf16 %v9717_v5  ;;  %v2705_v15 = vrot.slane %v2245_v33, 5  ;;  %5807 = vmatprep.subr.bf16.mxu1 %v5806_v2  ;;  %14254 = vst [vmem:[#allocation51_spill] sm:$0xff] %v9757_v20  ;;  %5660 = vmatmul.mubr.msk.f32.vlgmr.msra.gmra.mrb[0].mxu1 %vm3160_vm15, %v9728_v57  ;;  %v2646_v44 = vsel %vm1844_vm6, %v2628_v50, %v2645_v35  ;;  %v9772_v2 = vld [vmem:[%s13724_s2 + $0x8] sm:$0xff] }
 0x24c   : > { %v5810_v10 = vpack.c.bf16 %v3091_v28, %v3080_v14  ;;  %v2569_v16 = vsel %vm1832_vm3, %v14252_v37, %v2568_v60  ;;  %v9754_v59 = vsel %vm601_vm2, %v13837_v24, %v14253_v34  ;;  %v13832_v60 = vunpack.i.h.bf16 %v9757_v20  ;;  %5809 = vmatpush1.bf16.msra.mxu1 %v5808_v48  ;;  %v3143_v37 = vld [vmem:[%s13725_s3 + $0x8] sm:$0xff] }
 0x24d   : > { %v6423_v32 = vunpack.i.l.bf16 %v9757_v20  ;;  %v13833_v52 = vunpack.i.h.bf16 %v9759_v12  ;;  %v13835_v22 = vunpack.i.l.bf16 %v9759_v12  ;;  %v14255_v14 = vmov 0.0  }
 0x24e   : > { %3356 = vmatprep.mubr.f32.mxu1 %v14255_v14  ;;  %v14256_v28 = vunpack.i.l.bf16 %v9190_v6  ;;  %5811 = vmatprep.subr.bf16.mxu1 %v5810_v10  ;;  %v3079_v33 = vsel %vm1844_vm6, %v2569_v16, %v2628_v50  ;;  %v3090_v48 = vsel %vm1856_vm8, %v2646_v44, %v2705_v15  ;;  %v7280_v16 = vmov 0   ;;  %v9802_v53 = vpop.permute.xlu1 %6431 }
 0x24f   : > { %v9791_v6 = vsel %vm847_vm5, %v6423_v32, %v13832_v60  ;;  %v2246_v34 = vsel %vm724_vm4, %v13833_v52, %v6414_v11  ;;  %v2244_v50 = vsel %vm724_vm4, %v6414_v11, %v13835_v22  ;;  %v5812_v10 = vpack.c.bf16 %v3090_v48, %v3079_v33  ;;  %6581 = vset.pattern.permute.xlu1 %v7280_v16  ;;  %v9804_v60 = vpop.permute.xlu0 %6426  ;;  %v3142_v11 = vld [vmem:[%s13725_s3] sm:$0xff] }
 0x250   : > { %v9780_v35 = vsel %vm601_vm2, %v6283_v46, %v14256_v28  ;;  %v13838_v44 = vrot.slane %v9791_v6, 3  ;;  %v2722_v28 = vrot.slane %v2246_v34, 5  ;;  %v2724_v56 = vrot.slane %v2244_v50, 5  ;;  %5661 = vmatmul.mubr.msk.f32.gmra.mrb[2].mxu1 %vm3160_vm15, %v9772_v2  ;;  %3152 = vperm.xlu1 %6581, %v3143_v37  }
 0x251   : > { %v14257_v52 = vrot.slane %v9168_v40, 7  ;;  %v2635_v33 = vrot.slane %v9754_v59, 6  ;;  %v13839_v48 = vunpack.i.l.bf16 %v9802_v53  ;;  %v6429_v34 = vunpack.i.h.bf16 %v9804_v60  ;;  %5813 = vmatpush1.bf16.msra.mxu1 %v5812_v10  ;;  %3362 = vmatprep.mubr.f32.mxu1 %v14255_v14  ;;  %v9824_v40 = vld [vmem:[%s13724_s2 + $0x10] sm:$0xf] }
 0x252   : > { %v13840_v50 = vunpack.i.l.bf16 %v9804_v60  ;;  %v13842_v59 = vunpack.i.l.bf16 %v9408_v4  ;;  %v2725_v37 = vsel %vm1856_vm8, %v2706_v43, %v2724_v56  ;;  %v3113_v10 = vsel %vm1880_vm12, %v9117_v13, %v13838_v44  ;;  %6580 = vset.pattern.permute.xlu0 %v7280_v16  ;;  %v9852_v16 = vpop.permute.xlu1 %6441 }
 0x253   : > { %v9811_v51 = vsel %vm1832_vm3, %v14257_v52, %v2556_v45  ;;  %v3144_v45 = vld [vmem:[%s13725_s3 + $0x10] sm:$0xf]  ;;  %v14259_v24 = vrot.slane %v14258_v7, 4  ;;  %v2723_v8 = vsel %vm1856_vm8, %v2705_v15, %v2722_v28  ;;  %3147 = vperm.xlu0 %6580, %v3142_v11   ;;  %v13844_v56 = vunpack.i.h.bf16 %v9408_v4  ;;  %14260 = vst [vmem:[#allocation9_spill] sm:$0xff] %v9852_v16  ;;  %v6437_v44 = vpop.permute.xlu0 %6436 }
 0x254   : > { %v2309_v38 = vsel %vm847_vm5, %v13840_v50, %v6423_v32  ;;  %v2308_v13 = vsel %vm847_vm5, %v6429_v34, %v13839_v48  ;;  %5662 = vmatmul.mubr.msk.f32.gmra.mrb[4].mxu1 %vm3160_vm15, %v9824_v40  ;;  %3157 = vperm.xlu1 %6581, %v3144_v45   ;;  %v13841_v7 = vunpack.i.h.bf16 %v9852_v16  ;;  %v6439_v15 = vunpack.i.h.bf16 %v6437_v44  ;;  %v14262_v45 = vld [vmem:[#allocation18_spill] sm:$0xff] }
 0x255   : > { %v3102_v52 = vsel %vm1868_vm10, %v2725_v37, %v14259_v24  ;;  %v2859_v43 = vrot.slane %v2309_v38, 3  ;;  %v13843_v24 = vunpack.i.l.bf16 %v9852_v16  ;;  %v6438_v32 = vunpack.i.l.bf16 %v6437_v44  ;;  %3516 = vmatprep.mubr.f32.mxu1 %v14255_v14  ;;  %v14264_v37 = vld [vmem:[#allocation34_spill] sm:$0xff] }
 0x256   : > { %v5814_v22 = vpack.c.bf16 %v3113_v10, %v3102_v52  ;;  %v9865_v38 = vsel %vm601_vm2, %v13842_v59, %v6283_v46  ;;  %v14261_v28 = vunpack.i.h.bf16 %v9802_v53  ;;  %v14263_v52 = vrot.slane %v14262_v45, 4 }
 0x257   : > { %v3112_v10 = vsel %vm1880_vm12, %v14264_v37, %v2859_v43  ;;  %v2878_v48 = vrot.slane %v2308_v13, 3  ;;  %v2374_v46 = vsel %vm970_vm7, %v6439_v15, %v13841_v7  ;;  %v2373_v50 = vsel %vm970_vm7, %v6438_v32, %v13843_v24 }
 0x258   : > { %v2310_v11 = vsel %vm847_vm5, %v14261_v28, %v6429_v34  ;;  %5815 = vmatprep.subr.bf16.mxu1 %v5814_v22  ;;  %v3101_v44 = vsel %vm1868_vm10, %v2723_v8, %v14263_v52  ;;  %v2955_v28 = vrot.slane %v2374_v46, 2  ;;  %v2937_v45 = vrot.slane %v2373_v50, 2  ;;  %v9885_v8 = vpop.permute.xlu1 %6451  ;;  %v9887_v52 = vpop.permute.xlu0 %6446 }
 0x259   : > { %v5816_v34 = vpack.c.bf16 %v3112_v10, %v3101_v44  ;;  %14265 = vst [vmem:[#allocation18_spill] sm:$0xff] %v9885_v8  ;;  %v14266_v13 = vrot.slane %v9780_v35, 6  ;;  %v13846_v7 = vunpack.i.h.bf16 %v9885_v8  ;;  %v6453_v59 = vunpack.i.l.bf16 %v9885_v8 }
 0x25a   : > { %v13851_v24 = vunpack.i.h.bf16 %v9887_v52  ;;  %v13848_v44 = vunpack.i.l.bf16 %v9887_v52  ;;  %v14267_v10 = vunpack.i.h.bf16 %v9192_v3  ;;  %v2956_v8 = vsel %vm1892_vm13, %v2937_v45, %v2955_v28 }
 0x25b   : > { %v9892_v37 = vsel %vm1844_vm6, %v14266_v13, %v2635_v33  ;;  %5817 = vmatpush1.bf16.msra.mxu1 %v5816_v34  ;;  %v2622_v33 = vrot.slane %v9865_v38, 6  ;;  %v2876_v13 = vrot.slane %v2310_v11, 3  ;;  %v2439_v22 = vsel %vm1093_vm9, %v6453_v59, %v13846_v7 }
 0x25c   : > { %v2192_v46 = vsel %vm601_vm2, %v13844_v56, %v14267_v10  ;;  %v2375_v34 = vsel %vm970_vm7, %v13848_v44, %v6438_v32  ;;  %v2376_v3 = vsel %vm970_vm7, %v13851_v24, %v6439_v15  ;;  %v14268_v10 = vrot.slane %v9791_v6, 3  ;;  %v9921_v29 = vpop.permute.xlu1 %6461  ;;  %v9923_v7 = vpop.permute.xlu0 %6456 }
 0x25d   : > { %v3014_v11 = vrot.slane %v2439_v22, 1  ;;  %v2936_v50 = vrot.slane %v2375_v34, 2  ;;  %v2953_v56 = vrot.slane %v2376_v3, 2  ;;  %v13855_v32 = vunpack.i.h.bf16 %v9921_v29 }
 0x25e   : > { %v2879_v38 = vsel %vm1880_vm12, %v14268_v10, %v2878_v48  ;;  %v13852_v44 = vunpack.i.l.bf16 %v9921_v29  ;;  %v6459_v16 = vunpack.i.h.bf16 %v9923_v7  ;;  %v13856_v15 = vunpack.i.l.bf16 %v9923_v7 }
 0x25f   : > { %v2633_v6 = vrot.slane %v2192_v46, 6  ;;  %v3124_v48 = vsel %vm1892_vm13, %v2879_v38, %v2937_v45  ;;  %v3135_v22 = vsel %vm1904_vm14, %v2956_v8, %v3014_v11  ;;  %v2877_v34 = vsel %vm1880_vm12, %v2859_v43, %v2876_v13 }
 0x260   : > { %v2440_v28 = vsel %vm1093_vm9, %v6459_v16, %v13852_v44  ;;  %v2442_v3 = vsel %vm1093_vm9, %v13855_v32, %v6459_v16  ;;  %v2441_v46 = vsel %vm1093_vm9, %v13856_v15, %v6453_v59  ;;  %v5818_v45 = vpack.c.bf16 %v3135_v22, %v3124_v48  ;;  %v6472_v43 = vpop.permute.xlu1 %6471  ;;  %v9945_v13 = vpop.permute.xlu0 %6466 }
 0x261   : > { %v3030_v10 = vrot.slane %v2442_v3, 1  ;;  %v3032_v8 = vrot.slane %v2440_v28, 1  ;;  %v3013_v38 = vrot.slane %v2441_v46, 1  ;;  %v2954_v24 = vsel %vm1892_vm13, %v2936_v50, %v2953_v56 }
 0x262   : > { %v6474_v44 = vunpack.i.h.bf16 %v6472_v43  ;;  %v6473_v20 = vunpack.i.l.bf16 %v6472_v43  ;;  %v13859_v63 = vunpack.i.h.bf16 %v9945_v13  ;;  %v13857_v16 = vunpack.i.l.bf16 %v9945_v13  ;;  %5819 = vmatprep.subr.bf16.mxu1 %v5818_v45 }
 0x263   : > { %v6404_v32 = vunpack.i.h.bf16 %v9640_v19  ;;  %v3123_v59 = vsel %vm1892_vm13, %v2877_v34, %v2936_v50  ;;  %v3134_v48 = vsel %vm1904_vm14, %v2954_v24, %v3013_v38  ;;  %v3033_v22 = vsel %vm1904_vm14, %v3014_v11, %v3032_v8 }
 0x264   : > { %v14269_v28 = vunpack.i.l.bf16 %v9459_v36  ;;  %v9960_v3 = vsel %vm724_vm4, %v6474_v44, %v6473_v20  ;;  %v5820_v46 = vpack.c.bf16 %v3134_v48, %v3123_v59  ;;  %v3031_v45 = vsel %vm1904_vm14, %v3013_v38, %v3030_v10  ;;  %v9968_v50 = vpop.permute.xlu1 %2491  ;;  %v2488_v36 = vpop.permute.xlu0 %2487 }
 0x265   : > { %v13860_v43 = vrot.slane %v9960_v3, 5  ;;  %v2507_v24 = vsel %vm1216_vm11, %v13859_v63, %v6404_v32  ;;  %14270 = vst [vmem:[#allocation34_spill] sm:$0xff] %v9968_v50  ;;  %v14271_v11 = vunpack.i.h.bf16 %v9408_v4  ;;  %v14272_v34 = vunpack.i.h.bf16 %v9365_v39 }
 0x266   : > { %v2255_v56 = vsel %vm724_vm4, %v6473_v20, %v14269_v28  ;;  %v2505_v20 = vsel %vm1216_vm11, %v6404_v32, %v13857_v16  ;;  %v14273_v8 = vunpack.i.l.bf16 %v9408_v4  ;;  %v14274_v38 = vunpack.i.l.bf16 %v9365_v39  ;;  %5821 = vmatpush1.bf16.msra.mxu1 %v5820_v46 }
 0x267   : > { %v2700_v15 = vrot.slane %v2255_v56, 5  ;;  %v2172_v10 = vsel %vm601_vm2, %v14272_v34, %v14271_v11  ;;  %v5822_v48 = vpack.c.bf16 %v2505_v20, %v3033_v22  ;;  %v2634_v28 = vsel %vm1844_vm6, %v2622_v33, %v2633_v6 }
 0x268   : > { %v2171_v59 = vsel %vm601_vm2, %v14274_v38, %v14273_v8  ;;  %v14275_v32 = vrot.slane %v9780_v35, 6  ;;  %v3073_v4 = vsel %vm1844_vm6, %v9811_v51, %v2622_v33  ;;  %v3084_v11 = vsel %vm1856_vm8, %v2634_v28, %v13860_v43  ;;  %v10004_v8 = vpop.permute.xlu1 %6476  ;;  %v10006_v51 = vpop.permute.xlu0 %2483  ;;  %v14283_v28 = vld [vmem:[#allocation25_spill] sm:$0xff] }
 0x269   : > { %v3085_v16 = vsel %vm1856_vm8, %v9892_v37, %v2700_v15  ;;  %v14276_v46 = vunpack.i.h.bf16 %v9143_v41  ;;  %v14277_v22 = vunpack.i.h.bf16 %v9145_v31  ;;  %5823 = vmatprep.subr.bf16.mxu1 %v5822_v48  ;;  %v5752_v20 = vpack.c.bf16 %v3084_v11, %v3073_v4  ;;  %14278 = vst [vmem:[#allocation52_spill] sm:$0xff] %v10006_v51 }
 0x26a   : > { %v3074_v56 = vsel %vm1844_vm6, %v9697_v9, %v14275_v32  ;;  %v5824_v9 = vpack.c.bf16 %v2507_v24, %v3031_v45  ;;  %v2653_v34 = vrot.slane %v2172_v10, 6  ;;  %v2632_v37 = vrot.slane %v2171_v59, 6  ;;  %v14281_v24 = vld [vmem:[#allocation8_spill] sm:$0xff] }
 0x26b   : > { %v2106_v35 = vsel %vm478_vm1, %v14277_v22, %v14276_v46  ;;  %v5750_v6 = vpack.c.bf16 %v3085_v16, %v3074_v56  ;;  %v13858_v33 = vunpack.i.h.bf16 %v10004_v8  ;;  %v6478_v38 = vunpack.i.l.bf16 %v10004_v8  ;;  %v14279_v16 = vld [vmem:[#allocation24_spill] sm:$0xff]  ;;  %v14285_v56 = vld [vmem:[#allocation7_spill] sm:$0xff] }
 0x26c   : > { %5825 = vmatpush1.bf16.msra.mxu1 %v5824_v9  ;;  %v2506_v41 = vsel %vm1216_vm11, %v2488_v36, %v9968_v50  ;;  %v2576_v48 = vrot.slane %v2106_v35, 7  ;;  %v14280_v45 = vrot.slane %v14279_v16, 4  ;;  %v14282_v10 = vrot.slane %v14281_v24, 4 }
 0x26d   : > { %5751 = vmatprep.subr.bf16.mxu0 %v5750_v6  ;;  %5668 = vmatprep.subr.msk.mxu1 %vm1832_vm3, %v2506_v41  ;;  %v14284_v32 = vrot.slane %v14283_v28, 4  ;;  %v14286_v4 = vrot.slane %v14285_v56, 4  ;;  %v10030_v46 = vsel %vm724_vm4, %v13858_v33, %v6474_v44  ;;  %v14287_v22 = vunpack.i.h.bf16 %v9457_v62  ;;  %v14288_v6 = vld [vmem:[#allocation31_spill] sm:$0xff]  ;;  %v6487_v28 = vpop.permute.xlu1 %6486 }
 0x26e   : > { %5753 = vmatpush1.bf16.msra.mxu0 %v5752_v20  ;;  %v2790_v59 = vsel %vm1868_vm10, %v14282_v10, %v14280_v45  ;;  %v14289_v9 = vrot.slane %v14288_v6, 4  ;;  %v14290_v20 = vld [vmem:[#allocation12_spill] sm:$0xff]  ;;  %v13863_v45 = vrot.slane %v10030_v46, 5  ;;  %v2508_v44 = vsel %vm1216_vm11, %v10006_v51, %v2488_v36  ;;  %v14292_v36 = vld [vmem:[#allocation37_spill] sm:$0xff] }
 0x26f   : > { %v10024_v11 = vsel %vm1868_vm10, %v14286_v4, %v14284_v32  ;;  %v2256_v35 = vsel %vm724_vm4, %v6478_v38, %v14287_v22  ;;  %v14291_v41 = vrot.slane %v14290_v20, 4  ;;  %v10047_v32 = vpop.permute.xlu0 %6481  ;;  %v2654_v4 = vsel %vm1844_vm6, %v2632_v37, %v2653_v34 }
 0x270   : > { %v2712_v10 = vrot.slane %v2256_v35, 5  ;;  %v6489_v22 = vunpack.i.h.bf16 %v6487_v28  ;;  %v6488_v33 = vunpack.i.l.bf16 %v6487_v28  ;;  %v13866_v6 = vunpack.i.h.bf16 %v10047_v32  ;;  %5669 = vmatpush1.msk.msra.mxu1 %vm1832_vm3, %v2508_v44 }
 0x271   : > { %v10041_v16 = vsel %vm1868_vm10, %v14291_v41, %v14289_v9  ;;  %v6483_v63 = vunpack.i.l.bf16 %v10047_v32  ;;  %v13861_v9 = vmov 0.0|0.0   ;;  %5670 = vmatmul.mubr.msk.f32.vlgmr.msra.gmra.mrb[6].mxu1 %vm3160_vm15, %v9728_v57  ;;  %v14293_v35 = vrot.slane %v14292_v36, 7  ;;  %v14295_v36 = vld [vmem:[#allocation38_spill] sm:$0xff] }
 0x272   : > { %5846 = vmatprep.subr.bf16.mxu1 %v13861_v9  ;;  %v3094_v34 = vsel %vm1856_vm8, %v2654_v4, %v13863_v45  ;;  %v2713_v28 = vsel %vm1856_vm8, %v2700_v15, %v2712_v10  ;;  %v14294_v43 = vunpack.i.l.bf16 %v9480_v23  ;;  %v10071_v9 = vsel %vm847_vm5, %v6489_v22, %v6488_v33  ;;  %v14296_v15 = vld [vmem:[#allocation39_spill] sm:$0xff]  ;;  %v6497_v45 = vpop.permute.xlu1 %6496  ;;  %3522 = vmatprep.mubr.f32.mxu1 %v14255_v14 }
 0x273   : > { %v2577_v41 = vsel %vm1832_vm3, %v14293_v35, %v2576_v48  ;;  %v2238_v48 = vsel %vm724_vm4, %v13866_v6, %v6483_v63  ;;  %v2258_v4 = vsel %vm724_vm4, %v6483_v63, %v6478_v38  ;;  %v14297_v10 = vpack.c.bf16 %v14295_v36, %v14296_v15 }
 0x274   : > { %v10067_v44 = vsel %vm847_vm5, %v6488_v33, %v14294_v43  ;;  %v2710_v35 = vrot.slane %v2258_v4, 5  ;;  %v10084_v33 = vpop.permute.xlu0 %6491  ;;  %v14299_v50 = vmov 0.0|0.0   ;;  %v3083_v51 = vsel %vm1844_vm6, %v2577_v41, %v2632_v37 }
 0x275   : > { %5848 = vmatpush3.bf16.msra.mxu1 %v14297_v10  ;;  %v2854_v43 = vrot.slane %v10067_v44, 3  ;;  %14298 = vst [vmem:[#allocation24_spill] sm:$0xff] %v10084_v33  ;;  %v6499_v6 = vunpack.i.h.bf16 %v6497_v45  ;;  %v6498_v63 = vunpack.i.l.bf16 %v6497_v45  ;;  %v13867_v38 = vunpack.i.h.bf16 %v10084_v33 }
 0x276   : > { %5849 = vmatprep.subr.bf16.mxu1 %v14299_v50  ;;  %v6493_v36 = vunpack.i.l.bf16 %v10084_v33  ;;  %v2730_v15 = vrot.slane %v2238_v48, 5  ;;  %v5850_v10 = vpack.c.bf16 %v3094_v34, %v3083_v51  ;;  %v14300_v44 = vrot.slane %v14281_v24, 4  ;;  %5671 = vmatmul.mubr.msk.f32.gmra.mrb[8].mxu1 %vm3160_vm15, %v9772_v2 }
 0x277   : > { %v3107_v23 = vsel %vm1880_vm12, %v2790_v59, %v2854_v43  ;;  %v14301_v37 = vunpack.i.l.bf16 %v9552_v54  ;;  %v10105_v41 = vsel %vm847_vm5, %v13867_v38, %v6489_v22  ;;  %v14302_v51 = vunpack.i.h.bf16 %v9521_v25  ;;  %3528 = vmatprep.mubr.f32.mxu1 %v14255_v14 }
 0x278   : > { %v3096_v4 = vsel %vm1868_vm10, %v2713_v28, %v14300_v44  ;;  %v14303_v59 = vrot.slane %v9960_v3, 5  ;;  %v14304_v28 = vunpack.i.h.bf16 %v9552_v54  ;;  %v10120_v38 = vpop.permute.xlu0 %6501  ;;  %v14306_v33 = vrot.slane %v14285_v56, 4 }
 0x279   : > { %v2385_v45 = vsel %vm970_vm7, %v6498_v63, %v14301_v37  ;;  %v2320_v24 = vsel %vm847_vm5, %v6493_v36, %v14302_v51  ;;  %5851 = vmatpush3.bf16.msra.mxu1 %v5850_v10  ;;  %v6507_v37 = vpop.permute.xlu1 %6506  ;;  %14305 = vst [vmem:[#allocation8_spill] sm:$0xff] %v10120_v38  ;;  %v13872_v3 = vunpack.i.h.bf16 %v10120_v38  ;;  %v5754_v54 = vpack.c.bf16 %v3107_v23, %v3096_v4 }
 0x27a   : > { %v2711_v34 = vsel %vm1856_vm8, %v14303_v59, %v2710_v35  ;;  %v2386_v48 = vsel %vm970_vm7, %v6499_v6, %v14304_v28  ;;  %v2931_v44 = vrot.slane %v2385_v45, 2  ;;  %v6509_v42 = vunpack.i.h.bf16 %v6507_v37  ;;  %5852 = vmatprep.subr.bf16.mxu1 %v14299_v50  ;;  %5672 = vmatmul.mubr.msk.f32.gmra.mrb[10].mxu1 %vm3160_vm15, %v9824_v40 }
 0x27b   : > { %v6508_v51 = vunpack.i.l.bf16 %v6507_v37  ;;  %v6503_v35 = vunpack.i.l.bf16 %v10120_v38  ;;  %v2866_v59 = vrot.slane %v2320_v24, 3  ;;  %v3095_v45 = vsel %vm1868_vm10, %v2711_v34, %v14306_v33  ;;  %5755 = vmatprep.subr.bf16.mxu0 %v5754_v54 }
 0x27c   : > { %v14307_v28 = vrot.slane %v10071_v9, 3  ;;  %v2943_v37 = vrot.slane %v2386_v48, 2  ;;  %v14308_v23 = vrot.slane %v10030_v46, 5  ;;  %vm7282_vm0 = vmmov 0   ;;  %v6512_v46 = vpop.permute.xlu0 %6511 }
 0x27d   : > { %v2387_v22 = vsel %vm970_vm7, %v6508_v51, %v6498_v63  ;;  %v2322_v24 = vsel %vm847_vm5, %v6503_v35, %v6493_v36  ;;  %5737 = vmatprep.mubr.msk.f32.mxu1 %vm7282_vm0, %v14255_v14  ;;  %v2324_v63 = vsel %vm847_vm5, %v13872_v3, %v6503_v35  ;;  %v10149_v36 = vpop.permute.xlu1 %6516  ;;  %v14310_v38 = vrot.slane %v10105_v41, 3 }
 0x27e   : > { %v3106_v10 = vsel %vm1880_vm12, %v10024_v11, %v14307_v28  ;;  %v2731_v56 = vsel %vm1856_vm8, %v14308_v23, %v2730_v15  ;;  %v2388_v11 = vsel %vm970_vm7, %v6509_v42, %v6499_v6  ;;  %v2930_v33 = vrot.slane %v2387_v22, 2 }
 0x27f   : > { %v2864_v4 = vrot.slane %v2322_v24, 3  ;;  %v5756_v34 = vpack.c.bf16 %v3106_v10, %v3095_v45  ;;  %v13874_v15 = vunpack.i.h.bf16 %v10149_v36  ;;  %v13873_v48 = vunpack.i.l.bf16 %v10149_v36 }
 0x280   : > { %v6514_v28 = vunpack.i.h.bf16 %v6512_v46  ;;  %v6513_v23 = vunpack.i.l.bf16 %v6512_v46  ;;  %v14309_v6 = vrot.slane %v14290_v20, 4  ;;  %v3116_v35 = vsel %vm1880_vm12, %v10041_v16, %v14310_v38 }
 0x281   : > { %v2867_v54 = vsel %vm1880_vm12, %v2854_v43, %v2866_v59  ;;  %v2941_v24 = vrot.slane %v2388_v11, 2  ;;  %5757 = vmatpush1.bf16.msra.mxu0 %v5756_v34  ;;  %v2389_v45 = vsel %vm970_vm7, %v13873_v48, %v6508_v51  ;;  %v2944_v46 = vsel %vm1892_vm13, %v2931_v44, %v2943_v37  ;;  %v10176_v59 = vpop.permute.xlu1 %6526  ;;  %v10178_v51 = vpop.permute.xlu0 %6521 }
 0x282   : > { %v3105_v22 = vsel %vm1868_vm10, %v2731_v56, %v14309_v6  ;;  %v2884_v20 = vrot.slane %v2324_v63, 3  ;;  %v2390_v56 = vsel %vm970_vm7, %v13874_v15, %v6509_v42  ;;  %v14311_v16 = vunpack.i.l.bf16 %v9586_v26  ;;  %14312 = vst [vmem:[#allocation25_spill] sm:$0xff] %v10176_v59  ;;  %14313 = vst [vmem:[#allocation7_spill] sm:$0xff] %v10178_v51 }
 0x283   : > { %v5853_v10 = vpack.c.bf16 %v3116_v35, %v3105_v22  ;;  %v2453_v38 = vsel %vm1093_vm9, %v6514_v28, %v6513_v23  ;;  %v2940_v11 = vrot.slane %v2389_v45, 2  ;;  %v13871_v63 = vunpack.i.h.bf16 %v10176_v59 }
 0x284   : > { %v2451_v43 = vsel %vm1093_vm9, %v6513_v23, %v14311_v16  ;;  %v6528_v34 = vunpack.i.l.bf16 %v10176_v59  ;;  %v6524_v42 = vunpack.i.h.bf16 %v10178_v51  ;;  %v13876_v26 = vunpack.i.l.bf16 %v10178_v51 }
 0x285   : > { %v3008_v37 = vrot.slane %v2451_v43, 1  ;;  %5854 = vmatpush3.bf16.msra.mxu1 %v5853_v10  ;;  %v3118_v6 = vsel %vm1892_vm13, %v2867_v54, %v2931_v44  ;;  %v14314_v22 = vrot.slane %v10071_v9, 3  ;;  %v2961_v35 = vrot.slane %v2390_v56, 2  ;;  %v10204_v54 = vpop.permute.xlu1 %6536  ;;  %v6532_v56 = vpop.permute.xlu0 %6531 }
 0x286   : > { %5855 = vmatprep.subr.bf16.mxu1 %v14299_v50  ;;  %v3007_v45 = vrot.slane %v2453_v38, 1  ;;  %v2456_v10 = vsel %vm1093_vm9, %v13871_v63, %v6528_v34  ;;  %v2454_v43 = vsel %vm1093_vm9, %v6528_v34, %v6524_v42  ;;  %v14315_v44 = vunpack.i.h.bf16 %v9610_v58 }
 0x287   : > { %v2865_v23 = vsel %vm1880_vm12, %v14314_v22, %v2864_v4  ;;  %v3129_v16 = vsel %vm1904_vm14, %v2944_v46, %v3008_v37  ;;  %v2455_v4 = vsel %vm1093_vm9, %v13876_v26, %v6514_v28  ;;  %v2942_v38 = vsel %vm1892_vm13, %v2930_v33, %v2941_v24 }
 0x288   : > { %v2452_v9 = vsel %vm1093_vm9, %v6524_v42, %v14315_v44  ;;  %v3038_v22 = vrot.slane %v2456_v10, 1  ;;  %v3017_v46 = vrot.slane %v2455_v4, 1  ;;  %v3117_v34 = vsel %vm1892_vm13, %v2865_v23, %v2930_v33 }
 0x289   : > { %v3020_v63 = vrot.slane %v2452_v9, 1  ;;  %v3018_v3 = vrot.slane %v2454_v43, 1  ;;  %v6534_v48 = vunpack.i.h.bf16 %v6532_v56  ;;  %v6533_v15 = vunpack.i.l.bf16 %v6532_v56  ;;  %v2460_v10 = vpop.permute.xlu1 %2459  ;;  %v2464_v9 = vpop.permute.xlu0 %2463 }
 0x28a   : > { %v5758_v59 = vpack.c.bf16 %v3129_v16, %v3118_v6  ;;  %v6538_v42 = vunpack.i.l.bf16 %v10204_v54  ;;  %v3128_v44 = vsel %vm1904_vm14, %v2942_v38, %v3007_v45  ;;  %v14316_v28 = vrot.slane %v10105_v41, 3 }
 0x28b   : > { %v2962_v51 = vsel %vm1892_vm13, %v2940_v11, %v2961_v35  ;;  %v5760_v24 = vpack.c.bf16 %v3128_v44, %v3117_v34  ;;  %v14317_v6 = vunpack.i.l.bf16 %v9640_v19  ;;  %v3021_v41 = vsel %vm1904_vm14, %v3008_v37, %v3020_v63 }
 0x28c   : > { %v2885_v26 = vsel %vm1880_vm12, %v14316_v28, %v2884_v20  ;;  %5759 = vmatprep.subr.bf16.mxu0 %v5758_v59  ;;  %v3138_v23 = vsel %vm1904_vm14, %v2962_v51, %v3017_v46  ;;  %v2519_v20 = vsel %vm1216_vm11, %v6534_v48, %v6533_v15  ;;  %v3019_v35 = vsel %vm1904_vm14, %v3007_v45, %v3018_v3 }
 0x28d   : > { %v3127_v33 = vsel %vm1892_vm13, %v2885_v26, %v2940_v11  ;;  %v2517_v16 = vsel %vm1216_vm11, %v6533_v15, %v14317_v6  ;;  %5761 = vmatpush1.bf16.msra.mxu0 %v5760_v24  ;;  %v2521_v51 = vsel %vm1216_vm11, %v6538_v42, %v6534_v48  ;;  %v5764_v11 = vpack.c.bf16 %v2519_v20, %v3019_v35  ;;  %v6542_v26 = vpop.permute.xlu1 %6541  ;;  %v10229_v4 = vpop.permute.xlu0 %2499  ;;  %v14321_v6 = vld [vmem:[#allocation44_spill] sm:$0xff] }
 0x28e   : > { %v5856_v43 = vpack.c.bf16 %v3138_v23, %v3127_v33  ;;  %v5762_v59 = vpack.c.bf16 %v2517_v16, %v3021_v41  ;;  %v3039_v19 = vsel %vm1904_vm14, %v3017_v46, %v3038_v22  ;;  %v6544_v15 = vunpack.i.h.bf16 %v6542_v26  ;;  %v14322_v41 = vld [vmem:[#allocation5_spill] sm:$0xff] }
 0x28f   : > { %v6543_v37 = vunpack.i.l.bf16 %v6542_v26  ;;  %v2518_v3 = vsel %vm1216_vm11, %v2464_v9, %v9719_v61  ;;  %v5859_v63 = vpack.c.bf16 %v2521_v51, %v3039_v19  ;;  %v14318_v48 = vunpack.i.l.bf16 %v9717_v5 }
 0x290   : > { %5857 = vmatpush3.bf16.msra.mxu1 %v5856_v43  ;;  %5763 = vmatprep.subr.bf16.mxu0 %v5762_v59  ;;  %v14319_v56 = vunpack.i.h.bf16 %v9759_v12  ;;  %v14320_v22 = vunpack.i.h.bf16 %v9406_v47  ;;  %v2520_v61 = vsel %vm1216_vm11, %v2460_v10, %v2464_v9  ;;  %v2781_v20 = vrot.slane %v14322_v41, 4  ;;  %v14323_v59 = vld [vmem:[#allocation28_spill] sm:$0xff] }
 0x291   : > { %5858 = vmatprep.subr.bf16.mxu1 %v14299_v50  ;;  %5765 = vmatpush1.bf16.msra.mxu0 %v5764_v11  ;;  %v2247_v45 = vsel %vm724_vm4, %v6543_v37, %v14318_v48  ;;  %v10253_v28 = vpop.permute.xlu1 %6551  ;;  %v6547_v24 = vpop.permute.xlu0 %6546  ;;  %v2797_v35 = vrot.slane %v14323_v59, 4  ;;  %v2522_v51 = vsel %vm1216_vm11, %v10229_v4, %v2460_v10  ;;  %v14324_v11 = vunpack.i.l.bf16 %v9887_v52 }
 0x292   : > { %v2248_v38 = vsel %vm724_vm4, %v6544_v15, %v14319_v56  ;;  %v10247_v46 = vsel %vm724_vm4, %v14320_v22, %v6543_v37  ;;  %5653 = vmatprep.subr.msk.mxu0 %vm1832_vm3, %v2518_v3  ;;  %v2704_v34 = vrot.slane %v2247_v45, 5  ;;  %v6554_v33 = vunpack.i.h.bf16 %v10253_v28  ;;  %v14326_v3 = vld [vmem:[#allocation40_spill] sm:$0xff] }
 0x293   : > { %v2703_v5 = vrot.slane %v10247_v46, 5  ;;  %v2720_v44 = vrot.slane %v2248_v38, 5  ;;  %v6553_v47 = vunpack.i.l.bf16 %v10253_v28  ;;  %v6549_v23 = vunpack.i.h.bf16 %v6547_v24  ;;  %v14331_v22 = vld [vmem:[#allocation32_spill] sm:$0xff]  ;;  %v14332_v46 = vld [vmem:[#allocation35_spill] sm:$0xff] }
 0x294   : > { %5860 = vmatpush3.bf16.msra.mxu1 %v5859_v63  ;;  %v6548_v43 = vunpack.i.l.bf16 %v6547_v24  ;;  %v3089_v9 = vsel %vm1856_vm8, %v14321_v6, %v2704_v34  ;;  %v14325_v26 = vunpack.i.h.bf16 %v9887_v52  ;;  %v14327_v63 = vld [vmem:[#allocation36_spill] sm:$0xff]  ;;  %v14329_v45 = vunpack.i.h.bf16 %v9802_v53 }
 0x295   : > { %5735 = vmatprep.subr.mxu1 %v14255_v14  ;;  %5654 = vmatpush1.msk.msra.mxu0 %vm1832_vm3, %v2520_v61  ;;  %v2721_v16 = vsel %vm1856_vm8, %v2704_v34, %v2720_v44  ;;  %v2377_v19 = vsel %vm970_vm7, %v6553_v47, %v14324_v11  ;;  %v14328_v48 = vpack.c.bf16 %v14326_v3, %v14327_v63  ;;  %v6557_v10 = vpop.permute.xlu0 %6556  ;;  %v14330_v38 = vunpack.i.l.bf16 %v9804_v60  ;;  %v14338_v63 = vld [vmem:[#allocation30_spill] sm:$0xff] }
 0x296   : > { %5655 = vmatmul.mubr.msk.f32.vlgmr.msra.gmra.mrb[0].mxu0 %vm3160_vm15, %v9728_v57  ;;  %v2378_v37 = vsel %vm970_vm7, %v6554_v33, %v14325_v26  ;;  %v2312_v56 = vsel %vm847_vm5, %v6549_v23, %v14329_v45  ;;  %v14333_v61 = vpack.c.bf16 %v14331_v22, %v14332_v46  ;;  %v3088_v34 = vsel %vm1856_vm8, %v9442_v18, %v2703_v5 }
 0x297   : > { %5787 = vmatprep.subr.bf16.mxu0 %v14328_v48  ;;  %v2311_v52 = vsel %vm847_vm5, %v6548_v43, %v14330_v38  ;;  %v14334_v44 = vunpack.i.l.bf16 %v9457_v62  ;;  %v2935_v6 = vrot.slane %v2377_v19, 2  ;;  %3273 = vmatprep.mubr.f32.mxu0 %v14255_v14  ;;  %v2798_v60 = vsel %vm1868_vm10, %v2781_v20, %v2797_v35  ;;  %v14336_v19 = vld [vmem:[#allocation47_spill] sm:$0xff] }
 0x298   : > { %5736 = vmatpush3.msk.msra.mxu1 %vm1832_vm3, %v2522_v51  ;;  %5789 = vmatpush1.bf16.msra.mxu0 %v14333_v61  ;;  %v2858_v41 = vrot.slane %v2311_v52, 3  ;;  %v2951_v59 = vrot.slane %v2378_v37, 2  ;;  %v14335_v51 = vunpack.i.h.bf16 %v9482_v1  ;;  %v6558_v11 = vunpack.i.l.bf16 %v6557_v10 }
 0x299   : > { %v2250_v24 = vsel %vm724_vm4, %v14334_v44, %v6544_v15  ;;  %5738 = vmatmul.mubr.msk.f32.vlgmr.msra.gmra.mrb[12].mxu1 %vm3160_vm15, %v9728_v57  ;;  %v5790_v62 = vpack.c.bf16 %v3089_v9, %v9436_v49  ;;  %v2874_v15 = vrot.slane %v2312_v56, 3  ;;  %v5792_v26 = vpack.c.bf16 %v3088_v34, %v14336_v19  ;;  %v10332_v52 = vpop.permute.xlu0 %6561  ;;  %v10340_v34 = vpop.permute.xlu1 %2479 }
 0x29a   : > { %v2313_v18 = vsel %vm847_vm5, %v14335_v51, %v6548_v43  ;;  %5656 = vmatmul.mubr.msk.f32.gmra.mrb[2].mxu0 %vm3160_vm15, %v9772_v2  ;;  %5740 = vmatprep.mubr.msk.f32.mxu1 %vm7282_vm0, %v14255_v14  ;;  %v3100_v35 = vsel %vm1868_vm10, %v2721_v16, %v2781_v20  ;;  %v3111_v1 = vsel %vm1880_vm12, %v2798_v60, %v2858_v41  ;;  %v2718_v37 = vrot.slane %v2250_v24, 5  ;;  %v14337_v43 = vld [vmem:[#allocation6_spill] sm:$0xff] }
 0x29b   : > { %3279 = vmatprep.mubr.f32.mxu0 %v14255_v14  ;;  %5791 = vmatprep.subr.bf16.mxu0 %v5790_v62  ;;  %v2780_v3 = vrot.slane %v14337_v43, 4  ;;  %v2795_v48 = vrot.slane %v14338_v63, 4  ;;  %v2857_v45 = vrot.slane %v2313_v18, 3  ;;  %v14339_v49 = vunpack.i.l.bf16 %v9923_v7 }
 0x29c   : > { %5793 = vmatpush1.bf16.msra.mxu0 %v5792_v26  ;;  %v6559_v16 = vunpack.i.h.bf16 %v6557_v10  ;;  %v5794_v20 = vpack.c.bf16 %v3111_v1, %v3100_v35  ;;  %v2875_v56 = vsel %vm1880_vm12, %v2858_v41, %v2874_v15  ;;  %v2952_v38 = vsel %vm1892_vm13, %v2935_v6, %v2951_v59 }
 0x29d   : > { %5741 = vmatmul.mubr.msk.f32.gmra.mrb[14].mxu1 %vm3160_vm15, %v9772_v2  ;;  %v2443_v9 = vsel %vm1093_vm9, %v6558_v11, %v14339_v49  ;;  %v2719_v7 = vsel %vm1856_vm8, %v2703_v5, %v2718_v37  ;;  %v2796_v22 = vsel %vm1868_vm10, %v2780_v3, %v2795_v48  ;;  %v14340_v46 = vunpack.i.l.bf16 %v9521_v25  ;;  %v10372_v43 = vpop.permute.xlu1 %6566  ;;  %v14349_v49 = vld [vmem:[#allocation33_spill] sm:$0xff] }
 0x29e   : > { %5657 = vmatmul.mubr.msk.f32.gmra.mrb[4].mxu0 %vm3160_vm15, %v9824_v40  ;;  %5743 = vmatprep.mubr.msk.f32.mxu1 %vm7282_vm0, %v14255_v14  ;;  %v3012_v10 = vrot.slane %v2443_v9, 1  ;;  %v3110_v44 = vsel %vm1880_vm12, %v2796_v22, %v2857_v45  ;;  %v14341_v24 = vunpack.i.l.bf16 %v9554_v30  ;;  %v14342_v25 = vunpack.i.h.bf16 %v9554_v30 }
 0x29f   : > { %3433 = vmatprep.mubr.f32.mxu0 %v14255_v14  ;;  %v2314_v61 = vsel %vm847_vm5, %v14340_v46, %v6549_v23  ;;  %5795 = vmatprep.subr.bf16.mxu0 %v5794_v20  ;;  %v14343_v41 = vunpack.i.h.bf16 %v9921_v29  ;;  %v6563_v59 = vunpack.i.l.bf16 %v10332_v52  ;;  %v3099_v51 = vsel %vm1868_vm10, %v2719_v7, %v2780_v3  ;;  %v14352_v20 = vld [vmem:[#allocation45_spill] sm:$0xff]  ;;  %v14354_v7 = vld [vmem:[#allocation26_spill] sm:$0xff] }
 0x2a0   : > { %v2379_v5 = vsel %vm970_vm7, %v14341_v24, %v6553_v47  ;;  %v2380_v23 = vsel %vm970_vm7, %v14342_v25, %v6554_v33  ;;  %v2872_v18 = vrot.slane %v2314_v61, 3  ;;  %v14344_v62 = vunpack.i.h.bf16 %v9588_v0 }
 0x2a1   : > { %5744 = vmatmul.mubr.msk.f32.gmra.mrb[16].mxu1 %vm3160_vm15, %v9824_v40  ;;  %v2444_v60 = vsel %vm1093_vm9, %v6559_v16, %v14343_v41  ;;  %v5796_v47 = vpack.c.bf16 %v3110_v44, %v3099_v51  ;;  %v6539_v30 = vunpack.i.h.bf16 %v10204_v54  ;;  %v3122_v33 = vsel %vm1892_vm13, %v2875_v56, %v2935_v6  ;;  %v14347_v6 = vld [vmem:[#allocation10_spill] sm:$0xff]  ;;  %v6572_v51 = vpop.permute.xlu0 %6571 }
 0x2a2   : > { %v2445_v28 = vsel %vm1093_vm9, %v14344_v62, %v6558_v11  ;;  %v3133_v15 = vsel %vm1904_vm14, %v2952_v38, %v3012_v10  ;;  %v2934_v19 = vrot.slane %v2379_v5, 2  ;;  %v2949_v26 = vrot.slane %v2380_v23, 2 }
 0x2a3   : > { %v3028_v35 = vrot.slane %v2444_v60, 1  ;;  %v14345_v1 = vunpack.i.l.bf16 %v9610_v58  ;;  %5797 = vmatpush1.bf16.msra.mxu0 %v5796_v47  ;;  %v3011_v0 = vrot.slane %v2445_v28, 1  ;;  %v14346_v11 = vunpack.i.h.bf16 %v9675_v21 }
 0x2a4   : > { %v2805_v63 = vrot.slane %v14347_v6, 4  ;;  %v14348_v48 = vunpack.i.h.bf16 %v9145_v31  ;;  %v14350_v9 = vunpack.i.h.bf16 %v14349_v49  ;;  %v14353_v56 = vunpack.i.h.bf16 %v14352_v20 }
 0x2a5   : > { %v2446_v37 = vsel %vm1093_vm9, %v14345_v1, %v6559_v16  ;;  %v10378_v3 = vsel %vm724_vm4, %v14346_v11, %v6563_v59  ;;  %v14351_v16 = vunpack.i.h.bf16 %v9365_v39  ;;  %v2873_v38 = vsel %vm1880_vm12, %v2857_v45, %v2872_v18  ;;  %v14358_v1 = vld [vmem:[#allocation29_spill] sm:$0xff]  ;;  %v14359_v11 = vld [vmem:[#allocation27_spill] sm:$0xff] }
 0x2a6   : > { %v2108_v58 = vsel %vm478_vm1, %v14350_v9, %v14348_v48  ;;  %v2803_v22 = vrot.slane %v14354_v7, 4  ;;  %v14355_v46 = vunpack.i.l.bf16 %v9365_v39  ;;  %v14356_v31 = vunpack.i.l.bf16 %v14352_v20  ;;  %v14363_v20 = vld [vmem:[#allocation24_spill] sm:$0xff] }
 0x2a7   : > { %v2174_v21 = vsel %vm601_vm2, %v14353_v56, %v14351_v16  ;;  %v3026_v44 = vrot.slane %v2446_v37, 1  ;;  %v6564_v24 = vunpack.i.h.bf16 %v10332_v52  ;;  %v14357_v5 = vunpack.i.h.bf16 %v9945_v13 }
 0x2a8   : > { %v10401_v61 = vsel %vm601_vm2, %v14356_v31, %v14355_v46  ;;  %v2707_v45 = vrot.slane %v10378_v3, 5  ;;  %v5798_v23 = vpack.c.bf16 %v3133_v15, %v3122_v33  ;;  %v2950_v41 = vsel %vm1892_vm13, %v2934_v19, %v2949_v26 }
 0x2a9   : > { %v2509_v25 = vsel %vm1216_vm11, %v6539_v30, %v14357_v5  ;;  %v3029_v39 = vsel %vm1904_vm14, %v3012_v10, %v3028_v35  ;;  %v6568_v60 = vunpack.i.l.bf16 %v10372_v43  ;;  %v3121_v18 = vsel %vm1892_vm13, %v2873_v38, %v2934_v19  ;;  %v6577_v35 = vpop.permute.xlu1 %6576 }
 0x2aa   : > { %v3132_v62 = vsel %vm1904_vm14, %v2950_v41, %v3011_v0  ;;  %v5802_v52 = vpack.c.bf16 %v2509_v25, %v3029_v39  ;;  %v2574_v28 = vrot.slane %v2108_v58, 7  ;;  %5799 = vmatprep.subr.bf16.mxu0 %v5798_v23  ;;  %v2785_v37 = vrot.slane %v14358_v1, 4  ;;  %v14369_v41 = vld [vmem:[#allocation50_spill] sm:$0xff]  ;;  %v14375_v1 = vld [vmem:[#allocation51_spill] sm:$0xff] }
 0x2ab   : > { %v5800_v47 = vpack.c.bf16 %v3132_v62, %v3121_v18  ;;  %v2784_v6 = vrot.slane %v14359_v11, 4  ;;  %v2651_v33 = vrot.slane %v2174_v21, 6  ;;  %v2631_v15 = vrot.slane %v10401_v61, 6  ;;  %v14365_v21 = vld [vmem:[#allocation49_spill] sm:$0xff]  ;;  %v14372_v62 = vld [vmem:[#allocation52_spill] sm:$0xff] }
 0x2ac   : > { %v14360_v10 = vunpack.i.h.bf16 %v10004_v8  ;;  %v3027_v19 = vsel %vm1904_vm14, %v3011_v0, %v3026_v44  ;;  %v14361_v48 = vunpack.i.h.bf16 %v10047_v32  ;;  %v6574_v9 = vunpack.i.h.bf16 %v6572_v51 }
 0x2ad   : > { %v6573_v58 = vunpack.i.l.bf16 %v6572_v51  ;;  %5801 = vmatpush1.bf16.msra.mxu0 %v5800_v47  ;;  %v3092_v16 = vsel %vm1856_vm8, %v9623_v27, %v2707_v45  ;;  %v14362_v8 = vunpack.i.h.bf16 %v9608_v17  ;;  %v6569_v0 = vunpack.i.h.bf16 %v10372_v43  ;;  %v2496_v54 = vpop.permute.xlu1 %2495 }
 0x2ae   : > { %v2239_v26 = vsel %vm724_vm4, %v6563_v59, %v14360_v10  ;;  %v2240_v49 = vsel %vm724_vm4, %v6564_v24, %v14361_v48  ;;  %v14364_v32 = vunpack.i.h.bf16 %v14363_v20  ;;  %5803 = vmatprep.subr.bf16.mxu0 %v5802_v52  ;;  %v5832_v38 = vpack.c.bf16 %v3092_v16, %v14365_v21  ;;  %v14373_v52 = vld [vmem:[#allocation8_spill] sm:$0xff]  ;;  %v14377_v48 = vld [vmem:[#allocation7_spill] sm:$0xff]  ;;  %v14379_v16 = vld [vmem:[#allocation9_spill] sm:$0xff] }
 0x2af   : > { %v2511_v59 = vsel %vm1216_vm11, %v14362_v8, %v6539_v30  ;;  %v14366_v46 = vunpack.i.l.bf16 %v9759_v12  ;;  %v2708_v31 = vrot.slane %v2239_v26, 5  ;;  %v6578_v17 = vunpack.i.l.bf16 %v6577_v35  ;;  %v14367_v30 = vld [vmem:[#allocation43_spill] sm:$0xff] }
 0x2b0   : > { %v2303_v56 = vsel %vm847_vm5, %v6568_v60, %v14364_v32  ;;  %v5804_v61 = vpack.c.bf16 %v2511_v59, %v3027_v19  ;;  %v2728_v44 = vrot.slane %v2240_v49, 5  ;;  %v14368_v5 = vrot.slane %v14367_v30, 7 }
 0x2b1   : > { %v2242_v27 = vsel %vm724_vm4, %v14366_v46, %v6564_v24  ;;  %v2652_v25 = vsel %vm1844_vm6, %v2631_v15, %v2651_v33  ;;  %v2806_v23 = vsel %vm1868_vm10, %v2785_v37, %v2805_v63  ;;  %v2512_v12 = vsel %vm1216_vm11, %v14369_v41, %v10340_v34 }
 0x2b2   : > { %v2575_v43 = vsel %vm1832_vm3, %v14368_v5, %v2574_v28  ;;  %v14370_v39 = vunpack.i.h.bf16 %v10149_v36  ;;  %v14371_v51 = vunpack.i.l.bf16 %v10149_v36  ;;  %5805 = vmatpush1.bf16.msra.mxu0 %v5804_v61  ;;  %v2510_v63 = vsel %vm1216_vm11, %v10340_v34, %v14372_v62  ;;  %v14383_v5 = vld [vmem:[#allocation18_spill] sm:$0xff] }
 0x2b3   : > { %v14374_v28 = vunpack.i.h.bf16 %v14373_v52  ;;  %v14376_v33 = vunpack.i.h.bf16 %v14375_v1  ;;  %v2862_v36 = vrot.slane %v2303_v56, 3  ;;  %v2726_v26 = vrot.slane %v2242_v27, 5  ;;  %5663 = vmatprep.subr.msk.mxu0 %vm1832_vm3, %v2510_v63 }
 0x2b4   : > { %v2370_v24 = vsel %vm970_vm7, %v6574_v9, %v14370_v39  ;;  %v2369_v18 = vsel %vm970_vm7, %v6573_v58, %v14371_v51  ;;  %v6579_v19 = vunpack.i.h.bf16 %v6577_v35  ;;  %v14378_v49 = vunpack.i.l.bf16 %v14377_v48  ;;  %v14388_v51 = vld [vmem:[#allocation48_spill] sm:$0xff] }
 0x2b5   : > { %v2304_v47 = vsel %vm847_vm5, %v6569_v0, %v14374_v28  ;;  %v2305_v10 = vsel %vm847_vm5, %v14376_v33, %v6568_v60  ;;  %v14380_v8 = vunpack.i.h.bf16 %v14379_v16  ;;  %v3093_v20 = vsel %vm1856_vm8, %v2652_v25, %v2708_v31 }
 0x2b6   : > { %v2435_v34 = vsel %vm1093_vm9, %v6578_v17, %v14378_v49  ;;  %v2959_v32 = vrot.slane %v2370_v24, 2  ;;  %v14381_v60 = vunpack.i.l.bf16 %v14379_v16  ;;  %v2939_v21 = vrot.slane %v2369_v18, 2  ;;  %5664 = vmatpush1.msk.msra.mxu0 %vm1832_vm3, %v2512_v12  ;;  %v14389_v12 = vld [vmem:[#allocation41_spill] sm:$0xff] }
 0x2b7   : > { %v2372_v59 = vsel %vm970_vm7, %v14380_v8, %v6574_v9  ;;  %v2729_v35 = vsel %vm1856_vm8, %v2708_v31, %v2728_v44  ;;  %v14382_v46 = vunpack.i.l.bf16 %v9802_v53  ;;  %v2861_v61 = vrot.slane %v2305_v10, 3  ;;  %5665 = vmatmul.mubr.msk.f32.vlgmr.msra.gmra.mrb[6].mxu0 %vm3160_vm15, %v9728_v57  ;;  %v14385_v53 = vld [vmem:[#allocation46_spill] sm:$0xff] }
 0x2b8   : > { %v2371_v56 = vsel %vm970_vm7, %v14381_v60, %v6573_v58  ;;  %v2882_v30 = vrot.slane %v2304_v47, 3  ;;  %v3082_v9 = vsel %vm1844_vm6, %v2575_v43, %v2631_v15  ;;  %v14384_v25 = vunpack.i.h.bf16 %v14383_v5  ;;  %v14386_v31 = vld [vmem:[#allocation42_spill] sm:$0xff]  ;;  %3439 = vmatprep.mubr.f32.mxu0 %v14255_v14  ;;  %v14391_v43 = vld [vmem:[#allocation25_spill] sm:$0xff] }
 0x2b9   : > { %v2306_v27 = vsel %vm847_vm5, %v14382_v46, %v6569_v0  ;;  %v3016_v58 = vrot.slane %v2435_v34, 1  ;;  %v2957_v39 = vrot.slane %v2372_v59, 2  ;;  %v14387_v44 = vpack.c.bf16 %v14385_v53, %v14386_v31 }
 0x2ba   : > { %v2437_v41 = vsel %vm1093_vm9, %v14384_v25, %v6578_v17  ;;  %v5830_v0 = vpack.c.bf16 %v3093_v20, %v3082_v9  ;;  %v2938_v24 = vrot.slane %v2371_v56, 2  ;;  %v14390_v18 = vpack.c.bf16 %v14388_v51, %v14389_v12  ;;  %v14395_v56 = vld [vmem:[#allocation34_spill] sm:$0xff] }
 0x2bb   : > { %5827 = vmatprep.subr.bf16.mxu0 %v14387_v44  ;;  %v3104_v15 = vsel %vm1868_vm10, %v2729_v35, %v2785_v37  ;;  %v3115_v17 = vsel %vm1880_vm12, %v2806_v23, %v2862_v36  ;;  %v2727_v57 = vsel %vm1856_vm8, %v2707_v45, %v2726_v26  ;;  %v14392_v62 = vunpack.i.h.bf16 %v14391_v43  ;;  %5666 = vmatmul.mubr.msk.f32.gmra.mrb[8].mxu0 %vm3160_vm15, %v9772_v2  ;;  %v2494_v2 = vpop.permute.xlu0 %2493 }
 0x2bc   : > { %5829 = vmatpush1.bf16.msra.mxu0 %v14390_v18  ;;  %v2960_v52 = vsel %vm1892_vm13, %v2939_v21, %v2959_v32  ;;  %v2880_v28 = vrot.slane %v2306_v27, 3  ;;  %v14393_v47 = vunpack.i.l.bf16 %v9921_v29  ;;  %v3015_v1 = vrot.slane %v2437_v41, 1  ;;  %3445 = vmatprep.mubr.f32.mxu0 %v14255_v14 }
 0x2bd   : > { %v2436_v63 = vsel %vm1093_vm9, %v6579_v19, %v14392_v62  ;;  %5831 = vmatprep.subr.bf16.mxu0 %v5830_v0  ;;  %v2804_v3 = vsel %vm1868_vm10, %v2784_v6, %v2803_v22  ;;  %v5834_v45 = vpack.c.bf16 %v3115_v17, %v3104_v15  ;;  %v3103_v23 = vsel %vm1868_vm10, %v2727_v57, %v2784_v6  ;;  %v14396_v62 = vld [vmem:[#allocation17_spill] sm:$0xff] }
 0x2be   : > { %v2438_v37 = vsel %vm1093_vm9, %v14393_v47, %v6579_v19  ;;  %v3114_v29 = vsel %vm1880_vm12, %v2804_v3, %v2861_v61  ;;  %v2883_v33 = vsel %vm1880_vm12, %v2862_v36, %v2882_v30  ;;  %v3036_v10 = vrot.slane %v2436_v63, 1  ;;  %v14398_v3 = vld [vmem:[#allocation16_spill] sm:$0xff] }
 0x2bf   : > { %v3126_v7 = vsel %vm1892_vm13, %v2883_v33, %v2939_v21  ;;  %v3137_v22 = vsel %vm1904_vm14, %v2960_v52, %v3016_v58  ;;  %v2958_v26 = vsel %vm1892_vm13, %v2938_v24, %v2957_v39  ;;  %v5836_v19 = vpack.c.bf16 %v3114_v29, %v3103_v23  ;;  %5667 = vmatmul.mubr.msk.f32.gmra.mrb[10].mxu0 %vm3160_vm15, %v9824_v40  ;;  %v14400_v33 = vld [vmem:[#allocation15_spill] sm:$0xff] }
 0x2c0   : > { %5833 = vmatpush1.bf16.msra.mxu0 %v5832_v38  ;;  %v2881_v11 = vsel %vm1880_vm12, %v2861_v61, %v2880_v28  ;;  %v3034_v6 = vrot.slane %v2438_v37, 1  ;;  %v5838_v36 = vpack.c.bf16 %v3137_v22, %v3126_v7  ;;  %v3136_v48 = vsel %vm1904_vm14, %v2958_v26, %v3015_v1  ;;  %3599 = vmatprep.mubr.f32.mxu0 %v14255_v14  ;;  %v14402_v22 = vld [vmem:[#allocation19_spill] sm:$0xff] }
 0x2c1   : > { %5835 = vmatprep.subr.bf16.mxu0 %v5834_v45  ;;  %v3125_v38 = vsel %vm1892_vm13, %v2881_v11, %v2938_v24  ;;  %v2501_v49 = vsel %vm1216_vm11, %v2494_v2, %v6538_v42  ;;  %v3037_v34 = vsel %vm1904_vm14, %v3016_v58, %v3036_v10  ;;  %v14394_v59 = vunpack.i.l.bf16 %v9945_v13  ;;  %v7200_v13 = vld [vmem:[%s13724_s2] sm:$0xff] }
 0x2c2   : > { %v5840_v16 = vpack.c.bf16 %v3136_v48, %v3125_v38  ;;  %v3035_v8 = vsel %vm1904_vm14, %v3015_v1, %v3034_v6  ;;  %v5842_v32 = vpack.c.bf16 %v2501_v49, %v3037_v34  ;;  %v2502_v42 = vsel %vm1216_vm11, %v2496_v54, %v10229_v4  ;;  %v7201_v4 = vld [vmem:[%s13724_s2 + $0x8] sm:$0xff] }
 0x2c3   : > { %v2503_v20 = vsel %vm1216_vm11, %v14394_v59, %v2494_v2  ;;  %v2504_v21 = vsel %vm1216_vm11, %v14395_v56, %v2496_v54  ;;  %vm14452_vm0 = vcmp.lt.s32.totalorder %v7725_v55, 19  ;;  %vm5093_vm6 = vcmask 424960  }
 0x2c4   : > { %5837 = vmatpush1.bf16.msra.mxu0 %v5836_v19  ;;  %v5844_v60 = vpack.c.bf16 %v2503_v20, %v3035_v8  ;;  %vm14479_vm8 = vmmov %vm14452_vm0 }
 0x2c5   : > { %5839 = vmatprep.subr.bf16.mxu0 %v5838_v36  ;;  %vm14481_vm12 = vmmov %vm14452_vm0 }
 0x2c6   : > { %vm14484_vm13 = vmmov %vm14452_vm0 }
 0x2c7   : > { %vm14487_vm14 = vmmov %vm14452_vm0 }
 0x2c8   : > { %5841 = vmatpush1.bf16.msra.mxu0 %v5840_v16 }
 0x2c9   : > { %5843 = vmatprep.subr.bf16.mxu0 %v5842_v32 }
 0x2cc   : > { %5845 = vmatpush1.bf16.msra.mxu0 %v5844_v60 }
 0x2cd   : > { %5673 = vmatprep.subr.msk.mxu0 %vm1832_vm3, %v2502_v42 }
 0x2cf   : > { %v10594_v44 = vpop.permute.xlu1 %3152 }
 0x2d0   : > { %5674 = vmatpush1.msk.msra.mxu0 %vm1832_vm3, %v2504_v21  ;;  %vm14453_vm3 = vmmov %vm14452_vm0 }
 0x2d1   : > { %5675 = vmatmul.mubr.msk.f32.vlgmr.msra.gmra.mrb[12].mxu0 %vm3160_vm15, %v7200_v13 }
 0x2d2   : > { %3605 = vmatprep.mubr.f32.mxu0 %v14255_v14  ;;  %v10591_v53 = vpop.permute.xlu0 %3147 }
 0x2d5   : > { %5676 = vmatmul.mubr.msk.f32.gmra.mrb[14].mxu0 %vm3160_vm15, %v7201_v4  ;;  %v14407_v4 = vld [vmem:[#allocation11_spill] sm:$0xff] }
 0x2d6   : > { %3611 = vmatprep.mubr.f32.mxu0 %v14255_v14 }
 0x2d9   : > { %5677 = vmatmul.mubr.msk.f32.gmra.mrb[16].mxu0 %vm3160_vm15, %v9824_v40  ;;  %vm14492_vm15 = vmmov %vm14452_vm0 }
 0x31e   : > { %v3352_v35 = vpop.f32.mrb[0].mxu1 }
 0x31f   : > { %v3354_v46 = vpop.f32.mrb[1].mxu1  ;;  %v3353_v24 = vadd.f32 %v3352_v35, %v10591_v53 }
 0x320   : > { %v3355_v31 = vadd.f32 %v3354_v46, %v10591_v53 }
 0x321   : > { %v3700_v43 = vmax.f32 %v3353_v24, 0.0 }
 0x322   : > { %v3701_v51 = vmax.f32 %v3355_v31, 0.0 }
 0x323   : > { %v3358_v27 = vpop.f32.mrb[2].mxu1  ;;  %v10615_v2 = vmul.f32 %v3700_v43, %v14402_v22 }
 0x324   : > { %v10573_v61 = vpop.f32.mrb[3].mxu1  ;;  %v3359_v0 = vadd.f32 %v3358_v27, %v10594_v44  ;;  %v10601_v63 = vmul.f32 %v3701_v51, %v14396_v62 }
 0x325   : > { %14404 = vst [vmem:[#allocation39_spill] sm:$0xff] %v10615_v2 }
 0x326   : > { %v3711_v57 = vmax.f32 %v3359_v0, 0.0  ;;  %14397 = vst [vmem:[#allocation31_spill] sm:$0xff] %v10601_v63 }
 0x327   : > { %v10575_v30 = vpop.f32.mrb[4].mxu1 }
 0x328   : > { %v10577_v9 = vpop.f32.mrb[5].mxu1  ;;  %v10612_v26 = vmul.f32 %v3711_v57, %v14402_v22 }
 0x32a   : > { %14403 = vst [vmem:[#allocation38_spill] sm:$0xff] %v10612_v26  ;;  %v6612_v60 = vpack.i.bf16 %v10612_v26, %v10615_v2 }
 0x344   : > { %v10579_v5 = vpop.f32.mrb[6].mxu1 }
 0x345   : > { %v10581_v25 = vpop.f32.mrb[7].mxu1 }
 0x349   : > { %v10583_v41 = vpop.f32.mrb[8].mxu1 }
 0x34a   : > { %v10585_v58 = vpop.f32.mrb[9].mxu1 }
 0x34d   : > { %v10587_v39 = vpop.f32.mrb[10].mxu1 }
 0x34e   : > { %v10589_v40 = vpop.f32.mrb[11].mxu1 }
 0x369   : > { %v3269_v12 = vpop.f32.mrb[0].mxu0 }
 0x36a   : > { %v3270_v18 = vadd.f32 %v3269_v12, %v10591_v53  ;;  %v3271_v15 = vpop.f32.mrb[1].mxu0 }
 0x36b   : > { %v3272_v17 = vadd.f32 %v3271_v15, %v10591_v53 }
 0x36c   : > { %v3698_v52 = vmax.f32 %v3270_v18, 0.0  ;;  %v3684_v28 = vpop.f32.mrb[12].mxu1  ;;  %v3361_v18 = vadd.f32 %v10573_v61, %v10594_v44 }
 0x36d   : > { %v3699_v47 = vmax.f32 %v3272_v17, 0.0  ;;  %v3275_v37 = vpop.f32.mrb[2].mxu0  ;;  %v5739_v1 = vpop.f32.mrb[13].mxu1  ;;  %v3685_v36 = vadd.f32 %v3684_v28, %v10591_v53 }
 0x36e   : > { %v10604_v45 = vmul.f32 %v3698_v52, %v14398_v3  ;;  %v3276_v23 = vadd.f32 %v3275_v37, %v10594_v44  ;;  %v3277_v29 = vpop.f32.mrb[3].mxu0  ;;  %v3712_v15 = vmax.f32 %v3361_v18, 0.0  ;;  %v10674_v17 = vpop.permute.xlu1 %3157 }
 0x36f   : > { %v10608_v10 = vmul.f32 %v3699_v47, %v14400_v33  ;;  %v3278_v7 = vadd.f32 %v3277_v29, %v10594_v44  ;;  %v3708_v56 = vmax.f32 %v3685_v36, 0.0  ;;  %v3365_v47 = vadd.f32 %v10575_v30, %v10674_v17 }
 0x370   : > { %14399 = vst [vmem:[#allocation12_spill] sm:$0xff] %v10604_v45  ;;  %v3709_v19 = vmax.f32 %v3276_v23, 0.0  ;;  %v3689_v11 = vpop.f32.mrb[14].mxu1  ;;  %v6602_v6 = vpack.i.bf16 %v10601_v63, %v10604_v45  ;;  %v10678_v57 = vmul.f32 %v3712_v15, %v14396_v62 }
 0x371   : > { %14401 = vst [vmem:[#allocation37_spill] sm:$0xff] %v10608_v10  ;;  %v3710_v38 = vmax.f32 %v3278_v7, 0.0  ;;  %v3690_v48 = vadd.f32 %v3689_v11, %v10594_v44  ;;  %v3281_v49 = vpop.f32.mrb[4].mxu0  ;;  %v5742_v34 = vpop.f32.mrb[15].mxu1  ;;  %v6582_v16 = vpack.i.bf16 %v10608_v10, %v10604_v45  ;;  %v10649_v46 = vmul.f32 %v3708_v56, %v14407_v4 }
 0x372   : > { %v10624_v8 = vmul.f32 %v3709_v19, %v14398_v3  ;;  %v10626_v59 = vpop.f32.mrb[5].mxu0  ;;  %6603 = vrot.lane.b32.xlu1 %v6602_v6, %s7276_s18  ;;  %v6592_v27 = vpack.i.bf16 %v10615_v2, %v10608_v10  ;;  %14411 = vst [vmem:[#allocation32_spill] sm:$0xff] %v10678_v57  ;;  %v3282_v43 = vadd.f32 %v3281_v49, %v10674_v17  ;;  %v14412_v19 = vld [vmem:[#allocation21_spill] sm:$0xff]  ;;  %v3722_v30 = vmax.f32 %v3365_v47, 0.0 }
 0x373   : > { %v10630_v20 = vmul.f32 %v3710_v38, %v14400_v33  ;;  %v3719_v32 = vmax.f32 %v3690_v48, 0.0  ;;  %6583 = vrot.lane.b32.xlu0 %v6582_v16, %s7272_s10  ;;  %14409 = vst [vmem:[#allocation40_spill] sm:$0xff] %v10649_v46  ;;  %v6662_v23 = vpack.i.bf16 %v10678_v57, %v10601_v63  ;;  %v3367_v56 = vadd.f32 %v10577_v9, %v10674_v17 }
 0x374   : > { %14405 = vst [vmem:[#allocation44_spill] sm:$0xff] %v10624_v8  ;;  %v10633_v54 = vpop.f32.mrb[16].mxu1  ;;  %v6617_v42 = vpack.i.bf16 %v10624_v8, %v10604_v45  ;;  %v6627_v0 = vpack.i.bf16 %v10624_v8, %v10601_v63  ;;  %v3720_v37 = vmax.f32 %v3282_v43, 0.0 }
 0x375   : > { %14406 = vst [vmem:[#allocation5_spill] sm:$0xff] %v10630_v20  ;;  %v5745_v21 = vpop.f32.mrb[17].mxu1  ;;  %v10642_v13 = vpack.i.bf16 %v10630_v20, %v10608_v10  ;;  %v10645_v35 = vmul.f32 %v3719_v32, %v14407_v4  ;;  %v6667_v15 = vpack.i.bf16 %v10612_v26, %v10630_v20 }
 0x376   : > { %6613 = vrot.lane.b32.xlu1 %v6612_v60, %s7270_s24  ;;  %v10696_v48 = vmul.f32 %v3720_v37, %v14398_v3  ;;  %v14415_v21 = vld [vmem:[#allocation20_spill] sm:$0xff] }
 0x377   : > { %14408 = vst [vmem:[#allocation28_spill] sm:$0xff] %v10645_v35  ;;  %6588 = vrot.lane.b32.xlu0 %v6582_v16, %s7273_s13  ;;  %v10657_v31 = vpack.i.bf16 %v10645_v35, %v10649_v46 }
 0x378   : > { %14414 = vst [vmem:[#allocation47_spill] sm:$0xff] %v10696_v48  ;;  %v6682_v9 = vpack.i.bf16 %v10608_v10, %v10696_v48 }
 0x379   : > { %14410 = vst [vmem:[#allocation36_spill] sm:$0xff] %v10657_v31 }
 0x37a   : > { %6618 = vrot.lane.b32.xlu1 %v6617_v42, %s7271_s30 }
 0x37b   : > { %6593 = vrot.lane.b32.xlu0 %v6592_v27, %s7275_s16 }
 0x37e   : > { %6628 = vrot.lane.b32.xlu1 %v6627_v0, %s7272_s10 }
 0x37f   : > { %6598 = vrot.lane.b32.xlu0 %v6592_v27, %s7276_s18 }
 0x382   : > { %6633 = vrot.lane.b32.xlu1 %v6627_v0, %s7273_s13  ;;  %v10717_v0 = vmul.f32 %v3722_v30, %v14402_v22  ;;  %v3723_v22 = vmax.f32 %v3367_v56, 0.0 }
 0x383   : > { %6608 = vrot.lane.b32.xlu0 %v6617_v42, %s7270_s24 }
 0x384   : > { %v6717_v12 = vpack.i.bf16 %v10624_v8, %v10717_v0  ;;  %v6927_v14 = vpack.i.bf16 %v10717_v0, %v10645_v35 }
 0x386   : > { %6638 = vrot.lane.b32.xlu1 %v6612_v60, %s7274_s15 }
 0x387   : > { %6623 = vrot.lane.b32.xlu0 %v6612_v60, %s7271_s30 }
 0x38a   : > { %v3435_v52 = vpop.f32.mrb[6].mxu0  ;;  %6648 = vrot.lane.b32.xlu1 %v6612_v60, %s7277_s19 }
 0x38b   : > { %v3436_v61 = vadd.f32 %v3435_v52, %v10591_v53  ;;  %v3437_v28 = vpop.f32.mrb[7].mxu0  ;;  %6643 = vrot.lane.b32.xlu0 %v6617_v42, %s7274_s15 }
 0x38c   : > { %v3438_v1 = vadd.f32 %v3437_v28, %v10591_v53  ;;  %v6697_v28 = vpack.i.bf16 %v10601_v63, %v10717_v0 }
 0x38d   : > { %v3702_v29 = vmax.f32 %v3436_v61, 0.0  ;;  %v3284_v61 = vadd.f32 %v10626_v59, %v10674_v17  ;;  %v6702_v59 = vpack.i.bf16 %v10630_v20, %v10696_v48 }
 0x38e   : > { %v3441_v7 = vpop.f32.mrb[8].mxu0  ;;  %6663 = vrot.lane.b32.xlu1 %v6662_v23, %s7274_s15  ;;  %v3703_v6 = vmax.f32 %v3438_v1, 0.0  ;;  %v10746_v1 = vmul.f32 %v3723_v22, %v14396_v62  ;;  %v6707_v22 = vpack.i.bf16 %v10678_v57, %v10717_v0 }
 0x38f   : > { %v10691_v11 = vmul.f32 %v3702_v29, %v14412_v19  ;;  %v3442_v36 = vadd.f32 %v3441_v7, %v10594_v44  ;;  %v3443_v38 = vpop.f32.mrb[9].mxu0  ;;  %6653 = vrot.lane.b32.xlu0 %v6617_v42, %s7277_s19  ;;  %v3695_v29 = vadd.f32 %v10633_v54, %v10674_v17 }
 0x390   : > { %v3444_v49 = vadd.f32 %v3443_v38, %v10594_v44  ;;  %v10707_v42 = vmul.f32 %v3703_v6, %v14415_v21  ;;  %14419 = vst [vmem:[#allocation33_spill] sm:$0xff] %v10746_v1 }
 0x391   : > { %14413 = vst [vmem:[#allocation35_spill] sm:$0xff] %v10691_v11  ;;  %v3713_v34 = vmax.f32 %v3442_v36, 0.0  ;;  %v6797_v60 = vpack.i.bf16 %v10630_v20, %v10691_v11 }
 0x392   : > { %v3714_v16 = vmax.f32 %v3444_v49, 0.0  ;;  %v10699_v32 = vpop.f32.mrb[10].mxu0  ;;  %6678 = vrot.lane.b32.xlu1 %v6662_v23, %s7277_s19  ;;  %14416 = vst [vmem:[#allocation6_spill] sm:$0xff] %v10707_v42  ;;  %v3721_v23 = vmax.f32 %v3284_v61, 0.0  ;;  %v14423_v61 = vld [vmem:[#allocation14_spill] sm:$0xff] }
 0x393   : > { %v10710_v3 = vmul.f32 %v3713_v34, %v14412_v19  ;;  %v10712_v27 = vpop.f32.mrb[11].mxu0  ;;  %6658 = vrot.lane.b32.xlu0 %v10642_v13, %s7274_s15 }
 0x394   : > { %v10720_v18 = vmul.f32 %v3714_v16, %v14415_v21  ;;  %v10755_v7 = vmul.f32 %v3721_v23, %v14400_v33  ;;  %v14421_v16 = vld [vmem:[#allocation13_spill] sm:$0xff] }
 0x395   : > { %14417 = vst [vmem:[#allocation30_spill] sm:$0xff] %v10710_v3  ;;  %v10728_v43 = vpack.i.bf16 %v10710_v3, %v10691_v11  ;;  %v6827_v52 = vpack.i.bf16 %v10707_v42, %v10710_v3 }
 0x396   : > { %14418 = vst [vmem:[#allocation10_spill] sm:$0xff] %v10720_v18  ;;  %6683 = vrot.lane.b32.xlu1 %v6682_v9, %s7270_s24  ;;  %14420 = vst [vmem:[#allocation45_spill] sm:$0xff] %v10755_v7  ;;  %v6737_v33 = vpack.i.bf16 %v10755_v7, %v10630_v20  ;;  %v6777_v37 = vpack.i.bf16 %v10612_v26, %v10755_v7 }
 0x397   : > { %6668 = vrot.lane.b32.xlu0 %v6667_v15, %s7275_s16 }
 0x39a   : > { %6698 = vrot.lane.b32.xlu1 %v6697_v28, %s7271_s30 }
 0x39b   : > { %6673 = vrot.lane.b32.xlu0 %v10642_v13, %s7277_s19  ;;  %v6732_v13 = vpack.i.bf16 %v10746_v1, %v10678_v57 }
 0x39e   : > { %6703 = vrot.lane.b32.xlu1 %v6702_v59, %s7273_s13 }
 0x39f   : > { %6688 = vrot.lane.b32.xlu0 %v6697_v28, %s7270_s24 }
 0x3a2   : > { %6733 = vrot.lane.b32.xlu1 %v6732_v13, %s7270_s24 }
 0x3a3   : > { %6693 = vrot.lane.b32.xlu0 %v6682_v9, %s7271_s30  ;;  %v6752_v9 = vpack.i.bf16 %v10612_v26, %v10746_v1 }
 0x3a4   : > { %v3601_v6 = vpop.f32.mrb[12].mxu0 }
 0x3a5   : > { %v3602_v62 = vadd.f32 %v3601_v6, %v10591_v53  ;;  %v3603_v36 = vpop.f32.mrb[13].mxu0 }
 0x3a6   : > { %v3604_v38 = vadd.f32 %v3603_v36, %v10591_v53  ;;  %6738 = vrot.lane.b32.xlu1 %v6737_v33, %s7271_s30 }
 0x3a7   : > { %v3706_v30 = vmax.f32 %v3602_v62, 0.0  ;;  %6708 = vrot.lane.b32.xlu0 %v6707_v22, %s7273_s13  ;;  %v6757_v22 = vpack.i.bf16 %v10717_v0, %v10755_v7 }
 0x3a8   : > { %v3707_v49 = vmax.f32 %v3604_v38, 0.0  ;;  %v10763_v34 = vpop.f32.mrb[14].mxu0 }
 0x3a9   : > { %v10768_v56 = vmul.f32 %v3706_v30, %v14421_v16  ;;  %v3609_v15 = vpop.f32.mrb[15].mxu0 }
 0x3aa   : > { %v10773_v23 = vmul.f32 %v3707_v49, %v14423_v61  ;;  %v3610_v59 = vadd.f32 %v3609_v15, %v10594_v44  ;;  %6753 = vrot.lane.b32.xlu1 %v6752_v9, %s7272_s10 }
 0x3ab   : > { %14422 = vst [vmem:[#allocation26_spill] sm:$0xff] %v10768_v56  ;;  %v10782_v6 = vpack.i.bf16 %v10720_v18, %v10768_v56  ;;  %6713 = vrot.lane.b32.xlu0 %v6697_v28, %s7275_s16  ;;  %v6767_v28 = vpack.i.bf16 %v10755_v7, %v10604_v45 }
 0x3ac   : > { %14424 = vst [vmem:[#allocation29_spill] sm:$0xff] %v10773_v23  ;;  %v3718_v62 = vmax.f32 %v3610_v59, 0.0  ;;  %v10784_v36 = vpop.f32.mrb[16].mxu0  ;;  %v10788_v38 = vpack.i.bf16 %v10773_v23, %v10768_v56  ;;  %v10792_v30 = vpack.i.bf16 %v10649_v46, %v10773_v23 }
 0x3ad   : > { %v10794_v49 = vpop.f32.mrb[17].mxu0 }
 0x3ae   : > { %14425 = vst [vmem:[#allocation27_spill] sm:$0xff] %v10788_v38  ;;  %14426 = vst [vmem:[#allocation24_spill] sm:$0xff] %v10792_v30  ;;  %v10797_v15 = vmul.f32 %v3718_v62, %v14423_v61  ;;  %6758 = vrot.lane.b32.xlu1 %v6757_v22, %s7274_s15  ;;  %v6722_v62 = vpack.i.bf16 %v10678_v57, %v10696_v48  ;;  %v3525_v22 = vadd.f32 %v10583_v41, %v10594_v44 }
 0x3af   : > { %6718 = vrot.lane.b32.xlu0 %v6717_v12, %s7276_s18  ;;  %v6782_v12 = vpack.i.bf16 %v10691_v11, %v10678_v57  ;;  %v6762_v41 = vpack.i.bf16 %v10746_v1, %v10696_v48 }
 0x3b0   : > { %14427 = vst [vmem:[#allocation49_spill] sm:$0xff] %v10797_v15  ;;  %v10805_v59 = vpack.i.bf16 %v10797_v15, %v10773_v23 }
 0x3b2   : > { %14428 = vst [vmem:[#allocation43_spill] sm:$0xff] %v10805_v59  ;;  %6768 = vrot.lane.b32.xlu1 %v6767_v28, %s7275_s16  ;;  %v6787_v28 = vpack.i.bf16 %v10691_v11, %v10746_v1 }
 0x3b3   : > { %6723 = vrot.lane.b32.xlu0 %v6722_v62, %s7276_s18  ;;  %v6747_v62 = vpack.i.bf16 %v10615_v2, %v10755_v7 }
 0x3b6   : > { %6778 = vrot.lane.b32.xlu1 %v6777_v37, %s7276_s18  ;;  %v3519_v37 = vadd.f32 %v10579_v5, %v10591_v53  ;;  %v14429_v5 = vld [vmem:[#allocation23_spill] sm:$0xff] }
 0x3b7   : > { %4473 = vrot.lane.b32.xlu0 %v10717_v0, %s7277_s19 }
 0x3ba   : > { %4467 = vrot.lane.b32.xlu1 %v10755_v7, %s7277_s19 }
 0x3bb   : > { %6728 = vrot.lane.b32.xlu0 %v6737_v33, %s7270_s24  ;;  %v3715_v33 = vmax.f32 %v3525_v22, 0.0  ;;  %v6772_v22 = vpack.i.bf16 %v10746_v1, %v10624_v8 }
 0x3bd   : > { %v10850_v9 = vmul.f32 %v3715_v33, %v14429_v5 }
 0x3be   : > { %6783 = vrot.lane.b32.xlu1 %v6782_v12, %s7272_s10  ;;  %v3704_v12 = vmax.f32 %v3519_v37, 0.0  ;;  %v3448_v37 = vadd.f32 %v10699_v32, %v10674_v17 }
 0x3bf   : > { %6743 = vrot.lane.b32.xlu0 %v6732_v13, %s7271_s30  ;;  %v6792_v13 = vpack.i.bf16 %v10696_v48, %v10691_v11  ;;  %14430 = vst [vmem:[#allocation50_spill] sm:$0xff] %v10850_v9 }
 0x3c0   : > { %v10853_v51 = vmul.f32 %v3704_v12, %v14429_v5  ;;  %v3724_v33 = vmax.f32 %v3448_v37, 0.0 }
 0x3c2   : > { %6788 = vrot.lane.b32.xlu1 %v6787_v28, %s7273_s13  ;;  %14431 = vst [vmem:[#allocation52_spill] sm:$0xff] %v10853_v51  ;;  %v10866_v28 = vpack.i.bf16 %v10850_v9, %v10853_v51  ;;  %v6947_v30 = vpack.i.bf16 %v10853_v51, %v10707_v42 }
 0x3c3   : > { %6748 = vrot.lane.b32.xlu0 %v6747_v62, %s7272_s10  ;;  %v3521_v62 = vadd.f32 %v10581_v25, %v10591_v53  ;;  %v14434_v25 = vld [vmem:[#allocation22_spill] sm:$0xff] }
 0x3c4   : > { %14432 = vst [vmem:[#allocation8_spill] sm:$0xff] %v10866_v28 }
 0x3c5   : > { %v3705_v32 = vmax.f32 %v3521_v62, 0.0  ;;  %v3527_v62 = vadd.f32 %v10585_v58, %v10594_v44 }
 0x3c6   : > { %6793 = vrot.lane.b32.xlu1 %v6792_v13, %s7275_s16  ;;  %v10881_v13 = vmul.f32 %v3724_v33, %v14412_v19  ;;  %v6832_v19 = vpack.i.bf16 %v10710_v3, %v10746_v1 }
 0x3c7   : > { %6763 = vrot.lane.b32.xlu0 %v6762_v41, %s7274_s15  ;;  %v3716_v58 = vmax.f32 %v3527_v62, 0.0 }
 0x3c8   : > { %14433 = vst [vmem:[#allocation51_spill] sm:$0xff] %v10881_v13  ;;  %v6842_v41 = vpack.i.bf16 %v10707_v42, %v10881_v13  ;;  %v6867_v33 = vpack.i.bf16 %v10678_v57, %v10881_v13 }
 0x3ca   : > { %6798 = vrot.lane.b32.xlu1 %v6797_v60, %s7276_s18  ;;  %v3531_v60 = vadd.f32 %v10587_v39, %v10674_v17  ;;  %v10890_v39 = vmul.f32 %v3705_v32, %v14434_v25 }
 0x3cb   : > { %6773 = vrot.lane.b32.xlu0 %v6772_v22, %s7275_s16  ;;  %v3450_v22 = vadd.f32 %v10712_v27, %v10674_v17 }
 0x3cc   : > { %v3726_v12 = vmax.f32 %v3531_v60, 0.0  ;;  %14435 = vst [vmem:[#allocation7_spill] sm:$0xff] %v10890_v39 }
 0x3cd   : > { %v3725_v37 = vmax.f32 %v3450_v22, 0.0 }
 0x3ce   : > { %6808 = vrot.lane.b32.xlu1 %v10866_v28, %s7270_s24  ;;  %v10893_v53 = vmul.f32 %v3726_v12, %v14429_v5  ;;  %v3533_v5 = vadd.f32 %v10589_v40, %v10674_v17  ;;  %v3608_v40 = vadd.f32 %v10763_v34, %v10594_v44  ;;  %v10941_v44 = vmul.f32 %v3716_v58, %v14434_v25 }
 0x3cf   : > { %6803 = vrot.lane.b32.xlu0 %v10728_v43, %s7270_s24  ;;  %v6897_v58 = vpack.i.bf16 %v10696_v48, %v10649_v46 }
 0x3d0   : > { %14436 = vst [vmem:[#allocation9_spill] sm:$0xff] %v10893_v53  ;;  %v3727_v60 = vmax.f32 %v3533_v5, 0.0  ;;  %v3717_v22 = vmax.f32 %v3608_v40, 0.0  ;;  %14441 = vst [vmem:[#allocation41_spill] sm:$0xff] %v10941_v44 }
 0x3d2   : > { %6813 = vrot.lane.b32.xlu1 %v10728_v43, %s7271_s30  ;;  %v10932_v12 = vmul.f32 %v3727_v60, %v14434_v25  ;;  %v10950_v62 = vmul.f32 %v3717_v22, %v14421_v16 }
 0x3d3   : > { %6818 = vrot.lane.b32.xlu0 %v10866_v28, %s7271_s30 }
 0x3d4   : > { %14439 = vst [vmem:[#allocation42_spill] sm:$0xff] %v10932_v12  ;;  %14442 = vst [vmem:[#allocation25_spill] sm:$0xff] %v10950_v62 }
 0x3d6   : > { %6828 = vrot.lane.b32.xlu1 %v6827_v52, %s7275_s16  ;;  %v10903_v52 = vpack.i.bf16 %v10890_v39, %v10893_v53 }
 0x3d7   : > { %6823 = vrot.lane.b32.xlu0 %v10728_v43, %s7274_s15 }
 0x3da   : > { %6843 = vrot.lane.b32.xlu1 %v6842_v41, %s7270_s24 }
 0x3db   : > { %6833 = vrot.lane.b32.xlu0 %v6832_v19, %s7276_s18 }
 0x3de   : > { %6858 = vrot.lane.b32.xlu1 %v10903_v52, %s7271_s30 }
 0x3df   : > { %6838 = vrot.lane.b32.xlu0 %v10728_v43, %s7277_s19  ;;  %v10923_v43 = vmul.f32 %v3725_v37, %v14415_v21  ;;  %v6882_v37 = vpack.i.bf16 %v10932_v12, %v10941_v44 }
 0x3e1   : > { %14438 = vst [vmem:[#allocation46_spill] sm:$0xff] %v10923_v43  ;;  %v6877_v21 = vpack.i.bf16 %v10923_v43, %v10720_v18 }
 0x3e2   : > { %6863 = vrot.lane.b32.xlu1 %v6842_v41, %s7274_s15 }
 0x3e3   : > { %6848 = vrot.lane.b32.xlu0 %v10903_v52, %s7270_s24 }
 0x3e4   : > { %v10918_v27 = vpop.permute.xlu1 %6603 }
 0x3e5   : > { %14437 = vst [vmem:[#allocation18_spill] sm:$0xff] %v10918_v27  ;;  %v10927_v32 = vpop.permute.xlu0 %6583 }
 0x3e6   : > { %6868 = vrot.lane.b32.xlu1 %v6867_v33, %s7275_s16 }
 0x3e7   : > { %6853 = vrot.lane.b32.xlu0 %v6842_v41, %s7271_s30 }
 0x3e8   : > { %v10934_v19 = vpop.permute.xlu1 %6613 }
 0x3e9   : > { %v10936_v5 = vpop.permute.xlu0 %6588 }
 0x3ea   : > { %14440 = vst [vmem:[#allocation48_spill] sm:$0xff] %v10936_v5  ;;  %6873 = vrot.lane.b32.xlu1 %v6842_v41, %s7276_s18  ;;  %v10962_v41 = vpack.i.bf16 %v10950_v62, %v10768_v56 }
 0x3eb   : > { %6878 = vrot.lane.b32.xlu0 %v6877_v21, %s7270_s24 }
 0x3ec   : > { %v10945_v34 = vpop.permute.xlu1 %6618  ;;  %14444 = vst [vmem:[#allocation17_spill] sm:$0xff] %v10962_v41 }
 0x3ed   : > { %v10952_v60 = vpop.permute.xlu0 %6593 }
 0x3ee   : > { %14443 = vst [vmem:[#allocation34_spill] sm:$0xff] %v10952_v60  ;;  %6883 = vrot.lane.b32.xlu1 %v6882_v37, %s7270_s24 }
 0x3ef   : > { %6893 = vrot.lane.b32.xlu0 %v6882_v37, %s7271_s30  ;;  %v3614_v37 = vadd.f32 %v10784_v36, %v10674_v17  ;;  %v3730_v36 = vmax.f32 %v3695_v29, 0.0 }
 0x3f0   : > { %v10956_v25 = vpop.permute.xlu1 %6628 }
 0x3f1   : > { %v10958_v33 = vpop.permute.xlu0 %6598 }
 0x3f2   : > { %6888 = vrot.lane.b32.xlu1 %v6877_v21, %s7271_s30  ;;  %v6902_v21 = vpack.i.bf16 %v10615_v2, %v10649_v46  ;;  %v6932_v46 = vpack.i.bf16 %v10645_v35, %v10755_v7  ;;  %v6972_v7 = vpack.i.bf16 %v10893_v53, %v10720_v18 }
 0x3f3   : > { %6908 = vrot.lane.b32.xlu0 %v10962_v41, %s7270_s24 }
 0x3f4   : > { %v10967_v40 = vpop.permute.xlu1 %6633 }
 0x3f5   : > { %v10971_v22 = vpop.permute.xlu0 %6608 }
 0x3f6   : > { %14445 = vst [vmem:[#allocation16_spill] sm:$0xff] %v10971_v22  ;;  %6898 = vrot.lane.b32.xlu1 %v6897_v58, %s7272_s10  ;;  %v3728_v58 = vmax.f32 %v3614_v37, 0.0 }
 0x3f7   : > { %6923 = vrot.lane.b32.xlu0 %v10657_v31, %s7271_s30 }
 0x3f8   : > { %v10978_v24 = vpop.permute.xlu1 %6638  ;;  %v11000_v54 = vmul.f32 %v3728_v58, %v14421_v16 }
 0x3f9   : > { %v10984_v47 = vpop.permute.xlu0 %6623 }
 0x3fa   : > { %6903 = vrot.lane.b32.xlu1 %v6902_v21, %s7273_s13  ;;  %14447 = vst [vmem:[#allocation19_spill] sm:$0xff] %v11000_v54 }
 0x3fb   : > { %6928 = vrot.lane.b32.xlu0 %v6927_v14, %s7272_s10  ;;  %v11005_v14 = vmul.f32 %v3730_v36, %v14407_v4  ;;  %v6942_v36 = vpack.i.bf16 %v10881_v13, %v10707_v42 }
 0x3fc   : > { %v10990_v50 = vpop.permute.xlu1 %6648 }
 0x3fd   : > { %v10992_v11 = vpop.permute.xlu0 %6643  ;;  %14449 = vst [vmem:[#allocation21_spill] sm:$0xff] %v11005_v14  ;;  %v6957_v10 = vpack.i.bf16 %v10612_v26, %v11005_v14 }
 0x3fe   : > { %14446 = vst [vmem:[#allocation15_spill] sm:$0xff] %v10992_v11  ;;  %6913 = vrot.lane.b32.xlu1 %v10657_v31, %s7270_s24  ;;  %v13902_v31 = vunpack.i.l.bf16 %v10934_v19 }
 0x3ff   : > { %6933 = vrot.lane.b32.xlu0 %v6932_v46, %s7273_s13  ;;  %v6937_v46 = vpack.i.bf16 %v10773_v23, %v11000_v54 }
 0x400   : > { %v11002_v21 = vpop.permute.xlu1 %6663 }
 0x401   : > { %14448 = vst [vmem:[#allocation11_spill] sm:$0xff] %v11002_v21  ;;  %v11007_v37 = vpop.permute.xlu0 %6653 }
 0x402   : > { %14450 = vst [vmem:[#allocation20_spill] sm:$0xff] %v11007_v37  ;;  %6918 = vrot.lane.b32.xlu1 %v10962_v41, %s7271_s30  ;;  %v6962_v41 = vpack.i.bf16 %v10853_v51, %v10923_v43 }
 0x403   : > { %3828 = vrot.lane.b32.xlu0 %v11005_v14, %s7270_s24 }
 0x404   : > { %v11013_v29 = vpop.permute.xlu1 %6678 }
 0x405   : > { %14451 = vst [vmem:[#allocation13_spill] sm:$0xff] %v11013_v29  ;;  %v11017_v16 = vpop.permute.xlu0 %6658 }
 0x406   : > { %6938 = vrot.lane.b32.xlu1 %v6937_v46, %s7270_s24  ;;  %v6952_v46 = vpack.i.bf16 %v11005_v14, %v10630_v20 }
 0x407   : > { %4479 = vrot.lane.b32.xlu0 %v10746_v1, %s7277_s19 }
 0x408   : > { %v11022_v4 = vpop.permute.xlu1 %6683 }
 0x409   : > { %v11024_v58 = vpop.permute.xlu0 %6668  ;;  %v6686_v57 = vunpack.i.h.bf16 %v11022_v4 }
 0x40a   : > { %3927 = vrot.lane.b32.xlu1 %v11005_v14, %s7271_s30 }
 0x40b   : > { %6943 = vrot.lane.b32.xlu0 %v6942_v36, %s7272_s10 }
 0x40c   : > { %v11031_v23 = vpop.permute.xlu1 %6698 }
 0x40d   : > { %v11033_v45 = vpop.permute.xlu0 %6673 }
 0x40e   : > { %4461 = vrot.lane.b32.xlu1 %v10696_v48, %s7277_s19 }
 0x40f   : > { %6953 = vrot.lane.b32.xlu0 %v6952_v46, %s7272_s10  ;;  %v13901_v46 = vunpack.i.h.bf16 %v10934_v19 }
 0x410   : > { %v11040_v8 = vpop.permute.xlu1 %6703 }
 0x411   : > { %v11042_v1 = vpop.permute.xlu0 %6688 }
 0x412   : > { %4485 = vrot.lane.b32.xlu1 %v10881_v13, %s7277_s19  ;;  %v13899_v36 = vunpack.i.h.bf16 %v11042_v1 }
 0x413   : > { %6958 = vrot.lane.b32.xlu0 %v6957_v10, %s7273_s13 }
 0x414   : > { %v11050_v20 = vpop.permute.xlu1 %6733  ;;  %v3851_v10 = vsel %vm14452_vm0, %v13902_v31, %v13899_v36  ;;  %v3616_v36 = vadd.f32 %v10794_v49, %v10674_v17  ;;  %v11103_v17 = vpack.i.bf16 %v10850_v9, %v10923_v43  ;;  %v7007_v49 = vpack.i.bf16 %v10890_v39, %v10850_v9 }
 0x415   : > { %v13900_v38 = vunpack.i.l.bf16 %v11050_v20  ;;  %v11057_v59 = vpop.permute.xlu0 %6693 }
 0x416   : > { %6948 = vrot.lane.b32.xlu1 %v6947_v30, %s7273_s13  ;;  %v6967_v30 = vpack.i.bf16 %v10710_v3, %v10890_v39  ;;  %v11121_v3 = vpack.i.bf16 %v10941_v44, %v10893_v53 }
 0x417   : > { %6963 = vrot.lane.b32.xlu0 %v6962_v41, %s7272_s10  ;;  %v3852_v42 = vsel %vm14453_vm3, %v13901_v46, %v13900_v38  ;;  %vm14525_vm3 = vmmov %vm14452_vm0 }
 0x418   : > { %v11075_v28 = vpop.permute.xlu1 %6738  ;;  %v5905_v41 = vpack.c.bf16 %v3852_v42, %v3851_v10  ;;  %v6982_v42 = vpack.i.bf16 %v10720_v18, %v10881_v13  ;;  %v6992_v10 = vpack.i.bf16 %v10850_v9, %v10932_v12  ;;  %v14461_v13 = vunpack.i.h.bf16 %v10936_v5 }
 0x419   : > { %v11079_v48 = vpop.permute.xlu0 %6708 }
 0x41a   : > { %14454 = vst [vmem:[#allocation14_spill] sm:$0xff] %v11079_v48  ;;  %6968 = vrot.lane.b32.xlu1 %v6967_v30, %s7272_s10  ;;  %5906 = vmatprep.subr.bf16.mxu1 %v5905_v41  ;;  %v3729_v41 = vmax.f32 %v3616_v36, 0.0 }
 0x41b   : > { %6973 = vrot.lane.b32.xlu0 %v6972_v7, %s7272_s10 }
 0x41c   : > { %v11087_v38 = vpop.permute.xlu1 %6753  ;;  %v11133_v26 = vmul.f32 %v3729_v41, %v14423_v61 }
 0x41d   : > { %14455 = vst [vmem:[#allocation23_spill] sm:$0xff] %v11087_v38  ;;  %v11089_v46 = vpop.permute.xlu0 %6713 }
 0x41e   : > { %6978 = vrot.lane.b32.xlu1 %v6967_v30, %s7273_s13  ;;  %14458 = vst [vmem:[#allocation54_spill] sm:$0xff] %v11133_v26  ;;  %v7002_v30 = vpack.i.bf16 %v10853_v51, %v10720_v18  ;;  %v11175_v2 = vpack.i.bf16 %v11133_v26, %v10797_v15  ;;  %v11187_v41 = vpack.i.bf16 %v11005_v14, %v11133_v26  ;;  %v14472_v15 = vunpack.i.h.bf16 %v10952_v60 }
 0x41f   : > { %6983 = vrot.lane.b32.xlu0 %v6982_v42, %s7273_s13 }
 0x420   : > { %v11099_v31 = vpop.permute.xlu1 %6758  ;;  %14465 = vst [vmem:[#allocation59_spill] sm:$0xff] %v11175_v2  ;;  %14468 = vst [vmem:[#allocation62_spill] sm:$0xff] %v11187_v41 }
 0x421   : > { %14456 = vst [vmem:[#allocation22_spill] sm:$0xff] %v11099_v31  ;;  %v11109_v42 = vpop.permute.xlu0 %6718 }
 0x422   : > { %14457 = vst [vmem:[#allocation53_spill] sm:$0xff] %v11109_v42  ;;  %6988 = vrot.lane.b32.xlu1 %v11103_v17, %s7273_s13 }
 0x423   : > { %6993 = vrot.lane.b32.xlu0 %v6992_v10, %s7272_s10  ;;  %v7012_v10 = vpack.i.bf16 %v10768_v56, %v10941_v44  ;;  %v14462_v56 = vunpack.i.l.bf16 %v10936_v5  ;;  %v14473_v5 = vunpack.i.l.bf16 %v10952_v60 }
 0x424   : > { %v11135_v63 = vpop.permute.xlu1 %6768 }
 0x425   : > { %14459 = vst [vmem:[#allocation55_spill] sm:$0xff] %v11135_v63  ;;  %v11143_v36 = vpop.permute.xlu0 %6723  ;;  %v11163_v61 = vsel %vm724_vm4, %v14462_v56, %v14461_v13  ;;  %v11179_v56 = vpack.i.bf16 %v11133_v26, %v11000_v54  ;;  %v11212_v14 = vsel %vm970_vm7, %v14473_v5, %v14472_v15  ;;  %v6626_v63 = vunpack.i.h.bf16 %v10984_v47  ;;  %v5084_v15 = vld [vmem:[%s13726_s4] sm:$0x77] }
 0x426   : > { %14460 = vst [vmem:[#allocation56_spill] sm:$0xff] %v11143_v36  ;;  %4006 = vrot.lane.b32.xlu1 %v10941_v44, %s7272_s10  ;;  %14463 = vst [vmem:[#allocation57_spill] sm:$0xff] %v11163_v61  ;;  %v6625_v5 = vunpack.i.l.bf16 %v10984_v47  ;;  %v14480_v47 = vunpack.i.l.bf16 %v10971_v22 }
 0x427   : > { %6998 = vrot.lane.b32.xlu0 %v11121_v3, %s7273_s13  ;;  %14466 = vst [vmem:[#allocation60_spill] sm:$0xff] %v11179_v56  ;;  %v14470_v56 = vunpack.i.l.bf16 %v10927_v32  ;;  %14474 = vst [vmem:[#allocation64_spill] sm:$0xff] %v11212_v14 }
 0x428   : > { %v11171_v35 = vpop.permute.xlu1 %6778 }
 0x429   : > { %14464 = vst [vmem:[#allocation58_spill] sm:$0xff] %v11171_v35  ;;  %v11183_v7 = vpop.permute.xlu0 %4473  ;;  %v14469_v35 = vunpack.i.h.bf16 %v10927_v32 }
 0x42a   : > { %14467 = vst [vmem:[#allocation61_spill] sm:$0xff] %v11183_v7  ;;  %4107 = vrot.lane.b32.xlu1 %v10932_v12, %s7273_s13  ;;  %v14478_v7 = vunpack.i.l.bf16 %v10934_v19 }
 0x42b   : > { %v11200_v13 = vsel %vm601_vm2, %v14470_v56, %v14469_v35  ;;  %7003 = vrot.lane.b32.xlu0 %v7002_v30, %s7274_s15  ;;  %v11232_v56 = vcombine.high %v5084_v15, %v5084_v15  ;;  %v3857_v35 = vsel %vm14481_vm12, %v14480_v47, %v6686_v57  ;;  %v14482_v15 = vunpack.i.h.bf16 %v11057_v59  ;;  %vm14566_vm12 = vmmov %vm14452_vm0 }
 0x42c   : > { %14471 = vst [vmem:[#allocation63_spill] sm:$0xff] %v11200_v13  ;;  %v11218_v26 = vpop.permute.xlu1 %4467  ;;  %v3854_v42 = vsel %vm14479_vm8, %v6686_v57, %v14478_v7  ;;  %v14483_v7 = vunpack.i.h.bf16 %v10934_v19  ;;  %v14488_v47 = vunpack.i.l.bf16 %v11075_v28  ;;  %vm14528_vm8 = vmmov %vm14452_vm0 }
 0x42d   : > { %14475 = vst [vmem:[#allocation65_spill] sm:$0xff] %v11218_v26  ;;  %v11223_v13 = vpop.permute.xlu0 %6728  ;;  %14477 = vst [vmem:[#allocation67_spill] sm:$0xff] %v11232_v56  ;;  %v3953_v14 = vsel %vm478_vm1, %v14482_v15, %v6625_v5  ;;  %5684 = vmatprep.mubr.msk.f32.mxu0 %vm5093_vm6, %v11232_v56  ;;  %5687 = vmatprep.mubr.msk.f32.mxu1 %vm5093_vm6, %v11232_v56 }
 0x42e   : > { %14476 = vst [vmem:[#allocation66_spill] sm:$0xff] %v11223_v13  ;;  %v6730_v41 = vunpack.i.l.bf16 %v11223_v13  ;;  %7008 = vrot.lane.b32.xlu1 %v7007_v49, %s7274_s15  ;;  %v6690_v49 = vunpack.i.l.bf16 %v11042_v1  ;;  %v11267_v19 = vsel %vm478_vm1, %v14488_v47, %v6626_v63  ;;  %v14490_v47 = vpack.i.bf16 %v10923_v43, %v10950_v62 }
 0x42f   : > { %7013 = vrot.lane.b32.xlu0 %v7012_v10, %s7274_s15  ;;  %v14486_v10 = vunpack.i.h.bf16 %v10971_v22  ;;  %v4591_v38 = vrot.slane %v3953_v14, 4 }
 0x430   : > { %v3855_v30 = vsel %vm14484_vm13, %v6730_v41, %v14483_v7  ;;  %v11254_v26 = vpop.permute.xlu1 %6783  ;;  %vm14570_vm13 = vmmov %vm14452_vm0 }
 0x431   : > { %14485 = vst [vmem:[#allocation68_spill] sm:$0xff] %v11254_v26  ;;  %v3858_v60 = vsel %vm14487_vm14, %v14486_v10, %v6730_v41  ;;  %v11269_v15 = vpop.permute.xlu0 %6743  ;;  %v5907_v26 = vpack.c.bf16 %v3855_v30, %v3854_v42  ;;  %v6700_v41 = vunpack.i.l.bf16 %v11031_v23  ;;  %v14489_v10 = vunpack.i.h.bf16 %v11031_v23  ;;  %vm14578_vm14 = vmmov %vm14452_vm0 }
 0x432   : > { %v5861_v7 = vpack.c.bf16 %v3858_v60, %v3857_v35  ;;  %v13939_v22 = vunpack.i.h.bf16 %v11269_v15  ;;  %7018 = vrot.lane.b32.xlu1 %v14490_v47, %s7274_s15  ;;  %v14491_v35 = vunpack.i.h.bf16 %v11223_v13  ;;  %v4604_v47 = vrot.slane %v11267_v19, 4 }
 0x433   : > { %v3950_v57 = vsel %vm478_vm1, %v6625_v5, %v14489_v10  ;;  %7023 = vrot.lane.b32.xlu0 %v11175_v2, %s7270_s24  ;;  %v14493_v5 = vunpack.i.h.bf16 %v11050_v20  ;;  %v14494_v42 = vunpack.i.l.bf16 %v11269_v15  ;;  %5908 = vmatpush1.bf16.msra.mxu1 %v5907_v26  ;;  %v14496_v2 = vunpack.i.h.bf16 %v11075_v28 }
 0x434   : > { %v3856_v30 = vsel %vm14492_vm15, %v14491_v35, %v6690_v49  ;;  %5862 = vmatprep.subr.bf16.mxu0 %v5861_v7  ;;  %v3952_v60 = vsel %vm478_vm1, %v6700_v41, %v13939_v22  ;;  %v11305_v7 = vpop.permute.xlu1 %6788  ;;  %v4592_v56 = vrot.slane %v3950_v57, 4  ;;  %v14498_v22 = vunpack.i.h.bf16 %v10918_v27  ;;  %vm14609_vm15 = vmmov %vm14452_vm0 }
 0x435   : > { %v3853_v10 = vsel %vm14452_vm0, %v6690_v49, %v14493_v5  ;;  %v3951_v35 = vsel %vm478_vm1, %v6626_v63, %v14494_v42  ;;  %14495 = vst [vmem:[#allocation69_spill] sm:$0xff] %v11305_v7  ;;  %v3955_v14 = vsel %vm478_vm1, %v14496_v2, %v6700_v41  ;;  %v4628_v49 = vrot.slane %v3952_v60, 4  ;;  %v11311_v5 = vpop.permute.xlu0 %6748 }
 0x436   : > { %v4606_v19 = vrot.slane %v3951_v35, 4  ;;  %14497 = vst [vmem:[#allocation70_spill] sm:$0xff] %v11311_v5  ;;  %v14499_v13 = vunpack.i.h.bf16 %v10958_v33  ;;  %v6641_v26 = vunpack.i.h.bf16 %v10978_v24  ;;  %v6751_v57 = vunpack.i.h.bf16 %v11311_v5  ;;  %4212 = vrot.lane.b32.xlu1 %v11000_v54, %s7274_s15 }
 0x437   : > { %v5042_v2 = vsel %vm1868_vm10, %v3856_v30, %v4591_v38  ;;  %v6640_v41 = vunpack.i.l.bf16 %v10978_v24  ;;  %v14501_v60 = vpack.i.bf16 %v10932_v12, %v10893_v53  ;;  %v14502_v35 = vunpack.i.l.bf16 %v10958_v33 }
 0x438   : > { %v11319_v63 = vsel %vm1093_vm9, %v14499_v13, %v14498_v22  ;;  %v4607_v42 = vsel %vm1868_vm10, %v4592_v56, %v4606_v19  ;;  %v5043_v22 = vsel %vm1868_vm10, %v3853_v10, %v4592_v56  ;;  %v4629_v13 = vsel %vm1868_vm10, %v4606_v19, %v4628_v49  ;;  %v11342_v7 = vpop.permute.xlu1 %6793 }
 0x439   : > { %14500 = vst [vmem:[#allocation71_spill] sm:$0xff] %v11319_v63  ;;  %7028 = vrot.lane.b32.xlu0 %v14501_v60, %s7274_s15  ;;  %v14503_v5 = vunpack.i.l.bf16 %v10918_v27  ;;  %v4626_v24 = vrot.slane %v3955_v14, 4  ;;  %14505 = vst [vmem:[#allocation73_spill] sm:$0xff] %v11342_v7  ;;  %v5909_v48 = vpack.c.bf16 %v4607_v42, %v5043_v22  ;;  %v4605_v60 = vsel %vm1868_vm10, %v4591_v38, %v4604_v47  ;;  %v11355_v19 = vpop.permute.xlu0 %6763 }
 0x43a   : > { %v14506_v53 = vunpack.i.l.bf16 %v11002_v21  ;;  %v14507_v10 = vunpack.i.h.bf16 %v11002_v21  ;;  %14509 = vst [vmem:[#allocation75_spill] sm:$0xff] %v11355_v19  ;;  %v14510_v14 = vunpack.i.l.bf16 %v10956_v25  ;;  %v14511_v22 = vunpack.i.h.bf16 %v10958_v33 }
 0x43b   : > { %v11340_v30 = vsel %vm1093_vm9, %v14503_v5, %v14502_v35  ;;  %v5911_v5 = vpack.c.bf16 %v4605_v60, %v5042_v2  ;;  %v14514_v60 = vpack.i.bf16 %v10890_v39, %v10853_v51  ;;  %5910 = vmatprep.subr.bf16.mxu1 %v5909_v48  ;;  %v6661_v21 = vunpack.i.h.bf16 %v11017_v16 }
 0x43c   : > { %14504 = vst [vmem:[#allocation72_spill] sm:$0xff] %v11340_v30  ;;  %v4247_v56 = vsel %vm847_vm5, %v6640_v41, %v14506_v53  ;;  %v11353_v49 = vsel %vm847_vm5, %v6641_v26, %v14507_v10  ;;  %v4049_v42 = vsel %vm601_vm2, %v6751_v57, %v14510_v14  ;;  %v14512_v53 = vmov %v14502_v35  ;;  %v14589_v30 = vld [vmem:[#allocation23_spill] sm:$0xff] }
 0x43d   : > { %14508 = vst [vmem:[#allocation74_spill] sm:$0xff] %v11353_v49  ;;  %v11368_v35 = vsel %vm1093_vm9, %v14512_v53, %v14511_v22  ;;  %v14513_v10 = vunpack.i.h.bf16 %v10927_v32  ;;  %7038 = vrot.lane.b32.xlu1 %v14514_v60, %s7276_s18  ;;  %v5913_v14 = vpack.c.bf16 %v4049_v42, %v4629_v13  ;;  %v6660_v22 = vunpack.i.l.bf16 %v11017_v16  ;;  %5912 = vmatpush1.bf16.msra.mxu1 %v5911_v5  ;;  %v11388_v13 = vpop.permute.xlu1 %6798  ;;  %v11394_v33 = vpop.permute.xlu0 %6773 }
 0x43e   : > { %v14515_v53 = vpack.i.bf16 %v10923_v43, %v10853_v51  ;;  %v4627_v42 = vsel %vm1868_vm10, %v4604_v47, %v4626_v24  ;;  %v13951_v16 = vunpack.i.h.bf16 %v11013_v29  ;;  %v13950_v38 = vunpack.i.l.bf16 %v11013_v29  ;;  %14516 = vst [vmem:[#allocation76_spill] sm:$0xff] %v11394_v33 }
 0x43f   : > { %v4052_v2 = vsel %vm601_vm2, %v14513_v10, %v6751_v57  ;;  %v4833_v10 = vrot.slane %v4247_v56, 4  ;;  %5914 = vmatprep.subr.bf16.mxu1 %v5913_v14  ;;  %v13948_v57 = vunpack.i.h.bf16 %v10992_v11  ;;  %v13949_v48 = vunpack.i.l.bf16 %v10992_v11 }
 0x440   : > { %7033 = vrot.lane.b32.xlu0 %v14515_v53, %s7275_s16  ;;  %v5915_v53 = vpack.c.bf16 %v4052_v2, %v4627_v42  ;;  %v6651_v47 = vunpack.i.h.bf16 %v10990_v50  ;;  %v6650_v24 = vunpack.i.l.bf16 %v10990_v50  ;;  %v11406_v14 = vsel %vm847_vm5, %v6661_v21, %v6641_v26 }
 0x441   : > { %7048 = vrot.lane.b32.xlu1 %v10782_v6, %s7275_s16  ;;  %v4250_v2 = vsel %vm847_vm5, %v6660_v22, %v6640_v41  ;;  %v4253_v42 = vsel %vm847_vm5, %v13949_v48, %v6660_v22  ;;  %v11420_v50 = vsel %vm847_vm5, %v13948_v57, %v6661_v21  ;;  %v11422_v26 = vpop.permute.xlu1 %6808  ;;  %v14518_v56 = vrot.slane %v11353_v49, 4  ;;  %v11447_v57 = vpop.permute.xlu0 %6803  ;;  %v14581_v49 = vld [vmem:[#allocation8_spill] sm:$0xff] }
 0x442   : > { %5916 = vmatpush1.bf16.msra.mxu1 %v5915_v53  ;;  %14517 = vst [vmem:[#allocation77_spill] sm:$0xff] %v11420_v50  ;;  %v11439_v21 = vsel %vm1216_vm11, %v6650_v24, %v13950_v38  ;;  %v13954_v48 = vunpack.i.h.bf16 %v11447_v57  ;;  %v13956_v60 = vunpack.i.l.bf16 %v11447_v57  ;;  %v4831_v38 = vrot.slane %v4253_v42, 4 }
 0x443   : > { %v11427_v41 = vsel %vm1868_vm10, %v4833_v10, %v14518_v56  ;;  %14521 = vst [vmem:[#allocation80_spill] sm:$0xff] %v11439_v21  ;;  %v11445_v56 = vsel %vm1216_vm11, %v6651_v47, %v13951_v16  ;;  %v14523_v16 = vpack.i.bf16 %v10932_v12, %v10850_v9  ;;  %v6675_v22 = vunpack.i.l.bf16 %v11033_v45 }
 0x444   : > { %7043 = vrot.lane.b32.xlu0 %v10903_v52, %s7275_s16  ;;  %14519 = vst [vmem:[#allocation78_spill] sm:$0xff] %v11427_v41  ;;  %v11431_v52 = vsel %vm1868_vm10, %v10717_v0, %v4833_v10  ;;  %14522 = vst [vmem:[#allocation81_spill] sm:$0xff] %v11445_v56  ;;  %v4832_v10 = vrot.slane %v4250_v2, 4  ;;  %v14527_v5 = vunpack.i.h.bf16 %v11042_v1  ;;  %v6676_v0 = vunpack.i.h.bf16 %v11033_v45 }
 0x445   : > { %14520 = vst [vmem:[#allocation79_spill] sm:$0xff] %v11431_v52  ;;  %7058 = vrot.lane.b32.xlu1 %v10782_v6, %s7276_s18  ;;  %v14524_v6 = vunpack.i.l.bf16 %v11050_v20  ;;  %v11480_v2 = vpop.permute.xlu1 %6813  ;;  %v14534_v11 = vunpack.i.h.bf16 %v11031_v23  ;;  %v14539_v23 = vld [vmem:[#allocation47_spill] sm:$0xff]  ;;  %v11555_v41 = vsel %vm1216_vm11, %v6675_v22, %v6650_v24  ;;  %v14565_v21 = vunpack.i.l.bf16 %v10945_v34 }
 0x446   : > { %v14535_v1 = vunpack.i.h.bf16 %v11480_v2  ;;  %14550 = vst [vmem:[#allocation91_spill] sm:$0xff] %v11555_v41  ;;  %v14577_v41 = vunpack.i.l.bf16 %v11447_v57  ;;  %v14611_v19 = vrot.slane %v11319_v63, 4 }
 0x447   : > { %v11470_v42 = vsel %vm14525_vm3, %v14524_v6, %v13954_v48  ;;  %v13958_v6 = vunpack.i.l.bf16 %v11480_v2  ;;  %v11487_v48 = vpop.permute.xlu0 %6818  ;;  %vm14632_vm3 = vmmov %vm14452_vm0 }
 0x448   : > { %7053 = vrot.lane.b32.xlu0 %v14523_v16, %s7275_s16  ;;  %14526 = vst [vmem:[#allocation82_spill] sm:$0xff] %v11470_v42  ;;  %v11478_v16 = vsel %vm14528_vm8, %v14527_v5, %v13956_v60  ;;  %v14530_v5 = vrot.slane %v11406_v14, 4  ;;  %v14532_v60 = vld [vmem:[#allocation45_spill] sm:$0xff]  ;;  %vm14634_vm8 = vmmov %vm14452_vm0 }
 0x449   : > { %14529 = vst [vmem:[#allocation83_spill] sm:$0xff] %v11478_v16  ;;  %7068 = vrot.lane.b32.xlu1 %v11121_v3, %s7276_s18  ;;  %v11500_v53 = vsel %vm1868_vm10, %v14532_v60, %v4832_v10  ;;  %v3947_v51 = vsel %vm478_vm1, %v14534_v11, %v13958_v6  ;;  %v14536_v3 = vunpack.i.l.bf16 %v11269_v15  ;;  %v14537_v60 = vrot.slane %v11420_v50, 4  ;;  %v11542_v42 = vpop.permute.xlu1 %6828  ;;  %v14588_v50 = vld [vmem:[#allocation14_spill] sm:$0xff] }
 0x44a   : > { %v11496_v45 = vsel %vm1868_vm10, %v4832_v10, %v14530_v5  ;;  %14533 = vst [vmem:[#allocation45_spill] sm:$0xff] %v11500_v53  ;;  %v11525_v5 = vsel %vm1868_vm10, %v14539_v23, %v4831_v38  ;;  %v14541_v11 = vunpack.i.l.bf16 %v11007_v37  ;;  %14546 = vst [vmem:[#allocation88_spill] sm:$0xff] %v11542_v42 }
 0x44b   : > { %14531 = vst [vmem:[#allocation84_spill] sm:$0xff] %v11496_v45  ;;  %v11514_v9 = vsel %vm478_vm1, %v14536_v3, %v14535_v1  ;;  %v11521_v10 = vsel %vm1868_vm10, %v4831_v38, %v14537_v60  ;;  %14540 = vst [vmem:[#allocation47_spill] sm:$0xff] %v11525_v5  ;;  %v14543_v1 = vunpack.i.h.bf16 %v11040_v8  ;;  %v14544_v3 = vunpack.i.h.bf16 %v10967_v40  ;;  %v11551_v52 = vpop.permute.xlu0 %6823 }
 0x44c   : > { %7063 = vrot.lane.b32.xlu0 %v11103_v17, %s7276_s18  ;;  %14538 = vst [vmem:[#allocation85_spill] sm:$0xff] %v11521_v10  ;;  %v11531_v6 = vsel %vm1216_vm11, %v14541_v11, %v6675_v22  ;;  %v4593_v60 = vrot.slane %v3947_v51, 4  ;;  %v13963_v16 = vrot.slane %v11514_v9, 4  ;;  %v14547_v38 = vunpack.i.h.bf16 %v11007_v37  ;;  %14549 = vst [vmem:[#allocation90_spill] sm:$0xff] %v11551_v52 }
 0x44d   : > { %14542 = vst [vmem:[#allocation86_spill] sm:$0xff] %v11531_v6  ;;  %v11539_v17 = vsel %vm724_vm4, %v14544_v3, %v14543_v1  ;;  %v11559_v51 = vsel %vm1216_vm11, %v6676_v0, %v6651_v47  ;;  %v14552_v1 = vunpack.i.l.bf16 %v11075_v28  ;;  %v14553_v3 = vunpack.i.h.bf16 %v10945_v34  ;;  %4309 = vrot.lane.b32.xlu1 %v10950_v62, %s7275_s16  ;;  %v11601_v29 = vpop.permute.xlu1 %6843 }
 0x44e   : > { %14545 = vst [vmem:[#allocation87_spill] sm:$0xff] %v11539_v17  ;;  %v11548_v23 = vsel %vm1216_vm11, %v14547_v38, %v6676_v0  ;;  %14551 = vst [vmem:[#allocation92_spill] sm:$0xff] %v11559_v51  ;;  %v11577_v47 = vsel %vm1868_vm10, %v4593_v60, %v13963_v16  ;;  %v14555_v0 = vunpack.i.h.bf16 %v11075_v28  ;;  %v14557_v11 = vpack.i.bf16 %v10941_v44, %v11000_v54 }
 0x44f   : > { %14548 = vst [vmem:[#allocation89_spill] sm:$0xff] %v11548_v23  ;;  %v11567_v38 = vsel %vm478_vm1, %v14553_v3, %v14552_v1  ;;  %14554 = vst [vmem:[#allocation93_spill] sm:$0xff] %v11577_v47  ;;  %v14556_v1 = vunpack.i.l.bf16 %v11057_v59  ;;  %v14558_v16 = vunpack.i.h.bf16 %v11024_v58  ;;  %v14559_v37 = vunpack.i.l.bf16 %v11024_v58  ;;  %v11613_v22 = vpop.permute.xlu0 %6833 }
 0x450   : > { %7073 = vrot.lane.b32.xlu0 %v14557_v11, %s7275_s16  ;;  %v4602_v24 = vrot.slane %v11567_v38, 4  ;;  %v6810_v5 = vunpack.i.l.bf16 %v11422_v26  ;;  %14561 = vst [vmem:[#allocation95_spill] sm:$0xff] %v11613_v22  ;;  %v14563_v11 = vunpack.i.h.bf16 %v10918_v27  ;;  %v14571_v27 = vpack.i.bf16 %v10950_v62, %v10932_v12 }
 0x451   : > { %v3958_v3 = vsel %vm478_vm1, %v14556_v1, %v14555_v0  ;;  %v11598_v28 = vsel %vm970_vm7, %v14559_v37, %v14558_v16  ;;  %v6846_v37 = vunpack.i.h.bf16 %v11601_v29  ;;  %v14562_v0 = vunpack.i.l.bf16 %v11388_v13  ;;  %4410 = vrot.lane.b32.xlu1 %v11000_v54, %s7276_s18 }
 0x452   : > { %14560 = vst [vmem:[#allocation94_spill] sm:$0xff] %v11598_v28  ;;  %v4624_v10 = vrot.slane %v3958_v3, 4  ;;  %v14564_v16 = vunpack.i.h.bf16 %v11057_v59  ;;  %v14572_v56 = vrot.slane %v11539_v17, 4  ;;  %v6820_v23 = vunpack.i.l.bf16 %v11487_v48  ;;  %v14600_v17 = vld [vmem:[#allocation53_spill] sm:$0xff] }
 0x453   : > { %v11622_v1 = vsel %vm1093_vm9, %v14563_v11, %v14562_v0  ;;  %v11637_v53 = vsel %vm14566_vm12, %v6846_v37, %v6810_v5  ;;  %v14568_v0 = vunpack.i.l.bf16 %v11601_v29  ;;  %v14569_v11 = vunpack.i.h.bf16 %v11050_v20  ;;  %v11678_v45 = vpop.permute.xlu0 %6838  ;;  %vm14638_vm12 = vmmov %vm14452_vm0 }
 0x454   : > { %v11633_v3 = vsel %vm478_vm1, %v14565_v21, %v14564_v16  ;;  %14567 = vst [vmem:[#allocation96_spill] sm:$0xff] %v11637_v53  ;;  %7078 = vrot.lane.b32.xlu0 %v14571_v27, %s7276_s18  ;;  %v14573_v21 = vrot.slane %v11163_v61, 4  ;;  %v14575_v20 = vunpack.i.h.bf16 %v11613_v22  ;;  %v11666_v27 = vpop.permute.xlu1 %6858  ;;  %14580 = vst [vmem:[#allocation99_spill] sm:$0xff] %v11678_v45  ;;  %v14606_v45 = vld [vmem:[#allocation55_spill] sm:$0xff]  ;;  %v14630_v63 = vunpack.i.l.bf16 %v11613_v22 }
 0x455   : > { %v3850_v38 = vsel %vm14570_vm13, %v14569_v11, %v14568_v0  ;;  %v14576_v0 = vunpack.i.h.bf16 %v11143_v36  ;;  %v13982_v51 = vunpack.i.h.bf16 %v11666_v27  ;;  %7088 = vrot.lane.b32.xlu1 %v14581_v49, %s7277_s19  ;;  %vm14640_vm13 = vmmov %vm14452_vm0 }
 0x456   : > { %v11654_v16 = vsel %vm1868_vm10, %v14573_v21, %v14572_v56  ;;  %v11672_v56 = vsel %vm14578_vm14, %v14577_v41, %v6846_v37  ;;  %v11685_v41 = vsel %vm1868_vm10, %v4602_v24, %v4624_v10  ;;  %v11688_v37 = vsel %vm1868_vm10, %v3850_v38, %v4593_v60  ;;  %v14599_v38 = vld [vmem:[#allocation63_spill] sm:$0xff]  ;;  %vm14647_vm14 = vmmov %vm14452_vm0 }
 0x457   : > { %14574 = vst [vmem:[#allocation97_spill] sm:$0xff] %v11654_v16  ;;  %v11664_v11 = vsel %vm1093_vm9, %v14576_v0, %v14575_v20  ;;  %14579 = vst [vmem:[#allocation98_spill] sm:$0xff] %v11672_v56  ;;  %v6776_v21 = vunpack.i.h.bf16 %v11394_v33  ;;  %v11695_v6 = vsel %vm478_vm1, %v6820_v23, %v13982_v51  ;;  %v14583_v20 = vld [vmem:[#allocation6_spill] sm:$0xff]  ;;  %v14586_v10 = vrot.slane %v11622_v1, 4  ;;  %v11727_v51 = vpop.permute.xlu0 %6848 }
 0x458   : > { %14582 = vst [vmem:[#allocation8_spill] sm:$0xff] %v11688_v37  ;;  %v14584_v0 = vpack.i.bf16 %v10720_v18, %v14583_v20  ;;  %v14585_v49 = vrot.slane %v11664_v11, 4  ;;  %v11714_v20 = vpop.permute.xlu1 %6863  ;;  %v14591_v18 = vunpack.i.h.bf16 %v11099_v31  ;;  %v14593_v33 = vunpack.i.h.bf16 %v11089_v46  ;;  %v14594_v16 = vld [vmem:[#allocation34_spill] sm:$0xff] }
 0x459   : > { %14590 = vst [vmem:[#allocation14_spill] sm:$0xff] %v11714_v20  ;;  %v14595_v37 = vunpack.i.h.bf16 %v14594_v16  ;;  %v14602_v47 = vunpack.i.h.bf16 %v11714_v20  ;;  %v14608_v20 = vunpack.i.h.bf16 %v11727_v51 }
 0x45a   : > { %7083 = vrot.lane.b32.xlu0 %v14584_v0, %s7277_s19  ;;  %v11706_v60 = vsel %vm1868_vm10, %v14586_v10, %v14585_v49  ;;  %v14592_v49 = vunpack.i.l.bf16 %v11099_v31  ;;  %v14597_v31 = vld [vmem:[#allocation17_spill] sm:$0xff] }
 0x45b   : > { %14587 = vst [vmem:[#allocation100_spill] sm:$0xff] %v11706_v60  ;;  %v11735_v0 = vsel %vm970_vm7, %v14595_v37, %v14593_v33  ;;  %7098 = vrot.lane.b32.xlu1 %v14597_v31, %s7277_s19  ;;  %v14601_v33 = vunpack.i.l.bf16 %v11089_v46  ;;  %v14603_v31 = vunpack.i.l.bf16 %v11551_v52  ;;  %v11774_v52 = vsel %vm14609_vm15, %v6810_v5, %v14608_v20  ;;  %vm14663_vm15 = vmmov %vm14452_vm0 }
 0x45c   : > { %v11723_v10 = vsel %vm847_vm5, %v14592_v49, %v14591_v18  ;;  %14596 = vst [vmem:[#allocation23_spill] sm:$0xff] %v11735_v0  ;;  %v14598_v18 = vrot.slane %v11633_v3, 4  ;;  %14610 = vst [vmem:[#allocation63_spill] sm:$0xff] %v11774_v52  ;;  %v14614_v0 = vunpack.i.h.bf16 %v11024_v58 }
 0x45d   : > { %v4348_v37 = vsel %vm970_vm7, %v14601_v33, %v6776_v21  ;;  %v11768_v33 = vpop.permute.xlu1 %6868 }
 0x45e   : > { %v11743_v49 = vsel %vm1868_vm10, %v14598_v18, %v4602_v24  ;;  %v11759_v24 = vsel %vm847_vm5, %v14603_v31, %v14602_v47  ;;  %v14605_v18 = vpack.i.bf16 %v10941_v44, %v10890_v39  ;;  %14607 = vst [vmem:[#allocation17_spill] sm:$0xff] %v11768_v33  ;;  %v6811_v47 = vunpack.i.h.bf16 %v11422_v26  ;;  %v11780_v39 = vpop.permute.xlu0 %6853  ;;  %v14613_v26 = vld [vmem:[#allocation9_spill] sm:$0xff] }
 0x45f   : > { %14604 = vst [vmem:[#allocation34_spill] sm:$0xff] %v11759_v24  ;;  %v14002_v61 = vunpack.i.l.bf16 %v11768_v33  ;;  %v11786_v44 = vsel %vm1868_vm10, %v4348_v37, %v14611_v19  ;;  %v6856_v5 = vunpack.i.h.bf16 %v11780_v39  ;;  %4497 = vrot.lane.b32.xlu1 %v14613_v26, %s7277_s19  ;;  %v14616_v37 = vunpack.i.l.bf16 %v11542_v42 }
 0x460   : > { %7093 = vrot.lane.b32.xlu0 %v14605_v18, %s7277_s19  ;;  %v6871_v18 = vunpack.i.h.bf16 %v11768_v33  ;;  %14612 = vst [vmem:[#allocation101_spill] sm:$0xff] %v11786_v44  ;;  %v14619_v26 = vunpack.i.l.bf16 %v11780_v39  ;;  %v6860_v31 = vunpack.i.l.bf16 %v11666_v27 }
 0x461   : > { %v4345_v24 = vsel %vm970_vm7, %v6776_v21, %v14002_v61  ;;  %v14618_v21 = vunpack.i.l.bf16 %v11480_v2 }
 0x462   : > { %v11801_v19 = vsel %vm970_vm7, %v14614_v0, %v6871_v18  ;;  %v11809_v20 = vsel %vm970_vm7, %v6871_v18, %v14616_v37  ;;  %v11821_v0 = vsel %vm478_vm1, %v6856_v5, %v6820_v23  ;;  %v11829_v37 = vpop.permute.xlu1 %6873  ;;  %v6879_v44 = vpop.permute.xlu0 %6878 }
 0x463   : > { %14615 = vst [vmem:[#allocation102_spill] sm:$0xff] %v11801_v19  ;;  %14617 = vst [vmem:[#allocation103_spill] sm:$0xff] %v11809_v20  ;;  %v11817_v61 = vsel %vm478_vm1, %v14618_v21, %v6856_v5  ;;  %v14011_v21 = vunpack.i.h.bf16 %v11829_v37  ;;  %v6881_v5 = vunpack.i.h.bf16 %v6879_v44  ;;  %v6880_v42 = vunpack.i.l.bf16 %v6879_v44  ;;  %4503 = vrot.lane.b32.xlu1 %v10932_v12, %s7277_s19  ;;  %v14626_v44 = vld [vmem:[#allocation43_spill] sm:$0xff]  ;;  %v14636_v20 = vld [vmem:[#allocation60_spill] sm:$0xff] }
 0x464   : > { %4491 = vrot.lane.b32.xlu0 %v10923_v43, %s7277_s19  ;;  %v14620_v43 = vunpack.i.h.bf16 %v11269_v15  ;;  %14621 = vst [vmem:[#allocation104_spill] sm:$0xff] %v11829_v37  ;;  %v14622_v15 = vrot.slane %v11622_v1, 4  ;;  %v14627_v1 = vrot.slane %v11514_v9, 4  ;;  %v14629_v12 = vunpack.i.l.bf16 %v11829_v37 }
 0x465   : > { %v11873_v9 = vsel %vm14632_vm3, %v6880_v42, %v6811_v47  ;;  %vm14687_vm3 = vmmov %vm14452_vm0 }
 0x466   : > { %v3949_v18 = vsel %vm478_vm1, %v14620_v43, %v14619_v26  ;;  %v11840_v43 = vsel %vm1868_vm10, %v4345_v24, %v14622_v15  ;;  %v6850_v26 = vunpack.i.l.bf16 %v11727_v51  ;;  %v4594_v15 = vrot.slane %v11817_v61, 4  ;;  %14633 = vst [vmem:[#allocation107_spill] sm:$0xff] %v11873_v9 }
 0x467   : > { %v4630_v19 = vrot.slane %v3949_v18, 4  ;;  %14623 = vst [vmem:[#allocation105_spill] sm:$0xff] %v11840_v43  ;;  %v14624_v18 = vunpack.i.l.bf16 %v11388_v13  ;;  %7108 = vrot.lane.b32.xlu1 %v14636_v20, %s7271_s30  ;;  %v14650_v43 = vunpack.i.h.bf16 %v14606_v45 }
 0x468   : > { %7103 = vrot.lane.b32.xlu0 %v14626_v44, %s7271_s30  ;;  %v11879_v61 = vsel %vm14634_vm8, %v6881_v5, %v6850_v26  ;;  %vm14711_vm8 = vmmov %vm14452_vm0 }
 0x469   : > { %v11849_v33 = vsel %vm1093_vm9, %v14624_v18, %v14011_v21  ;;  %v11858_v24 = vsel %vm1868_vm10, %v14627_v1, %v4630_v19  ;;  %v4444_v18 = vsel %vm1093_vm9, %v14630_v63, %v14629_v12  ;;  %v14631_v21 = vunpack.i.l.bf16 %v11601_v29  ;;  %v11875_v19 = vpop.permute.xlu1 %6883  ;;  %v11884_v29 = vpop.permute.xlu0 %6893 }
 0x46a   : > { %14625 = vst [vmem:[#allocation106_spill] sm:$0xff] %v11849_v33  ;;  %14628 = vst [vmem:[#allocation43_spill] sm:$0xff] %v11858_v24  ;;  %v4991_v1 = vrot.slane %v4444_v18, 4  ;;  %v14017_v12 = vunpack.i.h.bf16 %v11875_v19  ;;  %v6885_v63 = vunpack.i.l.bf16 %v11875_v19  ;;  %v14637_v18 = vunpack.i.h.bf16 %v11447_v57 }
 0x46b   : > { %v3847_v33 = vsel %vm14452_vm0, %v14631_v21, %v6881_v5  ;;  %14635 = vst [vmem:[#allocation108_spill] sm:$0xff] %v11884_v29  ;;  %v14641_v21 = vrot.slane %v11664_v11, 4  ;;  %v14656_v57 = vunpack.i.l.bf16 %v11780_v39  ;;  %v14661_v39 = vld [vmem:[#allocation58_spill] sm:$0xff] }
 0x46c   : > { %v11895_v5 = vsel %vm14638_vm12, %v14637_v18, %v6880_v42  ;;  %v3841_v23 = vsel %vm14640_vm13, %v6850_v26, %v14017_v12  ;;  %4509 = vrot.lane.b32.xlu0 %v11000_v54, %s7277_s19  ;;  %v11911_v53 = vsel %vm1868_vm10, %v3847_v33, %v4594_v15  ;;  %v14644_v42 = vunpack.i.h.bf16 %v11884_v29  ;;  %vm14714_vm12 = vmmov %vm14452_vm0 }
 0x46d   : > { %14639 = vst [vmem:[#allocation60_spill] sm:$0xff] %v11895_v5  ;;  %v11906_v37 = vsel %vm1868_vm10, %v14641_v21, %v4991_v1  ;;  %14643 = vst [vmem:[#allocation110_spill] sm:$0xff] %v11911_v53  ;;  %v14645_v26 = vunpack.i.l.bf16 %v11884_v29  ;;  %v14646_v12 = vunpack.i.h.bf16 %v11487_v48  ;;  %v6889_v1 = vpop.permute.xlu1 %6888  ;;  %v11931_v33 = vsel %vm14647_vm14, %v6811_v47, %v6885_v63  ;;  %v11934_v56 = vpop.permute.xlu0 %6908  ;;  %v14651_v47 = vld [vmem:[#allocation27_spill] sm:$0xff] }
 0x46e   : > { %14642 = vst [vmem:[#allocation109_spill] sm:$0xff] %v11906_v37  ;;  %v11917_v18 = vsel %vm478_vm1, %v6860_v31, %v14644_v42  ;;  %14648 = vst [vmem:[#allocation111_spill] sm:$0xff] %v11931_v33  ;;  %v6891_v42 = vunpack.i.h.bf16 %v6889_v1  ;;  %v6890_v9 = vunpack.i.l.bf16 %v6889_v1  ;;  %v14649_v5 = vunpack.i.l.bf16 %v11089_v46  ;;  %7118 = vrot.lane.b32.xlu1 %v14651_v47, %s7273_s13  ;;  %v14684_v33 = vld [vmem:[#allocation66_spill] sm:$0xff] }
 0x46f   : > { %v11925_v11 = vsel %vm478_vm1, %v14646_v12, %v14645_v26  ;;  %v14652_v1 = vrot.slane %v11695_v6, 4  ;;  %v14654_v37 = vunpack.i.h.bf16 %v11487_v48  ;;  %v14655_v21 = vunpack.i.h.bf16 %v11480_v2  ;;  %vm14723_vm13 = vmmov %vm14452_vm0 }
 0x470   : > { %v4351_v12 = vsel %vm970_vm7, %v14650_v43, %v14649_v5  ;;  %v3943_v5 = vsel %vm478_vm1, %v6891_v42, %v6860_v31  ;;  %7113 = vrot.lane.b32.xlu0 %v14651_v47, %s7272_s10  ;;  %v14658_v31 = vrot.slane %v11723_v10, 4  ;;  %v14659_v2 = vrot.slane %v11406_v14, 4  ;;  %vm14733_vm14 = vmmov %vm14452_vm0 }
 0x471   : > { %v11951_v60 = vsel %vm1868_vm10, %v3841_v23, %v14652_v1  ;;  %v11957_v43 = vsel %vm478_vm1, %v6890_v9, %v14654_v37  ;;  %v3945_v26 = vsel %vm478_vm1, %v14655_v21, %v6890_v9  ;;  %v3946_v23 = vsel %vm478_vm1, %v14656_v57, %v6891_v42  ;;  %v11972_v52 = vpop.permute.xlu1 %6898  ;;  %v11996_v14 = vpop.permute.xlu0 %6923 }
 0x472   : > { %14653 = vst [vmem:[#allocation27_spill] sm:$0xff] %v11951_v60  ;;  %v4610_v48 = vrot.slane %v3945_v26, 4  ;;  %v4612_v37 = vrot.slane %v11957_v43, 4  ;;  %v4634_v1 = vrot.slane %v3943_v5, 4  ;;  %14657 = vst [vmem:[#allocation112_spill] sm:$0xff] %v11972_v52  ;;  %v11979_v9 = vsel %vm1868_vm10, %v14659_v2, %v14658_v31 }
 0x473   : > { %14660 = vst [vmem:[#allocation113_spill] sm:$0xff] %v11979_v9  ;;  %v14662_v57 = vunpack.i.h.bf16 %v11934_v56  ;;  %v14665_v26 = vunpack.i.l.bf16 %v11934_v56  ;;  %v14666_v47 = vunpack.i.h.bf16 %v11727_v51  ;;  %14668 = vst [vmem:[#allocation115_spill] sm:$0xff] %v11996_v14  ;;  %v14669_v43 = vrot.slane %v11368_v35, 4 }
 0x474   : > { %v6780_v31 = vunpack.i.l.bf16 %v14661_v39  ;;  %v4632_v2 = vrot.slane %v3946_v23, 4  ;;  %7123 = vrot.lane.b32.xlu0 %v14636_v20, %s7272_s10  ;;  %v14675_v23 = vrot.slane %v11925_v11, 4  ;;  %v14696_v53 = vunpack.i.l.bf16 %v11996_v14 }
 0x475   : > { %v11986_v42 = vsel %vm14663_vm15, %v6885_v63, %v14662_v57  ;;  %v11994_v10 = vsel %vm14452_vm0, %v14666_v47, %v14665_v26  ;;  %v12001_v5 = vsel %vm1868_vm10, %v4351_v12, %v14669_v43  ;;  %v14671_v57 = vld [vmem:[#allocation49_spill] sm:$0xff]  ;;  %v12011_v26 = vsel %vm1868_vm10, %v4612_v37, %v4634_v1  ;;  %v12036_v47 = vpop.permute.xlu1 %6903  ;;  %vm14735_vm15 = vmmov %vm14452_vm0 }
 0x476   : > { %14664 = vst [vmem:[#allocation58_spill] sm:$0xff] %v11986_v42  ;;  %14667 = vst [vmem:[#allocation114_spill] sm:$0xff] %v11994_v10  ;;  %v14672_v51 = vpack.i.bf16 %v14671_v57, %v10950_v62  ;;  %v12018_v12 = vsel %vm1868_vm10, %v4594_v15, %v4610_v48  ;;  %v14676_v43 = vrot.slane %v11695_v6, 4  ;;  %v14678_v1 = vunpack.i.l.bf16 %v14594_v16  ;;  %v12044_v42 = vpop.permute.xlu0 %6928 }
 0x477   : > { %14670 = vst [vmem:[#allocation116_spill] sm:$0xff] %v12001_v5  ;;  %14673 = vst [vmem:[#allocation117_spill] sm:$0xff] %v12011_v26  ;;  %v14685_v26 = vunpack.i.h.bf16 %v14684_v33  ;;  %v14688_v10 = vunpack.i.h.bf16 %v11143_v36  ;;  %v14689_v6 = vunpack.i.h.bf16 %v14661_v39  ;;  %v14690_v33 = vld [vmem:[#allocation59_spill] sm:$0xff] }
 0x478   : > { %7128 = vrot.lane.b32.xlu1 %v14672_v51, %s7272_s10  ;;  %14674 = vst [vmem:[#allocation118_spill] sm:$0xff] %v12018_v12  ;;  %v12025_v63 = vsel %vm1868_vm10, %v14676_v43, %v14675_v23  ;;  %v14679_v51 = vunpack.i.l.bf16 %v14606_v45  ;;  %14680 = vst [vmem:[#allocation120_spill] sm:$0xff] %v12036_v47  ;;  %v14682_v23 = vld [vmem:[#allocation68_spill] sm:$0xff]  ;;  %v14695_v12 = vunpack.i.l.bf16 %v10945_v34 }
 0x479   : > { %14677 = vst [vmem:[#allocation119_spill] sm:$0xff] %v12025_v63  ;;  %14683 = vst [vmem:[#allocation68_spill] sm:$0xff] %v12044_v42  ;;  %v12060_v43 = vsel %vm1093_vm9, %v14689_v6, %v14688_v10  ;;  %v14693_v10 = vunpack.i.h.bf16 %v10945_v34  ;;  %v14694_v6 = vunpack.i.h.bf16 %v11996_v14  ;;  %v14700_v14 = vunpack.i.l.bf16 %v14589_v30  ;;  %v12110_v60 = vpop.permute.xlu1 %6913 }
 0x47a   : > { %v12033_v21 = vsel %vm970_vm7, %v14679_v51, %v14678_v1  ;;  %v14686_v1 = vunpack.i.l.bf16 %v11022_v4  ;;  %14702 = vst [vmem:[#allocation59_spill] sm:$0xff] %v12110_v60  ;;  %v6915_v34 = vunpack.i.l.bf16 %v12110_v60  ;;  %v14706_v63 = vunpack.i.h.bf16 %v14589_v30 }
 0x47b   : > { %v12082_v16 = vsel %vm478_vm1, %v14694_v6, %v14693_v10  ;;  %v14699_v10 = vpack.i.bf16 %v11000_v54, %v10950_v62  ;;  %v4595_v54 = vrot.slane %v11821_v0, 4  ;;  %v12118_v6 = vpop.permute.xlu0 %6933  ;;  %v14705_v62 = vunpack.i.l.bf16 %v14682_v23  ;;  %v14707_v0 = vld [vmem:[#allocation36_spill] sm:$0xff] }
 0x47c   : > { %v3859_v51 = vsel %vm14687_vm3, %v14686_v1, %v14685_v26  ;;  %7138 = vrot.lane.b32.xlu1 %v14690_v33, %s7273_s13  ;;  %v12068_v26 = vsel %vm1868_vm10, %v4610_v48, %v4632_v2  ;;  %v14692_v1 = vunpack.i.l.bf16 %v11143_v36  ;;  %v3959_v48 = vsel %vm478_vm1, %v14696_v53, %v14695_v12  ;;  %14704 = vst [vmem:[#allocation121_spill] sm:$0xff] %v12118_v6  ;;  %vm14920_vm3 = vmmov %vm14452_vm0 }
 0x47d   : > { %14691 = vst [vmem:[#allocation66_spill] sm:$0xff] %v12068_v26  ;;  %v14697_v2 = vunpack.i.l.bf16 %v10967_v40  ;;  %7133 = vrot.lane.b32.xlu0 %v14699_v10, %s7273_s13  ;;  %v14701_v53 = vunpack.i.h.bf16 %v12044_v42  ;;  %v14709_v26 = vld [vmem:[#allocation16_spill] sm:$0xff]  ;;  %v12156_v15 = vpop.permute.xlu1 %6918 }
 0x47e   : > { %v12074_v20 = vsel %vm1093_vm9, %v14692_v1, %v6780_v31  ;;  %v14698_v1 = vunpack.i.h.bf16 %v12036_v47  ;;  %v14710_v28 = vunpack.i.l.bf16 %v14709_v26  ;;  %v14712_v9 = vunpack.i.h.bf16 %v14709_v26  ;;  %v14716_v26 = vld [vmem:[#allocation69_spill] sm:$0xff]  ;;  %14717 = vst [vmem:[#allocation36_spill] sm:$0xff] %v12156_v15 }
 0x47f   : > { %v4051_v12 = vsel %vm601_vm2, %v14701_v53, %v14700_v14  ;;  %v4050_v14 = vsel %vm601_vm2, %v14706_v63, %v14705_v62  ;;  %v4636_v53 = vrot.slane %v11917_v18, 4  ;;  %v14713_v62 = vunpack.i.h.bf16 %v12110_v60 }
 0x480   : > { %v12096_v36 = vsel %vm724_vm4, %v14698_v1, %v14697_v2  ;;  %v14703_v2 = vrot.slane %v11633_v3, 4  ;;  %7148 = vrot.lane.b32.xlu1 %v14707_v0, %s7274_s15  ;;  %v3860_v5 = vsel %vm14711_vm8, %v6915_v34, %v14710_v28  ;;  %v14044_v3 = vunpack.i.h.bf16 %v14716_v26  ;;  %v14724_v28 = vld [vmem:[#allocation24_spill] sm:$0xff]  ;;  %vm14922_vm8 = vmmov %vm14452_vm0 }
 0x481   : > { %v3861_v18 = vsel %vm14714_vm12, %v14713_v62, %v14712_v9  ;;  %7143 = vrot.lane.b32.xlu0 %v14626_v44, %s7274_s15  ;;  %v12168_v62 = vpop.permute.xlu0 %3828  ;;  %vm15011_vm12 = vmmov %vm14452_vm0 }
 0x482   : > { %v5041_v1 = vsel %vm1868_vm10, %v3859_v51, %v14703_v2  ;;  %v4589_v51 = vrot.slane %v3959_v48, 4  ;;  %v14708_v2 = vrot.slane %v12096_v36, 4  ;;  %v12146_v48 = vsel %vm1868_vm10, %v4595_v54, %v4612_v37  ;;  %14721 = vst [vmem:[#allocation69_spill] sm:$0xff] %v12168_v62 }
 0x483   : > { %v5863_v60 = vpack.c.bf16 %v3861_v18, %v3860_v5  ;;  %v14719_v37 = vunpack.i.l.bf16 %v10956_v25  ;;  %v14046_v5 = vunpack.i.l.bf16 %v12156_v15  ;;  %v14722_v18 = vunpack.i.l.bf16 %v11022_v4 }
 0x484   : > { %v5054_v10 = vsel %vm1868_vm10, %v4051_v12, %v14708_v2  ;;  %v14715_v12 = vunpack.i.l.bf16 %v14600_v17  ;;  %7158 = vrot.lane.b32.xlu1 %v14724_v28, %s7275_s16  ;;  %v14726_v4 = vunpack.i.l.bf16 %v11884_v29  ;;  %v6901_v29 = vunpack.i.h.bf16 %v11972_v52 }
 0x485   : > { %v5917_v63 = vpack.c.bf16 %v5054_v10, %v4050_v14  ;;  %v14718_v10 = vunpack.i.h.bf16 %v14682_v23  ;;  %v3862_v9 = vsel %vm14723_vm13, %v12168_v62, %v14722_v18  ;;  %5864 = vmatpush1.bf16.msra.mxu0 %v5863_v60  ;;  %v14728_v60 = vrot.slane %v12082_v16, 4  ;;  %vm15019_vm13 = vmmov %vm14452_vm0 }
 0x486   : > { %v12152_v2 = vsel %vm1093_vm9, %v6780_v31, %v14715_v12  ;;  %v14043_v31 = vunpack.i.h.bf16 %v12156_v15  ;;  %v5865_v12 = vpack.c.bf16 %v11743_v49, %v5041_v1  ;;  %v14777_v62 = vunpack.i.h.bf16 %v10967_v40  ;;  %v14830_v15 = vld [vmem:[#allocation44_spill] sm:$0xff] }
 0x487   : > { %v12165_v14 = vsel %vm601_vm2, %v14719_v37, %v14718_v10  ;;  %5918 = vmatprep.subr.bf16.mxu1 %v5917_v63  ;;  %v12181_v10 = vsel %vm1868_vm10, %v11879_v61, %v4595_v54  ;;  %v14725_v63 = vrot.slane %v11925_v11, 4  ;;  %v4601_v54 = vsel %vm1868_vm10, %v4589_v51, %v14728_v60  ;;  %v14729_v11 = vld [vmem:[#allocation62_spill] sm:$0xff]  ;;  %v12218_v60 = vpop.permute.xlu1 %6938 }
 0x488   : > { %14720 = vst [vmem:[#allocation16_spill] sm:$0xff] %v12165_v14  ;;  %v12195_v37 = vsel %vm478_vm1, %v14726_v4, %v14043_v31  ;;  %v5040_v61 = vsel %vm1868_vm10, %v3862_v9, %v4589_v51  ;;  %7153 = vrot.lane.b32.xlu0 %v14729_v11, %s7274_s15  ;;  %5866 = vmatprep.subr.bf16.mxu0 %v5865_v12  ;;  %14732 = vst [vmem:[#allocation62_spill] sm:$0xff] %v12218_v60  ;;  %v14049_v12 = vunpack.i.l.bf16 %v12118_v6  ;;  %s6117_s15 = smul.u32 44, %s15100_s25 }
 0x489   : > { %v12186_v49 = vsel %vm1868_vm10, %v14725_v63, %v4636_v53  ;;  %14727 = vst [vmem:[#allocation24_spill] sm:$0xff] %v12195_v37  ;;  %v14730_v53 = vunpack.i.l.bf16 %v10967_v40  ;;  %v14731_v63 = vunpack.i.h.bf16 %v11666_v27  ;;  %v14048_v51 = vrot.slane %v12195_v37, 4  ;;  %7168 = vrot.lane.b32.xlu1 %v14729_v11, %s7275_s16 }
 0x48a   : > { %v5867_v9 = vpack.c.bf16 %v4601_v54, %v5040_v61  ;;  %v6941_v1 = vunpack.i.h.bf16 %v12218_v60  ;;  %v14737_v61 = vunpack.i.l.bf16 %v11934_v56 }
 0x48b   : > { %v12209_v18 = vsel %vm724_vm4, %v14730_v53, %v14044_v3  ;;  %v3935_v4 = vsel %vm478_vm1, %v14731_v63, %v14046_v5  ;;  %v14047_v53 = vunpack.i.l.bf16 %v12218_v60  ;;  %v12223_v3 = vpop.permute.xlu0 %4479  ;;  %v14734_v5 = vunpack.i.h.bf16 %v11875_v19  ;;  %v14739_v63 = vld [vmem:[#allocation48_spill] sm:$0xff] }
 0x48c   : > { %v4597_v31 = vrot.slane %v3935_v4, 4  ;;  %5868 = vmatpush1.bf16.msra.mxu0 %v5867_v9  ;;  %v12236_v4 = vsel %vm14733_vm14, %v6941_v1, %v6915_v34  ;;  %7163 = vrot.lane.b32.xlu0 %v14724_v28, %s7276_s18  ;;  %v14736_v9 = vpack.c.bf16 %v14599_v38, %v11685_v41  ;;  %v12253_v34 = vsel %vm14452_vm0, %v14737_v61, %v6941_v1  ;;  %v12264_v28 = vpop.permute.xlu1 %3927  ;;  %v14744_v1 = vld [vmem:[#allocation70_spill] sm:$0xff] }
 0x48d   : > { %v3838_v11 = vsel %vm14735_vm15, %v14734_v5, %v14047_v53  ;;  %v14738_v19 = vunpack.i.h.bf16 %v12036_v47  ;;  %v14740_v27 = vunpack.i.h.bf16 %v14739_v63  ;;  %14741 = vst [vmem:[#allocation48_spill] sm:$0xff] %v12264_v28  ;;  %v6750_v61 = vunpack.i.l.bf16 %v14744_v1  ;;  %7178 = vrot.lane.b32.xlu1 %v14690_v33, %s7276_s18 }
 0x48e   : > { %5870 = vmatprep.subr.bf16.mxu0 %v14736_v9  ;;  %v12269_v41 = vsel %vm1868_vm10, %v4597_v31, %v14048_v51  ;;  %v12272_v38 = vsel %vm1868_vm10, %v3838_v11, %v4597_v31  ;;  %v14745_v9 = vunpack.i.l.bf16 %v11040_v8  ;;  %v14747_v11 = vunpack.i.l.bf16 %v14716_v26 }
 0x48f   : > { %v12262_v5 = vsel %vm724_vm4, %v14740_v27, %v14738_v19  ;;  %14742 = vst [vmem:[#allocation122_spill] sm:$0xff] %v12269_v41  ;;  %14743 = vst [vmem:[#allocation123_spill] sm:$0xff] %v12272_v38  ;;  %v14746_v19 = vunpack.i.l.bf16 %v11057_v59  ;;  %v12286_v51 = vpop.permute.xlu0 %6943  ;;  %v14748_v1 = vunpack.i.l.bf16 %v14588_v50  ;;  %v14749_v31 = vunpack.i.l.bf16 %v10927_v32 }
 0x490   : > { %v4156_v27 = vsel %vm724_vm4, %v14745_v9, %v14049_v12  ;;  %v14750_v38 = vunpack.i.l.bf16 %v11972_v52  ;;  %v14753_v9 = vld [vmem:[#allocation28_spill] sm:$0xff]  ;;  %v14755_v32 = vunpack.i.h.bf16 %v12044_v42 }
 0x491   : > { %v3961_v53 = vsel %vm478_vm1, %v12264_v28, %v14746_v19  ;;  %v12296_v54 = vsel %vm724_vm4, %v14748_v1, %v14747_v11  ;;  %v4057_v19 = vsel %vm601_vm2, %v6901_v29, %v6750_v61  ;;  %v14751_v11 = vunpack.i.l.bf16 %v14739_v63  ;;  %7188 = vrot.lane.b32.xlu1 %v14626_v44, %s7277_s19 }
 0x492   : > { %v4622_v59 = vrot.slane %v3961_v53, 4  ;;  %v4058_v41 = vsel %vm601_vm2, %v14750_v38, %v14749_v31  ;;  %v14752_v1 = vunpack.i.l.bf16 %v12036_v47  ;;  %v14754_v12 = vpack.i.bf16 %v14753_v9, %v14671_v57  ;;  %v12336_v47 = vpop.permute.xlu1 %4461 }
 0x493   : > { %v4054_v38 = vsel %vm601_vm2, %v6750_v61, %v14755_v32  ;;  %v4745_v31 = vrot.slane %v4156_v27, 4  ;;  %v14756_v63 = vrot.slane %v12082_v16, 4  ;;  %14759 = vst [vmem:[#allocation70_spill] sm:$0xff] %v12336_v47  ;;  %v12340_v37 = vpop.permute.xlu0 %6953  ;;  %v14761_v16 = vrot.slane %v12209_v18, 4 }
 0x494   : > { %v12316_v53 = vsel %vm724_vm4, %v14752_v1, %v14751_v11  ;;  %7173 = vrot.lane.b32.xlu0 %v14754_v12, %s7275_s16  ;;  %v14757_v11 = vunpack.i.h.bf16 %v12286_v51  ;;  %v14758_v1 = vunpack.i.l.bf16 %v14589_v30  ;;  %14760 = vst [vmem:[#allocation124_spill] sm:$0xff] %v12340_v37  ;;  %v14768_v44 = vunpack.i.h.bf16 %v12340_v37 }
 0x495   : > { %v4623_v52 = vsel %vm1868_vm10, %v14756_v63, %v4622_v59  ;;  %v14762_v59 = vld [vmem:[#allocation75_spill] sm:$0xff]  ;;  %v14766_v63 = vld [vmem:[#allocation57_spill] sm:$0xff] }
 0x496   : > { %v4048_v33 = vsel %vm601_vm2, %v14758_v1, %v14757_v11  ;;  %v5871_v61 = vpack.c.bf16 %v4058_v41, %v4623_v52  ;;  %v6955_v1 = vunpack.i.l.bf16 %v12340_v37  ;;  %v4710_v52 = vrot.slane %v12316_v53, 4 }
 0x497   : > { %v12345_v27 = vsel %vm1868_vm10, %v4048_v33, %v14761_v16  ;;  %v14763_v41 = vrot.slane %v12262_v5, 4  ;;  %v14764_v16 = vld [vmem:[#allocation21_spill] sm:$0xff]  ;;  %v14767_v57 = vrot.slane %v14766_v63, 4  ;;  %v4060_v12 = vsel %vm601_vm2, %v14768_v44, %v6901_v29 }
 0x498   : > { %v14765_v32 = vpack.i.bf16 %v14764_v16, %v14753_v9  ;;  %5872 = vmatpush1.bf16.msra.mxu0 %v5871_v61  ;;  %v14769_v53 = vunpack.i.h.bf16 %v14589_v30  ;;  %v14771_v9 = vunpack.i.h.bf16 %v10956_v25  ;;  %v14775_v29 = vunpack.i.l.bf16 %v12044_v42 }
 0x499   : > { %v5053_v33 = vsel %vm1868_vm10, %v4054_v38, %v14763_v41  ;;  %v5052_v11 = vsel %vm1868_vm10, %v4057_v19, %v14767_v57  ;;  %v12373_v41 = vpop.permute.xlu1 %4485  ;;  %v5051_v28 = vsel %vm1868_vm10, %v4060_v12, %v4710_v52  ;;  %v14781_v12 = vld [vmem:[#allocation22_spill] sm:$0xff] }
 0x49a   : > { %7183 = vrot.lane.b32.xlu0 %v14765_v32, %s7276_s18  ;;  %v4053_v38 = vsel %vm601_vm2, %v6955_v1, %v14769_v53  ;;  %14770 = vst [vmem:[#allocation57_spill] sm:$0xff] %v12373_v41  ;;  %v4056_v61 = vsel %vm601_vm2, %v14771_v9, %v6955_v1  ;;  %v14772_v32 = vld [vmem:[#allocation87_spill] sm:$0xff]  ;;  %v14774_v19 = vmov %v14771_v9  ;;  %v12388_v53 = vpop.permute.xlu0 %6958  ;;  %v14778_v9 = vunpack.i.h.bf16 %v12118_v6 }
 0x49b   : > { %v14773_v63 = vrot.slane %v14772_v32, 4  ;;  %v4059_v30 = vsel %vm601_vm2, %v14775_v29, %v14774_v19  ;;  %v5919_v44 = vpack.c.bf16 %v5053_v33, %v4053_v38  ;;  %14776 = vst [vmem:[#allocation87_spill] sm:$0xff] %v12388_v53  ;;  %v5873_v37 = vpack.c.bf16 %v5052_v11, %v4056_v61  ;;  %v14779_v32 = vld [vmem:[#allocation54_spill] sm:$0xff]  ;;  %v14784_v19 = vld [vmem:[#allocation97_spill] sm:$0xff] }
 0x49c   : > { %v6961_v25 = vunpack.i.h.bf16 %v12388_v53  ;;  %v14060_v1 = vunpack.i.l.bf16 %v12388_v53  ;;  %4515 = vrot.lane.b32.xlu1 %v14779_v32, %s7277_s19  ;;  %v5875_v33 = vpack.c.bf16 %v5051_v28, %v4059_v30  ;;  %v4749_v38 = vrot.slane %v12296_v54, 4  ;;  %v5085_v54 = vld [vmem:[%s13727_s5] sm:$0x7] }
 0x49d   : > { %v4746_v57 = vsel %vm1868_vm10, %v14773_v63, %v4745_v31  ;;  %v4158_v31 = vsel %vm724_vm4, %v14778_v9, %v14777_v62  ;;  %v14780_v11 = vunpack.i.h.bf16 %v14762_v59  ;;  %v14782_v61 = vunpack.i.h.bf16 %v14781_v12  ;;  %v14783_v63 = vld [vmem:[#allocation90_spill] sm:$0xff]  ;;  %5874 = vmatprep.subr.bf16.mxu0 %v5873_v37  ;;  %5920 = vmatpush1.bf16.msra.mxu1 %v5919_v44 }
 0x49e   : > { %7193 = vrot.lane.b32.xlu0 %v14707_v0, %s7277_s19  ;;  %v5877_v29 = vpack.c.bf16 %v4746_v57, %v14784_v19  ;;  %v6801_v28 = vunpack.i.h.bf16 %v11388_v13  ;;  %v14785_v30 = vunpack.i.h.bf16 %v11040_v8  ;;  %v14787_v0 = vunpack.i.l.bf16 %v11040_v8  ;;  %v12432_v57 = vpop.permute.xlu1 %6948  ;;  %5876 = vmatpush1.bf16.msra.mxu0 %v5875_v33  ;;  %v12434_v32 = vpop.permute.xlu0 %6963 }
 0x49f   : > { %v12408_v40 = vsel %vm847_vm5, %v14782_v61, %v14780_v11  ;;  %v14786_v11 = vunpack.i.h.bf16 %v14588_v50  ;;  %v4721_v13 = vrot.slane %v4158_v31, 4  ;;  %v14788_v8 = vunpack.i.h.bf16 %v14606_v45 }
 0x4a0   : > { %v4152_v9 = vsel %vm724_vm4, %v14785_v30, %v6961_v25  ;;  %v4159_v37 = vsel %vm724_vm4, %v14060_v1, %v14787_v0  ;;  %5878 = vmatprep.subr.bf16.mxu0 %v5877_v29  ;;  %v14790_v44 = vunpack.i.l.bf16 %v14781_v12  ;;  %v14791_v33 = vunpack.i.l.bf16 %v14762_v59  ;;  %5088 = vperm.xlu1 %6581, %v5085_v54   ;;  %v14795_v1 = vld [vmem:[#allocation11_spill] sm:$0xff] }
 0x4a1   : > { %v4149_v61 = vsel %vm724_vm4, %v6961_v25, %v14786_v11  ;;  %v4725_v19 = vrot.slane %v4152_v9, 4  ;;  %v4743_v30 = vrot.slane %v4159_v37, 4  ;;  %v14789_v11 = vunpack.i.h.bf16 %v11342_v7 }
 0x4a2   : > { %v4727_v62 = vrot.slane %v4149_v61, 4  ;;  %v4255_v31 = vsel %vm847_vm5, %v14791_v33, %v14790_v44  ;;  %v14792_v9 = vunpack.i.l.bf16 %v14588_v50  ;;  %v14793_v29 = vunpack.i.l.bf16 %v12118_v6  ;;  %v14799_v33 = vld [vmem:[#allocation14_spill] sm:$0xff]  ;;  %4521 = vrot.lane.b32.xlu0 %v14764_v16, %s7277_s19  ;;  %v12485_v16 = vpop.permute.xlu0 %6973  ;;  %s269_s19 = scalar_lea.vmem %s13728_s6, %s6117_s15 }
 0x4a3   : > { %v4354_v0 = vsel %vm970_vm7, %v14789_v11, %v14788_v8  ;;  %v14794_v37 = vunpack.i.h.bf16 %v14783_v63  ;;  %v14796_v25 = vunpack.i.h.bf16 %v14795_v1  ;;  %v14797_v8 = vunpack.i.l.bf16 %v14783_v63 }
 0x4a4   : > { %v4153_v61 = vsel %vm724_vm4, %v14793_v29, %v14792_v9  ;;  %v14798_v11 = vunpack.i.l.bf16 %v14795_v1  ;;  %v4744_v54 = vsel %vm1868_vm10, %v4721_v13, %v4743_v30  ;;  %v4868_v9 = vrot.slane %v12408_v40, 4  ;;  %v14800_v29 = vld [vmem:[#allocation76_spill] sm:$0xff] }
 0x4a5   : > { %v12461_v12 = vsel %vm847_vm5, %v14796_v25, %v14794_v37  ;;  %v12475_v25 = vpop.permute.xlu1 %6968  ;;  %v14802_v37 = vrot.slane %v12096_v36, 4  ;;  %v4750_v6 = vsel %vm1868_vm10, %v4727_v62, %v4749_v38  ;;  %v4747_v45 = vrot.slane %v4153_v61, 4 }
 0x4a6   : > { %v4244_v44 = vsel %vm847_vm5, %v14798_v11, %v14797_v8  ;;  %14801 = vst [vmem:[#allocation22_spill] sm:$0xff] %v12475_v25  ;;  %v14803_v8 = vunpack.i.h.bf16 %v14661_v39  ;;  %v4722_v40 = vsel %vm1868_vm10, %v4710_v52, %v4721_v13  ;;  %v14804_v30 = vrot.slane %v12262_v5, 4 }
 0x4a7   : > { %v4728_v1 = vsel %vm1868_vm10, %v14802_v37, %v4727_v62  ;;  %v14805_v36 = vunpack.i.h.bf16 %v14600_v17  ;;  %v4848_v38 = vrot.slane %v12461_v12, 4  ;;  %v4834_v39 = vrot.slane %v4244_v44, 4 }
 0x4a8   : > { %v4449_v11 = vsel %vm1093_vm9, %v6801_v28, %v14803_v8  ;;  %v4726_v53 = vsel %vm1868_vm10, %v14804_v30, %v4725_v19  ;;  %v5879_v62 = vpack.c.bf16 %v4744_v54, %v4722_v40  ;;  %v14806_v8 = vunpack.i.l.bf16 %v11613_v22  ;;  %v14835_v22 = vld [vmem:[#allocation74_spill] sm:$0xff] }
 0x4a9   : > { %v4452_v37 = vsel %vm1093_vm9, %v14805_v36, %v6801_v28  ;;  %v14807_v61 = vunpack.i.l.bf16 %v14600_v17  ;;  %v14808_v5 = vunpack.i.l.bf16 %v14799_v33  ;;  %v14809_v13 = vunpack.i.h.bf16 %v14762_v59  ;;  %v14813_v59 = vld [vmem:[#allocation72_spill] sm:$0xff] }
 0x4aa   : > { %v5921_v42 = vpack.c.bf16 %v4750_v6, %v4728_v1  ;;  %v4748_v28 = vsel %vm1868_vm10, %v4725_v19, %v4747_v45  ;;  %v4864_v12 = vrot.slane %v4255_v31, 4  ;;  %v4965_v44 = vrot.slane %v4449_v11, 4  ;;  %5880 = vmatpush1.bf16.msra.mxu0 %v5879_v62  ;;  %v14815_v45 = vld [vmem:[#allocation5_spill] sm:$0xff]  ;;  %v12527_v31 = vpop.permute.xlu0 %6983  ;;  %v14819_v11 = vld [vmem:[#allocation71_spill] sm:$0xff] }
 0x4ab   : > { %v4447_v52 = vsel %vm1093_vm9, %v14807_v61, %v14806_v8  ;;  %v4246_v30 = vsel %vm847_vm5, %v14809_v13, %v14808_v5  ;;  %v14810_v54 = vunpack.i.l.bf16 %v11024_v58  ;;  %v14811_v40 = vunpack.i.l.bf16 %v14800_v29  ;;  %v12517_v61 = vpop.permute.xlu1 %6978  ;;  %v14816_v19 = vld [vmem:[#allocation37_spill] sm:$0xff] }
 0x4ac   : > { %v5923_v8 = vpack.c.bf16 %v4748_v28, %v4726_v53  ;;  %14812 = vst [vmem:[#allocation90_spill] sm:$0xff] %v12517_v61  ;;  %v4963_v17 = vrot.slane %v4452_v37, 4  ;;  %v14814_v5 = vrot.slane %v14813_v59, 4  ;;  %5922 = vmatprep.subr.bf16.mxu1 %v5921_v42  ;;  %v14817_v58 = vpack.c.bf16 %v14815_v45, %v14816_v19  ;;  %v14821_v37 = vld [vmem:[#allocation61_spill] sm:$0xff]  ;;  %v14824_v19 = vld [vmem:[#allocation99_spill] sm:$0xff] }
 0x4ad   : > { %v12515_v36 = vsel %vm970_vm7, %v14811_v40, %v14810_v54  ;;  %v14818_v1 = vrot.slane %v12060_v43, 4  ;;  %v14820_v62 = vrot.slane %v14819_v11, 4  ;;  %v14822_v13 = vld [vmem:[#allocation65_spill] sm:$0xff]  ;;  %v4989_v42 = vrot.slane %v4447_v52, 4  ;;  %v14825_v11 = vld [vmem:[#allocation32_spill] sm:$0xff] }
 0x4ae   : > { %v12522_v6 = vsel %vm1868_vm10, %v4354_v0, %v14814_v5  ;;  %5882 = vmatprep.subr.bf16.mxu0 %v14817_v58  ;;  %v12540_v0 = vsel %vm1216_vm11, %v14822_v13, %v14821_v37  ;;  %v4870_v28 = vrot.slane %v4246_v30, 4  ;;  %5924 = vmatpush1.bf16.msra.mxu1 %v5923_v8  ;;  %v4849_v54 = vsel %vm1868_vm10, %v4834_v39, %v4848_v38  ;;  %v14823_v40 = vld [vmem:[#allocation33_spill] sm:$0xff] }
 0x4af   : > { %v12534_v53 = vsel %vm1868_vm10, %v14820_v62, %v14818_v1  ;;  %v5065_v5 = vsel %vm1868_vm10, %v14823_v40, %v4834_v39  ;;  %v14826_v62 = vld [vmem:[#allocation31_spill] sm:$0xff]  ;;  %v14828_v52 = vunpack.i.l.bf16 %v11342_v7  ;;  %v14829_v30 = vunpack.i.h.bf16 %v11089_v46  ;;  %v14831_v39 = vld [vmem:[#allocation12_spill] sm:$0xff]  ;;  %v12561_v45 = vpop.permute.xlu1 %6988  ;;  %v14833_v58 = vld [vmem:[#allocation77_spill] sm:$0xff] }
 0x4b0   : > { %v14827_v29 = vpack.c.bf16 %v14825_v11, %v14826_v62  ;;  %v14832_v40 = vpack.c.bf16 %v14830_v15, %v14831_v39  ;;  %v14834_v60 = vrot.slane %v14833_v58, 4  ;;  %v14836_v11 = vrot.slane %v14835_v22, 4  ;;  %v14841_v58 = vld [vmem:[#allocation45_spill] sm:$0xff]  ;;  %v12583_v22 = vpop.permute.xlu0 %6993 }
 0x4b1   : > { %v4343_v8 = vsel %vm970_vm7, %v14829_v30, %v14828_v52  ;;  %v14837_v62 = vrot.slane %v11368_v35, 4  ;;  %v14838_v52 = vrot.slane %v12152_v2, 4  ;;  %v14839_v30 = vld [vmem:[#allocation88_spill] sm:$0xff]  ;;  %14843 = vst [vmem:[#allocation97_spill] sm:$0xff] %v12583_v22 }
 0x4b2   : > { %5926 = vmatprep.subr.bf16.mxu1 %v14827_v29  ;;  %5884 = vmatpush1.bf16.msra.mxu0 %v14832_v40  ;;  %v4865_v1 = vsel %vm1868_vm10, %v14834_v60, %v4864_v12  ;;  %v4869_v29 = vsel %vm1868_vm10, %v14836_v11, %v4868_v9  ;;  %v14074_v39 = vunpack.i.h.bf16 %v14839_v30  ;;  %v14840_v40 = vld [vmem:[#allocation84_spill] sm:$0xff]  ;;  %v5929_v60 = vpack.c.bf16 %v4849_v54, %v5065_v5 }
 0x4b3   : > { %v12572_v46 = vsel %vm1868_vm10, %v14837_v62, %v4965_v44  ;;  %v12577_v15 = vsel %vm1868_vm10, %v4965_v44, %v14838_v52  ;;  %v14842_v24 = vpack.c.bf16 %v14840_v40, %v14841_v58  ;;  %v14844_v9 = vrot.slane %v14813_v59, 4  ;;  %v14846_v44 = vld [vmem:[#allocation34_spill] sm:$0xff]  ;;  %v14848_v40 = vld [vmem:[#allocation39_spill] sm:$0xff] }
 0x4b4   : > { %v14845_v12 = vrot.slane %v12074_v20, 4  ;;  %v6950_v62 = vunpack.i.l.bf16 %v12432_v57  ;;  %v14847_v52 = vld [vmem:[#allocation38_spill] sm:$0xff]  ;;  %v4871_v54 = vsel %vm1868_vm10, %v4848_v38, %v4870_v28  ;;  %v14850_v59 = vrot.slane %v12060_v43, 4 }
 0x4b5   : > { %5886 = vmatprep.subr.bf16.mxu0 %v14842_v24  ;;  %v12588_v35 = vsel %vm1868_vm10, %v14844_v9, %v4963_v17  ;;  %v14849_v24 = vpack.c.bf16 %v14847_v52, %v14848_v40  ;;  %v6945_v20 = vunpack.i.l.bf16 %v12286_v51  ;;  %v14851_v58 = vunpack.i.l.bf16 %v14824_v19  ;;  %v14852_v9 = vld [vmem:[#allocation13_spill] sm:$0xff] }
 0x4b6   : > { %v12593_v2 = vsel %vm1868_vm10, %v4963_v17, %v14845_v12  ;;  %v12604_v5 = vsel %vm1868_vm10, %v14850_v59, %v4989_v42  ;;  %v5891_v17 = vpack.c.bf16 %v12033_v21, %v4865_v1  ;;  %v14853_v12 = vunpack.i.l.bf16 %v14852_v9  ;;  %v14856_v1 = vld [vmem:[#allocation85_spill] sm:$0xff]  ;;  %v14860_v59 = vld [vmem:[#allocation23_spill] sm:$0xff] }
 0x4b7   : > { %5928 = vmatpush1.bf16.msra.mxu1 %v14849_v24  ;;  %v14854_v38 = vunpack.i.h.bf16 %v14824_v19  ;;  %v14855_v43 = vunpack.i.h.bf16 %v14852_v9  ;;  %v6951_v28 = vunpack.i.h.bf16 %v12432_v57  ;;  %v6966_v21 = vunpack.i.h.bf16 %v12434_v32  ;;  %v12629_v24 = vpop.permute.xlu1 %4006 }
 0x4b8   : > { %5930 = vmatprep.subr.bf16.mxu1 %v5929_v60  ;;  %v12614_v52 = vsel %vm1216_vm11, %v14853_v12, %v14851_v58  ;;  %v14857_v60 = vld [vmem:[#allocation47_spill] sm:$0xff]  ;;  %14859 = vst [vmem:[#allocation11_spill] sm:$0xff] %v12629_v24  ;;  %v5935_v58 = vpack.c.bf16 %v14860_v59, %v4869_v29  ;;  %v5897_v12 = vpack.c.bf16 %v12577_v15, %v12572_v46  ;;  %v14861_v9 = vunpack.i.l.bf16 %v11342_v7  ;;  %v14866_v15 = vld [vmem:[#allocation106_spill] sm:$0xff]  ;;  %v14879_v7 = vld [vmem:[#allocation105_spill] sm:$0xff] }
 0x4b9   : > { %v12622_v42 = vsel %vm1216_vm11, %v14855_v43, %v14854_v38  ;;  %v14858_v40 = vpack.c.bf16 %v14856_v1, %v14857_v60  ;;  %v14862_v38 = vld [vmem:[#allocation64_spill] sm:$0xff]  ;;  %v14863_v43 = vld [vmem:[#allocation113_spill] sm:$0xff]  ;;  %v5933_v1 = vpack.c.bf16 %v4343_v8, %v4871_v54  ;;  %v12645_v60 = vpop.permute.xlu0 %6998  ;;  %v5899_v29 = vpack.c.bf16 %v12593_v2, %v12588_v35  ;;  %v14872_v2 = vld [vmem:[#allocation51_spill] sm:$0xff] }
 0x4ba   : > { %v12640_v57 = vsel %vm970_vm7, %v14861_v9, %v14074_v39  ;;  %v14864_v11 = vpack.c.bf16 %v14862_v38, %v14863_v43  ;;  %14865 = vst [vmem:[#allocation14_spill] sm:$0xff] %v12645_v60  ;;  %v14867_v59 = vunpack.i.h.bf16 %v14716_v26  ;;  %v14868_v39 = vld [vmem:[#allocation78_spill] sm:$0xff]  ;;  %v14869_v38 = vld [vmem:[#allocation79_spill] sm:$0xff]  ;;  %v14871_v35 = vrot.slane %v14846_v44, 4  ;;  %v14875_v8 = vld [vmem:[#allocation116_spill] sm:$0xff] }
 0x4bb   : > { %5888 = vmatpush1.bf16.msra.mxu0 %v14858_v40  ;;  %v12673_v43 = vsel %vm1216_vm11, %v14821_v37, %v12223_v3  ;;  %v12694_v37 = vsel %vm601_vm2, %v6945_v20, %v6966_v21  ;;  %v6986_v40 = vunpack.i.h.bf16 %v12527_v31  ;;  %v14876_v46 = vld [vmem:[#allocation94_spill] sm:$0xff] }
 0x4bc   : > { %5890 = vmatprep.subr.bf16.mxu0 %v14864_v11  ;;  %v12656_v9 = vsel %vm724_vm4, %v14867_v59, %v6950_v62  ;;  %v14870_v11 = vpack.c.bf16 %v14868_v39, %v14869_v38  ;;  %v12667_v54 = vsel %vm1868_vm10, %v14872_v2, %v14871_v35  ;;  %v12679_v39 = vsel %vm1216_vm11, %v12336_v47, %v14822_v13 }
 0x4bd   : > { %v6965_v59 = vunpack.i.l.bf16 %v12434_v32  ;;  %v14873_v38 = vunpack.i.h.bf16 %v14682_v23  ;;  %v12690_v35 = vsel %vm724_vm4, %v6950_v62, %v6951_v28  ;;  %v6971_v13 = vunpack.i.h.bf16 %v12475_v25  ;;  %v12698_v32 = vpop.permute.xlu1 %4107 }
 0x4be   : > { %5932 = vmatpush1.bf16.msra.mxu1 %v14870_v11  ;;  %v6981_v2 = vunpack.i.h.bf16 %v12517_v61  ;;  %14874 = vst [vmem:[#allocation72_spill] sm:$0xff] %v12698_v32  ;;  %v6985_v62 = vunpack.i.l.bf16 %v12527_v31  ;;  %v14877_v47 = vpack.c.bf16 %v14875_v8, %v14876_v46  ;;  %v12717_v31 = vsel %vm1216_vm11, %v12223_v3, %v12373_v41 }
 0x4bf   : > { %5934 = vmatprep.subr.bf16.mxu1 %v5933_v1  ;;  %v12686_v11 = vsel %vm601_vm2, %v14873_v38, %v6945_v20  ;;  %5892 = vmatpush1.bf16.msra.mxu0 %v5891_v17  ;;  %v12707_v20 = vpop.permute.xlu0 %7003  ;;  %v14880_v17 = vld [vmem:[#allocation103_spill] sm:$0xff]  ;;  %v14883_v1 = vld [vmem:[#allocation117_spill] sm:$0xff]  ;;  %v14884_v3 = vunpack.i.l.bf16 %v14682_v23  ;;  %v14888_v23 = vpack.c.bf16 %v12522_v6, %v12515_v36  ;;  %v14891_v6 = vunpack.i.l.bf16 %v12517_v61 }
 0x4c0   : > { %5894 = vmatprep.subr.bf16.mxu0 %v14877_v47  ;;  %v14878_v47 = vunpack.i.h.bf16 %v12286_v51  ;;  %v14881_v38 = vpack.c.bf16 %v14879_v7, %v14880_v17  ;;  %v14885_v51 = vunpack.i.h.bf16 %v14588_v50  ;;  %v14886_v7 = vunpack.i.l.bf16 %v12707_v20 }
 0x4c1   : > { %v12735_v46 = vsel %vm601_vm2, %v14884_v3, %v6971_v13  ;;  %v12752_v14 = vpop.permute.xlu1 %7008  ;;  %v14889_v3 = vunpack.i.h.bf16 %v12485_v16  ;;  %v14897_v19 = vrot.slane %v12656_v9, 4 }
 0x4c2   : > { %5936 = vmatpush1.bf16.msra.mxu1 %v5935_v58  ;;  %v4045_v8 = vsel %vm601_vm2, %v14878_v47, %v6965_v59  ;;  %v14882_v58 = vld [vmem:[#allocation66_spill] sm:$0xff]  ;;  %v4146_v47 = vsel %vm724_vm4, %v14885_v51, %v6981_v2  ;;  %v12760_v51 = vsel %vm724_vm4, %v6981_v2, %v6986_v40 }
 0x4c3   : > { %5938 = vmatprep.subr.bf16.mxu1 %v14881_v38  ;;  %v14887_v38 = vunpack.i.h.bf16 %v14783_v63  ;;  %5896 = vmatpush1.bf16.msra.mxu0 %v14888_v23  ;;  %v4042_v50 = vsel %vm601_vm2, %v6965_v59, %v14889_v3  ;;  %v14890_v63 = vunpack.i.l.bf16 %v14716_v26  ;;  %v12767_v36 = vpop.permute.xlu0 %7013  ;;  %v12773_v23 = vsel %vm724_vm4, %v6951_v28, %v14891_v6  ;;  %v14892_v59 = vld [vmem:[#allocation101_spill] sm:$0xff]  ;;  %v14893_v3 = vld [vmem:[#allocation102_spill] sm:$0xff] }
 0x4c4   : > { %5898 = vmatprep.subr.bf16.mxu0 %v5897_v12  ;;  %v14894_v2 = vpack.c.bf16 %v14892_v59, %v14893_v3  ;;  %v14895_v26 = vunpack.i.l.bf16 %v12475_v25  ;;  %v14896_v12 = vunpack.i.l.bf16 %v12485_v16  ;;  %v12793_v28 = vsel %vm1868_vm10, %v4045_v8, %v14897_v19  ;;  %v14899_v25 = vld [vmem:[#allocation100_spill] sm:$0xff]  ;;  %v14912_v19 = vld [vmem:[#allocation86_spill] sm:$0xff] }
 0x4c5   : > { %v12747_v17 = vsel %vm847_vm5, %v14887_v38, %v14886_v7  ;;  %v4147_v7 = vsel %vm724_vm4, %v14890_v63, %v6985_v62  ;;  %v4729_v6 = vrot.slane %v4146_v47, 4  ;;  %v6991_v59 = vunpack.i.h.bf16 %v12561_v45 }
 0x4c6   : > { %v4850_v38 = vrot.slane %v12747_v17, 4  ;;  %5940 = vmatpush1.bf16.msra.mxu1 %v14894_v2  ;;  %v12782_v63 = vsel %vm601_vm2, %v6966_v21, %v14895_v26  ;;  %v12788_v17 = vsel %vm601_vm2, %v6971_v13, %v14896_v12  ;;  %v6990_v3 = vunpack.i.l.bf16 %v12561_v45  ;;  %v14898_v2 = vld [vmem:[#allocation109_spill] sm:$0xff]  ;;  %v12813_v45 = vpop.permute.xlu1 %7018 }
 0x4c7   : > { %v14900_v21 = vpack.c.bf16 %v14898_v2, %v14899_v25  ;;  %v14901_v26 = vrot.slane %v14846_v44, 4  ;;  %v4751_v8 = vrot.slane %v4147_v7, 4  ;;  %v14902_v47 = vrot.slane %v12690_v35, 4  ;;  %5900 = vmatpush1.bf16.msra.mxu0 %v5899_v29  ;;  %v14903_v44 = vld [vmem:[#allocation92_spill] sm:$0xff]  ;;  %v14904_v2 = vld [vmem:[#allocation91_spill] sm:$0xff]  ;;  %v12820_v13 = vpop.permute.xlu0 %7023 }
 0x4c8   : > { %14906 = vst [vmem:[#allocation5_spill] sm:$0xff] %v12820_v13  ;;  %v14907_v25 = vpack.c.bf16 %v12604_v5, %v12534_v53  ;;  %v14908_v7 = vunpack.i.l.bf16 %v14799_v33  ;;  %v14909_v5 = vpack.c.bf16 %v12622_v42, %v12614_v52  ;;  %v14916_v42 = vunpack.i.l.bf16 %v12583_v22 }
 0x4c9   : > { %5942 = vmatprep.subr.bf16.mxu1 %v14900_v21  ;;  %v12803_v61 = vsel %vm1868_vm10, %v14901_v26, %v4850_v38  ;;  %v12811_v12 = vsel %vm1868_vm10, %v4042_v50, %v14902_v47  ;;  %v14905_v21 = vpack.c.bf16 %v14903_v44, %v14904_v2  ;;  %v14083_v26 = vunpack.i.h.bf16 %v12813_v45 }
 0x4ca   : > { %v6996_v47 = vunpack.i.h.bf16 %v12583_v22  ;;  %5944 = vmatpush1.bf16.msra.mxu1 %v14907_v25  ;;  %v7025_v44 = vunpack.i.l.bf16 %v12820_v13  ;;  %v4144_v50 = vsel %vm724_vm4, %v6985_v62, %v6990_v3  ;;  %v14910_v25 = vrot.slane %v12209_v18, 4  ;;  %v14911_v62 = vld [vmem:[#allocation89_spill] sm:$0xff]  ;;  %v12858_v13 = vpop.permute.xlu1 %4212 }
 0x4cb   : > { %5902 = vmatprep.subr.bf16.mxu0 %v14905_v21  ;;  %v12836_v21 = vsel %vm724_vm4, %v6986_v40, %v6991_v59  ;;  %v4243_v53 = vsel %vm847_vm5, %v14908_v7, %v14083_v26  ;;  %5946 = vmatprep.subr.bf16.mxu1 %v14909_v5  ;;  %v14913_v41 = vpack.c.bf16 %v14911_v62, %v14912_v19  ;;  %v14914_v7 = vrot.slane %v12760_v51, 4  ;;  %v14918_v5 = vld [vmem:[#allocation59_spill] sm:$0xff] }
 0x4cc   : > { %v12852_v2 = vsel %vm1868_vm10, %v14910_v25, %v4729_v6  ;;  %v4872_v29 = vrot.slane %v4243_v53, 4  ;;  %v14915_v26 = vrot.slane %v12656_v9, 4  ;;  %v12868_v18 = vsel %vm1868_vm10, %v4729_v6, %v4751_v8  ;;  %v12885_v6 = vpop.permute.xlu0 %7028 }
 0x4cd   : > { %5904 = vmatpush1.bf16.msra.mxu0 %v14913_v41  ;;  %v14917_v53 = vunpack.i.h.bf16 %v12485_v16  ;;  %v7000_v41 = vunpack.i.l.bf16 %v12645_v60  ;;  %v14919_v25 = vunpack.i.h.bf16 %v14918_v5  ;;  %v14921_v8 = vunpack.i.h.bf16 %v11934_v56  ;;  %v14924_v5 = vld [vmem:[#allocation81_spill] sm:$0xff] }
 0x4ce   : > { %v12865_v52 = vsel %vm1868_vm10, %v14915_v26, %v14914_v7  ;;  %5682 = vmatprep.subr.msk.mxu0 %vm1868_vm10, %v12540_v0  ;;  %v4753_v7 = vrot.slane %v4144_v50, 4  ;;  %v12908_v56 = vsel %vm601_vm2, %v6996_v47, %v12629_v24  ;;  %v7006_v50 = vunpack.i.h.bf16 %v12707_v20 }
 0x4cf   : > { %v4039_v19 = vsel %vm601_vm2, %v14917_v53, %v14916_v42  ;;  %v12881_v9 = vsel %vm14920_vm3, %v7025_v44, %v14919_v25  ;;  %v12891_v26 = vsel %vm14922_vm8, %v14921_v8, %v7025_v44  ;;  %v14923_v42 = vunpack.i.l.bf16 %v12485_v16  ;;  %v14925_v25 = vld [vmem:[#allocation80_spill] sm:$0xff] }
 0x4d0   : > { %v14926_v40 = vpack.c.bf16 %v14924_v5, %v14925_v25  ;;  %v12914_v16 = vsel %vm1868_vm10, %v4850_v38, %v4872_v29  ;;  %v14927_v8 = vrot.slane %v12773_v23, 4  ;;  %v7011_v5 = vunpack.i.h.bf16 %v12752_v14  ;;  %v12951_v44 = vpop.permute.xlu0 %7033  ;;  %v14932_v38 = vld [vmem:[#allocation82_spill] sm:$0xff]  ;;  %v14933_v29 = vld [vmem:[#allocation83_spill] sm:$0xff] }
 0x4d1   : > { %v12898_v53 = vsel %vm601_vm2, %v14923_v42, %v6996_v47  ;;  %v14928_v42 = vunpack.i.h.bf16 %v12645_v60  ;;  %5683 = vmatpush1.msk.msra.mxu0 %vm1868_vm10, %v12679_v39  ;;  %v7010_v25 = vunpack.i.l.bf16 %v12752_v14  ;;  %v14929_v39 = vld [vmem:[#allocation60_spill] sm:$0xff]  ;;  %v14934_v62 = vpack.c.bf16 %v14932_v38, %v14933_v29  ;;  %v14937_v38 = vld [vmem:[#allocation63_spill] sm:$0xff] }
 0x4d2   : > { %5948 = vmatpush1.bf16.msra.mxu1 %v14926_v40  ;;  %v12921_v40 = vsel %vm1868_vm10, %v4039_v19, %v14927_v8  ;;  %v4141_v19 = vsel %vm724_vm4, %v6990_v3, %v7000_v41  ;;  %v12945_v8 = vld [vmem:[%s13726_s4] sm:$0x77]  ;;  %v4138_v3 = vsel %vm724_vm4, %v7000_v41, %v12698_v32  ;;  %v14935_v41 = vunpack.i.h.bf16 %v14799_v33 }
 0x4d3   : > { %5685 = vmatprep.subr.msk.mxu1 %vm1868_vm10, %v12717_v31  ;;  %v12927_v47 = vsel %vm724_vm4, %v6991_v59, %v14928_v42  ;;  %v12932_v31 = vpop.permute.xlu1 %7038  ;;  %v7015_v59 = vunpack.i.l.bf16 %v12767_v36  ;;  %5194 = vmatmul.mubr.f32.vlgmr.msra.gmra.mrb[18].mxu0 %v12945_v8  ;;  %v14930_v42 = vld [vmem:[#allocation98_spill] sm:$0xff]  ;;  %v14939_v29 = vrot.slane %v12760_v51, 4  ;;  %v4755_v60 = vrot.slane %v4141_v19, 4  ;;  %v14946_v51 = vld [vmem:[#allocation107_spill] sm:$0xff] }
 0x4d4   : > { %v14931_v0 = vpack.c.bf16 %v14929_v39, %v14930_v42  ;;  %v6005_v39 = vpack.c.bf16 %v12921_v40, %v12908_v56  ;;  %v4735_v42 = vrot.slane %v12927_v47, 4  ;;  %v4238_v14 = vsel %vm847_vm5, %v14935_v41, %v7006_v50  ;;  %v14941_v47 = vld [vmem:[#allocation17_spill] sm:$0xff] }
 0x4d5   : > { %v4235_v56 = vsel %vm847_vm5, %v7006_v50, %v7011_v5  ;;  %v14940_v40 = vunpack.i.h.bf16 %v12951_v44  ;;  %v14942_v41 = vunpack.i.l.bf16 %v14941_v47  ;;  %v4757_v50 = vrot.slane %v4138_v3, 4  ;;  %v14950_v47 = vld [vmem:[#allocation119_spill] sm:$0xff] }
 0x4d6   : > { %5950 = vmatprep.subr.bf16.mxu0 %v14931_v0  ;;  %5686 = vmatpush1.msk.msra.mxu1 %vm1868_vm10, %v12673_v43  ;;  %v14936_v43 = vld [vmem:[#allocation111_spill] sm:$0xff]  ;;  %v12979_v0 = vsel %vm1868_vm10, %v14939_v29, %v4753_v7  ;;  %v14947_v7 = vld [vmem:[#allocation96_spill] sm:$0xff]  ;;  %v14949_v33 = vunpack.i.l.bf16 %v12707_v20  ;;  %v4836_v20 = vrot.slane %v4238_v14, 4  ;;  %v14954_v3 = vunpack.i.l.bf16 %v12813_v45 }
 0x4d7   : > { %5952 = vmatpush1.bf16.msra.mxu0 %v14934_v62  ;;  %5265 = vmatmul.mubr.f32.vlgmr.msra.gmra.mrb[18].mxu1 %v12945_v8  ;;  %v14938_v62 = vpack.c.bf16 %v14936_v43, %v14937_v38  ;;  %v4342_v32 = vsel %vm970_vm7, %v14942_v41, %v14940_v40  ;;  %v14943_v43 = vld [vmem:[#allocation118_spill] sm:$0xff]  ;;  %v14948_v29 = vpack.c.bf16 %v14946_v51, %v14947_v7  ;;  %v12996_v19 = vpop.permute.xlu1 %7048  ;;  %v14951_v41 = vld [vmem:[#allocation27_spill] sm:$0xff]  ;;  %v14955_v7 = vrot.slane %v14866_v15, 4 }
 0x4d8   : > { %v14944_v38 = vld [vmem:[#allocation110_spill] sm:$0xff]  ;;  %v13002_v24 = vsel %vm847_vm5, %v14949_v33, %v7010_v25  ;;  %v13006_v40 = vsel %vm847_vm5, %v7010_v25, %v7015_v59  ;;  %v14953_v51 = vld [vmem:[#allocation67_spill] sm:$0xff]  ;;  %v13020_v33 = vsel %vm847_vm5, %v7015_v59, %v14954_v3  ;;  %v7030_v25 = vunpack.i.l.bf16 %v12885_v6 }
 0x4d9   : > { %5994 = vmatprep.subr.bf16.mxu1 %v14938_v62  ;;  %v14945_v62 = vpack.c.bf16 %v14943_v43, %v14944_v38  ;;  %v14952_v43 = vpack.c.bf16 %v14950_v47, %v14951_v41  ;;  %5690 = vmatprep.mubr.msk.f32.mxu0 %vm5093_vm6, %v14953_v51  ;;  %v14956_v47 = vld [vmem:[#allocation93_spill] sm:$0xff]  ;;  %v14957_v41 = vld [vmem:[#allocation8_spill] sm:$0xff]  ;;  %v4837_v14 = vrot.slane %v4235_v56, 4  ;;  %v7031_v38 = vunpack.i.h.bf16 %v12885_v6 }
 0x4da   : > { %5996 = vmatpush1.bf16.msra.mxu1 %v14948_v29  ;;  %v13026_v29 = vsel %vm1868_vm10, %v4342_v32, %v14955_v7  ;;  %5693 = vmatprep.mubr.msk.f32.mxu1 %vm5093_vm6, %v14953_v51  ;;  %v14959_v59 = vunpack.i.h.bf16 %v12996_v19  ;;  %v14960_v3 = vunpack.i.l.bf16 %v14839_v30  ;;  %v14961_v32 = vpack.c.bf16 %v12686_v11, %v14882_v58 }
 0x4db   : > { %5954 = vmatprep.subr.bf16.mxu0 %v14945_v62  ;;  %5998 = vmatprep.subr.bf16.mxu1 %v14952_v43  ;;  %v13012_v62 = vpop.permute.xlu0 %7043  ;;  %v14958_v43 = vpack.c.bf16 %v14956_v47, %v14957_v41  ;;  %v5965_v7 = vpack.c.bf16 %v12979_v0, %v12865_v52  ;;  %v4852_v47 = vrot.slane %v13002_v24, 4  ;;  %v14962_v56 = vunpack.i.h.bf16 %v12767_v36  ;;  %v13058_v11 = vpop.permute.xlu1 %7058 }
 0x4dc   : > { %v13040_v22 = vsel %vm970_vm7, %v14960_v3, %v14959_v59  ;;  %v4854_v41 = vrot.slane %v13006_v40, 4  ;;  %v14963_v59 = vpack.c.bf16 %v12146_v48, %v12181_v10  ;;  %v4856_v58 = vrot.slane %v13020_v33, 4 }
 0x4dd   : > { %5956 = vmatpush1.bf16.msra.mxu0 %v14958_v43  ;;  %v4232_v6 = vsel %vm847_vm5, %v7011_v5, %v14962_v56  ;;  %v14964_v24 = vpack.c.bf16 %v12782_v63, %v12186_v49  ;;  %v7061_v52 = vunpack.i.h.bf16 %v13058_v11  ;;  %v14965_v0 = vrot.slane %v12773_v23, 4  ;;  %v14969_v63 = vld [vmem:[#allocation16_spill] sm:$0xff] }
 0x4de   : > { %5958 = vmatprep.subr.bf16.mxu0 %v14961_v32  ;;  %6000 = vmatpush1.bf16.msra.mxu1 %v14963_v59  ;;  %v14966_v3 = vrot.slane %v12836_v21, 4  ;;  %v14967_v48 = vrot.slane %v12690_v35, 4  ;;  %v14968_v33 = vunpack.i.h.bf16 %v12813_v45  ;;  %v14970_v32 = vld [vmem:[#allocation43_spill] sm:$0xff]  ;;  %v4758_v59 = vsel %vm1868_vm10, %v4735_v42, %v4757_v50  ;;  %v14982_v43 = vld [vmem:[#allocation104_spill] sm:$0xff] }
 0x4df   : > { %6002 = vmatprep.subr.bf16.mxu1 %v14964_v24  ;;  %v13065_v5 = vpop.permute.xlu0 %7053  ;;  %v4736_v40 = vsel %vm1868_vm10, %v14965_v0, %v4735_v42  ;;  %v14971_v56 = vpack.c.bf16 %v14969_v63, %v14970_v32  ;;  %v14973_v0 = vld [vmem:[#allocation46_spill] sm:$0xff]  ;;  %v14974_v63 = vld [vmem:[#allocation95_spill] sm:$0xff]  ;;  %v13107_v32 = vpop.permute.xlu1 %7068 }
 0x4e0   : > { %v4734_v10 = vsel %vm1868_vm10, %v14967_v48, %v14966_v3  ;;  %v4240_v49 = vsel %vm847_vm5, %v14968_v33, %v7030_v25  ;;  %v14972_v23 = vmov %v14966_v3  ;;  %v13088_v35 = vsel %vm1868_vm10, %v14973_v0, %v4836_v20 }
 0x4e1   : > { %5960 = vmatpush1.bf16.msra.mxu0 %v14971_v56  ;;  %v4756_v24 = vsel %vm1868_vm10, %v14972_v23, %v4755_v60  ;;  %v4838_v3 = vrot.slane %v4232_v6, 4  ;;  %v4234_v48 = vsel %vm847_vm5, %v7031_v38, %v12858_v13  ;;  %v4237_v33 = vsel %vm847_vm5, %v7030_v25, %v7031_v38  ;;  %v14978_v56 = vld [vmem:[#allocation9_spill] sm:$0xff] }
 0x4e2   : > { %v14975_v42 = vunpack.i.h.bf16 %v14974_v63  ;;  %v14976_v60 = vpack.c.bf16 %v12793_v28, %v12788_v17  ;;  %v14977_v6 = vpack.c.bf16 %v12694_v37, %v14883_v1  ;;  %v4853_v38 = vsel %vm1868_vm10, %v4836_v20, %v4852_v47 }
 0x4e3   : > { %v13111_v25 = vsel %vm1868_vm10, %v4837_v14, %v4854_v41  ;;  %v13115_v23 = vsel %vm1868_vm10, %v14978_v56, %v4837_v14  ;;  %v4874_v0 = vrot.slane %v4240_v49, 4  ;;  %v7040_v17 = vunpack.i.l.bf16 %v12932_v31  ;;  %v13119_v63 = vpop.permute.xlu0 %7063  ;;  %v14981_v56 = vld [vmem:[#allocation42_spill] sm:$0xff] }
 0x4e4   : > { %v4440_v21 = vsel %vm1093_vm9, %v14975_v42, %v7061_v52  ;;  %5962 = vmatprep.subr.bf16.mxu0 %v14976_v60  ;;  %6004 = vmatpush1.bf16.msra.mxu1 %v14977_v6  ;;  %v7035_v28 = vunpack.i.l.bf16 %v12951_v44  ;;  %v13122_v37 = vsel %vm1868_vm10, %v4838_v3, %v4856_v58  ;;  %v4878_v1 = vrot.slane %v4234_v48, 4 }
 0x4e5   : > { %v4971_v50 = vrot.slane %v4440_v21, 4  ;;  %6006 = vmatprep.subr.bf16.mxu1 %v6005_v39  ;;  %v4876_v20 = vrot.slane %v4237_v33, 4  ;;  %v14979_v42 = vpack.c.bf16 %v12345_v27, %v12735_v46  ;;  %v7065_v14 = vunpack.i.l.bf16 %v13119_v63 }
 0x4e6   : > { %v14980_v49 = vrot.slane %v14866_v15, 4  ;;  %v6009_v39 = vpack.c.bf16 %v4758_v59, %v4736_v40  ;;  %v6011_v60 = vpack.c.bf16 %v4756_v24, %v4734_v10  ;;  %v5973_v6 = vpack.c.bf16 %v4853_v38, %v13088_v35 }
 0x4e7   : > { %5964 = vmatpush1.bf16.msra.mxu0 %v14979_v42  ;;  %v5069_v48 = vsel %vm1868_vm10, %v14981_v56, %v4838_v3  ;;  %v7041_v33 = vunpack.i.h.bf16 %v12932_v31  ;;  %v14983_v27 = vunpack.i.l.bf16 %v14982_v43  ;;  %v14984_v15 = vpack.c.bf16 %v12811_v12, %v12898_v53  ;;  %v13144_v42 = vpop.permute.xlu1 %4309  ;;  %v13155_v24 = vpop.permute.xlu0 %7073 }
 0x4e8   : > { %v13131_v21 = vsel %vm1868_vm10, %v14980_v49, %v4971_v50  ;;  %5966 = vmatprep.subr.bf16.mxu0 %v5965_v7  ;;  %v6017_v7 = vpack.c.bf16 %v13122_v37, %v5069_v48  ;;  %v6019_v40 = vpack.c.bf16 %v13111_v25, %v13115_v23  ;;  %v14985_v10 = vunpack.i.h.bf16 %v14982_v43 }
 0x4e9   : > { %v4441_v46 = vsel %vm1093_vm9, %v14983_v27, %v7065_v14  ;;  %6008 = vmatpush1.bf16.msra.mxu1 %v14984_v15  ;;  %v14986_v12 = vunpack.i.h.bf16 %v14839_v30  ;;  %v4875_v35 = vsel %vm1868_vm10, %v4852_v47, %v4874_v0  ;;  %v13163_v3 = vsel %vm1868_vm10, %v4854_v41, %v4876_v20  ;;  %v14988_v47 = vld [vmem:[#allocation10_spill] sm:$0xff]  ;;  %v14992_v15 = vld [vmem:[#allocation7_spill] sm:$0xff] }
 0x4ea   : > { %v13153_v31 = vsel %vm1093_vm9, %v14985_v10, %v7040_v17  ;;  %v4993_v59 = vrot.slane %v4441_v46, 4  ;;  %6010 = vmatprep.subr.bf16.mxu1 %v6009_v39  ;;  %v7070_v43 = vunpack.i.l.bf16 %v13107_v32  ;;  %v7066_v38 = vunpack.i.h.bf16 %v13119_v63  ;;  %v14989_v0 = vld [vmem:[#allocation6_spill] sm:$0xff] }
 0x4eb   : > { %v4337_v53 = vsel %vm970_vm7, %v14986_v12, %v7035_v28  ;;  %v14987_v37 = vpack.c.bf16 %v12868_v18, %v12852_v2  ;;  %v4879_v49 = vsel %vm1868_vm10, %v4856_v58, %v4878_v1  ;;  %v7050_v30 = vunpack.i.l.bf16 %v12996_v19  ;;  %v13186_v58 = vpop.permute.xlu1 %4410 }
 0x4ec   : > { %v7046_v39 = vunpack.i.h.bf16 %v13012_v62  ;;  %v14090_v56 = vunpack.i.l.bf16 %v13058_v11  ;;  %v14990_v41 = vpack.c.bf16 %v14988_v47, %v14989_v0  ;;  %v13178_v20 = vsel %vm1868_vm10, %v4971_v50, %v4993_v59  ;;  %v14991_v50 = vld [vmem:[#allocation41_spill] sm:$0xff]  ;;  %v14995_v59 = vld [vmem:[#allocation35_spill] sm:$0xff] }
 0x4ed   : > { %5968 = vmatpush1.bf16.msra.mxu0 %v14987_v37  ;;  %v13182_v63 = vsel %vm1093_vm9, %v7040_v17, %v7041_v33  ;;  %v4957_v2 = vrot.slane %v13153_v31, 4  ;;  %v7045_v18 = vunpack.i.l.bf16 %v13012_v62  ;;  %6012 = vmatpush1.bf16.msra.mxu1 %v6011_v60  ;;  %v5977_v1 = vpack.c.bf16 %v4337_v53, %v4875_v35  ;;  %v13194_v17 = vpop.permute.xlu0 %7078 }
 0x4ee   : > { %5970 = vmatprep.subr.bf16.mxu0 %v14990_v41  ;;  %v7055_v48 = vunpack.i.l.bf16 %v13065_v5  ;;  %v7071_v27 = vunpack.i.h.bf16 %v13107_v32  ;;  %v14089_v46 = vunpack.i.l.bf16 %v13155_v24  ;;  %v14993_v10 = vpack.c.bf16 %v14991_v50, %v14992_v15  ;;  %v14994_v32 = vld [vmem:[#allocation30_spill] sm:$0xff]  ;;  %v14999_v50 = vld [vmem:[#allocation52_spill] sm:$0xff] }
 0x4ef   : > { %v5987_v31 = vpack.c.bf16 %v13178_v20, %v13131_v21  ;;  %v4437_v62 = vsel %vm1093_vm9, %v7061_v52, %v7066_v38  ;;  %v4438_v60 = vsel %vm1093_vm9, %v7065_v14, %v7070_v43  ;;  %v14996_v12 = vpack.c.bf16 %v14994_v32, %v14995_v59  ;;  %v15014_v21 = vld [vmem:[#allocation115_spill] sm:$0xff] }
 0x4f0   : > { %6014 = vmatprep.subr.bf16.mxu1 %v14993_v10  ;;  %v14088_v53 = vunpack.i.h.bf16 %v13194_v17  ;;  %v7080_v35 = vunpack.i.l.bf16 %v13194_v17  ;;  %v4334_v37 = vsel %vm970_vm7, %v7035_v28, %v7046_v39  ;;  %v4430_v47 = vsel %vm1093_vm9, %v7041_v33, %v14090_v56 }
 0x4f1   : > { %5972 = vmatpush1.bf16.msra.mxu0 %v14996_v12  ;;  %v7056_v52 = vunpack.i.h.bf16 %v13065_v5  ;;  %v4331_v14 = vsel %vm970_vm7, %v7046_v39, %v7050_v30  ;;  %v14997_v0 = vunpack.i.h.bf16 %v12951_v44  ;;  %v7076_v28 = vunpack.i.h.bf16 %v13155_v24  ;;  %v13235_v39 = vpop.permute.xlu1 %7088  ;;  %v7084_v59 = vpop.permute.xlu0 %7083 }
 0x4f2   : > { %5974 = vmatprep.subr.bf16.mxu0 %v5973_v6  ;;  %v4431_v33 = vsel %vm1093_vm9, %v7071_v27, %v14088_v53  ;;  %v4432_v5 = vsel %vm1093_vm9, %v7080_v35, %v13186_v58  ;;  %v14998_v6 = vld [vmem:[#allocation50_spill] sm:$0xff]  ;;  %v4973_v44 = vrot.slane %v4437_v62, 4  ;;  %v4995_v10 = vrot.slane %v4438_v60, 4 }
 0x4f3   : > { %v4339_v41 = vsel %vm970_vm7, %v14997_v0, %v7045_v18  ;;  %v15000_v15 = vpack.c.bf16 %v14998_v6, %v14999_v50  ;;  %v4333_v32 = vsel %vm970_vm7, %v7056_v52, %v14089_v46  ;;  %v15001_v12 = vunpack.i.h.bf16 %v12996_v19 }
 0x4f4   : > { %v4958_v53 = vrot.slane %v13182_v63, 4  ;;  %v6023_v6 = vpack.c.bf16 %v4334_v37, %v13163_v3  ;;  %v4959_v50 = vrot.slane %v4430_v47, 4  ;;  %v15002_v62 = vpack.c.bf16 %v12803_v61, %v12667_v54 }
 0x4f5   : > { %6016 = vmatpush1.bf16.msra.mxu1 %v15000_v15  ;;  %v4338_v0 = vsel %vm970_vm7, %v15001_v12, %v7055_v48  ;;  %v6021_v60 = vpack.c.bf16 %v4331_v14, %v4879_v49  ;;  %v4336_v15 = vsel %vm970_vm7, %v7045_v18, %v7056_v52  ;;  %v4999_v46 = vrot.slane %v4432_v5, 4  ;;  %v13258_v3 = vpop.permute.xlu1 %7098 }
 0x4f6   : > { %6018 = vmatprep.subr.bf16.mxu1 %v6017_v7  ;;  %5976 = vmatpush1.bf16.msra.mxu0 %v15002_v62  ;;  %v4977_v7 = vrot.slane %v4431_v33, 4  ;;  %v5078_v56 = vsel %vm1868_vm10, %v4339_v41, %v4957_v2  ;;  %v4435_v12 = vsel %vm1093_vm9, %v7070_v43, %v7080_v35  ;;  %v4332_v54 = vsel %vm970_vm7, %v7076_v28, %v13144_v42  ;;  %v7094_v43 = vpop.permute.xlu0 %7093 }
 0x4f7   : > { %5978 = vmatprep.subr.bf16.mxu0 %v5977_v1  ;;  %v5981_v61 = vpack.c.bf16 %v5078_v56, %v4338_v0  ;;  %v5080_v49 = vsel %vm1868_vm10, %v4333_v32, %v4959_v50  ;;  %v4434_v18 = vsel %vm1093_vm9, %v7066_v38, %v7071_v27  ;;  %v4335_v1 = vsel %vm970_vm7, %v7055_v48, %v7076_v28 }
 0x4f8   : > { %v4974_v25 = vsel %vm1868_vm10, %v4957_v2, %v4973_v44  ;;  %v4996_v23 = vsel %vm1868_vm10, %v4973_v44, %v4995_v10  ;;  %v7090_v56 = vunpack.i.l.bf16 %v13235_v39  ;;  %v7086_v35 = vunpack.i.h.bf16 %v7084_v59  ;;  %v15004_v44 = vld [vmem:[#allocation5_spill] sm:$0xff] }
 0x4f9   : > { %6020 = vmatpush1.bf16.msra.mxu1 %v6019_v40  ;;  %v7091_v40 = vunpack.i.h.bf16 %v13235_v39  ;;  %v7085_v37 = vunpack.i.l.bf16 %v7084_v59  ;;  %v15003_v47 = vpack.c.bf16 %v12640_v57, %v12914_v16  ;;  %v4997_v38 = vrot.slane %v4435_v12, 4  ;;  %v13279_v33 = vpop.permute.xlu1 %4497 }
 0x4fa   : > { %6022 = vmatprep.subr.bf16.mxu1 %v6021_v60  ;;  %v6025_v27 = vpack.c.bf16 %v5080_v49, %v4332_v54  ;;  %v4978_v48 = vsel %vm1868_vm10, %v4959_v50, %v4977_v7  ;;  %v5000_v52 = vsel %vm1868_vm10, %v4977_v7, %v4999_v46  ;;  %v7101_v2 = vunpack.i.h.bf16 %v13258_v3  ;;  %v4492_v16 = vpop.permute.xlu0 %4491 }
 0x4fb   : > { %5980 = vmatpush1.bf16.msra.mxu0 %v15003_v47  ;;  %v7100_v14 = vunpack.i.l.bf16 %v13258_v3  ;;  %v7096_v41 = vunpack.i.h.bf16 %v7094_v43  ;;  %v7095_v28 = vunpack.i.l.bf16 %v7094_v43  ;;  %v4975_v5 = vrot.slane %v4434_v18, 4 }
 0x4fc   : > { %5982 = vmatprep.subr.bf16.mxu0 %v5981_v61  ;;  %v5079_v57 = vsel %vm1868_vm10, %v4336_v15, %v4958_v53  ;;  %v5985_v39 = vpack.c.bf16 %v4996_v23, %v4974_v25  ;;  %v7026_v10 = vunpack.i.h.bf16 %v15004_v44  ;;  %v15005_v32 = vpack.c.bf16 %v13026_v29, %v13040_v22 }
 0x4fd   : > { %6024 = vmatpush1.bf16.msra.mxu1 %v6023_v6  ;;  %v6027_v46 = vpack.c.bf16 %v5079_v57, %v4335_v1  ;;  %v4535_v59 = vsel %vm1216_vm11, %v7085_v37, %v7090_v56  ;;  %v4536_v0 = vsel %vm1216_vm11, %v7086_v35, %v7091_v40  ;;  %v15006_v6 = vld [vmem:[#allocation99_spill] sm:$0xff]  ;;  %v6029_v7 = vpack.c.bf16 %v5000_v52, %v4978_v48  ;;  %v4504_v61 = vpop.permute.xlu1 %4503  ;;  %v15012_v48 = vld [vmem:[#allocation36_spill] sm:$0xff] }
 0x4fe   : > { %6026 = vmatprep.subr.bf16.mxu1 %v6025_v27  ;;  %v15007_v50 = vunpack.i.l.bf16 %v15006_v6  ;;  %v15008_v60 = vunpack.i.h.bf16 %v15006_v6  ;;  %v4998_v22 = vsel %vm1868_vm10, %v4975_v5, %v4997_v38  ;;  %v4533_v29 = vsel %vm1216_vm11, %v7091_v40, %v7096_v41  ;;  %v7104_v18 = vpop.permute.xlu0 %7103 }
 0x4ff   : > { %5984 = vmatpush1.bf16.msra.mxu0 %v15005_v32  ;;  %v4532_v12 = vsel %vm1216_vm11, %v7090_v56, %v7095_v28  ;;  %v4529_v54 = vsel %vm1216_vm11, %v7095_v28, %v7100_v14  ;;  %v4530_v49 = vsel %vm1216_vm11, %v7096_v41, %v7101_v2  ;;  %v5989_v1 = vpack.c.bf16 %v4536_v0, %v4535_v59  ;;  %v15009_v56 = vld [vmem:[#allocation62_spill] sm:$0xff] }
 0x500   : > { %v4538_v62 = vsel %vm1216_vm11, %v15007_v50, %v7085_v37  ;;  %v4539_v15 = vsel %vm1216_vm11, %v15008_v60, %v7086_v35  ;;  %5986 = vmatprep.subr.bf16.mxu0 %v5985_v39  ;;  %v4976_v43 = vsel %vm1868_vm10, %v4958_v53, %v4975_v5  ;;  %v7106_v25 = vunpack.i.h.bf16 %v7104_v18  ;;  %v15018_v60 = vld [vmem:[#allocation69_spill] sm:$0xff] }
 0x501   : > { %6028 = vmatpush1.bf16.msra.mxu1 %v6027_v46  ;;  %v7105_v23 = vunpack.i.l.bf16 %v7104_v18  ;;  %v6031_v40 = vpack.c.bf16 %v4998_v22, %v4976_v43  ;;  %v15010_v35 = vunpack.i.l.bf16 %v15009_v56  ;;  %v5991_v47 = vpack.c.bf16 %v4539_v15, %v4538_v62  ;;  %v7109_v57 = vpop.permute.xlu1 %7108 }
 0x502   : > { %6030 = vmatprep.subr.bf16.mxu1 %v6029_v7  ;;  %v6035_v38 = vpack.c.bf16 %v4533_v29, %v4532_v12  ;;  %v6033_v27 = vpack.c.bf16 %v4530_v49, %v4529_v54  ;;  %v15013_v63 = vunpack.i.h.bf16 %v15012_v48  ;;  %v15015_v20 = vunpack.i.l.bf16 %v15014_v21  ;;  %v13342_v59 = vpop.permute.xlu0 %4509  ;;  %v15020_v7 = vld [vmem:[#allocation57_spill] sm:$0xff]  ;;  %v15021_v54 = vld [vmem:[#allocation48_spill] sm:$0xff] }
 0x503   : > { %5988 = vmatpush1.bf16.msra.mxu0 %v5987_v31  ;;  %v3835_v37 = vsel %vm15011_vm12, %v15010_v35, %v7026_v10  ;;  %v15016_v52 = vunpack.i.h.bf16 %v15014_v21  ;;  %v15017_v28 = vunpack.i.l.bf16 %v15012_v48  ;;  %v4537_v0 = vsel %vm1216_vm11, %v4492_v16, %v13279_v33  ;;  %v15024_v21 = vld [vmem:[#allocation24_spill] sm:$0xff] }
 0x504   : > { %5990 = vmatprep.subr.bf16.mxu0 %v5989_v1  ;;  %v13327_v53 = vsel %vm478_vm1, %v15013_v63, %v7106_v25  ;;  %v3929_v31 = vsel %vm478_vm1, %v7105_v23, %v15015_v20  ;;  %v7111_v6 = vunpack.i.h.bf16 %v7109_v57  ;;  %v7110_v50 = vunpack.i.l.bf16 %v7109_v57  ;;  %v15022_v1 = vld [vmem:[#allocation108_spill] sm:$0xff] }
 0x505   : > { %v3930_v41 = vsel %vm478_vm1, %v7106_v25, %v15016_v52  ;;  %v3932_v5 = vsel %vm478_vm1, %v15017_v28, %v7105_v23  ;;  %6032 = vmatpush1.bf16.msra.mxu1 %v6031_v40  ;;  %v4618_v39 = vrot.slane %v13327_v53, 4  ;;  %v4599_v46 = vrot.slane %v3929_v31, 4 }
 0x506   : > { %v4598_v44 = vrot.slane %v3932_v5, 4  ;;  %v4620_v32 = vrot.slane %v3930_v41, 4  ;;  %6034 = vmatprep.subr.bf16.mxu1 %v6033_v27  ;;  %v4531_v62 = vsel %vm1216_vm11, %v4504_v61, %v13342_v59  ;;  %v3832_v15 = vsel %vm15019_vm13, %v7026_v10, %v15018_v60  ;;  %v7114_v56 = vpop.permute.xlu0 %7113  ;;  %v15027_v41 = vld [vmem:[#allocation120_spill] sm:$0xff] }
 0x507   : > { %5992 = vmatpush1.bf16.msra.mxu0 %v5991_v47  ;;  %v4540_v22 = vsel %vm1216_vm11, %v15020_v7, %v4492_v16  ;;  %v3931_v49 = vsel %vm478_vm1, %v7111_v6, %v15021_v54  ;;  %v3934_v18 = vsel %vm478_vm1, %v7110_v50, %v7111_v6  ;;  %v15023_v43 = vunpack.i.h.bf16 %v15022_v1  ;;  %v7119_v16 = vpop.permute.xlu1 %7118 }
 0x508   : > { %5688 = vmatprep.subr.msk.mxu0 %vm1868_vm10, %v4537_v0  ;;  %v4619_v29 = vsel %vm1868_vm10, %v4598_v44, %v4618_v39  ;;  %v5049_v12 = vsel %vm1868_vm10, %v3835_v37, %v4598_v44  ;;  %v7121_v40 = vunpack.i.h.bf16 %v7119_v16  ;;  %v4621_v35 = vsel %vm1868_vm10, %v4599_v46, %v4620_v32 }
 0x509   : > { %v3937_v10 = vsel %vm478_vm1, %v15023_v43, %v7110_v50  ;;  %6036 = vmatpush1.bf16.msra.mxu1 %v6035_v38  ;;  %v6041_v25 = vpack.c.bf16 %v4619_v29, %v5049_v12  ;;  %v5050_v37 = vsel %vm1868_vm10, %v3832_v15, %v4599_v46  ;;  %v4642_v47 = vrot.slane %v3931_v49, 4  ;;  %v15034_v50 = vld [vmem:[#allocation22_spill] sm:$0xff] }
 0x50a   : > { %v4638_v23 = vrot.slane %v3937_v10, 4  ;;  %5691 = vmatprep.subr.msk.mxu1 %vm1868_vm10, %v4531_v62  ;;  %v7120_v27 = vunpack.i.l.bf16 %v7119_v16  ;;  %v7115_v48 = vunpack.i.l.bf16 %v7114_v56  ;;  %v4534_v38 = vsel %vm1216_vm11, %v13279_v33, %v4504_v61  ;;  %v15029_v33 = vld [vmem:[#allocation58_spill] sm:$0xff]  ;;  %v7124_v7 = vpop.permute.xlu0 %7123 }
 0x50b   : > { %5689 = vmatpush1.msk.msra.mxu0 %vm1868_vm10, %v4540_v22  ;;  %v4640_v63 = vrot.slane %v3934_v18, 4  ;;  %v7116_v53 = vunpack.i.h.bf16 %v7114_v56  ;;  %v15025_v20 = vrot.slane %v15024_v21, 4  ;;  %v15026_v52 = vpack.c.bf16 %v12891_v26, %v12253_v34  ;;  %v15030_v61 = vld [vmem:[#allocation114_spill] sm:$0xff]  ;;  %v7129_v44 = vpop.permute.xlu1 %7128  ;;  %v15038_v18 = vld [vmem:[#allocation112_spill] sm:$0xff] }
 0x50c   : > { %5336 = vmatmul.mubr.f32.vlgmr.msra.gmra.mrb[20].mxu0 %v12945_v8  ;;  %v15028_v28 = vunpack.i.l.bf16 %v15027_v41  ;;  %v15031_v57 = vpack.c.bf16 %v15029_v33, %v15030_v61  ;;  %v6085_v46 = vpack.c.bf16 %v4621_v35, %v5050_v37  ;;  %v13394_v0 = vsel %vm724_vm4, %v7120_v27, %v7121_v40  ;;  %v15032_v34 = vld [vmem:[#allocation90_spill] sm:$0xff]  ;;  %v15045_v61 = vld [vmem:[#allocation68_spill] sm:$0xff] }
 0x50d   : > { %v4639_v31 = vsel %vm1868_vm10, %v15025_v20, %v4638_v23  ;;  %6038 = vmatprep.subr.bf16.mxu0 %v15026_v52  ;;  %5692 = vmatpush1.msk.msra.mxu1 %vm1868_vm10, %v4534_v38  ;;  %v15033_v26 = vunpack.i.l.bf16 %v15032_v34  ;;  %v15035_v62 = vunpack.i.l.bf16 %v15034_v50  ;;  %v15036_v15 = vmov 0.0|0.0   ;;  %v15040_v23 = vld [vmem:[#allocation122_spill] sm:$0xff] }
 0x50e   : > { %v13386_v5 = vsel %vm724_vm4, %v7121_v40, %v15028_v28  ;;  %6040 = vmatpush1.bf16.msra.mxu0 %v15031_v57  ;;  %5407 = vmatmul.mubr.f32.vlgmr.msra.gmra.mrb[20].mxu1 %v12945_v8  ;;  %v4643_v22 = vsel %vm1868_vm10, %v4620_v32, %v4642_v47  ;;  %v15037_v29 = vpack.c.bf16 %v12881_v9, %v12236_v4  ;;  %v7131_v12 = vunpack.i.h.bf16 %v7129_v44  ;;  %v15041_v40 = vld [vmem:[#allocation123_spill] sm:$0xff] }
 0x50f   : > { %v13400_v6 = vsel %vm724_vm4, %v15033_v26, %v7120_v27  ;;  %v4034_v60 = vsel %vm601_vm2, %v15035_v62, %v7115_v48  ;;  %6081 = vmatprep.subr.bf16.mxu1 %v15036_v15  ;;  %6042 = vmatprep.subr.bf16.mxu0 %v6041_v25  ;;  %v7130_v54 = vunpack.i.l.bf16 %v7129_v44  ;;  %v7126_v49 = vunpack.i.h.bf16 %v7124_v7  ;;  %v7139_v37 = vpop.permute.xlu1 %7138  ;;  %v15043_v27 = vld [vmem:[#allocation97_spill] sm:$0xff]  ;;  %v15047_v44 = vld [vmem:[#allocation11_spill] sm:$0xff] }
 0x510   : > { %6083 = vmatpush1.bf16.msra.mxu1 %v15037_v29  ;;  %v15039_v1 = vunpack.i.l.bf16 %v15038_v18  ;;  %v7125_v10 = vunpack.i.l.bf16 %v7124_v7  ;;  %v4031_v16 = vsel %vm601_vm2, %v7115_v48, %v7116_v53  ;;  %v4641_v32 = vsel %vm1868_vm10, %v4618_v39, %v4640_v63  ;;  %5696 = vmatprep.mubr.msk.f32.mxu0 %vm5093_vm6, %v14953_v51 }
 0x511   : > { %6084 = vmatprep.subr.bf16.mxu1 %v15036_v15  ;;  %v4718_v4 = vrot.slane %v13400_v6, 4  ;;  %v4719_v9 = vrot.slane %v13394_v0, 4  ;;  %v6047_v25 = vpack.c.bf16 %v4034_v60, %v4639_v31  ;;  %v15042_v56 = vpack.c.bf16 %v15040_v23, %v15041_v40  ;;  %5698 = vmatprep.mubr.msk.f32.mxu1 %vm5093_vm6, %v14953_v51  ;;  %v15048_v0 = vld [vmem:[#allocation124_spill] sm:$0xff]  ;;  %v15050_v60 = vld [vmem:[#allocation121_spill] sm:$0xff] }
 0x512   : > { %v4028_v43 = vsel %vm601_vm2, %v7116_v53, %v15039_v1  ;;  %v6045_v35 = vpack.c.bf16 %v4031_v16, %v4641_v32  ;;  %v4033_v47 = vsel %vm601_vm2, %v7125_v10, %v7126_v49  ;;  %v15044_v48 = vunpack.i.l.bf16 %v15043_v27  ;;  %v7134_v53 = vpop.permute.xlu0 %7133 }
 0x513   : > { %6044 = vmatpush1.bf16.msra.mxu0 %v15042_v56  ;;  %v7141_v38 = vunpack.i.h.bf16 %v7139_v37  ;;  %v7140_v63 = vunpack.i.l.bf16 %v7139_v37  ;;  %v7136_v21 = vunpack.i.h.bf16 %v7134_v53  ;;  %v7135_v20 = vunpack.i.l.bf16 %v7134_v53  ;;  %v7149_v50 = vpop.permute.xlu1 %7148  ;;  %v15055_v37 = vld [vmem:[#allocation87_spill] sm:$0xff] }
 0x514   : > { %v4036_v39 = vsel %vm601_vm2, %v15044_v48, %v7125_v10  ;;  %6046 = vmatprep.subr.bf16.mxu0 %v6045_v35  ;;  %6086 = vmatpush1.bf16.msra.mxu1 %v6085_v46  ;;  %v4032_v31 = vsel %vm601_vm2, %v7130_v54, %v7131_v12  ;;  %v5060_v52 = vsel %vm1868_vm10, %v4033_v47, %v4719_v9  ;;  %v4720_v41 = vrot.slane %v13386_v5, 4 }
 0x515   : > { %v6088_v28 = vpack.c.bf16 %v4028_v43, %v4643_v22  ;;  %6087 = vmatprep.subr.bf16.mxu1 %v15036_v15  ;;  %v6049_v33 = vpack.c.bf16 %v5060_v52, %v4032_v31  ;;  %v15046_v57 = vunpack.i.l.bf16 %v15045_v61  ;;  %v4035_v46 = vsel %vm601_vm2, %v15047_v44, %v7130_v54  ;;  %v15052_v54 = vld [vmem:[#allocation14_spill] sm:$0xff]  ;;  %v15054_v43 = vld [vmem:[#allocation72_spill] sm:$0xff] }
 0x516   : > { %v15049_v34 = vunpack.i.h.bf16 %v15048_v0  ;;  %v5059_v62 = vsel %vm1868_vm10, %v4036_v39, %v4718_v4  ;;  %v15051_v7 = vunpack.i.h.bf16 %v15050_v60  ;;  %v4132_v29 = vsel %vm724_vm4, %v7136_v21, %v7141_v38  ;;  %v7144_v1 = vpop.permute.xlu0 %7143 }
 0x517   : > { %v4029_v51 = vsel %vm601_vm2, %v7131_v12, %v15046_v57  ;;  %6048 = vmatpush1.bf16.msra.mxu0 %v6047_v25  ;;  %v4131_v12 = vsel %vm724_vm4, %v7135_v20, %v7140_v63  ;;  %v15053_v18 = vunpack.i.h.bf16 %v15052_v54  ;;  %v4135_v10 = vsel %vm724_vm4, %v15054_v43, %v7136_v21  ;;  %v13477_v53 = vpop.permute.xlu1 %7158  ;;  %v15059_v57 = vld [vmem:[#allocation26_spill] sm:$0xff] }
 0x518   : > { %v4030_v26 = vsel %vm601_vm2, %v7126_v49, %v15049_v34  ;;  %v4128_v22 = vsel %vm724_vm4, %v7140_v63, %v15051_v7  ;;  %6050 = vmatprep.subr.bf16.mxu0 %v6049_v33  ;;  %v4739_v16 = vrot.slane %v4131_v12, 4  ;;  %6089 = vmatpush1.bf16.msra.mxu1 %v6088_v28  ;;  %v7151_v32 = vunpack.i.h.bf16 %v7149_v50 }
 0x519   : > { %v4134_v49 = vsel %vm724_vm4, %v15053_v18, %v7135_v20  ;;  %v7150_v25 = vunpack.i.l.bf16 %v7149_v50  ;;  %v7146_v23 = vunpack.i.h.bf16 %v7144_v1  ;;  %v7145_v40 = vunpack.i.l.bf16 %v7144_v1  ;;  %6090 = vmatprep.subr.bf16.mxu1 %v15036_v15  ;;  %v15057_v20 = vld [vmem:[#allocation15_spill] sm:$0xff] }
 0x51a   : > { %v6051_v56 = vpack.c.bf16 %v5059_v62, %v4035_v46  ;;  %v5061_v35 = vsel %vm1868_vm10, %v4030_v26, %v4720_v41  ;;  %v15056_v47 = vunpack.i.l.bf16 %v15055_v37  ;;  %v4761_v48 = vrot.slane %v4132_v29, 4  ;;  %v7154_v28 = vpop.permute.xlu0 %7153 }
 0x51b   : > { %v4737_v39 = vrot.slane %v4134_v49, 4  ;;  %v6091_v63 = vpack.c.bf16 %v5061_v35, %v4029_v51  ;;  %v4759_v21 = vrot.slane %v4135_v10, 4  ;;  %v15058_v31 = vunpack.i.l.bf16 %v15057_v20  ;;  %v7169_v7 = vpop.permute.xlu1 %7168 }
 0x51c   : > { %v4129_v27 = vsel %vm724_vm4, %v7141_v38, %v15056_v47  ;;  %6052 = vmatpush1.bf16.msra.mxu0 %v6051_v56  ;;  %v4741_v33 = vrot.slane %v4128_v22, 4  ;;  %v4740_v61 = vsel %vm1868_vm10, %v4719_v9, %v4739_v16  ;;  %v15060_v38 = vld [vmem:[#allocation25_spill] sm:$0xff]  ;;  %v15061_v51 = vunpack.i.h.bf16 %v15057_v20  ;;  %v15064_v47 = vld [vmem:[#allocation75_spill] sm:$0xff] }
 0x51d   : > { %v13483_v52 = vsel %vm847_vm5, %v7150_v25, %v15058_v31  ;;  %6092 = vmatpush1.bf16.msra.mxu1 %v6091_v63  ;;  %v6059_v44 = vpack.c.bf16 %v15060_v38, %v15059_v57  ;;  %v4763_v46 = vrot.slane %v4129_v27, 4  ;;  %v13496_v34 = vsel %vm847_vm5, %v7146_v23, %v7151_v32  ;;  %v15069_v57 = vld [vmem:[#allocation55_spill] sm:$0xff] }
 0x51e   : > { %v13492_v0 = vsel %vm847_vm5, %v7151_v32, %v15061_v51  ;;  %v4226_v26 = vsel %vm847_vm5, %v7145_v40, %v7150_v25  ;;  %6093 = vmatprep.subr.bf16.mxu1 %v15036_v15  ;;  %v4841_v9 = vrot.slane %v13483_v52, 4  ;;  %v7155_v50 = vunpack.i.l.bf16 %v7154_v28  ;;  %v7164_v49 = vpop.permute.xlu0 %7163 }
 0x51f   : > { %v4762_v62 = vsel %vm1868_vm10, %v4739_v16, %v4761_v48  ;;  %v4738_v60 = vsel %vm1868_vm10, %v4718_v4, %v4737_v39  ;;  %v15062_v22 = vunpack.i.l.bf16 %v12813_v45  ;;  %v7156_v12 = vunpack.i.h.bf16 %v7154_v28  ;;  %v13529_v35 = vpop.permute.xlu1 %7178  ;;  %v15066_v48 = vld [vmem:[#allocation49_spill] sm:$0xff] }
 0x520   : > { %v6053_v54 = vpack.c.bf16 %v4762_v62, %v4740_v61  ;;  %v4760_v18 = vsel %vm1868_vm10, %v4737_v39, %v4759_v21  ;;  %v4860_v1 = vrot.slane %v13496_v34, 4  ;;  %v15063_v43 = vunpack.i.h.bf16 %v12767_v36 }
 0x521   : > { %v13510_v29 = vsel %vm847_vm5, %v15062_v22, %v7146_v23  ;;  %v4840_v4 = vrot.slane %v4226_v26, 4  ;;  %v6055_v10 = vpack.c.bf16 %v4760_v18, %v4738_v60  ;;  %v7161_v45 = vunpack.i.h.bf16 %v13477_v53  ;;  %v15071_v60 = vld [vmem:[#allocation18_spill] sm:$0xff] }
 0x522   : > { %v4229_v6 = vsel %vm847_vm5, %v15063_v43, %v7145_v40  ;;  %v7160_v16 = vunpack.i.l.bf16 %v13477_v53  ;;  %v13523_v32 = vsel %vm847_vm5, %v12858_v13, %v7155_v50  ;;  %6054 = vmatprep.subr.bf16.mxu0 %v6053_v54  ;;  %v4742_v25 = vsel %vm1868_vm10, %v4720_v41, %v4741_v33  ;;  %v15067_v41 = vld [vmem:[#allocation29_spill] sm:$0xff]  ;;  %v13542_v53 = vpop.permute.xlu0 %7173  ;;  %v15074_v54 = vld [vmem:[#allocation54_spill] sm:$0xff] }
 0x523   : > { %6056 = vmatpush1.bf16.msra.mxu0 %v6055_v10  ;;  %v4764_v36 = vsel %vm1868_vm10, %v4741_v33, %v4763_v46  ;;  %v7171_v23 = vunpack.i.h.bf16 %v7169_v7  ;;  %v7170_v40 = vunpack.i.l.bf16 %v7169_v7  ;;  %v7166_v56 = vunpack.i.h.bf16 %v7164_v49 }
 0x524   : > { %v4228_v37 = vsel %vm847_vm5, %v7155_v50, %v7156_v12  ;;  %v15065_v27 = vunpack.i.l.bf16 %v15064_v47  ;;  %v6094_v5 = vpack.c.bf16 %v4764_v36, %v4742_v25  ;;  %v15068_v39 = vpack.c.bf16 %v15066_v48, %v15067_v41  ;;  %v15080_v36 = vld [vmem:[#allocation40_spill] sm:$0xff] }
 0x525   : > { %v7165_v63 = vunpack.i.l.bf16 %v7164_v49  ;;  %v4862_v21 = vrot.slane %v13492_v0, 4  ;;  %v4858_v20 = vrot.slane %v13510_v29, 4  ;;  %v7181_v31 = vunpack.i.h.bf16 %v13529_v35 }
 0x526   : > { %v13537_v13 = vsel %vm847_vm5, %v7156_v12, %v15065_v27  ;;  %6058 = vmatprep.subr.bf16.mxu0 %v15068_v39  ;;  %v7180_v28 = vunpack.i.l.bf16 %v13529_v35  ;;  %v4839_v33 = vrot.slane %v4229_v6, 4  ;;  %v4328_v61 = vsel %vm970_vm7, %v7050_v30, %v7160_v16  ;;  %6095 = vmatpush1.bf16.msra.mxu1 %v6094_v5  ;;  %v15083_v39 = vld [vmem:[#allocation21_spill] sm:$0xff] }
 0x527   : > { %v15070_v38 = vunpack.i.l.bf16 %v15069_v57  ;;  %v4880_v51 = vrot.slane %v13523_v32, 4  ;;  %v4882_v26 = vrot.slane %v4228_v37, 4  ;;  %v4884_v50 = vrot.slane %v13537_v13, 4  ;;  %6096 = vmatprep.subr.bf16.mxu1 %v15036_v15  ;;  %6060 = vmatpush1.bf16.msra.mxu0 %v6059_v44  ;;  %v15077_v32 = vld [vmem:[#allocation73_spill] sm:$0xff]  ;;  %v7184_v37 = vpop.permute.xlu0 %7183 }
 0x528   : > { %v4327_v62 = vsel %vm970_vm7, %v7170_v40, %v7171_v23  ;;  %v15072_v19 = vunpack.i.l.bf16 %v15071_v60  ;;  %v13571_v7 = vsel %vm1093_vm9, %v7165_v63, %v7166_v56  ;;  %v15073_v22 = vunpack.i.l.bf16 %v13058_v11 }
 0x529   : > { %v13556_v46 = vsel %vm970_vm7, %v7161_v45, %v15070_v38  ;;  %v4861_v12 = vsel %vm1868_vm10, %v4840_v4, %v4860_v1  ;;  %v5071_v18 = vsel %vm1868_vm10, %v15074_v54, %v4840_v4  ;;  %v15075_v49 = vunpack.i.l.bf16 %v13155_v24  ;;  %v15079_v4 = vld [vmem:[#allocation28_spill] sm:$0xff] }
 0x52a   : > { %v13566_v30 = vsel %vm1093_vm9, %v7166_v56, %v15072_v19  ;;  %v13577_v29 = vsel %vm1093_vm9, %v15073_v22, %v7165_v63  ;;  %v13591_v11 = vsel %vm1093_vm9, %v13186_v58, %v7181_v31  ;;  %v15076_v43 = vunpack.i.h.bf16 %v13194_v17  ;;  %v15082_v58 = vld [vmem:[#allocation19_spill] sm:$0xff] }
 0x52b   : > { %v4330_v44 = vsel %vm970_vm7, %v15075_v49, %v7170_v40  ;;  %v6061_v10 = vpack.c.bf16 %v4861_v12, %v5071_v18  ;;  %v15078_v25 = vunpack.i.h.bf16 %v15077_v32  ;;  %v15081_v40 = vpack.c.bf16 %v15079_v4, %v15080_v36 }
 0x52c   : > { %v13597_v6 = vsel %vm1093_vm9, %v15076_v43, %v7180_v28  ;;  %v4859_v56 = vsel %vm1868_vm10, %v4839_v33, %v4858_v20  ;;  %v5070_v35 = vsel %vm1868_vm10, %v15082_v58, %v4839_v33  ;;  %v4863_v17 = vsel %vm1868_vm10, %v4841_v9, %v4862_v21 }
 0x52d   : > { %v4357_v24 = vsel %vm970_vm7, %v7171_v23, %v15078_v25  ;;  %6098 = vmatpush1.bf16.msra.mxu1 %v15081_v40  ;;  %v4962_v47 = vrot.slane %v13566_v30, 4  ;;  %v4960_v23 = vrot.slane %v13577_v29, 4  ;;  %v4961_v27 = vrot.slane %v13571_v7, 4  ;;  %6062 = vmatprep.subr.bf16.mxu0 %v6061_v10  ;;  %v15084_v29 = vld [vmem:[#allocation56_spill] sm:$0xff] }
 0x52e   : > { %6099 = vmatprep.subr.bf16.mxu1 %v15036_v15  ;;  %v6063_v13 = vpack.c.bf16 %v4859_v56, %v5070_v35  ;;  %v5001_v5 = vrot.slane %v13591_v11, 4  ;;  %v4979_v48 = vrot.slane %v13597_v6, 4  ;;  %v7175_v41 = vunpack.i.l.bf16 %v13542_v53  ;;  %v15088_v10 = vld [vmem:[#allocation76_spill] sm:$0xff] }
 0x52f   : > { %v5072_v63 = vsel %vm1868_vm10, %v15083_v39, %v4841_v9  ;;  %v4325_v57 = vsel %vm970_vm7, %v7160_v16, %v7161_v45  ;;  %v4883_v38 = vsel %vm1868_vm10, %v4860_v1, %v4882_v26  ;;  %v7186_v60 = vunpack.i.h.bf16 %v7184_v37 }
 0x530   : > { %6064 = vmatpush1.bf16.msra.mxu0 %v6063_v13  ;;  %v6100_v33 = vpack.c.bf16 %v4863_v17, %v5072_v63  ;;  %v7176_v19 = vunpack.i.h.bf16 %v13542_v53  ;;  %v6065_v30 = vpack.c.bf16 %v4325_v57, %v4883_v38  ;;  %v7185_v7 = vunpack.i.l.bf16 %v7184_v37 }
 0x531   : > { %v4881_v22 = vsel %vm1868_vm10, %v4858_v20, %v4880_v51  ;;  %v5081_v52 = vsel %vm1868_vm10, %v4330_v44, %v4960_v23  ;;  %v4426_v9 = vsel %vm1093_vm9, %v7181_v31, %v7186_v60  ;;  %v15085_v12 = vunpack.i.l.bf16 %v15084_v29  ;;  %v15086_v20 = vld [vmem:[#allocation53_spill] sm:$0xff]  ;;  %v7194_v31 = vpop.permute.xlu0 %7193 }
 0x532   : > { %6101 = vmatpush1.bf16.msra.mxu1 %v6100_v33  ;;  %v6067_v45 = vpack.c.bf16 %v4328_v61, %v4881_v22  ;;  %v5083_v1 = vsel %vm1868_vm10, %v4357_v24, %v4962_v47  ;;  %6066 = vmatprep.subr.bf16.mxu0 %v6065_v30  ;;  %v5003_v16 = vrot.slane %v4426_v9, 4  ;;  %v4425_v53 = vsel %vm1093_vm9, %v7180_v28, %v7185_v7  ;;  %v7189_v61 = vpop.permute.xlu1 %7188 }
 0x533   : > { %v4456_v34 = vsel %vm1093_vm9, %v7186_v60, %v15085_v12  ;;  %v15087_v51 = vunpack.i.h.bf16 %v15086_v20  ;;  %6102 = vmatprep.subr.bf16.mxu1 %v15036_v15  ;;  %v4329_v54 = vsel %vm970_vm7, %v13144_v42, %v7175_v41  ;;  %v4981_v18 = vrot.slane %v4425_v53, 4 }
 0x534   : > { %v5005_v49 = vrot.slane %v4456_v34, 4  ;;  %6068 = vmatpush1.bf16.msra.mxu0 %v6067_v45  ;;  %v4885_v28 = vsel %vm1868_vm10, %v4862_v21, %v4884_v50  ;;  %v4326_v43 = vsel %vm970_vm7, %v7175_v41, %v7176_v19  ;;  %v5082_v6 = vsel %vm1868_vm10, %v4327_v62, %v4961_v27 }
 0x535   : > { %v4455_v26 = vsel %vm1093_vm9, %v7185_v7, %v15087_v51  ;;  %v6103_v11 = vpack.c.bf16 %v13556_v46, %v4885_v28  ;;  %v15089_v32 = vunpack.i.l.bf16 %v15088_v10  ;;  %v6069_v25 = vpack.c.bf16 %v5082_v6, %v4326_v43  ;;  %v4522_v38 = vpop.permute.xlu0 %4521  ;;  %v15094_v7 = vld [vmem:[#allocation70_spill] sm:$0xff] }
 0x536   : > { %v4983_v44 = vrot.slane %v4455_v26, 4  ;;  %v7196_v24 = vunpack.i.h.bf16 %v7194_v31  ;;  %v7195_v4 = vunpack.i.l.bf16 %v7194_v31  ;;  %v6071_v36 = vpack.c.bf16 %v5081_v52, %v4329_v54  ;;  %v4516_v3 = vpop.permute.xlu1 %4515 }
 0x537   : > { %v4356_v42 = vsel %vm970_vm7, %v7176_v19, %v15089_v32  ;;  %v7191_v0 = vunpack.i.h.bf16 %v7189_v61  ;;  %6104 = vmatpush1.bf16.msra.mxu1 %v6103_v11  ;;  %v4982_v21 = vsel %vm1868_vm10, %v4961_v27, %v4981_v18  ;;  %v5004_v46 = vsel %vm1868_vm10, %v4981_v18, %v5003_v16  ;;  %6070 = vmatprep.subr.bf16.mxu0 %v6069_v25 }
 0x538   : > { %v7190_v50 = vunpack.i.l.bf16 %v7189_v61  ;;  %6105 = vmatprep.subr.bf16.mxu1 %v15036_v15  ;;  %v6073_v62 = vpack.c.bf16 %v5004_v46, %v4982_v21  ;;  %v4980_v40 = vsel %vm1868_vm10, %v4960_v23, %v4979_v48  ;;  %v5002_v56 = vsel %vm1868_vm10, %v4979_v48, %v5001_v5  ;;  %6072 = vmatpush1.bf16.msra.mxu0 %v6071_v36  ;;  %v15090_v5 = vld [vmem:[#allocation20_spill] sm:$0xff] }
 0x539   : > { %v6106_v58 = vpack.c.bf16 %v5083_v1, %v4356_v42  ;;  %v4984_v35 = vsel %vm1868_vm10, %v4962_v47, %v4983_v44  ;;  %v5006_v17 = vsel %vm1868_vm10, %v4983_v44, %v5005_v49  ;;  %v4524_v27 = vsel %vm1216_vm11, %v7191_v0, %v7196_v24 }
 0x53a   : > { %6074 = vmatprep.subr.bf16.mxu0 %v6073_v62  ;;  %v4523_v37 = vsel %vm1216_vm11, %v7190_v50, %v7195_v4  ;;  %v6075_v13 = vpack.c.bf16 %v5002_v56, %v4980_v40  ;;  %v6109_v41 = vpack.c.bf16 %v5006_v17, %v4984_v35  ;;  %v4526_v23 = vsel %vm1216_vm11, %v7100_v14, %v7190_v50  ;;  %v5089_v22 = vpop.permute.xlu1 %5088 }
 0x53b   : > { %6107 = vmatpush1.bf16.msra.mxu1 %v6106_v58  ;;  %v6077_v39 = vpack.c.bf16 %v4524_v27, %v4523_v37  ;;  %v4527_v47 = vsel %vm1216_vm11, %v7101_v2, %v7191_v0  ;;  %v15091_v48 = vunpack.i.l.bf16 %v15090_v5  ;;  %v15092_v33 = vunpack.i.h.bf16 %v15090_v5 }
 0x53c   : > { %6108 = vmatprep.subr.bf16.mxu1 %v15036_v15  ;;  %6076 = vmatpush1.bf16.msra.mxu0 %v6075_v13  ;;  %v6079_v14 = vpack.c.bf16 %v4527_v47, %v4526_v23  ;;  %v4525_v60 = vsel %vm1216_vm11, %v4516_v3, %v4522_v38  ;;  %v4528_v19 = vsel %vm1216_vm11, %v13342_v59, %v4516_v3  ;;  %v15093_v30 = vmov 0.0  }
 0x53d   : > { %v4553_v63 = vsel %vm1216_vm11, %v7195_v4, %v15091_v48  ;;  %v4554_v57 = vsel %vm1216_vm11, %v7196_v24, %v15092_v33  ;;  %6078 = vmatprep.subr.bf16.mxu0 %v6077_v39 }
 0x53e   : > { %v6112_v2 = vpack.c.bf16 %v4554_v57, %v4553_v63 }
 0x53f   : > { %6110 = vmatpush1.bf16.msra.mxu1 %v6109_v41 }
 0x540   : > { %6111 = vmatprep.subr.bf16.mxu1 %v15036_v15  ;;  %6080 = vmatpush1.bf16.msra.mxu0 %v6079_v14  ;;  %v4555_v15 = vsel %vm1216_vm11, %v4522_v38, %v15094_v7 }
 0x541   : > { %5694 = vmatprep.subr.msk.mxu0 %vm1868_vm10, %v4525_v60 }
 0x543   : > { %6113 = vmatpush1.bf16.msra.mxu1 %v6112_v2 }
 0x544   : > { %5528 = vmatprep.subr.mxu1 %v15093_v30  ;;  %5695 = vmatpush1.msk.msra.mxu0 %vm1868_vm10, %v4528_v19 }
 0x545   : > { %5478 = vmatmul.mubr.f32.vlgmr.msra.gmra.mrb[22].mxu0 %v12945_v8 }
 0x547   : > { %5697 = vmatpush1.msk.msra.mxu1 %vm1868_vm10, %v4555_v15 }
 0x548   : > { %5549 = vmatmul.mubr.f32.vlgmr.msra.gmra.mrb[22].mxu1 %v12945_v8 }
 0x5a6   : > { %v5195_v52 = vpop.f32.mrb[18].mxu0 }
 0x5a7   : > { %v5196_v59 = vadd.f32 %v5195_v52, %v5089_v22  ;;  %v5197_v9 = vpop.f32.mrb[19].mxu0 }
 0x5a8   : > { %v5198_v29 = vadd.f32 %v5197_v9, %v5089_v22 }
 0x5aa   : > { %v5266_v12 = vpop.f32.mrb[18].mxu1  ;;  %v5564_v45 = vcombine.low %v5196_v59, %v5198_v29 }
 0x5ab   : > { %v5267_v55 = vadd.f32 %v5266_v12, %v5089_v22  ;;  %v5268_v34 = vpop.f32.mrb[19].mxu1 }
 0x5ac   : > { %v5269_v1 = vadd.f32 %v5268_v34, %v5089_v22  ;;  %5574 = vst [vmem:[%s269_s19] sm:$0x77] %v5564_v45 }
 0x5ae   : > { %v5565_v16 = vcombine.low %v5267_v55, %v5269_v1 }
 0x5b0   : > { %5575 = vst [vmem:[%s269_s19 + $0x8] sm:$0x77] %v5565_v16 }
 0x5df   : > { %v5337_v8 = vpop.f32.mrb[20].mxu0 }
 0x5e0   : > { %v5338_v53 = vadd.f32 %v5337_v8, %v5089_v22  ;;  %v5339_v20 = vpop.f32.mrb[21].mxu0 }
 0x5e1   : > { %v5340_v51 = vadd.f32 %v5339_v20, %v5089_v22  ;;  %v5408_v26 = vpop.f32.mrb[20].mxu1 }
 0x5e2   : > { %v5409_v31 = vadd.f32 %v5408_v26, %v5089_v22  ;;  %v5410_v54 = vpop.f32.mrb[21].mxu1 }
 0x5e3   : > { %v5566_v61 = vcombine.low %v5338_v53, %v5340_v51  ;;  %v5411_v18 = vadd.f32 %v5410_v54, %v5089_v22 }
 0x5e5   : > { %5576 = vst [vmem:[%s269_s19 + $0x10] sm:$0x77] %v5566_v61  ;;  %v5567_v49 = vcombine.low %v5409_v31, %v5411_v18 }
 0x5e7   : > { %5577 = vst [vmem:[%s269_s19 + $0x18] sm:$0x77] %v5567_v49 }
 0x618   : > { %v5479_v28 = vpop.f32.mrb[22].mxu0 }
 0x619   : > { %v5480_v44 = vadd.f32 %v5479_v28, %v5089_v22  ;;  %v5481_v11 = vpop.f32.mrb[23].mxu0 }
 0x61a   : > { %v5482_v6 = vadd.f32 %v5481_v11, %v5089_v22 }
 0x61b   : > { %v5550_v43 = vpop.f32.mrb[22].mxu1 }
 0x61c   : > { %v5551_v10 = vadd.f32 %v5550_v43, %v5089_v22  ;;  %v5552_v32 = vpop.f32.mrb[23].mxu1  ;;  %v5568_v42 = vcombine.low %v5480_v44, %v5482_v6 }
 0x61e   : > { %5579 = vst [vmem:[%s269_s19 + $0x28] sm:$0x7] %v5551_v10  ;;  %5578 = vst [vmem:[%s269_s19 + $0x20] sm:$0x77] %v5568_v42 }
 0x61f PF: > { %p16_p8 = scmp.ge.s32.totalorder %s7340_s26, 4   ;;  %s15095_s21 = smov %s7259_s22 }
 0x620   : > { %s15096_s22 = smov %s7263_s23  ;;  %s15097_s23 = smov %s7350_s29 }
 0x621   : > { %s15098_s24 = smov %s7340_s26  ;;  %18 = sbr.rel (!%p16_p8) target bundleno = 3 (0x3), region = 84 }
 0x628   :  { %5601 = vsyncpa [#allocation3], 1 }
 0x629   :  { %5603 = vsyncpa [#allocation3 + $0x1], 1 }

</bundles_post_ra>
